<compile_context>
chip_gen: v5e
topology: v5e:2x2
jax: 0.10.0
libtpu: 0.0.40
codegen_flags: <defaults>
</compile_context>

<pallas_src>
import jax
import jax.numpy as jnp
from jax import lax
from jax.experimental import pallas as pl
from jax.experimental.pallas import tpu as pltpu


# ------------------------------ Pallas kernel -------------------------------


def _ffm_fused_kernel(pb_ref, pt_ref, pbt_ref,      # processed: body / top halo / bottom halo
                      ob_ref, ot_ref, obt_ref,      # origin:    body / top halo / bottom halo
                      gate_ref, w_ref, b_ref,       # gate logits, packed weight (9C,C), bias (1,C)
                      out_ref,                      # output tile (TH, W, C) fp32
                      xpad_ref, col_ref):           # scratch: padded halo window, stacked im2col
    """One (batch, row-tile) step of the FFM hot path.

    conv3x3(processed) and conv3x3(origin) share weights, so both branches are
    stacked into one (2*M, 9*C) bf16 im2col buffer and contracted with the
    packed (9*C, C) weight in a single MXU matmul (fp32 accumulation).  The
    sigmoid gate and the weighted blend run in fp32 on the matmul output.
    """
    TH, W, C = pb_ref.shape            # row-tile block (batch dim squeezed)
    M = TH * W
    i = pl.program_id(1)
    nt = pl.num_programs(1)

    # Zero the padded scratch once per step: provides the left/right zero
    # columns and the top/bottom zero rows when the tile touches the image edge.
    xpad_ref[...] = jnp.zeros_like(xpad_ref)

    def stage(body_ref, top_ref, bot_ref, row0):
        # body + 1-row halos -> zero-padded (TH+2, W+2, C) window, all in VMEM.
        xpad_ref[1:TH + 1, 1:W + 1, :] = body_ref[...]

        @pl.when(i > 0)
        def _():
            xpad_ref[0:1, 1:W + 1, :] = top_ref[...]

        @pl.when(i < nt - 1)
        def _():
            xpad_ref[TH + 1:TH + 2, 1:W + 1, :] = bot_ref[...]

        # im2col: 9 shifted windows -> columns [t*C:(t+1)*C] of the stacked buffer.
        for t in range(9):
            ky, kx = divmod(t, 3)
            col_ref[row0:row0 + M, t * C:(t + 1) * C] = (
                xpad_ref[ky:ky + TH, kx:kx + W, :].reshape(M, C))

    stage(pb_ref, pt_ref, pbt_ref, 0)      # processed branch -> rows [0, M)
    stage(ob_ref, ot_ref, obt_ref, M)      # origin branch    -> rows [M, 2M)

    # Single bf16 matmul for both branches, fp32 accumulation on the MXU.
    acc = jnp.dot(col_ref[...], w_ref[...], preferred_element_type=jnp.float32)
    acc = acc + b_ref[...]                                   # (2M, C) + (1, C)

    p = acc[:M, :].reshape(TH, W, C)
    o = acc[M:, :].reshape(TH, W, C)
    g = jax.nn.sigmoid(gate_ref[...].astype(jnp.float32))    # (TH, W, 1) fp32
    out_ref[...] = (g * p + (1.0 - g) * o).astype(out_ref.dtype)


# ------------------------------ Pallas wrapper -------------------------------


def _pick_tile_h(H, W, C, budget_bytes=6 << 20):
    """Largest row tile whose per-step working set fits a conservative VMEM
    budget (sized against v7x's 32 MiB scoped / 64 MiB physical VMEM), while
    keeping >= 2 row tiles so both grid axes stay 'parallel' (v7x has 2 TCs)."""
    best = 1
    for t in range(1, H + 1):
        if H % t:
            continue
        if H > 1 and t > H // 2:
            continue
        work = (2 * t * W * 9 * C * 2          # stacked bf16 im2col
                + 2 * t * W * C * 4            # fp32 matmul result
                + (t + 2) * (W + 2) * C * 2)   # bf16 halo scratch
        if work <= budget_bytes:
            best = t
    return best


def _ffm_fused_pallas(proc, orig, gate_logits, w_packed, bias, tile_h):
    """proc/orig: (B,H,W,C) bf16; gate_logits: (B,H,W,1) fp32;
    w_packed: (9*C, C) bf16; bias: (C,) fp32.  Returns (B,H,W,C) fp32."""
    B, H, W, C = proc.shape
    nt = H // tile_h

    body_spec = pl.BlockSpec((None, tile_h, W, C), lambda b, i: (b, i, 0, 0))
    # 1-row halo blocks of the SAME (unpadded) input arrays: block unit = 1 row,
    # index clamped at the image border (the unused edge rows stay zero in the
    # VMEM scratch), so no zero-padded copies are ever materialized in HBM.
    top_spec = pl.BlockSpec(
        (None, 1, W, C), lambda b, i: (b, jnp.maximum(i * tile_h - 1, 0), 0, 0))
    bot_spec = pl.BlockSpec(
        (None, 1, W, C), lambda b, i: (b, jnp.minimum((i + 1) * tile_h, H - 1), 0, 0))
    gate_spec = pl.BlockSpec((None, tile_h, W, 1), lambda b, i: (b, i, 0, 0))
    w_spec = pl.BlockSpec((9 * C, C), lambda b, i: (0, 0))
    b_spec = pl.BlockSpec((1, C), lambda b, i: (0, 0))
    out_spec = pl.BlockSpec((None, tile_h, W, C), lambda b, i: (b, i, 0, 0))

    return pl.pallas_call(
        _ffm_fused_kernel,
        out_shape=jax.ShapeDtypeStruct((B, H, W, C), jnp.float32),
        grid=(B, nt),
        in_specs=[body_spec, top_spec, bot_spec,
                  body_spec, top_spec, bot_spec,
                  gate_spec, w_spec, b_spec],
        out_specs=out_spec,
        scratch_shapes=[
            pltpu.VMEM((tile_h + 2, W + 2, C), jnp.bfloat16),    # padded halo window
            pltpu.VMEM((2 * tile_h * W, 9 * C), jnp.bfloat16),   # stacked im2col
        ],
        compiler_params=pltpu.CompilerParams(
            dimension_semantics=("parallel", "parallel"),
            vmem_limit_bytes=32 * 1024 * 1024),
    )(proc, proc, proc, orig, orig, orig, gate_logits, w_packed,
      bias.reshape(1, C))


# --------------------------------- JAX glue ----------------------------------


def _bilinear_resize_nhwc(x, out_h, out_w):
    """Bilinear resize matching F.interpolate(mode='bilinear', align_corners=False)."""
    B, h, w, C = x.shape
    sy = h / out_h
    sx = w / out_w
    ys = jnp.maximum((jnp.arange(out_h, dtype=jnp.float32) + 0.5) * sy - 0.5, 0.0)
    xs = jnp.maximum((jnp.arange(out_w, dtype=jnp.float32) + 0.5) * sx - 0.5, 0.0)
    y0 = jnp.clip(jnp.floor(ys).astype(jnp.int32), 0, h - 1)
    x0 = jnp.clip(jnp.floor(xs).astype(jnp.int32), 0, w - 1)
    y1 = jnp.minimum(y0 + 1, h - 1)
    x1 = jnp.minimum(x0 + 1, w - 1)
    wy1 = (ys - y0.astype(jnp.float32))[None, :, None, None]
    wx1 = (xs - x0.astype(jnp.float32))[None, None, :, None]
    row = x[:, y0, :, :] * (1.0 - wy1) + x[:, y1, :, :] * wy1
    return row[:, :, x0, :] * (1.0 - wx1) + row[:, :, x1, :] * wx1


def _pack_conv_weight(w_oihw):
    """PyTorch Conv2d weight (Cout, Cin, 3, 3) -> packed im2col layout (9*Cin, Cout)."""
    cout, cin = w_oihw.shape[0], w_oihw.shape[1]
    return jnp.transpose(w_oihw, (2, 3, 1, 0)).reshape(9 * cin, cout)


def ffm_forward(processed, origin, params, r):
    """FFM.forward. processed/origin: NCHW float32. Returns NCHW float32."""
    assert processed.shape == origin.shape
    B, C, H, W = processed.shape
    proc = jnp.transpose(processed, (0, 2, 3, 1))   # NHWC
    orig = jnp.transpose(origin, (0, 2, 3, 1))

    # ---- gate path (tiny: (H/r, W/r) spatial, 1 output channel) -------------
    # TODO(synk): deliberately computed with XLA rather than Pallas — a Cout=1
    # conv is a lane-width-1 matmul (1/128 MXU columns, masked stores); per the
    # perf review XLA already beats a dedicated Pallas call at this size.
    s = proc + orig
    hp, wp = H // r, W // r
    pooled = s[:, :hp * r, :wp * r, :].reshape(B, hp, r, wp, r, C).mean(axis=(2, 4))
    com = lax.conv_general_dilated(
        pooled, params["w_com_hwio"], window_strides=(1, 1), padding="SAME",
        dimension_numbers=("NHWC", "HWIO", "NHWC")) + params["b_com"].reshape(1, 1, 1, 1)
    if (H % 2 != 0) or (W % 2 != 0):
        th, tw = H, W
    else:
        th, tw = 2 * hp, 2 * wp
    gate_logits = _bilinear_resize_nhwc(com, th, tw)          # (B, th, tw, 1) fp32
    # PyTorch's blend broadcast requires the gate map to match the feature map
    # (i.e. r == 2 when both spatial dims are even).
    assert (th, tw) == (H, W)

    # ---- hot path: shared-weight 3x3 convs + sigmoid gate blend (Pallas) ----
    tile_h = _pick_tile_h(H, W, C)
    out_nhwc = _ffm_fused_pallas(
        proc.astype(jnp.bfloat16), orig.astype(jnp.bfloat16),
        gate_logits, params["w_conv_packed"], params["b_conv"], tile_h)
    return jnp.transpose(out_nhwc, (0, 3, 1, 2))              # back to NCHW


# ------------------------------ pure-JAX reference ---------------------------


def ffm_reference(processed, origin, w_com_oihw, b_com, w_conv_oihw, b_conv, r):
    """Plain-XLA reference of FFM.forward (with the same bf16 rounding of the
    3x3-conv operands as the Pallas path, so it can be compared tightly)."""
    B, C, H, W = processed.shape
    proc = jnp.transpose(processed, (0, 2, 3, 1))
    orig = jnp.transpose(origin, (0, 2, 3, 1))
    s = proc + orig
    hp, wp = H // r, W // r
    pooled = s[:, :hp * r, :wp * r, :].reshape(B, hp, r, wp, r, C).mean(axis=(2, 4))
    w_com_hwio = jnp.transpose(w_com_oihw, (2, 3, 1, 0))
    com = lax.conv_general_dilated(
        pooled, w_com_hwio, (1, 1), "SAME",
        dimension_numbers=("NHWC", "HWIO", "NHWC")) + b_com.reshape(1, 1, 1, 1)
    th, tw = (H, W) if (H % 2 or W % 2) else (2 * hp, 2 * wp)
    g = jax.nn.sigmoid(_bilinear_resize_nhwc(com, th, tw))
    pb = proc.astype(jnp.bfloat16).astype(jnp.float32)
    ob = orig.astype(jnp.bfloat16).astype(jnp.float32)
    w_hwio = jnp.transpose(w_conv_oihw, (2, 3, 1, 0)).astype(jnp.bfloat16).astype(jnp.float32)

    def conv(x):
        return lax.conv_general_dilated(
            x, w_hwio, (1, 1), "SAME",
            dimension_numbers=("NHWC", "HWIO", "NHWC")) + b_conv.reshape(1, 1, 1, C)

    out = g * conv(pb) + (1.0 - g) * conv(ob)
    return jnp.transpose(out, (0, 3, 1, 2))


# ----------------------------------- main ------------------------------------


if __name__ == "__main__":
    # Small but lane-friendly demo shapes: C is a multiple of 128 so the channel
    # (lane) axis of every DMA / MXU op is dense (module default is C = 1024).
    B, C, H, W, r = 2, 128, 16, 16, 2

    key = jax.random.PRNGKey(0)
    k = jax.random.split(key, 6)
    processed = jax.random.normal(k[0], (B, C, H, W), jnp.float32)
    origin = jax.random.normal(k[1], (B, C, H, W), jnp.float32)

    # PyTorch Conv2d weight layouts, then converted.
    w_com_oihw = jax.random.normal(k[2], (1, C, 3, 3), jnp.float32) * 0.1
    b_com = jax.random.normal(k[3], (1,), jnp.float32) * 0.1
    w_conv_oihw = jax.random.normal(k[4], (C, C, 3, 3), jnp.float32) * 0.1
    b_conv = jax.random.normal(k[5], (C,), jnp.float32) * 0.1

    params = {
        "w_com_hwio": jnp.transpose(w_com_oihw, (2, 3, 1, 0)),                  # (3,3,C,1) fp32
        "b_com": b_com,
        "w_conv_packed": _pack_conv_weight(w_conv_oihw).astype(jnp.bfloat16),   # (9C, C) bf16
        "b_conv": b_conv,                                                       # (C,) fp32
    }

    fwd = jax.jit(ffm_forward, static_argnums=3)
    out = fwd(processed, origin, params, r)
    jax.block_until_ready(out)
    assert out.shape == (B, C, H, W)
    assert out.dtype == jnp.float32

    ref = ffm_reference(processed, origin, w_com_oihw, b_com, w_conv_oihw, b_conv, r)
    err = float(jnp.max(jnp.abs(out - ref)))
    assert err < 5e-2, f"max |pallas - reference| = {err}"
    print("KERNEL_OK")
</pallas_src>

<mosaic_0001>
module attributes {stable_mosaic.version = 11 : i64} {
  func.func @_ffm_fused_kernel(%arg0: i32, %arg1: i32, %arg2: memref<1x8x16x128xbf16, #tpu.memory_space<vmem>>, %arg3: memref<1x1x16x128xbf16, #tpu.memory_space<vmem>>, %arg4: memref<1x1x16x128xbf16, #tpu.memory_space<vmem>>, %arg5: memref<1x8x16x128xbf16, #tpu.memory_space<vmem>>, %arg6: memref<1x1x16x128xbf16, #tpu.memory_space<vmem>>, %arg7: memref<1x1x16x128xbf16, #tpu.memory_space<vmem>>, %arg8: memref<1x8x16x1xf32, #tpu.memory_space<vmem>>, %arg9: memref<1152x128xbf16, #tpu.memory_space<vmem>>, %arg10: memref<1x128xf32, #tpu.memory_space<vmem>>, %arg11: memref<1x8x16x128xf32, #tpu.memory_space<vmem>>, %arg12: memref<10x18x128xbf16, #tpu.memory_space<vmem>>, %arg13: memref<256x1152xbf16, #tpu.memory_space<vmem>>) attributes {dimension_semantics = [#tpu.dimension_semantics<parallel>, #tpu.dimension_semantics<parallel>], iteration_bounds = array<i64: 2, 2>, scalar_prefetch = 0 : i64, scratch_operands = 2 : i64, tpu.core_type = #tpu.core_type<tc>, window_params = [{transform_indices = @transform_0, window_bounds = array<i64: 1, 8, 16, 128>}, {transform_indices = @transform_1, window_bounds = array<i64: 1, 1, 16, 128>}, {transform_indices = @transform_2, window_bounds = array<i64: 1, 1, 16, 128>}, {transform_indices = @transform_3, window_bounds = array<i64: 1, 8, 16, 128>}, {transform_indices = @transform_4, window_bounds = array<i64: 1, 1, 16, 128>}, {transform_indices = @transform_5, window_bounds = array<i64: 1, 1, 16, 128>}, {transform_indices = @transform_6, window_bounds = array<i64: 1, 8, 16, 1>}, {pipeline_mode = #tpu.pipeline_mode<synchronous>, transform_indices = @transform_7, window_bounds = array<i64: 1152, 128>}, {pipeline_mode = #tpu.pipeline_mode<synchronous>, transform_indices = @transform_8, window_bounds = array<i64: 1, 128>}, {transform_indices = @transform_9, window_bounds = array<i64: 1, 8, 16, 128>}]} {
    %cst = arith.constant 0.000000e+00 : bf16
    %0 = vector.broadcast %cst : bf16 to vector<10x18x128xbf16>
    %c0 = arith.constant 0 : index
    %c0_0 = arith.constant 0 : index
    %c0_1 = arith.constant 0 : index
    %1 = vector.load %arg12[%c0, %c0_0, %c0_1] : memref<10x18x128xbf16, #tpu.memory_space<vmem>>, vector<10x18x128xbf16>
    tpu.vector_store %arg12[%c0, %c0_0, %c0_1], %0 {strides = array<i32>} : memref<10x18x128xbf16, #tpu.memory_space<vmem>>, vector<10x18x128xbf16>,
    %c0_2 = arith.constant 0 : index
    %c0_3 = arith.constant 0 : index
    %c0_4 = arith.constant 0 : index
    %c0_5 = arith.constant 0 : index
    %2 = vector.load %arg2[%c0_2, %c0_3, %c0_4, %c0_5] : memref<1x8x16x128xbf16, #tpu.memory_space<vmem>>, vector<1x8x16x128xbf16>
    %3 = vector.shape_cast %2 : vector<1x8x16x128xbf16> to vector<8x16x128xbf16>
    %c1 = arith.constant 1 : index
    %c1_6 = arith.constant 1 : index
    %c0_7 = arith.constant 0 : index
    %4 = vector.load %arg12[%c1, %c1_6, %c0_7] : memref<10x18x128xbf16, #tpu.memory_space<vmem>>, vector<8x16x128xbf16>
    tpu.vector_store %arg12[%c1, %c1_6, %c0_7], %3 {strides = array<i32>} : memref<10x18x128xbf16, #tpu.memory_space<vmem>>, vector<8x16x128xbf16>,
    %c0_i32 = arith.constant 0 : i32
    %5 = arith.cmpi sgt, %arg1, %c0_i32 : i32
    %6 = arith.extui %5 : i1 to i32
    %c0_i32_8 = arith.constant 0 : i32
    %7 = arith.cmpi ne, %6, %c0_i32_8 : i32
    scf.if %7 {
      %c0_119 = arith.constant 0 : index
      %c0_120 = arith.constant 0 : index
      %c0_121 = arith.constant 0 : index
      %c0_122 = arith.constant 0 : index
      %101 = vector.load %arg3[%c0_119, %c0_120, %c0_121, %c0_122] : memref<1x1x16x128xbf16, #tpu.memory_space<vmem>>, vector<1x1x16x128xbf16>
      %102 = vector.shape_cast %101 : vector<1x1x16x128xbf16> to vector<1x16x128xbf16>
      %c0_123 = arith.constant 0 : index
      %c1_124 = arith.constant 1 : index
      %c0_125 = arith.constant 0 : index
      %103 = vector.load %arg12[%c0_123, %c1_124, %c0_125] : memref<10x18x128xbf16, #tpu.memory_space<vmem>>, vector<1x16x128xbf16>
      tpu.vector_store %arg12[%c0_123, %c1_124, %c0_125], %102 {strides = array<i32>} : memref<10x18x128xbf16, #tpu.memory_space<vmem>>, vector<1x16x128xbf16>,
    } else {
    }
    %c1_i32 = arith.constant 1 : i32
    %8 = arith.cmpi slt, %arg1, %c1_i32 : i32
    %9 = arith.extui %8 : i1 to i32
    %c0_i32_9 = arith.constant 0 : i32
    %10 = arith.cmpi ne, %9, %c0_i32_9 : i32
    scf.if %10 {
      %c0_119 = arith.constant 0 : index
      %c0_120 = arith.constant 0 : index
      %c0_121 = arith.constant 0 : index
      %c0_122 = arith.constant 0 : index
      %101 = vector.load %arg4[%c0_119, %c0_120, %c0_121, %c0_122] : memref<1x1x16x128xbf16, #tpu.memory_space<vmem>>, vector<1x1x16x128xbf16>
      %102 = vector.shape_cast %101 : vector<1x1x16x128xbf16> to vector<1x16x128xbf16>
      %c9 = arith.constant 9 : index
      %c1_123 = arith.constant 1 : index
      %c0_124 = arith.constant 0 : index
      %103 = vector.load %arg12[%c9, %c1_123, %c0_124] : memref<10x18x128xbf16, #tpu.memory_space<vmem>>, vector<1x16x128xbf16>
      tpu.vector_store %arg12[%c9, %c1_123, %c0_124], %102 {strides = array<i32>} : memref<10x18x128xbf16, #tpu.memory_space<vmem>>, vector<1x16x128xbf16>,
    } else {
    }
    %c0_10 = arith.constant 0 : index
    %c0_11 = arith.constant 0 : index
    %c0_12 = arith.constant 0 : index
    %11 = vector.load %arg12[%c0_10, %c0_11, %c0_12] : memref<10x18x128xbf16, #tpu.memory_space<vmem>>, vector<8x16x128xbf16>
    %12 = vector.shape_cast %11 : vector<8x16x128xbf16> to vector<128x128xbf16>
    %c0_13 = arith.constant 0 : index
    %c0_14 = arith.constant 0 : index
    %13 = vector.load %arg13[%c0_13, %c0_14] : memref<256x1152xbf16, #tpu.memory_space<vmem>>, vector<128x128xbf16>
    tpu.vector_store %arg13[%c0_13, %c0_14], %12 {strides = array<i32>} : memref<256x1152xbf16, #tpu.memory_space<vmem>>, vector<128x128xbf16>,
    %c0_15 = arith.constant 0 : index
    %c1_16 = arith.constant 1 : index
    %c0_17 = arith.constant 0 : index
    %14 = vector.load %arg12[%c0_15, %c1_16, %c0_17] : memref<10x18x128xbf16, #tpu.memory_space<vmem>>, vector<8x16x128xbf16>
    %15 = vector.shape_cast %14 : vector<8x16x128xbf16> to vector<128x128xbf16>
    %c0_18 = arith.constant 0 : index
    %c128 = arith.constant 128 : index
    %16 = vector.load %arg13[%c0_18, %c128] : memref<256x1152xbf16, #tpu.memory_space<vmem>>, vector<128x128xbf16>
    tpu.vector_store %arg13[%c0_18, %c128], %15 {strides = array<i32>} : memref<256x1152xbf16, #tpu.memory_space<vmem>>, vector<128x128xbf16>,
    %c0_19 = arith.constant 0 : index
    %c2 = arith.constant 2 : index
    %c0_20 = arith.constant 0 : index
    %17 = vector.load %arg12[%c0_19, %c2, %c0_20] : memref<10x18x128xbf16, #tpu.memory_space<vmem>>, vector<8x16x128xbf16>
    %18 = vector.shape_cast %17 : vector<8x16x128xbf16> to vector<128x128xbf16>
    %c0_21 = arith.constant 0 : index
    %c256 = arith.constant 256 : index
    %19 = vector.load %arg13[%c0_21, %c256] : memref<256x1152xbf16, #tpu.memory_space<vmem>>, vector<128x128xbf16>
    tpu.vector_store %arg13[%c0_21, %c256], %18 {strides = array<i32>} : memref<256x1152xbf16, #tpu.memory_space<vmem>>, vector<128x128xbf16>,
    %c1_22 = arith.constant 1 : index
    %c0_23 = arith.constant 0 : index
    %c0_24 = arith.constant 0 : index
    %20 = vector.load %arg12[%c1_22, %c0_23, %c0_24] : memref<10x18x128xbf16, #tpu.memory_space<vmem>>, vector<8x16x128xbf16>
    %21 = vector.shape_cast %20 : vector<8x16x128xbf16> to vector<128x128xbf16>
    %c0_25 = arith.constant 0 : index
    %c384 = arith.constant 384 : index
    %22 = vector.load %arg13[%c0_25, %c384] : memref<256x1152xbf16, #tpu.memory_space<vmem>>, vector<128x128xbf16>
    tpu.vector_store %arg13[%c0_25, %c384], %21 {strides = array<i32>} : memref<256x1152xbf16, #tpu.memory_space<vmem>>, vector<128x128xbf16>,
    %c1_26 = arith.constant 1 : index
    %c1_27 = arith.constant 1 : index
    %c0_28 = arith.constant 0 : index
    %23 = vector.load %arg12[%c1_26, %c1_27, %c0_28] : memref<10x18x128xbf16, #tpu.memory_space<vmem>>, vector<8x16x128xbf16>
    %24 = vector.shape_cast %23 : vector<8x16x128xbf16> to vector<128x128xbf16>
    %c0_29 = arith.constant 0 : index
    %c512 = arith.constant 512 : index
    %25 = vector.load %arg13[%c0_29, %c512] : memref<256x1152xbf16, #tpu.memory_space<vmem>>, vector<128x128xbf16>
    tpu.vector_store %arg13[%c0_29, %c512], %24 {strides = array<i32>} : memref<256x1152xbf16, #tpu.memory_space<vmem>>, vector<128x128xbf16>,
    %c1_30 = arith.constant 1 : index
    %c2_31 = arith.constant 2 : index
    %c0_32 = arith.constant 0 : index
    %26 = vector.load %arg12[%c1_30, %c2_31, %c0_32] : memref<10x18x128xbf16, #tpu.memory_space<vmem>>, vector<8x16x128xbf16>
    %27 = vector.shape_cast %26 : vector<8x16x128xbf16> to vector<128x128xbf16>
    %c0_33 = arith.constant 0 : index
    %c640 = arith.constant 640 : index
    %28 = vector.load %arg13[%c0_33, %c640] : memref<256x1152xbf16, #tpu.memory_space<vmem>>, vector<128x128xbf16>
    tpu.vector_store %arg13[%c0_33, %c640], %27 {strides = array<i32>} : memref<256x1152xbf16, #tpu.memory_space<vmem>>, vector<128x128xbf16>,
    %c2_34 = arith.constant 2 : index
    %c0_35 = arith.constant 0 : index
    %c0_36 = arith.constant 0 : index
    %29 = vector.load %arg12[%c2_34, %c0_35, %c0_36] : memref<10x18x128xbf16, #tpu.memory_space<vmem>>, vector<8x16x128xbf16>
    %30 = vector.shape_cast %29 : vector<8x16x128xbf16> to vector<128x128xbf16>
    %c0_37 = arith.constant 0 : index
    %c768 = arith.constant 768 : index
    %31 = vector.load %arg13[%c0_37, %c768] : memref<256x1152xbf16, #tpu.memory_space<vmem>>, vector<128x128xbf16>
    tpu.vector_store %arg13[%c0_37, %c768], %30 {strides = array<i32>} : memref<256x1152xbf16, #tpu.memory_space<vmem>>, vector<128x128xbf16>,
    %c2_38 = arith.constant 2 : index
    %c1_39 = arith.constant 1 : index
    %c0_40 = arith.constant 0 : index
    %32 = vector.load %arg12[%c2_38, %c1_39, %c0_40] : memref<10x18x128xbf16, #tpu.memory_space<vmem>>, vector<8x16x128xbf16>
    %33 = vector.shape_cast %32 : vector<8x16x128xbf16> to vector<128x128xbf16>
    %c0_41 = arith.constant 0 : index
    %c896 = arith.constant 896 : index
    %34 = vector.load %arg13[%c0_41, %c896] : memref<256x1152xbf16, #tpu.memory_space<vmem>>, vector<128x128xbf16>
    tpu.vector_store %arg13[%c0_41, %c896], %33 {strides = array<i32>} : memref<256x1152xbf16, #tpu.memory_space<vmem>>, vector<128x128xbf16>,
    %c2_42 = arith.constant 2 : index
    %c2_43 = arith.constant 2 : index
    %c0_44 = arith.constant 0 : index
    %35 = vector.load %arg12[%c2_42, %c2_43, %c0_44] : memref<10x18x128xbf16, #tpu.memory_space<vmem>>, vector<8x16x128xbf16>
    %36 = vector.shape_cast %35 : vector<8x16x128xbf16> to vector<128x128xbf16>
    %c0_45 = arith.constant 0 : index
    %c1024 = arith.constant 1024 : index
    %37 = vector.load %arg13[%c0_45, %c1024] : memref<256x1152xbf16, #tpu.memory_space<vmem>>, vector<128x128xbf16>
    tpu.vector_store %arg13[%c0_45, %c1024], %36 {strides = array<i32>} : memref<256x1152xbf16, #tpu.memory_space<vmem>>, vector<128x128xbf16>,
    %c0_46 = arith.constant 0 : index
    %c0_47 = arith.constant 0 : index
    %c0_48 = arith.constant 0 : index
    %c0_49 = arith.constant 0 : index
    %38 = vector.load %arg5[%c0_46, %c0_47, %c0_48, %c0_49] : memref<1x8x16x128xbf16, #tpu.memory_space<vmem>>, vector<1x8x16x128xbf16>
    %39 = vector.shape_cast %38 : vector<1x8x16x128xbf16> to vector<8x16x128xbf16>
    %c1_50 = arith.constant 1 : index
    %c1_51 = arith.constant 1 : index
    %c0_52 = arith.constant 0 : index
    %40 = vector.load %arg12[%c1_50, %c1_51, %c0_52] : memref<10x18x128xbf16, #tpu.memory_space<vmem>>, vector<8x16x128xbf16>
    tpu.vector_store %arg12[%c1_50, %c1_51, %c0_52], %39 {strides = array<i32>} : memref<10x18x128xbf16, #tpu.memory_space<vmem>>, vector<8x16x128xbf16>,
    %c0_i32_53 = arith.constant 0 : i32
    %41 = arith.cmpi sgt, %arg1, %c0_i32_53 : i32
    %42 = arith.extui %41 : i1 to i32
    %c0_i32_54 = arith.constant 0 : i32
    %43 = arith.cmpi ne, %42, %c0_i32_54 : i32
    scf.if %43 {
      %c0_119 = arith.constant 0 : index
      %c0_120 = arith.constant 0 : index
      %c0_121 = arith.constant 0 : index
      %c0_122 = arith.constant 0 : index
      %101 = vector.load %arg6[%c0_119, %c0_120, %c0_121, %c0_122] : memref<1x1x16x128xbf16, #tpu.memory_space<vmem>>, vector<1x1x16x128xbf16>
      %102 = vector.shape_cast %101 : vector<1x1x16x128xbf16> to vector<1x16x128xbf16>
      %c0_123 = arith.constant 0 : index
      %c1_124 = arith.constant 1 : index
      %c0_125 = arith.constant 0 : index
      %103 = vector.load %arg12[%c0_123, %c1_124, %c0_125] : memref<10x18x128xbf16, #tpu.memory_space<vmem>>, vector<1x16x128xbf16>
      tpu.vector_store %arg12[%c0_123, %c1_124, %c0_125], %102 {strides = array<i32>} : memref<10x18x128xbf16, #tpu.memory_space<vmem>>, vector<1x16x128xbf16>,
    } else {
    }
    %c1_i32_55 = arith.constant 1 : i32
    %44 = arith.cmpi slt, %arg1, %c1_i32_55 : i32
    %45 = arith.extui %44 : i1 to i32
    %c0_i32_56 = arith.constant 0 : i32
    %46 = arith.cmpi ne, %45, %c0_i32_56 : i32
    scf.if %46 {
      %c0_119 = arith.constant 0 : index
      %c0_120 = arith.constant 0 : index
      %c0_121 = arith.constant 0 : index
      %c0_122 = arith.constant 0 : index
      %101 = vector.load %arg7[%c0_119, %c0_120, %c0_121, %c0_122] : memref<1x1x16x128xbf16, #tpu.memory_space<vmem>>, vector<1x1x16x128xbf16>
      %102 = vector.shape_cast %101 : vector<1x1x16x128xbf16> to vector<1x16x128xbf16>
      %c9 = arith.constant 9 : index
      %c1_123 = arith.constant 1 : index
      %c0_124 = arith.constant 0 : index
      %103 = vector.load %arg12[%c9, %c1_123, %c0_124] : memref<10x18x128xbf16, #tpu.memory_space<vmem>>, vector<1x16x128xbf16>
      tpu.vector_store %arg12[%c9, %c1_123, %c0_124], %102 {strides = array<i32>} : memref<10x18x128xbf16, #tpu.memory_space<vmem>>, vector<1x16x128xbf16>,
    } else {
    }
    %c0_57 = arith.constant 0 : index
    %c0_58 = arith.constant 0 : index
    %c0_59 = arith.constant 0 : index
    %47 = vector.load %arg12[%c0_57, %c0_58, %c0_59] : memref<10x18x128xbf16, #tpu.memory_space<vmem>>, vector<8x16x128xbf16>
    %48 = vector.shape_cast %47 : vector<8x16x128xbf16> to vector<128x128xbf16>
    %c128_60 = arith.constant 128 : index
    %c0_61 = arith.constant 0 : index
    %49 = vector.load %arg13[%c128_60, %c0_61] : memref<256x1152xbf16, #tpu.memory_space<vmem>>, vector<128x128xbf16>
    tpu.vector_store %arg13[%c128_60, %c0_61], %48 {strides = array<i32>} : memref<256x1152xbf16, #tpu.memory_space<vmem>>, vector<128x128xbf16>,
    %c0_62 = arith.constant 0 : index
    %c1_63 = arith.constant 1 : index
    %c0_64 = arith.constant 0 : index
    %50 = vector.load %arg12[%c0_62, %c1_63, %c0_64] : memref<10x18x128xbf16, #tpu.memory_space<vmem>>, vector<8x16x128xbf16>
    %51 = vector.shape_cast %50 : vector<8x16x128xbf16> to vector<128x128xbf16>
    %c128_65 = arith.constant 128 : index
    %c128_66 = arith.constant 128 : index
    %52 = vector.load %arg13[%c128_65, %c128_66] : memref<256x1152xbf16, #tpu.memory_space<vmem>>, vector<128x128xbf16>
    tpu.vector_store %arg13[%c128_65, %c128_66], %51 {strides = array<i32>} : memref<256x1152xbf16, #tpu.memory_space<vmem>>, vector<128x128xbf16>,
    %c0_67 = arith.constant 0 : index
    %c2_68 = arith.constant 2 : index
    %c0_69 = arith.constant 0 : index
    %53 = vector.load %arg12[%c0_67, %c2_68, %c0_69] : memref<10x18x128xbf16, #tpu.memory_space<vmem>>, vector<8x16x128xbf16>
    %54 = vector.shape_cast %53 : vector<8x16x128xbf16> to vector<128x128xbf16>
    %c128_70 = arith.constant 128 : index
    %c256_71 = arith.constant 256 : index
    %55 = vector.load %arg13[%c128_70, %c256_71] : memref<256x1152xbf16, #tpu.memory_space<vmem>>, vector<128x128xbf16>
    tpu.vector_store %arg13[%c128_70, %c256_71], %54 {strides = array<i32>} : memref<256x1152xbf16, #tpu.memory_space<vmem>>, vector<128x128xbf16>,
    %c1_72 = arith.constant 1 : index
    %c0_73 = arith.constant 0 : index
    %c0_74 = arith.constant 0 : index
    %56 = vector.load %arg12[%c1_72, %c0_73, %c0_74] : memref<10x18x128xbf16, #tpu.memory_space<vmem>>, vector<8x16x128xbf16>
    %57 = vector.shape_cast %56 : vector<8x16x128xbf16> to vector<128x128xbf16>
    %c128_75 = arith.constant 128 : index
    %c384_76 = arith.constant 384 : index
    %58 = vector.load %arg13[%c128_75, %c384_76] : memref<256x1152xbf16, #tpu.memory_space<vmem>>, vector<128x128xbf16>
    tpu.vector_store %arg13[%c128_75, %c384_76], %57 {strides = array<i32>} : memref<256x1152xbf16, #tpu.memory_space<vmem>>, vector<128x128xbf16>,
    %c1_77 = arith.constant 1 : index
    %c1_78 = arith.constant 1 : index
    %c0_79 = arith.constant 0 : index
    %59 = vector.load %arg12[%c1_77, %c1_78, %c0_79] : memref<10x18x128xbf16, #tpu.memory_space<vmem>>, vector<8x16x128xbf16>
    %60 = vector.shape_cast %59 : vector<8x16x128xbf16> to vector<128x128xbf16>
    %c128_80 = arith.constant 128 : index
    %c512_81 = arith.constant 512 : index
    %61 = vector.load %arg13[%c128_80, %c512_81] : memref<256x1152xbf16, #tpu.memory_space<vmem>>, vector<128x128xbf16>
    tpu.vector_store %arg13[%c128_80, %c512_81], %60 {strides = array<i32>} : memref<256x1152xbf16, #tpu.memory_space<vmem>>, vector<128x128xbf16>,
    %c1_82 = arith.constant 1 : index
    %c2_83 = arith.constant 2 : index
    %c0_84 = arith.constant 0 : index
    %62 = vector.load %arg12[%c1_82, %c2_83, %c0_84] : memref<10x18x128xbf16, #tpu.memory_space<vmem>>, vector<8x16x128xbf16>
    %63 = vector.shape_cast %62 : vector<8x16x128xbf16> to vector<128x128xbf16>
    %c128_85 = arith.constant 128 : index
    %c640_86 = arith.constant 640 : index
    %64 = vector.load %arg13[%c128_85, %c640_86] : memref<256x1152xbf16, #tpu.memory_space<vmem>>, vector<128x128xbf16>
    tpu.vector_store %arg13[%c128_85, %c640_86], %63 {strides = array<i32>} : memref<256x1152xbf16, #tpu.memory_space<vmem>>, vector<128x128xbf16>,
    %c2_87 = arith.constant 2 : index
    %c0_88 = arith.constant 0 : index
    %c0_89 = arith.constant 0 : index
    %65 = vector.load %arg12[%c2_87, %c0_88, %c0_89] : memref<10x18x128xbf16, #tpu.memory_space<vmem>>, vector<8x16x128xbf16>
    %66 = vector.shape_cast %65 : vector<8x16x128xbf16> to vector<128x128xbf16>
    %c128_90 = arith.constant 128 : index
    %c768_91 = arith.constant 768 : index
    %67 = vector.load %arg13[%c128_90, %c768_91] : memref<256x1152xbf16, #tpu.memory_space<vmem>>, vector<128x128xbf16>
    tpu.vector_store %arg13[%c128_90, %c768_91], %66 {strides = array<i32>} : memref<256x1152xbf16, #tpu.memory_space<vmem>>, vector<128x128xbf16>,
    %c2_92 = arith.constant 2 : index
    %c1_93 = arith.constant 1 : index
    %c0_94 = arith.constant 0 : index
    %68 = vector.load %arg12[%c2_92, %c1_93, %c0_94] : memref<10x18x128xbf16, #tpu.memory_space<vmem>>, vector<8x16x128xbf16>
    %69 = vector.shape_cast %68 : vector<8x16x128xbf16> to vector<128x128xbf16>
    %c128_95 = arith.constant 128 : index
    %c896_96 = arith.constant 896 : index
    %70 = vector.load %arg13[%c128_95, %c896_96] : memref<256x1152xbf16, #tpu.memory_space<vmem>>, vector<128x128xbf16>
    tpu.vector_store %arg13[%c128_95, %c896_96], %69 {strides = array<i32>} : memref<256x1152xbf16, #tpu.memory_space<vmem>>, vector<128x128xbf16>,
    %c2_97 = arith.constant 2 : index
    %c2_98 = arith.constant 2 : index
    %c0_99 = arith.constant 0 : index
    %71 = vector.load %arg12[%c2_97, %c2_98, %c0_99] : memref<10x18x128xbf16, #tpu.memory_space<vmem>>, vector<8x16x128xbf16>
    %72 = vector.shape_cast %71 : vector<8x16x128xbf16> to vector<128x128xbf16>
    %c128_100 = arith.constant 128 : index
    %c1024_101 = arith.constant 1024 : index
    %73 = vector.load %arg13[%c128_100, %c1024_101] : memref<256x1152xbf16, #tpu.memory_space<vmem>>, vector<128x128xbf16>
    tpu.vector_store %arg13[%c128_100, %c1024_101], %72 {strides = array<i32>} : memref<256x1152xbf16, #tpu.memory_space<vmem>>, vector<128x128xbf16>,
    %c0_102 = arith.constant 0 : index
    %c0_103 = arith.constant 0 : index
    %74 = vector.load %arg13[%c0_102, %c0_103] : memref<256x1152xbf16, #tpu.memory_space<vmem>>, vector<256x1152xbf16>
    %c0_104 = arith.constant 0 : index
    %c0_105 = arith.constant 0 : index
    %75 = vector.load %arg9[%c0_104, %c0_105] : memref<1152x128xbf16, #tpu.memory_space<vmem>>, vector<1152x128xbf16>
    %cst_106 = arith.constant dense<0.000000e+00> : vector<256x128xf32>
    %76 = tpu.matmul %74, %75, %cst_106 {dimension_numbers = #tpu.dot_dimension_numbers<[1], [0], [0], [1], [0, 0, 1, 1], [], []>} : vector<256x1152xbf16>, vector<1152x128xbf16>, vector<256x128xf32> -> vector<256x128xf32>
    %c0_107 = arith.constant 0 : index
    %c0_108 = arith.constant 0 : index
    %77 = vector.load %arg10[%c0_107, %c0_108] : memref<1x128xf32, #tpu.memory_space<vmem>>, vector<1x128xf32>
    %78 = vector.broadcast %77 : vector<1x128xf32> to vector<256x128xf32>
    %79 = arith.addf %76, %78 : vector<256x128xf32>
    %80 = vector.extract_strided_slice %79 {offsets = [0, 0], sizes = [128, 128], strides = [1, 1]} : vector<256x128xf32> to vector<128x128xf32>
    %81 = vector.shape_cast %80 : vector<128x128xf32> to vector<8x16x128xf32>
    %82 = vector.extract_strided_slice %79 {offsets = [128, 0], sizes = [128, 128], strides = [1, 1]} : vector<256x128xf32> to vector<128x128xf32>
    %83 = vector.shape_cast %82 : vector<128x128xf32> to vector<8x16x128xf32>
    %c0_109 = arith.constant 0 : index
    %c0_110 = arith.constant 0 : index
    %c0_111 = arith.constant 0 : index
    %c0_112 = arith.constant 0 : index
    %84 = vector.load %arg8[%c0_109, %c0_110, %c0_111, %c0_112] : memref<1x8x16x1xf32, #tpu.memory_space<vmem>>, vector<1x8x16x1xf32>
    %85 = vector.shape_cast %84 : vector<1x8x16x1xf32> to vector<8x16x1xf32>
    %86 = arith.negf %85 : vector<8x16x1xf32>
    %87 = math.exp %86 : vector<8x16x1xf32>
    %cst_113 = arith.constant 1.000000e+00 : f32
    %88 = vector.broadcast %cst_113 : f32 to vector<8x16x1xf32>
    %89 = arith.addf %88, %87 : vector<8x16x1xf32>
    %90 = arith.divf %88, %89 : vector<8x16x1xf32>
    %91 = vector.broadcast %90 : vector<8x16x1xf32> to vector<8x16x128xf32>
    %92 = arith.mulf %91, %81 : vector<8x16x128xf32>
    %cst_114 = arith.constant 1.000000e+00 : f32
    %93 = vector.broadcast %cst_114 : f32 to vector<8x16x1xf32>
    %94 = arith.subf %93, %90 : vector<8x16x1xf32>
    %95 = vector.broadcast %94 : vector<8x16x1xf32> to vector<8x16x128xf32>
    %96 = arith.mulf %95, %83 : vector<8x16x128xf32>
    %97 = arith.addf %92, %96 : vector<8x16x128xf32>
    %c0_115 = arith.constant 0 : index
    %c0_116 = arith.constant 0 : index
    %c0_117 = arith.constant 0 : index
    %c0_118 = arith.constant 0 : index
    %98 = vector.load %arg11[%c0_115, %c0_116, %c0_117, %c0_118] : memref<1x8x16x128xf32, #tpu.memory_space<vmem>>, vector<1x8x16x128xf32>
    %99 = vector.shape_cast %98 : vector<1x8x16x128xf32> to vector<8x16x128xf32>
    %100 = vector.shape_cast %97 : vector<8x16x128xf32> to vector<1x8x16x128xf32>
    tpu.vector_store %arg11[%c0_115, %c0_116, %c0_117, %c0_118], %100 {strides = array<i32>} : memref<1x8x16x128xf32, #tpu.memory_space<vmem>>, vector<1x8x16x128xf32>,
    return
  }
  func.func @transform_0(%arg0: i32, %arg1: i32) -> (i32, i32, i32, i32) {
    %c0_i32 = arith.constant 0 : i32
    %c0_i32_0 = arith.constant 0 : i32
    %c0_i32_1 = arith.constant 0 : i32
    return %arg0, %arg1, %c0_i32, %c0_i32_0 : i32, i32, i32, i32
  }
  func.func @transform_1(%arg0: i32, %arg1: i32) -> (i32, i32, i32, i32) {
    %c8_i32 = arith.constant 8 : i32
    %0 = arith.muli %arg1, %c8_i32 : i32
    %c1_i32 = arith.constant 1 : i32
    %1 = arith.subi %0, %c1_i32 : i32
    %c0_i32 = arith.constant 0 : i32
    %2 = arith.maxsi %1, %c0_i32 : i32
    %c0_i32_0 = arith.constant 0 : i32
    %c0_i32_1 = arith.constant 0 : i32
    %c0_i32_2 = arith.constant 0 : i32
    return %arg0, %2, %c0_i32_0, %c0_i32_1 : i32, i32, i32, i32
  }
  func.func @transform_2(%arg0: i32, %arg1: i32) -> (i32, i32, i32, i32) {
    %c1_i32 = arith.constant 1 : i32
    %0 = arith.addi %arg1, %c1_i32 : i32
    %c8_i32 = arith.constant 8 : i32
    %1 = arith.muli %0, %c8_i32 : i32
    %c15_i32 = arith.constant 15 : i32
    %2 = arith.minsi %1, %c15_i32 : i32
    %c0_i32 = arith.constant 0 : i32
    %c0_i32_0 = arith.constant 0 : i32
    %c0_i32_1 = arith.constant 0 : i32
    return %arg0, %2, %c0_i32, %c0_i32_0 : i32, i32, i32, i32
  }
  func.func @transform_3(%arg0: i32, %arg1: i32) -> (i32, i32, i32, i32) {
    %c0_i32 = arith.constant 0 : i32
    %c0_i32_0 = arith.constant 0 : i32
    %c0_i32_1 = arith.constant 0 : i32
    return %arg0, %arg1, %c0_i32, %c0_i32_0 : i32, i32, i32, i32
  }
  func.func @transform_4(%arg0: i32, %arg1: i32) -> (i32, i32, i32, i32) {
    %c8_i32 = arith.constant 8 : i32
    %0 = arith.muli %arg1, %c8_i32 : i32
    %c1_i32 = arith.constant 1 : i32
    %1 = arith.subi %0, %c1_i32 : i32
    %c0_i32 = arith.constant 0 : i32
    %2 = arith.maxsi %1, %c0_i32 : i32
    %c0_i32_0 = arith.constant 0 : i32
    %c0_i32_1 = arith.constant 0 : i32
    %c0_i32_2 = arith.constant 0 : i32
    return %arg0, %2, %c0_i32_0, %c0_i32_1 : i32, i32, i32, i32
  }
  func.func @transform_5(%arg0: i32, %arg1: i32) -> (i32, i32, i32, i32) {
    %c1_i32 = arith.constant 1 : i32
    %0 = arith.addi %arg1, %c1_i32 : i32
    %c8_i32 = arith.constant 8 : i32
    %1 = arith.muli %0, %c8_i32 : i32
    %c15_i32 = arith.constant 15 : i32
    %2 = arith.minsi %1, %c15_i32 : i32
    %c0_i32 = arith.constant 0 : i32
    %c0_i32_0 = arith.constant 0 : i32
    %c0_i32_1 = arith.constant 0 : i32
    return %arg0, %2, %c0_i32, %c0_i32_0 : i32, i32, i32, i32
  }
  func.func @transform_6(%arg0: i32, %arg1: i32) -> (i32, i32, i32, i32) {
    %c0_i32 = arith.constant 0 : i32
    %c0_i32_0 = arith.constant 0 : i32
    %c0_i32_1 = arith.constant 0 : i32
    return %arg0, %arg1, %c0_i32, %c0_i32_0 : i32, i32, i32, i32
  }
  func.func @transform_7(%arg0: i32, %arg1: i32) -> (i32, i32) {
    %c0_i32 = arith.constant 0 : i32
    %c0_i32_0 = arith.constant 0 : i32
    %c0_i32_1 = arith.constant 0 : i32
    return %c0_i32, %c0_i32_0 : i32, i32
  }
  func.func @transform_8(%arg0: i32, %arg1: i32) -> (i32, i32) {
    %c0_i32 = arith.constant 0 : i32
    %c0_i32_0 = arith.constant 0 : i32
    %c0_i32_1 = arith.constant 0 : i32
    return %c0_i32, %c0_i32_0 : i32, i32
  }
  func.func @transform_9(%arg0: i32, %arg1: i32) -> (i32, i32, i32, i32) {
    %c0_i32 = arith.constant 0 : i32
    %c0_i32_0 = arith.constant 0 : i32
    %c0_i32_1 = arith.constant 0 : i32
    return %arg0, %arg1, %c0_i32, %c0_i32_0 : i32, i32, i32, i32
  }
}

</mosaic_0001>

<bundles_post_ra>
// kernel: ffm_forward.1
= control target key start
LH: loop header
LB: loop body
LE: loop exit
PB: predicated region body
PF: predicated region fallthrough
CT: control target
= control target key end

     0   :  { %s10335_s0 = inlined_call_operand.vmem [shape: bf16[2,16,16,128], index: 0, kind: input, shape index: {}, may-alias: {0,1,2}]   ;;  %s10336_s1 = inlined_call_operand.vmem [shape: bf16[2,16,16,128], index: 1, kind: input, shape index: {}, may-alias: {0,1,2}]   ;;  %s10337_s2 = inlined_call_operand.vmem [shape: bf16[2,16,16,128], index: 2, kind: input, shape index: {}, may-alias: {0,1,2}]   ;;  %s10338_s3 = inlined_call_operand.vmem [shape: bf16[2,16,16,128], index: 3, kind: input, shape index: {}, may-alias: {3,4,5}]   ;;  %s10339_s4 = inlined_call_operand.vmem [shape: bf16[2,16,16,128], index: 4, kind: input, shape index: {}, may-alias: {3,4,5}]   ;;  %s10340_s5 = inlined_call_operand.vmem [shape: bf16[2,16,16,128], index: 5, kind: input, shape index: {}, may-alias: {3,4,5}]   ;;  %s10341_s6 = inlined_call_operand.vmem [shape: f32[2,16,16,1], index: 6, kind: input, shape index: {}]   ;;  %s10342_s7 = inlined_call_operand.vmem [shape: bf16[1152,128], index: 7, kind: input, shape index: {}]   ;;  %s10343_s8 = inlined_call_operand.vmem [shape: f32[1,128], index: 8, kind: input, shape index: {}]   ;;  %s10344_s9 = inlined_call_operand.hbm [shape: f32[2,16,16,128], index: 9, kind: output, shape index: {}]  }
   0x1   :  { %10352 = sst [smem:[#allocation36_spill]] %s10335_s0 }
   0x2   :  { %10353 = sst [smem:[#allocation37_spill]] %s10336_s1 }
   0x3   :  { %14 = vsyncpa [#allocation5], 0 }
   0x4   :  { %16 = vsyncpa [#allocation5 + $0x1], 0  ;;  %s8450_s30 = smov 0   ;;  %s8452_s10 = smov 0  }
   0x5   :  { %s8454_s11 = smov 0   ;;  %s8456_s12 = smov 0  }
   0x6   :  { %s8458_s13 = smov 0   ;;  %s8460_s14 = smov 0  }
   0x7   :  { %s8462_s15 = smov 0   ;;  %s8464_s16 = smov 0  }
   0x8 LB: > { %10354 = sst [smem:[#allocation7_spill]] %s8375_s11  ;;  %s6897_s17 = sadd.s32 4294967295, %s8395_s16   ;;  %s8395_s16 = sphi %s8464_s16, %s22_s16   ;;  %s8391_s15 = sphi %s8462_s15, %s10474_s15   ;;  %s8387_s14 = sphi %s8460_s14, %s10473_s14   ;;  %s8383_s13 = sphi %s8458_s13, %s10472_s13   ;;  %s8379_s12 = sphi %s8456_s12, %s10477_s12   ;;  %s8375_s11 = sphi %s8454_s11, %s10470_s11   ;;  %s8371_s10 = sphi %s8452_s10, %s10476_s10   ;;  %s8367_s30 = sphi %s8450_s30, %s10475_s30  }
   0x9   : > { %10355 = sst [smem:[#allocation8_spill]] %s8387_s14  ;;  %s6898_s18 = sadd.s32 4294967294, %s8395_s16  }
   0xa   : > { %10356 = sst [smem:[#allocation9_spill]] %s8391_s15  ;;  %s31_s19 = sadd.s32 1, %s8387_s14 }
   0xb   : > { %p32_p0 = scmp.ge.s32.totalorder %s31_s19, 2  ;;  %s34_s20 = sadd.s32 1, %s8391_s15 }
   0xc   : > { %p323_p1 = scmp.ne.s32.totalorder %s8375_s11, %s8371_s10  ;;  %p324_p2 = scmp.eq.s32.totalorder %s6897_s17, 3 }
   0xd   : > { %s10479_s19 = smov (%p32_p0, %s31_s19), 0  ;;  %s10481_s20 = smov (!%p32_p0, %s34_s20), %s8391_s15 }
   0xe   : > { %10357 = sst [smem:[#allocation10_spill]] %s10479_s19  ;;  %s309_s21 = ssub.s32 %s8387_s14, %s10479_s19 }
   0xf   : > { %p8501_p3 = por %p324_p2, %p323_p1  ;;  %p36_p4 = scmp.ge.s32.totalorder %s10481_s20, 2 }
  0x10   : > { %p329_p5 = scmp.ne.s32.totalorder %s8371_s10, %s8367_s30  ;;  %p330_p6 = scmp.eq.s32.totalorder %s6898_s18, 3 }
  0x11   : > { %p6913_p7 = scmp.ge.s32.totalorder %s8395_s16, 1  ;;  %s10483_s20 = smov (%p36_p4, %s10481_s20), 0 }
  0x12   : > { %10359 = sst [smem:[#allocation11_spill]] %s10483_s20  ;;  %p8510_p8 = por %p330_p6, %p329_p5 }
  0x13   : > { %p476_p9 = scmp.lt.s32.totalorder %s8395_s16, 5  ;;  %s308_s24 = ssub.s32 %s8391_s15, %s10483_s20 }
  0x14   : > { %s10360_s23 = scalar_select %p8510_p8, 1, 0 }
  0x15   : > { %s313_s25 = sadd.s32 1, %s8375_s11  ;;  %s310_s26 = sor.u32 %s309_s21, %s308_s24 }
  0x16   : > { %10361 = sst [smem:[#allocation12_spill]] %s10360_s23  ;;  %p477_p10 = pnand %p6913_p7, %p476_p9 }
  0x17   : > { %p311_p11 = scmp.eq.s32.totalorder %s310_s26, 0 }
  0x18   : > { %480 = sbr.rel (%p477_p10) target bundleno = 1111 (0x457), region = 56 }
  0x19   : > { %s8519_s27 = scalar_select %p311_p11, %s8375_s11, %s313_s25  }
  0x1b   : > { %10362 = sst [smem:[#allocation13_spill]] %s8519_s27 }
  0x1d   : > { %s10345_s28 = sand.u32 1, %s8371_s10   ;;  %s8523_s29 = sshll.u32 %s8379_s12, 3  ;;  %v8397_v0 = vmov 0   ;;  %vm903_vm0 = vsmask.f32 7938  ;;  %vm902_vm1 = vcmask 1043456  }
  0x1e   : > { %695 = vst [vmem:[#allocation2 + $0xc] sm:$0xf] %v8397_v0  ;;  %s8528_s17 = sshll.u32 %s10345_s28, 7  ;;  %p590_p12 = scmp.lt.s32.totalorder %s8383_s13, 1  ;;  %vm738_vm2 = vsmask.f32 256  ;;  %vm8619_vm5 = vmand %vm902_vm1, %vm903_vm0 }
  0x1f   : > { %692 = vst [vmem:[#allocation2] sm:$0xf] %v8397_v0  ;;  %p592_p13 = scmp.lt.s32.totalorder %s8523_s29, 15  ;;  %s6920_s25 = sadd.s32 4294967295, %s8523_s29  ;;  %vm739_vm3 = vsmask.f32 4368 }
  0x20   : > { %693 = vst [vmem:[#allocation2 + $0x4] sm:$0xf] %v8397_v0  ;;  %s591_s18 = scalar_select %p590_p12, %s8383_s13, 1  ;;  %vm909_vm4 = vcmask 1040384   ;;  %vm8626_vm6 = vmor %vm738_vm2, %vm739_vm3 }
  0x21   : > { %694 = vst [vmem:[#allocation2 + $0x8] sm:$0x1] %v8397_v0  ;;  %s593_s21 = scalar_select %p592_p13, %s8523_s29, 15  ;;  %vm8635_vm7 = vmand %vm909_vm4, %vm738_vm2 }
  0x22   : > { %696 = vst [vmem:[#allocation2 + $0x10] sm:$0xf] %v8397_v0  ;;  %s8538_s24 = sshll.u32 %s591_s18, 5  ;;  %p602_p0 = scmp.gt.s32.totalorder %s6920_s25, 0 }
  0x23   : > { %697 = vst [vmem:[#allocation2 + $0x14] sm:$0x1] %v8397_v0  ;;  %s6916_s26 = sshll.u32 %s593_s21, 1  ;;  %p6921_p1 = scmp.lt.s32.totalorder %s6920_s25, 15 }
  0x24   : > { %698 = vst [vmem:[#allocation2 + $0x18] sm:$0xf] %v8397_v0  ;;  %s8544_s28 = sadd.s32 %s8538_s24, %s6916_s26  ;;  %s7911_s19 = sadd.s32 8, %s8523_s29 }
  0x25   : > { %699 = vst [vmem:[#allocation2 + $0x1c] sm:$0xf] %v8397_v0  ;;  %s6918_s20 = sshll.u32 %s8544_s28, 2  ;;  %s10363_s0 = sld [smem:[#allocation36_spill]]  ;;  %v905_v22 = vld [vmem:[#allocation2 + $0xc] sm:$0xf] }
  0x26   : > { %700 = vst [vmem:[#allocation2 + $0x20] sm:$0x1] %v8397_v0  ;;  %p8555_p2 = scmp.lt.s32.totalorder %s7911_s19, 15  ;;  %s10485_s25 = smov (!%p602_p0, %s6920_s25), 0 }
  0x27   : > { %701 = vst [vmem:[#allocation2 + $0x24] sm:$0xf] %v8397_v0  ;;  %s10489_s25 = smov (!%p6921_p1, %s10485_s25), 15  ;;  %s8573_s18 = scalar_lea.vmem %s10338_s3, %s6918_s20 }
  0x28   : > { %702 = vst [vmem:[#allocation2 + $0x28] sm:$0xf] %v8397_v0  ;;  %s10487_s19 = smov (!%p8555_p2, %s7911_s19), 15  ;;  %s6926_s15 = sshll.u32 %s10489_s25, 1 }
  0x29   : > { %703 = vst [vmem:[#allocation2 + $0x2c] sm:$0x1] %v8397_v0  ;;  %s10491_s19 = smov (!%p8555_p2, %s10487_s19), 15  ;;  %s10365_s1 = sld [smem:[#allocation37_spill]] }
  0x2a   : > { %704 = vst [vmem:[#allocation2 + $0x30] sm:$0xf] %v8397_v0  ;;  %s6933_s27 = sshll.u32 %s10491_s19, 1  ;;  %v911_v27 = vld [vmem:[#allocation2 + $0x14] sm:$0x1]  ;;  %p6961_p4 = scmp.le.s32.totalorder %s8379_s12, 0 }
  0x2b   : > { %s8553_s14 = scalar_lea.vmem %s10363_s0, %s6918_s20  ;;  %705 = vst [vmem:[#allocation2 + $0x34] sm:$0xf] %v8397_v0  ;;  %s610_s0 = sadd.s32 %s6926_s15, %s8538_s24  ;;  %v914_v28 = vld [vmem:[#allocation2 + $0x18] sm:$0xf] }
  0x2c   : > { %v722_v1 = vld [vmem:[%s8553_s14] sm:$0xf]  ;;  %v723_v2 = vld [vmem:[%s8553_s14 + $0x4] sm:$0xf]  ;;  %706 = vst [vmem:[#allocation2 + $0x38] sm:$0x1] %v8397_v0  ;;  %s627_s21 = sadd.s32 %s6933_s27, %s8538_s24 }
  0x2d   : > { %v742_v3 = vshrl.u32 %v722_v1, 16  ;;  %707 = vst [vmem:[#allocation2 + $0x3c] sm:$0xf] %v8397_v0  ;;  %s6928_s11 = sshll.u32 %s610_s0, 2  ;;  %v750_v4 = vshrl.u32 %v723_v2, 16  ;;  %s6935_s29 = sshll.u32 %s627_s21, 2 }
  0x2e   : > { %v724_v5 = vld [vmem:[%s8553_s14 + $0x8] sm:$0xf]  ;;  %708 = vst [vmem:[#allocation2 + $0x40] sm:$0xf] %v8397_v0  ;;  %s8590_s0 = scalar_lea.vmem %s10337_s2, %s6935_s29  ;;  %s8595_s26 = scalar_lea.vmem %s10339_s4, %s6928_s11  ;;  %v745_v7 = vshll.u32 %v722_v1, 16  ;;  %v753_v11 = vshll.u32 %v723_v2, 16 }
  0x2f   : > { %s8584_s20 = scalar_lea.vmem %s10365_s1, %s6928_s11  ;;  %709 = vst [vmem:[#allocation2 + $0x44] sm:$0x1] %v8397_v0  ;;  %v759_v6 = vshrl.u32 %v724_v5, 16  ;;  %s8601_s25 = scalar_lea.vmem %s10340_s5, %s6935_s29  ;;  %v725_v8 = vld [vmem:[%s8553_s14 + $0xc] sm:$0xf]  ;;  %v744_v9 = vrot.slane %v742_v3, 7 }
  0x30   : > { %710 = vst [vmem:[#allocation2 + $0x48] sm:$0xf] %v8397_v0  ;;  %s6960_s1 = sshll.u32 %s8544_s28, 3  ;;  %v752_v10 = vrot.slane %v750_v4, 7  ;;  %v767_v12 = vshrl.u32 %v725_v8, 16  ;;  %v762_v15 = vshll.u32 %v724_v5, 16 }
  0x31   : > { %711 = vst [vmem:[#allocation2 + $0x4c] sm:$0xf] %v8397_v0  ;;  %s8609_s11 = scalar_lea.vmem %s10341_s6, %s6960_s1  ;;  %v726_v13 = vld [vmem:[%s8553_s14 + $0x10] sm:$0xf]  ;;  %v761_v14 = vrot.slane %v759_v6, 7  ;;  %v770_v18 = vshll.u32 %v725_v8, 16  ;;  %v747_v20 = vor.u32 %v745_v7, %v744_v9 }
  0x32   : > { %712 = vst [vmem:[#allocation2 + $0x50] sm:$0x1] %v8397_v0  ;;  %v776_v16 = vshrl.u32 %v726_v13, 16  ;;  %v769_v17 = vrot.slane %v767_v12, 7  ;;  %v727_v19 = vld [vmem:[%s8553_s14 + $0x14] sm:$0xf]  ;;  %v755_v24 = vor.u32 %v753_v11, %v752_v10 }
  0x33   : > { %713 = vst [vmem:[#allocation2 + $0x54] sm:$0xf] %v8397_v0  ;;  %v748_v23 = vrot.slane %v744_v9, 4  ;;  %v784_v25 = vshrl.u32 %v727_v19, 16  ;;  %v779_v30 = vshll.u32 %v726_v13, 16  ;;  %v757_v31 = vrot.slane %v752_v10, 4 }
  0x34   : > { %714 = vst [vmem:[#allocation2 + $0x58] sm:$0xf] %v8397_v0  ;;  %v778_v29 = vrot.slane %v776_v16, 7  ;;  %v764_v32 = vor.u32 %v762_v15, %v761_v14  ;;  %v765_v33 = vrot.slane %v761_v14, 4  ;;  %v728_v34 = vld [vmem:[%s8553_s14 + $0x18] sm:$0xf]  ;;  %v772_v36 = vor.u32 %v770_v18, %v769_v17 }
  0x35   : > { %715 = vst [vmem:[#allocation2 + $0x5c] sm:$0x1] %v8397_v0  ;;  %v786_v37 = vrot.slane %v784_v25, 7  ;;  %v787_v38 = vshll.u32 %v727_v19, 16  ;;  %v793_v39 = vshrl.u32 %v728_v34, 16  ;;  %v906_v40 = vsel %vm8619_vm5, %v747_v20, %v905_v22  ;;  %s8700_s1 = scalar_lea.vmem [#allocation4], %s8528_s17 }
  0x36   : > { %716 = vst [vmem:[#allocation2 + $0x60] sm:$0xf] %v8397_v0  ;;  %v756_v41 = vsel %vm8626_vm6, %v748_v23, %v755_v24  ;;  %v918_v42 = vld [vmem:[#allocation2 + $0x20] sm:$0x1]  ;;  %v796_v43 = vshll.u32 %v728_v34, 16  ;;  %v774_v45 = vrot.slane %v769_v17, 4  ;;  %v781_v46 = vor.u32 %v779_v30, %v778_v29 }
  0x37   : > { %717 = vst [vmem:[#allocation2 + $0x64] sm:$0xf] %v8397_v0  ;;  %v729_v44 = vld [vmem:[%s8553_s14 + $0x1c] sm:$0xf]  ;;  %v795_v47 = vrot.slane %v793_v39, 7  ;;  %v912_v49 = vsel %vm8635_vm7, %v757_v31, %v911_v27  ;;  %v915_v50 = vsel %vm8619_vm5, %v764_v32, %v914_v28  ;;  %v773_v53 = vsel %vm8626_vm6, %v765_v33, %v772_v36 }
  0x38   : > { %718 = vst [vmem:[#allocation2 + $0x68] sm:$0x1] %v8397_v0  ;;  %v801_v48 = vshrl.u32 %v729_v44, 16  ;;  %v921_v51 = vld [vmem:[#allocation2 + $0x24] sm:$0xf]  ;;  %v804_v52 = vshll.u32 %v729_v44, 16  ;;  %v789_v55 = vor.u32 %v787_v38, %v786_v37  ;;  %v919_v1 = vsel %vm8635_vm7, %v774_v45, %v918_v42 }
  0x39   : > { %719 = vst [vmem:[#allocation2 + $0x6c] sm:$0xf] %v8397_v0  ;;  %v782_v54 = vrot.slane %v778_v29, 4  ;;  %v791_v56 = vrot.slane %v786_v37, 4  ;;  %v925_v57 = vld [vmem:[#allocation2 + $0x2c] sm:$0x1]  ;;  %v798_v60 = vor.u32 %v796_v43, %v795_v47  ;;  %v922_v2 = vsel %vm8619_vm5, %v781_v46, %v921_v51 }
  0x3a   : > { %720 = vst [vmem:[#allocation2 + $0x70] sm:$0xf] %v8397_v0  ;;  %v928_v58 = vld [vmem:[#allocation2 + $0x30] sm:$0xf]  ;;  %v730_v59 = vld [vmem:[%s8553_s14 + $0x20] sm:$0xf] }
  0x3b   : > { %721 = vst [vmem:[#allocation2 + $0x74] sm:$0x1] %v8397_v0  ;;  %v803_v61 = vrot.slane %v801_v48, 7  ;;  %v810_v62 = vshrl.u32 %v730_v59, 16  ;;  %v813_v63 = vshll.u32 %v730_v59, 16  ;;  %v799_v3 = vrot.slane %v795_v47, 4 }
  0x3c   : > { %907 = vst [vmem:[#allocation2 + $0xc] sm:$0xf] %v906_v40  ;;  %v731_v4 = vld [vmem:[%s8553_s14 + $0x24] sm:$0xf]  ;;  %v790_v9 = vsel %vm8626_vm6, %v782_v54, %v789_v55  ;;  %v932_v10 = vld [vmem:[#allocation2 + $0x38] sm:$0x1]  ;;  %v926_v12 = vsel %vm8635_vm7, %v791_v56, %v925_v57  ;;  %v929_v13 = vsel %vm8619_vm5, %v798_v60, %v928_v58 }
  0x3d   : > { %908 = vst [vmem:[#allocation2 + $0x10] sm:$0xf] %v756_v41  ;;  %v806_v5 = vor.u32 %v804_v52, %v803_v61  ;;  %v808_v6 = vrot.slane %v803_v61, 4  ;;  %v812_v7 = vrot.slane %v810_v62, 7  ;;  %v818_v8 = vshrl.u32 %v731_v4, 16 }
  0x3e   : > { %913 = vst [vmem:[#allocation2 + $0x14] sm:$0x1] %v912_v49  ;;  %v821_v11 = vshll.u32 %v731_v4, 16  ;;  %v935_v15 = vld [vmem:[#allocation2 + $0x3c] sm:$0xf] }
  0x3f   : > { %916 = vst [vmem:[#allocation2 + $0x18] sm:$0xf] %v915_v50  ;;  %v815_v14 = vor.u32 %v813_v63, %v812_v7  ;;  %v732_v16 = vld [vmem:[%s8553_s14 + $0x28] sm:$0xf]  ;;  %v816_v17 = vrot.slane %v812_v7, 4  ;;  %v820_v18 = vrot.slane %v818_v8, 7  ;;  %v807_v22 = vsel %vm8626_vm6, %v799_v3, %v806_v5 }
  0x40   : > { %917 = vst [vmem:[#allocation2 + $0x1c] sm:$0xf] %v773_v53  ;;  %v827_v19 = vshrl.u32 %v732_v16, 16  ;;  %v830_v20 = vshll.u32 %v732_v16, 16  ;;  %v933_v23 = vsel %vm8635_vm7, %v808_v6, %v932_v10  ;;  %v939_v24 = vld [vmem:[#allocation2 + $0x44] sm:$0x1] }
  0x41   : > { %920 = vst [vmem:[#allocation2 + $0x20] sm:$0x1] %v919_v1  ;;  %v733_v25 = vld [vmem:[%s8553_s14 + $0x2c] sm:$0xf]  ;;  %v823_v27 = vor.u32 %v821_v11, %v820_v18  ;;  %v825_v28 = vrot.slane %v820_v18, 4  ;;  %v936_v31 = vsel %vm8619_vm5, %v815_v14, %v935_v15 }
  0x42   : > { %923 = vst [vmem:[#allocation2 + $0x24] sm:$0xf] %v922_v2  ;;  %v829_v29 = vrot.slane %v827_v19, 7  ;;  %v835_v30 = vshrl.u32 %v733_v25, 16  ;;  %v942_v32 = vld [vmem:[#allocation2 + $0x48] sm:$0xf] }
  0x43   : > { %924 = vst [vmem:[#allocation2 + $0x28] sm:$0xf] %v790_v9  ;;  %v838_v33 = vshll.u32 %v733_v25, 16  ;;  %v824_v34 = vsel %vm8626_vm6, %v816_v17, %v823_v27  ;;  %v940_v36 = vsel %vm8635_vm7, %v825_v28, %v939_v24  ;;  %v734_v38 = vld [vmem:[%s8553_s14 + $0x30] sm:$0xf] }
  0x44   : > { %927 = vst [vmem:[#allocation2 + $0x2c] sm:$0x1] %v926_v12  ;;  %v832_v37 = vor.u32 %v830_v20, %v829_v29  ;;  %v833_v39 = vrot.slane %v829_v29, 4  ;;  %v837_v40 = vrot.slane %v835_v30, 7  ;;  %v844_v41 = vshrl.u32 %v734_v38, 16 }
  0x45   : > { %930 = vst [vmem:[#allocation2 + $0x30] sm:$0xf] %v929_v13  ;;  %v847_v42 = vshll.u32 %v734_v38, 16  ;;  %v946_v44 = vld [vmem:[#allocation2 + $0x50] sm:$0x1] }
  0x46   : > { %931 = vst [vmem:[#allocation2 + $0x34] sm:$0xf] %v807_v22  ;;  %v943_v43 = vsel %vm8619_vm5, %v832_v37, %v942_v32  ;;  %v735_v45 = vld [vmem:[%s8553_s14 + $0x34] sm:$0xf]  ;;  %v840_v46 = vor.u32 %v838_v33, %v837_v40  ;;  %v842_v47 = vrot.slane %v837_v40, 4  ;;  %v846_v48 = vrot.slane %v844_v41, 7 }
  0x47   : > { %934 = vst [vmem:[#allocation2 + $0x38] sm:$0x1] %v933_v23  ;;  %v852_v49 = vshrl.u32 %v735_v45, 16  ;;  %v949_v50 = vld [vmem:[#allocation2 + $0x54] sm:$0xf]  ;;  %v855_v51 = vshll.u32 %v735_v45, 16 }
  0x48   : > { %937 = vst [vmem:[#allocation2 + $0x3c] sm:$0xf] %v936_v31  ;;  %v841_v52 = vsel %vm8626_vm6, %v833_v39, %v840_v46  ;;  %v947_v53 = vsel %vm8635_vm7, %v842_v47, %v946_v44  ;;  %v849_v54 = vor.u32 %v847_v42, %v846_v48  ;;  %v736_v55 = vld [vmem:[%s8553_s14 + $0x38] sm:$0xf]  ;;  %v850_v56 = vrot.slane %v846_v48, 4 }
  0x49   : > { %938 = vst [vmem:[#allocation2 + $0x40] sm:$0xf] %v824_v34  ;;  %v854_v57 = vrot.slane %v852_v49, 7  ;;  %v861_v58 = vshrl.u32 %v736_v55, 16  ;;  %v864_v59 = vshll.u32 %v736_v55, 16 }
  0x4a   : > { %941 = vst [vmem:[#allocation2 + $0x44] sm:$0x1] %v940_v36  ;;  %v950_v60 = vsel %vm8619_vm5, %v849_v54, %v949_v50  ;;  %v953_v61 = vld [vmem:[#allocation2 + $0x5c] sm:$0x1]  ;;  %v956_v4 = vld [vmem:[#allocation2 + $0x60] sm:$0xf] }
  0x4b   : > { %944 = vst [vmem:[#allocation2 + $0x48] sm:$0xf] %v943_v43  ;;  %v737_v62 = vld [vmem:[%s8553_s14 + $0x3c] sm:$0xf]  ;;  %v857_v63 = vor.u32 %v855_v51, %v854_v57  ;;  %v859_v1 = vrot.slane %v854_v57, 4  ;;  %v863_v2 = vrot.slane %v861_v58, 7 }
  0x4c   : > { %945 = vst [vmem:[#allocation2 + $0x4c] sm:$0xf] %v841_v52  ;;  %v869_v3 = vshrl.u32 %v737_v62, 16  ;;  %v872_v5 = vshll.u32 %v737_v62, 16  ;;  %v960_v12 = vld [vmem:[#allocation2 + $0x68] sm:$0x1] }
  0x4d   : > { %948 = vst [vmem:[#allocation2 + $0x50] sm:$0x1] %v947_v53  ;;  %v858_v6 = vsel %vm8626_vm6, %v850_v56, %v857_v63  ;;  %v954_v7 = vsel %vm8635_vm7, %v859_v1, %v953_v61  ;;  %v866_v8 = vor.u32 %v864_v59, %v863_v2  ;;  %v867_v9 = vrot.slane %v863_v2, 4 }
  0x4e   : > { %951 = vst [vmem:[#allocation2 + $0x54] sm:$0xf] %v950_v60  ;;  %v871_v10 = vrot.slane %v869_v3, 7 }
  0x4f   : > { %952 = vst [vmem:[#allocation2 + $0x58] sm:$0xf] %v858_v6  ;;  %v957_v11 = vsel %vm8619_vm5, %v866_v8, %v956_v4 }
  0x50   : > { %955 = vst [vmem:[#allocation2 + $0x5c] sm:$0x1] %v954_v7  ;;  %v874_v13 = vor.u32 %v872_v5, %v871_v10  ;;  %v876_v14 = vrot.slane %v871_v10, 4  ;;  %966 = sbr.rel (%p6961_p4) target bundleno = 96 (0x60), region = 60 }
  0x51   : > { %958 = vst [vmem:[#allocation2 + $0x60] sm:$0xf] %v957_v11 }
  0x52   : > { %v875_v15 = vsel %vm8626_vm6, %v867_v9, %v874_v13  ;;  %v961_v16 = vsel %vm8635_vm7, %v876_v14, %v960_v12 }
  0x53   : > { %959 = vst [vmem:[#allocation2 + $0x64] sm:$0xf] %v875_v15 }
  0x54   : > { %962 = vst [vmem:[#allocation2 + $0x68] sm:$0x1] %v961_v16 }
  0x55   : > { %v967_v17 = vld [vmem:[%s8584_s20] sm:$0xf]  ;;  %v968_v18 = vld [vmem:[%s8584_s20 + $0x4] sm:$0xf]  ;;  %v993_v28 = vld [vmem:[#allocation2 + $0x8] sm:$0x1] }
  0x56   : > { %v970_v19 = vshrl.u32 %v967_v17, 16  ;;  %v973_v20 = vshll.u32 %v967_v17, 16  ;;  %v978_v22 = vshrl.u32 %v968_v18, 16  ;;  %v981_v23 = vshll.u32 %v968_v18, 16  ;;  %v989_v27 = vld [vmem:[#allocation2] sm:$0xf] }
  0x58   : > { %v972_v24 = vrot.slane %v970_v19, 7  ;;  %v980_v25 = vrot.slane %v978_v22, 7 }
  0x5a   : > { %v975_v29 = vor.u32 %v973_v20, %v972_v24  ;;  %v976_v30 = vrot.slane %v972_v24, 4  ;;  %v983_v31 = vor.u32 %v981_v23, %v980_v25  ;;  %v985_v32 = vrot.slane %v980_v25, 4 }
  0x5c   : > { %v990_v33 = vsel %vm8619_vm5, %v975_v29, %v989_v27  ;;  %v984_v34 = vsel %vm8626_vm6, %v976_v30, %v983_v31  ;;  %v994_v36 = vsel %vm8635_vm7, %v985_v32, %v993_v28 }
  0x5d   : > { %991 = vst [vmem:[#allocation2] sm:$0xf] %v990_v33 }
  0x5e   : > { %992 = vst [vmem:[#allocation2 + $0x4] sm:$0xf] %v984_v34 }
  0x5f   : > { %995 = vst [vmem:[#allocation2 + $0x8] sm:$0x1] %v994_v36 }
  0x60 PF: > { %p6962_p5 = scmp.ge.s32.totalorder %s8379_s12, 1 }
  0x62   : > { %999 = sbr.rel (%p6962_p5) target bundleno = 114 (0x72), region = 64 }
  0x67   : > { %v1000_v37 = vld [vmem:[%s8590_s0] sm:$0xf]  ;;  %v1001_v38 = vld [vmem:[%s8590_s0 + $0x4] sm:$0xf]  ;;  %v1023_v45 = vld [vmem:[#allocation2 + $0x6c] sm:$0xf] }
  0x68   : > { %v1003_v39 = vshrl.u32 %v1000_v37, 16  ;;  %v1006_v40 = vshll.u32 %v1000_v37, 16  ;;  %v1011_v41 = vshrl.u32 %v1001_v38, 16  ;;  %v1014_v42 = vshll.u32 %v1001_v38, 16  ;;  %v1027_v46 = vld [vmem:[#allocation2 + $0x74] sm:$0x1] }
  0x6a   : > { %v1005_v43 = vrot.slane %v1003_v39, 7  ;;  %v1013_v44 = vrot.slane %v1011_v41, 7 }
  0x6c   : > { %v1008_v47 = vor.u32 %v1006_v40, %v1005_v43  ;;  %v1009_v48 = vrot.slane %v1005_v43, 4  ;;  %v1016_v49 = vor.u32 %v1014_v42, %v1013_v44  ;;  %v1018_v50 = vrot.slane %v1013_v44, 4 }
  0x6e   : > { %v1024_v51 = vsel %vm8619_vm5, %v1008_v47, %v1023_v45  ;;  %v1017_v52 = vsel %vm8626_vm6, %v1009_v48, %v1016_v49  ;;  %v1028_v53 = vsel %vm8635_vm7, %v1018_v50, %v1027_v46 }
  0x6f   : > { %1025 = vst [vmem:[#allocation2 + $0x6c] sm:$0xf] %v1024_v51 }
  0x70   : > { %1026 = vst [vmem:[#allocation2 + $0x70] sm:$0xf] %v1017_v52 }
  0x71   : > { %1029 = vst [vmem:[#allocation2 + $0x74] sm:$0x1] %v1028_v53 }
  0x72 PF: > { %v1030_v54 = vld [vmem:[#allocation2] sm:$0xf]  ;;  %v1031_v55 = vld [vmem:[#allocation2 + $0x4] sm:$0xf]  ;;  %v1032_v56 = vld [vmem:[#allocation2 + $0xc] sm:$0xf] }
  0x73   : > { %1046 = vst [vmem:[#allocation3] sm:$0xf] %v1030_v54  ;;  %v1033_v57 = vld [vmem:[#allocation2 + $0x10] sm:$0xf]  ;;  %v1034_v58 = vld [vmem:[#allocation2 + $0x18] sm:$0xf] }
  0x74   : > { %1047 = vst [vmem:[#allocation3 + $0x24] sm:$0xf] %v1031_v55  ;;  %v1035_v59 = vld [vmem:[#allocation2 + $0x1c] sm:$0xf]  ;;  %v1036_v60 = vld [vmem:[#allocation2 + $0x24] sm:$0xf] }
  0x75   : > { %1048 = vst [vmem:[#allocation3 + $0x48] sm:$0xf] %v1032_v56  ;;  %v1037_v61 = vld [vmem:[#allocation2 + $0x28] sm:$0xf]  ;;  %v1038_v62 = vld [vmem:[#allocation2 + $0x30] sm:$0xf] }
  0x76   : > { %1049 = vst [vmem:[#allocation3 + $0x6c] sm:$0xf] %v1033_v57  ;;  %v1039_v63 = vld [vmem:[#allocation2 + $0x34] sm:$0xf]  ;;  %v1040_v1 = vld [vmem:[#allocation2 + $0x3c] sm:$0xf] }
  0x77   : > { %1050 = vst [vmem:[#allocation3 + $0x90] sm:$0xf] %v1034_v58  ;;  %v1041_v2 = vld [vmem:[#allocation2 + $0x40] sm:$0xf]  ;;  %v1042_v4 = vld [vmem:[#allocation2 + $0x48] sm:$0xf] }
  0x78   : > { %1051 = vst [vmem:[#allocation3 + $0xb4] sm:$0xf] %v1035_v59  ;;  %v1062_v3 = vld [vmem:[#allocation2] sm:$0xf]  ;;  %v1063_v5 = vld [vmem:[#allocation2 + $0x4] sm:$0xf] }
  0x79   : > { %1052 = vst [vmem:[#allocation3 + $0xd8] sm:$0xf] %v1036_v60  ;;  %vm1086_vm8 = vsmask.f32 3328  ;;  %v1043_v6 = vld [vmem:[#allocation2 + $0x4c] sm:$0xf] }
  0x7a   : > { %1053 = vst [vmem:[#allocation3 + $0xfc] sm:$0xf] %v1037_v61  ;;  %vm1087_vm9 = vsmask.f32 7440  ;;  %v1090_v7 = vshrl.u32 %v1062_v3, 16  ;;  %v1093_v8 = vshll.u32 %v1062_v3, 16 }
  0x7b   : > { %1054 = vst [vmem:[#allocation3 + $0x120] sm:$0xf] %v1038_v62  ;;  %v1044_v9 = vld [vmem:[#allocation2 + $0x54] sm:$0xf]  ;;  %v1099_v10 = vshll.u32 %v1063_v5, 16  ;;  %v1103_v11 = vshrl.u32 %v1063_v5, 16  ;;  %vm8726_vm10 = vmor %vm1086_vm8, %vm1087_vm9 }
  0x7c   : > { %1055 = vst [vmem:[#allocation3 + $0x144] sm:$0xf] %v1039_v63  ;;  %v1064_v12 = vld [vmem:[#allocation2 + $0x8] sm:$0x1]  ;;  %v1045_v13 = vld [vmem:[#allocation2 + $0x58] sm:$0xf] }
  0x7d   : > { %1056 = vst [vmem:[#allocation3 + $0x168] sm:$0xf] %v1040_v1  ;;  %v1092_v14 = vrot.slane %v1090_v7, 4  ;;  %v1095_v15 = vrot.slane %v1093_v8, 5  ;;  %v1109_v16 = vshll.u32 %v1064_v12, 16  ;;  %v1101_v17 = vrot.slane %v1099_v10, 5 }
  0x7e   : > { %1057 = vst [vmem:[#allocation3 + $0x18c] sm:$0xf] %v1041_v2  ;;  %v1105_v18 = vrot.slane %v1103_v11, 4  ;;  %v1065_v19 = vld [vmem:[#allocation2 + $0xc] sm:$0xf]  ;;  %vm1361_vm11 = vcmask 1042432  }
  0x7f   : > { %1058 = vst [vmem:[#allocation3 + $0x1b0] sm:$0xf] %v1042_v4  ;;  %v1096_v20 = vor.u32 %v1095_v15, %v1092_v14  ;;  %v1111_v22 = vrot.slane %v1109_v16, 5  ;;  %v1066_v23 = vld [vmem:[#allocation2 + $0x10] sm:$0xf]  ;;  %v1114_v24 = vshrl.u32 %v1065_v19, 16 }
  0x80   : > { %1059 = vst [vmem:[#allocation3 + $0x1d4] sm:$0xf] %v1043_v6  ;;  %v1106_v27 = vor.u32 %v1105_v18, %v1101_v17  ;;  %v1117_v28 = vshll.u32 %v1065_v19, 16  ;;  %v1123_v29 = vshll.u32 %v1066_v23, 16  ;;  %v1067_v30 = vld [vmem:[#allocation2 + $0x14] sm:$0x1] }
  0x81   : > { %1060 = vst [vmem:[#allocation3 + $0x1f8] sm:$0xf] %v1044_v9  ;;  %v1097_v31 = vrot.slane %v1096_v20, 4  ;;  %v1116_v32 = vrot.slane %v1114_v24, 4  ;;  %v1127_v33 = vshrl.u32 %v1066_v23, 16  ;;  %v1133_v34 = vshll.u32 %v1067_v30, 16 }
  0x82   : > { %1061 = vst [vmem:[#allocation3 + $0x21c] sm:$0xf] %v1045_v13  ;;  %v1107_v36 = vrot.slane %v1106_v27, 4  ;;  %v1119_v37 = vrot.slane %v1117_v28, 5  ;;  %v1125_v38 = vrot.slane %v1123_v29, 5  ;;  %vm1362_vm12 = vcmask 1046532  }
  0x83   : > { %v1102_v39 = vsel %vm8726_vm10, %v1097_v31, %v1101_v17  ;;  %v1129_v40 = vrot.slane %v1127_v33, 4  ;;  %v1135_v41 = vrot.slane %v1133_v34, 5  ;;  %v1068_v42 = vld [vmem:[#allocation2 + $0x18] sm:$0xf]  ;;  %v1069_v43 = vld [vmem:[#allocation2 + $0x1c] sm:$0xf]  ;;  %vm8758_vm13 = vmor %vm1361_vm11, %vm1362_vm12 }
  0x84   : > { %1297 = vst [vmem:[#allocation3 + $0x4] sm:$0xf] %v1102_v39  ;;  %v1112_v44 = vsel %vm8726_vm10, %v1107_v36, %v1111_v22  ;;  %v1120_v45 = vor.u32 %v1119_v37, %v1116_v32  ;;  %v1138_v46 = vshrl.u32 %v1068_v42, 16  ;;  %v1141_v47 = vshll.u32 %v1068_v42, 16  ;;  %v1070_v48 = vld [vmem:[#allocation2 + $0x20] sm:$0x1] }
  0x85   : > { %1298 = vst [vmem:[#allocation3 + $0x28] sm:$0xf] %v1112_v44  ;;  %v1130_v49 = vor.u32 %v1129_v40, %v1125_v38  ;;  %v1147_v50 = vshll.u32 %v1069_v43, 16  ;;  %v1151_v51 = vshrl.u32 %v1069_v43, 16  ;;  %v1157_v52 = vshll.u32 %v1070_v48, 16 }
  0x86   : > { %v1121_v53 = vrot.slane %v1120_v45, 4  ;;  %v1140_v54 = vrot.slane %v1138_v46, 4  ;;  %v1143_v55 = vrot.slane %v1141_v47, 5  ;;  %v1071_v56 = vld [vmem:[#allocation2 + $0x24] sm:$0xf] }
  0x87   : > { %v1131_v57 = vrot.slane %v1130_v49, 4  ;;  %v1149_v58 = vrot.slane %v1147_v50, 5  ;;  %v1153_v59 = vrot.slane %v1151_v51, 4  ;;  %v1159_v60 = vrot.slane %v1157_v52, 5  ;;  %v1072_v61 = vld [vmem:[#allocation2 + $0x28] sm:$0xf] }
  0x88   : > { %v1126_v62 = vsel %vm8726_vm10, %v1121_v53, %v1125_v38  ;;  %v1144_v63 = vor.u32 %v1143_v55, %v1140_v54  ;;  %v1162_v1 = vshrl.u32 %v1071_v56, 16  ;;  %v1165_v2 = vshll.u32 %v1071_v56, 16  ;;  %v1073_v3 = vld [vmem:[#allocation2 + $0x2c] sm:$0x1]  ;;  %v1074_v4 = vld [vmem:[#allocation2 + $0x30] sm:$0xf] }
  0x89   : > { %1299 = vst [vmem:[#allocation3 + $0x4c] sm:$0xf] %v1126_v62  ;;  %v1136_v5 = vsel %vm8726_vm10, %v1131_v57, %v1135_v41  ;;  %v1154_v6 = vor.u32 %v1153_v59, %v1149_v58  ;;  %v1171_v7 = vshll.u32 %v1072_v61, 16  ;;  %v1175_v8 = vshrl.u32 %v1072_v61, 16  ;;  %v1075_v9 = vld [vmem:[#allocation2 + $0x34] sm:$0xf] }
  0x8a   : > { %1300 = vst [vmem:[#allocation3 + $0x70] sm:$0xf] %v1136_v5  ;;  %v1145_v10 = vrot.slane %v1144_v63, 4  ;;  %v1164_v11 = vrot.slane %v1162_v1, 4  ;;  %v1167_v12 = vrot.slane %v1165_v2, 5  ;;  %v1181_v13 = vshll.u32 %v1073_v3, 16 }
  0x8b   : > { %v1155_v14 = vrot.slane %v1154_v6, 4  ;;  %v1173_v15 = vrot.slane %v1171_v7, 5  ;;  %v1177_v16 = vrot.slane %v1175_v8, 4  ;;  %v1186_v17 = vshrl.u32 %v1074_v4, 16  ;;  %v1076_v18 = vld [vmem:[#allocation2 + $0x38] sm:$0x1] }
  0x8c   : > { %v1150_v19 = vsel %vm8726_vm10, %v1145_v10, %v1149_v58  ;;  %v1168_v20 = vor.u32 %v1167_v12, %v1164_v11  ;;  %v1183_v22 = vrot.slane %v1181_v13, 5  ;;  %v1189_v23 = vshll.u32 %v1074_v4, 16  ;;  %v1077_v24 = vld [vmem:[#allocation2 + $0x3c] sm:$0xf]  ;;  %v1078_v31 = vld [vmem:[#allocation2 + $0x40] sm:$0xf] }
  0x8d   : > { %1301 = vst [vmem:[#allocation3 + $0x94] sm:$0xf] %v1150_v19  ;;  %v1160_v27 = vsel %vm8726_vm10, %v1155_v14, %v1159_v60  ;;  %v1178_v28 = vor.u32 %v1177_v16, %v1173_v15  ;;  %v1188_v29 = vrot.slane %v1186_v17, 4  ;;  %v1195_v30 = vshll.u32 %v1075_v9, 16  ;;  %v1079_v41 = vld [vmem:[#allocation2 + $0x44] sm:$0x1] }
  0x8e   : > { %1302 = vst [vmem:[#allocation3 + $0xb8] sm:$0xf] %v1160_v27  ;;  %v1169_v32 = vrot.slane %v1168_v20, 4  ;;  %v1191_v33 = vrot.slane %v1189_v23, 5  ;;  %v1199_v34 = vshrl.u32 %v1075_v9, 16  ;;  %v1205_v36 = vshll.u32 %v1076_v18, 16 }
  0x8f   : > { %v1179_v37 = vrot.slane %v1178_v28, 4  ;;  %v1197_v38 = vrot.slane %v1195_v30, 5  ;;  %v1210_v39 = vshrl.u32 %v1077_v24, 16  ;;  %v1213_v40 = vshll.u32 %v1077_v24, 16  ;;  %v1080_v46 = vld [vmem:[#allocation2 + $0x48] sm:$0xf] }
  0x90   : > { %v1174_v42 = vsel %vm8726_vm10, %v1169_v32, %v1173_v15  ;;  %v1192_v43 = vor.u32 %v1191_v33, %v1188_v29  ;;  %v1201_v44 = vrot.slane %v1199_v34, 4  ;;  %v1207_v45 = vrot.slane %v1205_v36, 5  ;;  %v1081_v47 = vld [vmem:[#allocation2 + $0x4c] sm:$0xf]  ;;  %v1082_v52 = vld [vmem:[#allocation2 + $0x50] sm:$0x1] }
  0x91   : > { %1303 = vst [vmem:[#allocation3 + $0xdc] sm:$0xf] %v1174_v42  ;;  %v1184_v48 = vsel %vm8726_vm10, %v1179_v37, %v1183_v22  ;;  %v1212_v49 = vrot.slane %v1210_v39, 4  ;;  %v1215_v50 = vrot.slane %v1213_v40, 5  ;;  %v1219_v51 = vshll.u32 %v1078_v31, 16 }
  0x92   : > { %1304 = vst [vmem:[#allocation3 + $0x100] sm:$0xf] %v1184_v48  ;;  %v1193_v53 = vrot.slane %v1192_v43, 4  ;;  %v1202_v54 = vor.u32 %v1201_v44, %v1197_v38  ;;  %v1223_v55 = vshrl.u32 %v1078_v31, 16  ;;  %v1229_v56 = vshll.u32 %v1079_v41, 16 }
  0x93   : > { %v1216_v57 = vor.u32 %v1215_v50, %v1212_v49  ;;  %v1221_v58 = vrot.slane %v1219_v51, 5  ;;  %v1234_v59 = vshrl.u32 %v1080_v46, 16  ;;  %v1237_v60 = vshll.u32 %v1080_v46, 16  ;;  %v1083_v61 = vld [vmem:[#allocation2 + $0x54] sm:$0xf] }
  0x94   : > { %v1198_v62 = vsel %vm8726_vm10, %v1193_v53, %v1197_v38  ;;  %v1203_v63 = vrot.slane %v1202_v54, 4  ;;  %v1225_v1 = vrot.slane %v1223_v55, 4  ;;  %v1231_v2 = vrot.slane %v1229_v56, 5  ;;  %v1084_v3 = vld [vmem:[#allocation2 + $0x58] sm:$0xf] }
  0x95   : > { %1305 = vst [vmem:[#allocation3 + $0x124] sm:$0xf] %v1198_v62  ;;  %v1217_v4 = vrot.slane %v1216_v57, 4  ;;  %v1236_v5 = vrot.slane %v1234_v59, 4  ;;  %v1239_v6 = vrot.slane %v1237_v60, 5  ;;  %v1243_v7 = vshll.u32 %v1081_v47, 16 }
  0x96   : > { %v1208_v8 = vsel %vm8726_vm10, %v1203_v63, %v1207_v45  ;;  %v1226_v9 = vor.u32 %v1225_v1, %v1221_v58  ;;  %v1247_v10 = vshrl.u32 %v1081_v47, 16  ;;  %v1253_v11 = vshll.u32 %v1082_v52, 16  ;;  %v1085_v12 = vld [vmem:[#allocation2 + $0x5c] sm:$0x1]  ;;  %v1313_v13 = vld [vmem:[#allocation2] sm:$0xe] }
  0x97   : > { %1306 = vst [vmem:[#allocation3 + $0x148] sm:$0xf] %v1208_v8  ;;  %v1222_v14 = vsel %vm8726_vm10, %v1217_v4, %v1221_v58  ;;  %v1240_v15 = vor.u32 %v1239_v6, %v1236_v5  ;;  %v1245_v16 = vrot.slane %v1243_v7, 5  ;;  %v1258_v17 = vshrl.u32 %v1083_v61, 16  ;;  %v1314_v18 = vld [vmem:[#allocation2 + $0x4] sm:$0xf] }
  0x98   : > { %1307 = vst [vmem:[#allocation3 + $0x16c] sm:$0xf] %v1222_v14  ;;  %v1227_v19 = vrot.slane %v1226_v9, 4  ;;  %v1249_v20 = vrot.slane %v1247_v10, 4  ;;  %v1255_v22 = vrot.slane %v1253_v11, 5  ;;  %v1261_v23 = vshll.u32 %v1083_v61, 16 }
  0x99   : > { %v1241_v24 = vrot.slane %v1240_v15, 4  ;;  %v1260_v27 = vrot.slane %v1258_v17, 4  ;;  %v1267_v28 = vshll.u32 %v1084_v3, 16  ;;  %v1271_v29 = vshrl.u32 %v1084_v3, 16  ;;  %v1315_v30 = vld [vmem:[#allocation2 + $0x8] sm:$0x1] }
  0x9a   : > { %v1232_v31 = vsel %vm8726_vm10, %v1227_v19, %v1231_v2  ;;  %v1250_v32 = vor.u32 %v1249_v20, %v1245_v16  ;;  %v1263_v33 = vrot.slane %v1261_v23, 5  ;;  %v1277_v34 = vshll.u32 %v1085_v12, 16  ;;  %v1316_v36 = vld [vmem:[#allocation2 + $0xc] sm:$0xe]  ;;  %v1317_v37 = vld [vmem:[#allocation2 + $0x10] sm:$0xf] }
  0x9b   : > { %1308 = vst [vmem:[#allocation3 + $0x190] sm:$0xf] %v1232_v31  ;;  %v1246_v38 = vsel %vm8726_vm10, %v1241_v24, %v1245_v16  ;;  %v1269_v39 = vrot.slane %v1267_v28, 5  ;;  %v1273_v40 = vrot.slane %v1271_v29, 4  ;;  %v6963_v42 = vrot.slane %v1313_v13, 9 }
  0x9c   : > { %1309 = vst [vmem:[#allocation3 + $0x1b4] sm:$0xf] %v1246_v38  ;;  %v1251_v43 = vrot.slane %v1250_v32, 4  ;;  %v1264_v44 = vor.u32 %v1263_v33, %v1260_v27  ;;  %v1279_v45 = vrot.slane %v1277_v34, 5  ;;  %v1366_v46 = vrot.slane %v1314_v18, 5 }
  0x9d   : > { %v1274_v47 = vor.u32 %v1273_v40, %v1269_v39  ;;  %v1369_v48 = vrot.slane %v1315_v30, 5  ;;  %v6964_v49 = vrot.slane %v1316_v36, 9  ;;  %v1373_v50 = vrot.slane %v1317_v37, 5  ;;  %v1318_v51 = vld [vmem:[#allocation2 + $0x14] sm:$0x1] }
  0x9e   : > { %v1256_v52 = vsel %vm8726_vm10, %v1251_v43, %v1255_v22  ;;  %v1265_v53 = vrot.slane %v1264_v44, 4  ;;  %v1367_v54 = vsel %vm8758_vm13, %v6963_v42, %v1366_v46  ;;  %v1368_v55 = vrot.slane %v1366_v46, 4  ;;  %v1319_v56 = vld [vmem:[#allocation2 + $0x18] sm:$0xe]  ;;  %v1320_v57 = vld [vmem:[#allocation2 + $0x1c] sm:$0xf] }
  0x9f   : > { %1310 = vst [vmem:[#allocation3 + $0x1d8] sm:$0xf] %v1256_v52  ;;  %v1275_v58 = vrot.slane %v1274_v47, 4  ;;  %v1375_v59 = vrot.slane %v1373_v50, 4  ;;  %v1376_v60 = vrot.slane %v1318_v51, 5  ;;  %v6965_v63 = vrot.slane %v1319_v56, 9 }
  0xa0   : > { %v1270_v61 = vsel %vm8726_vm10, %v1265_v53, %v1269_v39  ;;  %1436 = vst [vmem:[#allocation3 + $0x8] sm:$0xf] %v1367_v54  ;;  %v1370_v62 = vsel %vm8758_vm13, %v1368_v55, %v1369_v48  ;;  %v1380_v1 = vrot.slane %v1320_v57, 5  ;;  %v1321_v2 = vld [vmem:[#allocation2 + $0x20] sm:$0x1]  ;;  %v1374_v4 = vsel %vm8758_vm13, %v6964_v49, %v1373_v50 }
  0xa1   : > { %1311 = vst [vmem:[#allocation3 + $0x1fc] sm:$0xf] %v1270_v61  ;;  %v1280_v3 = vsel %vm8726_vm10, %v1275_v58, %v1279_v45  ;;  %v1383_v5 = vrot.slane %v1321_v2, 5  ;;  %v1322_v6 = vld [vmem:[#allocation2 + $0x24] sm:$0xe]  ;;  %v1377_v7 = vsel %vm8758_vm13, %v1375_v59, %v1376_v60 }
  0xa2   : > { %1312 = vst [vmem:[#allocation3 + $0x220] sm:$0xf] %v1280_v3  ;;  %v1382_v8 = vrot.slane %v1380_v1, 4  ;;  %v1323_v9 = vld [vmem:[#allocation2 + $0x28] sm:$0xf]  ;;  %v6966_v10 = vrot.slane %v1322_v6, 9  ;;  %v1381_v11 = vsel %vm8758_vm13, %v6965_v63, %v1380_v1 }
  0xa3   : > { %1437 = vst [vmem:[#allocation3 + $0x2c] sm:$0xf] %v1370_v62  ;;  %v1387_v12 = vrot.slane %v1323_v9, 5  ;;  %v1324_v13 = vld [vmem:[#allocation2 + $0x2c] sm:$0x1] }
  0xa4   : > { %1438 = vst [vmem:[#allocation3 + $0x50] sm:$0xf] %v1374_v4  ;;  %v1384_v14 = vsel %vm8758_vm13, %v1382_v8, %v1383_v5  ;;  %v1390_v15 = vrot.slane %v1324_v13, 5  ;;  %v1325_v16 = vld [vmem:[#allocation2 + $0x30] sm:$0xe] }
  0xa5   : > { %1439 = vst [vmem:[#allocation3 + $0x74] sm:$0xf] %v1377_v7  ;;  %v1388_v17 = vsel %vm8758_vm13, %v6966_v10, %v1387_v12  ;;  %v1389_v18 = vrot.slane %v1387_v12, 4  ;;  %v1326_v19 = vld [vmem:[#allocation2 + $0x34] sm:$0xf]  ;;  %v6967_v20 = vrot.slane %v1325_v16, 9 }
  0xa6   : > { %1440 = vst [vmem:[#allocation3 + $0x98] sm:$0xf] %v1381_v11  ;;  %v1394_v22 = vrot.slane %v1326_v19, 5  ;;  %v1327_v23 = vld [vmem:[#allocation2 + $0x38] sm:$0x1] }
  0xa7   : > { %1441 = vst [vmem:[#allocation3 + $0xbc] sm:$0xf] %v1384_v14  ;;  %v1391_v24 = vsel %vm8758_vm13, %v1389_v18, %v1390_v15  ;;  %v1397_v27 = vrot.slane %v1327_v23, 5  ;;  %v1328_v28 = vld [vmem:[#allocation2 + $0x3c] sm:$0xe] }
  0xa8   : > { %1442 = vst [vmem:[#allocation3 + $0xe0] sm:$0xf] %v1388_v17  ;;  %v1395_v29 = vsel %vm8758_vm13, %v6967_v20, %v1394_v22  ;;  %v1396_v30 = vrot.slane %v1394_v22, 4  ;;  %v1329_v31 = vld [vmem:[#allocation2 + $0x40] sm:$0xf]  ;;  %v6968_v32 = vrot.slane %v1328_v28, 9 }
  0xa9   : > { %1443 = vst [vmem:[#allocation3 + $0x104] sm:$0xf] %v1391_v24  ;;  %v1401_v33 = vrot.slane %v1329_v31, 5  ;;  %v1330_v34 = vld [vmem:[#allocation2 + $0x44] sm:$0x1] }
  0xaa   : > { %1444 = vst [vmem:[#allocation3 + $0x128] sm:$0xf] %v1395_v29  ;;  %v1398_v36 = vsel %vm8758_vm13, %v1396_v30, %v1397_v27  ;;  %v1404_v37 = vrot.slane %v1330_v34, 5  ;;  %v1331_v38 = vld [vmem:[#allocation2 + $0x48] sm:$0xe] }
  0xab   : > { %1445 = vst [vmem:[#allocation3 + $0x14c] sm:$0xf] %v1398_v36  ;;  %v1402_v39 = vsel %vm8758_vm13, %v6968_v32, %v1401_v33  ;;  %v1403_v40 = vrot.slane %v1401_v33, 4  ;;  %v1332_v42 = vld [vmem:[#allocation2 + $0x4c] sm:$0xf]  ;;  %v6969_v43 = vrot.slane %v1331_v38, 9 }
  0xac   : > { %1446 = vst [vmem:[#allocation3 + $0x170] sm:$0xf] %v1402_v39  ;;  %v1408_v44 = vrot.slane %v1332_v42, 5  ;;  %v1333_v45 = vld [vmem:[#allocation2 + $0x50] sm:$0x1] }
  0xad   : > { %v1405_v46 = vsel %vm8758_vm13, %v1403_v40, %v1404_v37  ;;  %v1411_v47 = vrot.slane %v1333_v45, 5  ;;  %v1334_v48 = vld [vmem:[#allocation2 + $0x54] sm:$0xe]  ;;  %v1335_v49 = vld [vmem:[#allocation2 + $0x58] sm:$0xf] }
  0xae   : > { %1447 = vst [vmem:[#allocation3 + $0x194] sm:$0xf] %v1405_v46  ;;  %v1409_v50 = vsel %vm8758_vm13, %v6969_v43, %v1408_v44  ;;  %v1410_v51 = vrot.slane %v1408_v44, 4  ;;  %v6970_v52 = vrot.slane %v1334_v48, 9  ;;  %v1415_v53 = vrot.slane %v1335_v49, 5 }
  0xaf   : > { %1448 = vst [vmem:[#allocation3 + $0x1b8] sm:$0xf] %v1409_v50  ;;  %v1336_v54 = vld [vmem:[#allocation2 + $0x5c] sm:$0x1]  ;;  %v1452_v55 = vld [vmem:[#allocation2 + $0xc] sm:$0xf] }
  0xb0   : > { %v1412_v56 = vsel %vm8758_vm13, %v1410_v51, %v1411_v47  ;;  %v1416_v57 = vsel %vm8758_vm13, %v6970_v52, %v1415_v53  ;;  %v1417_v58 = vrot.slane %v1415_v53, 4  ;;  %v1418_v59 = vrot.slane %v1336_v54, 5  ;;  %1468 = vst [vmem:[#allocation3 + $0xc] sm:$0xf] %v1452_v55  ;;  %v1453_v60 = vld [vmem:[#allocation2 + $0x10] sm:$0xf] }
  0xb1   : > { %1449 = vst [vmem:[#allocation3 + $0x1dc] sm:$0xf] %v1412_v56  ;;  %v1454_v62 = vld [vmem:[#allocation2 + $0x18] sm:$0xf]  ;;  %v1455_v63 = vld [vmem:[#allocation2 + $0x1c] sm:$0xf] }
  0xb2   : > { %1450 = vst [vmem:[#allocation3 + $0x200] sm:$0xf] %v1416_v57  ;;  %v1419_v61 = vsel %vm8758_vm13, %v1417_v58, %v1418_v59  ;;  %v1456_v1 = vld [vmem:[#allocation2 + $0x24] sm:$0xf]  ;;  %v1457_v2 = vld [vmem:[#allocation2 + $0x28] sm:$0xf] }
  0xb3   : > { %1451 = vst [vmem:[#allocation3 + $0x224] sm:$0xf] %v1419_v61  ;;  %v1458_v3 = vld [vmem:[#allocation2 + $0x30] sm:$0xf]  ;;  %v1459_v4 = vld [vmem:[#allocation2 + $0x34] sm:$0xf] }
  0xb4   : > { %1469 = vst [vmem:[#allocation3 + $0x30] sm:$0xf] %v1453_v60  ;;  %v1460_v5 = vld [vmem:[#allocation2 + $0x3c] sm:$0xf]  ;;  %v1461_v6 = vld [vmem:[#allocation2 + $0x40] sm:$0xf] }
  0xb5   : > { %1470 = vst [vmem:[#allocation3 + $0x54] sm:$0xf] %v1454_v62  ;;  %v1462_v7 = vld [vmem:[#allocation2 + $0x48] sm:$0xf]  ;;  %v1484_v8 = vld [vmem:[#allocation2 + $0xc] sm:$0xf] }
  0xb6   : > { %1471 = vst [vmem:[#allocation3 + $0x78] sm:$0xf] %v1455_v63  ;;  %v1485_v9 = vld [vmem:[#allocation2 + $0x10] sm:$0xf]  ;;  %v1463_v10 = vld [vmem:[#allocation2 + $0x4c] sm:$0xf] }
  0xb7   : > { %1472 = vst [vmem:[#allocation3 + $0x9c] sm:$0xf] %v1456_v1  ;;  %v1509_v11 = vshrl.u32 %v1484_v8, 16  ;;  %v1512_v12 = vshll.u32 %v1484_v8, 16  ;;  %v1518_v13 = vshll.u32 %v1485_v9, 16  ;;  %v1522_v14 = vshrl.u32 %v1485_v9, 16 }
  0xb8   : > { %1473 = vst [vmem:[#allocation3 + $0xc0] sm:$0xf] %v1457_v2  ;;  %v1464_v15 = vld [vmem:[#allocation2 + $0x54] sm:$0xf]  ;;  %v1487_v17 = vld [vmem:[#allocation2 + $0x18] sm:$0xf] }
  0xb9   : > { %1474 = vst [vmem:[#allocation3 + $0xe4] sm:$0xf] %v1458_v3  ;;  %v1486_v16 = vld [vmem:[#allocation2 + $0x14] sm:$0x1]  ;;  %v1465_v18 = vld [vmem:[#allocation2 + $0x58] sm:$0xf] }
  0xba   : > { %1475 = vst [vmem:[#allocation3 + $0x108] sm:$0xf] %v1459_v4  ;;  %v1511_v19 = vrot.slane %v1509_v11, 4  ;;  %v1514_v20 = vrot.slane %v1512_v12, 5  ;;  %v1520_v22 = vrot.slane %v1518_v13, 5  ;;  %v1524_v23 = vrot.slane %v1522_v14, 4 }
  0xbb   : > { %1476 = vst [vmem:[#allocation3 + $0x12c] sm:$0xf] %v1460_v5  ;;  %v1466_v24 = vld [vmem:[#allocation2 + $0x60] sm:$0xf]  ;;  %v1528_v27 = vshll.u32 %v1486_v16, 16  ;;  %v1533_v29 = vshrl.u32 %v1487_v17, 16 }
  0xbc   : > { %1477 = vst [vmem:[#allocation3 + $0x150] sm:$0xf] %v1461_v6  ;;  %v1488_v28 = vld [vmem:[#allocation2 + $0x1c] sm:$0xf]  ;;  %v1467_v30 = vld [vmem:[#allocation2 + $0x64] sm:$0xf]  ;;  %v1515_v31 = vor.u32 %v1514_v20, %v1511_v19  ;;  %v1525_v32 = vor.u32 %v1524_v23, %v1520_v22 }
  0xbd   : > { %1478 = vst [vmem:[#allocation3 + $0x174] sm:$0xf] %v1462_v7  ;;  %v1536_v33 = vshll.u32 %v1487_v17, 16  ;;  %v1542_v34 = vshll.u32 %v1488_v28, 16  ;;  %v1489_v36 = vld [vmem:[#allocation2 + $0x20] sm:$0x1] }
  0xbe   : > { %1479 = vst [vmem:[#allocation3 + $0x198] sm:$0xf] %v1463_v10  ;;  %v1530_v37 = vrot.slane %v1528_v27, 5  ;;  %v1535_v38 = vrot.slane %v1533_v29, 4  ;;  %v1546_v39 = vshrl.u32 %v1488_v28, 16  ;;  %v1552_v40 = vshll.u32 %v1489_v36, 16 }
  0xbf   : > { %1480 = vst [vmem:[#allocation3 + $0x1bc] sm:$0xf] %v1464_v15  ;;  %v1516_v42 = vrot.slane %v1515_v31, 4  ;;  %v1526_v43 = vrot.slane %v1525_v32, 4  ;;  %v1538_v44 = vrot.slane %v1536_v33, 5  ;;  %v1544_v45 = vrot.slane %v1542_v34, 5 }
  0xc0   : > { %1481 = vst [vmem:[#allocation3 + $0x1e0] sm:$0xf] %v1465_v18  ;;  %v1548_v46 = vrot.slane %v1546_v39, 4  ;;  %v1554_v47 = vrot.slane %v1552_v40, 5  ;;  %v1490_v48 = vld [vmem:[#allocation2 + $0x24] sm:$0xf] }
  0xc1   : > { %1482 = vst [vmem:[#allocation3 + $0x204] sm:$0xf] %v1466_v24  ;;  %v1521_v49 = vsel %vm8726_vm10, %v1516_v42, %v1520_v22  ;;  %v1531_v50 = vsel %vm8726_vm10, %v1526_v43, %v1530_v37  ;;  %v1539_v51 = vor.u32 %v1538_v44, %v1535_v38  ;;  %v1491_v52 = vld [vmem:[#allocation2 + $0x28] sm:$0xf]  ;;  %v1557_v53 = vshrl.u32 %v1490_v48, 16 }
  0xc2   : > { %1483 = vst [vmem:[#allocation3 + $0x228] sm:$0xf] %v1467_v30  ;;  %v1549_v54 = vor.u32 %v1548_v46, %v1544_v45  ;;  %v1560_v55 = vshll.u32 %v1490_v48, 16  ;;  %v1566_v56 = vshll.u32 %v1491_v52, 16  ;;  %v1492_v57 = vld [vmem:[#allocation2 + $0x2c] sm:$0x1] }
  0xc3   : > { %1716 = vst [vmem:[#allocation3 + $0x10] sm:$0xf] %v1521_v49  ;;  %v1540_v58 = vrot.slane %v1539_v51, 4  ;;  %v1559_v59 = vrot.slane %v1557_v53, 4  ;;  %v1570_v60 = vshrl.u32 %v1491_v52, 16  ;;  %v1576_v61 = vshll.u32 %v1492_v57, 16 }
  0xc4   : > { %1717 = vst [vmem:[#allocation3 + $0x34] sm:$0xf] %v1531_v50  ;;  %v1550_v62 = vrot.slane %v1549_v54, 4  ;;  %v1562_v63 = vrot.slane %v1560_v55, 5  ;;  %v1568_v1 = vrot.slane %v1566_v56, 5 }
  0xc5   : > { %v1545_v2 = vsel %vm8726_vm10, %v1540_v58, %v1544_v45  ;;  %v1572_v3 = vrot.slane %v1570_v60, 4  ;;  %v1578_v4 = vrot.slane %v1576_v61, 5  ;;  %v1493_v5 = vld [vmem:[#allocation2 + $0x30] sm:$0xf]  ;;  %v1494_v6 = vld [vmem:[#allocation2 + $0x34] sm:$0xf] }
  0xc6   : > { %1718 = vst [vmem:[#allocation3 + $0x58] sm:$0xf] %v1545_v2  ;;  %v1555_v7 = vsel %vm8726_vm10, %v1550_v62, %v1554_v47  ;;  %v1563_v8 = vor.u32 %v1562_v63, %v1559_v59  ;;  %v1581_v9 = vshrl.u32 %v1493_v5, 16  ;;  %v1584_v10 = vshll.u32 %v1493_v5, 16  ;;  %v1495_v11 = vld [vmem:[#allocation2 + $0x38] sm:$0x1] }
  0xc7   : > { %1719 = vst [vmem:[#allocation3 + $0x7c] sm:$0xf] %v1555_v7  ;;  %v1573_v12 = vor.u32 %v1572_v3, %v1568_v1  ;;  %v1590_v13 = vshll.u32 %v1494_v6, 16  ;;  %v1594_v14 = vshrl.u32 %v1494_v6, 16  ;;  %v1600_v15 = vshll.u32 %v1495_v11, 16 }
  0xc8   : > { %v1564_v16 = vrot.slane %v1563_v8, 4  ;;  %v1583_v17 = vrot.slane %v1581_v9, 4  ;;  %v1586_v18 = vrot.slane %v1584_v10, 5  ;;  %v1496_v19 = vld [vmem:[#allocation2 + $0x3c] sm:$0xf] }
  0xc9   : > { %v1574_v20 = vrot.slane %v1573_v12, 4  ;;  %v1592_v22 = vrot.slane %v1590_v13, 5  ;;  %v1596_v23 = vrot.slane %v1594_v14, 4  ;;  %v1602_v24 = vrot.slane %v1600_v15, 5  ;;  %v1497_v27 = vld [vmem:[#allocation2 + $0x40] sm:$0xf] }
  0xca   : > { %v1569_v28 = vsel %vm8726_vm10, %v1564_v16, %v1568_v1  ;;  %v1587_v29 = vor.u32 %v1586_v18, %v1583_v17  ;;  %v1605_v30 = vshrl.u32 %v1496_v19, 16  ;;  %v1608_v31 = vshll.u32 %v1496_v19, 16  ;;  %v1498_v32 = vld [vmem:[#allocation2 + $0x44] sm:$0x1]  ;;  %v1499_v33 = vld [vmem:[#allocation2 + $0x48] sm:$0xf] }
  0xcb   : > { %1720 = vst [vmem:[#allocation3 + $0xa0] sm:$0xf] %v1569_v28  ;;  %v1579_v34 = vsel %vm8726_vm10, %v1574_v20, %v1578_v4  ;;  %v1597_v36 = vor.u32 %v1596_v23, %v1592_v22  ;;  %v1614_v37 = vshll.u32 %v1497_v27, 16  ;;  %v1618_v38 = vshrl.u32 %v1497_v27, 16  ;;  %v1500_v39 = vld [vmem:[#allocation2 + $0x4c] sm:$0xf] }
  0xcc   : > { %1721 = vst [vmem:[#allocation3 + $0xc4] sm:$0xf] %v1579_v34  ;;  %v1588_v40 = vrot.slane %v1587_v29, 4  ;;  %v1607_v42 = vrot.slane %v1605_v30, 4  ;;  %v1610_v43 = vrot.slane %v1608_v31, 5  ;;  %v1624_v44 = vshll.u32 %v1498_v32, 16 }
  0xcd   : > { %v1598_v45 = vrot.slane %v1597_v36, 4  ;;  %v1616_v46 = vrot.slane %v1614_v37, 5  ;;  %v1620_v47 = vrot.slane %v1618_v38, 4  ;;  %v1629_v48 = vshrl.u32 %v1499_v33, 16  ;;  %v1501_v49 = vld [vmem:[#allocation2 + $0x50] sm:$0x1] }
  0xce   : > { %v1593_v50 = vsel %vm8726_vm10, %v1588_v40, %v1592_v22  ;;  %v1611_v51 = vor.u32 %v1610_v43, %v1607_v42  ;;  %v1626_v52 = vrot.slane %v1624_v44, 5  ;;  %v1632_v53 = vshll.u32 %v1499_v33, 16  ;;  %v1502_v54 = vld [vmem:[#allocation2 + $0x54] sm:$0xf]  ;;  %v1503_v59 = vld [vmem:[#allocation2 + $0x58] sm:$0xf] }
  0xcf   : > { %1722 = vst [vmem:[#allocation3 + $0xe8] sm:$0xf] %v1593_v50  ;;  %v1603_v55 = vsel %vm8726_vm10, %v1598_v45, %v1602_v24  ;;  %v1621_v56 = vor.u32 %v1620_v47, %v1616_v46  ;;  %v1631_v57 = vrot.slane %v1629_v48, 4  ;;  %v1638_v58 = vshll.u32 %v1500_v39, 16  ;;  %v1504_v5 = vld [vmem:[#allocation2 + $0x5c] sm:$0x1] }
  0xd0   : > { %1723 = vst [vmem:[#allocation3 + $0x10c] sm:$0xf] %v1603_v55  ;;  %v1612_v60 = vrot.slane %v1611_v51, 4  ;;  %v1634_v61 = vrot.slane %v1632_v53, 5  ;;  %v1642_v62 = vshrl.u32 %v1500_v39, 16  ;;  %v1648_v63 = vshll.u32 %v1501_v49, 16 }
  0xd1   : > { %v1622_v1 = vrot.slane %v1621_v56, 4  ;;  %v1640_v2 = vrot.slane %v1638_v58, 5  ;;  %v1653_v3 = vshrl.u32 %v1502_v54, 16  ;;  %v1656_v4 = vshll.u32 %v1502_v54, 16  ;;  %v1505_v10 = vld [vmem:[#allocation2 + $0x60] sm:$0xf] }
  0xd2   : > { %v1617_v6 = vsel %vm8726_vm10, %v1612_v60, %v1616_v46  ;;  %v1635_v7 = vor.u32 %v1634_v61, %v1631_v57  ;;  %v1644_v8 = vrot.slane %v1642_v62, 4  ;;  %v1650_v9 = vrot.slane %v1648_v63, 5  ;;  %v1506_v11 = vld [vmem:[#allocation2 + $0x64] sm:$0xf]  ;;  %v1507_v16 = vld [vmem:[#allocation2 + $0x68] sm:$0x1] }
  0xd3   : > { %1724 = vst [vmem:[#allocation3 + $0x130] sm:$0xf] %v1617_v6  ;;  %v1627_v12 = vsel %vm8726_vm10, %v1622_v1, %v1626_v52  ;;  %v1655_v13 = vrot.slane %v1653_v3, 4  ;;  %v1658_v14 = vrot.slane %v1656_v4, 5  ;;  %v1662_v15 = vshll.u32 %v1503_v59, 16 }
  0xd4   : > { %1725 = vst [vmem:[#allocation3 + $0x154] sm:$0xf] %v1627_v12  ;;  %v1636_v17 = vrot.slane %v1635_v7, 4  ;;  %v1645_v18 = vor.u32 %v1644_v8, %v1640_v2  ;;  %v1666_v19 = vshrl.u32 %v1503_v59, 16  ;;  %v1672_v20 = vshll.u32 %v1504_v5, 16 }
  0xd5   : > { %v1659_v22 = vor.u32 %v1658_v14, %v1655_v13  ;;  %v1664_v23 = vrot.slane %v1662_v15, 5  ;;  %v1677_v24 = vshrl.u32 %v1505_v10, 16  ;;  %v1680_v27 = vshll.u32 %v1505_v10, 16  ;;  %v1732_v28 = vld [vmem:[#allocation2 + $0xc] sm:$0xe] }
  0xd6   : > { %v1641_v29 = vsel %vm8726_vm10, %v1636_v17, %v1640_v2  ;;  %v1646_v30 = vrot.slane %v1645_v18, 4  ;;  %v1668_v31 = vrot.slane %v1666_v19, 4  ;;  %v1674_v32 = vrot.slane %v1672_v20, 5  ;;  %v1733_v33 = vld [vmem:[#allocation2 + $0x10] sm:$0xf] }
  0xd7   : > { %1726 = vst [vmem:[#allocation3 + $0x178] sm:$0xf] %v1641_v29  ;;  %v1660_v34 = vrot.slane %v1659_v22, 4  ;;  %v1679_v36 = vrot.slane %v1677_v24, 4  ;;  %v1682_v37 = vrot.slane %v1680_v27, 5  ;;  %v1686_v38 = vshll.u32 %v1506_v11, 16 }
  0xd8   : > { %v1651_v39 = vsel %vm8726_vm10, %v1646_v30, %v1650_v9  ;;  %v1669_v40 = vor.u32 %v1668_v31, %v1664_v23  ;;  %v1690_v42 = vshrl.u32 %v1506_v11, 16  ;;  %v1696_v43 = vshll.u32 %v1507_v16, 16  ;;  %v1734_v44 = vld [vmem:[#allocation2 + $0x14] sm:$0x1]  ;;  %v1735_v45 = vld [vmem:[#allocation2 + $0x18] sm:$0xe] }
  0xd9   : > { %1727 = vst [vmem:[#allocation3 + $0x19c] sm:$0xf] %v1651_v39  ;;  %v1665_v46 = vsel %vm8726_vm10, %v1660_v34, %v1664_v23  ;;  %v1683_v47 = vor.u32 %v1682_v37, %v1679_v36  ;;  %v1688_v48 = vrot.slane %v1686_v38, 5  ;;  %v6971_v49 = vrot.slane %v1732_v28, 9  ;;  %v1736_v50 = vld [vmem:[#allocation2 + $0x1c] sm:$0xf] }
  0xda   : > { %1728 = vst [vmem:[#allocation3 + $0x1c0] sm:$0xf] %v1665_v46  ;;  %v1670_v51 = vrot.slane %v1669_v40, 4  ;;  %v1692_v52 = vrot.slane %v1690_v42, 4  ;;  %v1698_v53 = vrot.slane %v1696_v43, 5  ;;  %v1782_v54 = vrot.slane %v1733_v33, 5 }
  0xdb   : > { %v1684_v55 = vrot.slane %v1683_v47, 4  ;;  %v1785_v56 = vrot.slane %v1734_v44, 5  ;;  %v6972_v57 = vrot.slane %v1735_v45, 9  ;;  %v1789_v58 = vrot.slane %v1736_v50, 5  ;;  %v1737_v59 = vld [vmem:[#allocation2 + $0x20] sm:$0x1] }
  0xdc   : > { %v1675_v60 = vsel %vm8726_vm10, %v1670_v51, %v1674_v32  ;;  %v1693_v61 = vor.u32 %v1692_v52, %v1688_v48  ;;  %v1783_v62 = vsel %vm8758_vm13, %v6971_v49, %v1782_v54  ;;  %v1784_v63 = vrot.slane %v1782_v54, 4  ;;  %v1738_v1 = vld [vmem:[#allocation2 + $0x24] sm:$0xe]  ;;  %v1739_v2 = vld [vmem:[#allocation2 + $0x28] sm:$0xf] }
  0xdd   : > { %1729 = vst [vmem:[#allocation3 + $0x1e4] sm:$0xf] %v1675_v60  ;;  %v1689_v3 = vsel %vm8726_vm10, %v1684_v55, %v1688_v48  ;;  %v1791_v4 = vrot.slane %v1789_v58, 4  ;;  %v1792_v5 = vrot.slane %v1737_v59, 5  ;;  %v1740_v6 = vld [vmem:[#allocation2 + $0x2c] sm:$0x1]  ;;  %v1790_v11 = vsel %vm8758_vm13, %v6972_v57, %v1789_v58 }
  0xde   : > { %1730 = vst [vmem:[#allocation3 + $0x208] sm:$0xf] %v1689_v3  ;;  %v1694_v7 = vrot.slane %v1693_v61, 4  ;;  %v1786_v8 = vsel %vm8758_vm13, %v1784_v63, %v1785_v56  ;;  %v6973_v9 = vrot.slane %v1738_v1, 9  ;;  %v1796_v10 = vrot.slane %v1739_v2, 5 }
  0xdf   : > { %1852 = vst [vmem:[#allocation3 + $0x14] sm:$0xf] %v1783_v62  ;;  %v1799_v12 = vrot.slane %v1740_v6, 5  ;;  %v1741_v13 = vld [vmem:[#allocation2 + $0x30] sm:$0xe]  ;;  %v1793_v15 = vsel %vm8758_vm13, %v1791_v4, %v1792_v5 }
  0xe0   : > { %v1699_v14 = vsel %vm8726_vm10, %v1694_v7, %v1698_v53  ;;  %1853 = vst [vmem:[#allocation3 + $0x38] sm:$0xf] %v1786_v8  ;;  %v1798_v16 = vrot.slane %v1796_v10, 4  ;;  %v1742_v17 = vld [vmem:[#allocation2 + $0x34] sm:$0xf]  ;;  %v6974_v18 = vrot.slane %v1741_v13, 9  ;;  %v1797_v19 = vsel %vm8758_vm13, %v6973_v9, %v1796_v10 }
  0xe1   : > { %1731 = vst [vmem:[#allocation3 + $0x22c] sm:$0xf] %v1699_v14  ;;  %v1803_v20 = vrot.slane %v1742_v17, 5  ;;  %v1743_v22 = vld [vmem:[#allocation2 + $0x38] sm:$0x1] }
  0xe2   : > { %1854 = vst [vmem:[#allocation3 + $0x5c] sm:$0xf] %v1790_v11  ;;  %v1800_v23 = vsel %vm8758_vm13, %v1798_v16, %v1799_v12  ;;  %v1806_v24 = vrot.slane %v1743_v22, 5  ;;  %v1744_v27 = vld [vmem:[#allocation2 + $0x3c] sm:$0xe] }
  0xe3   : > { %1855 = vst [vmem:[#allocation3 + $0x80] sm:$0xf] %v1793_v15  ;;  %v1804_v28 = vsel %vm8758_vm13, %v6974_v18, %v1803_v20  ;;  %v1805_v29 = vrot.slane %v1803_v20, 4  ;;  %v1745_v30 = vld [vmem:[#allocation2 + $0x40] sm:$0xf]  ;;  %v6975_v31 = vrot.slane %v1744_v27, 9 }
  0xe4   : > { %1856 = vst [vmem:[#allocation3 + $0xa4] sm:$0xf] %v1797_v19  ;;  %v1810_v32 = vrot.slane %v1745_v30, 5  ;;  %v1746_v33 = vld [vmem:[#allocation2 + $0x44] sm:$0x1] }
  0xe5   : > { %1857 = vst [vmem:[#allocation3 + $0xc8] sm:$0xf] %v1800_v23  ;;  %v1807_v34 = vsel %vm8758_vm13, %v1805_v29, %v1806_v24  ;;  %v1813_v36 = vrot.slane %v1746_v33, 5  ;;  %v1747_v37 = vld [vmem:[#allocation2 + $0x48] sm:$0xe] }
  0xe6   : > { %1858 = vst [vmem:[#allocation3 + $0xec] sm:$0xf] %v1804_v28  ;;  %v1811_v38 = vsel %vm8758_vm13, %v6975_v31, %v1810_v32  ;;  %v1812_v39 = vrot.slane %v1810_v32, 4  ;;  %v1748_v40 = vld [vmem:[#allocation2 + $0x4c] sm:$0xf]  ;;  %v6976_v42 = vrot.slane %v1747_v37, 9 }
  0xe7   : > { %1859 = vst [vmem:[#allocation3 + $0x110] sm:$0xf] %v1807_v34  ;;  %v1817_v43 = vrot.slane %v1748_v40, 5  ;;  %v1749_v44 = vld [vmem:[#allocation2 + $0x50] sm:$0x1] }
  0xe8   : > { %1860 = vst [vmem:[#allocation3 + $0x134] sm:$0xf] %v1811_v38  ;;  %v1814_v45 = vsel %vm8758_vm13, %v1812_v39, %v1813_v36  ;;  %v1820_v46 = vrot.slane %v1749_v44, 5  ;;  %v1750_v47 = vld [vmem:[#allocation2 + $0x54] sm:$0xe] }
  0xe9   : > { %1861 = vst [vmem:[#allocation3 + $0x158] sm:$0xf] %v1814_v45  ;;  %v1818_v48 = vsel %vm8758_vm13, %v6976_v42, %v1817_v43  ;;  %v1819_v49 = vrot.slane %v1817_v43, 4  ;;  %v1751_v50 = vld [vmem:[#allocation2 + $0x58] sm:$0xf]  ;;  %v6977_v51 = vrot.slane %v1750_v47, 9 }
  0xea   : > { %1862 = vst [vmem:[#allocation3 + $0x17c] sm:$0xf] %v1818_v48  ;;  %v1824_v52 = vrot.slane %v1751_v50, 5  ;;  %v1752_v53 = vld [vmem:[#allocation2 + $0x5c] sm:$0x1] }
  0xeb   : > { %v1821_v54 = vsel %vm8758_vm13, %v1819_v49, %v1820_v46  ;;  %v1827_v55 = vrot.slane %v1752_v53, 5  ;;  %v1753_v56 = vld [vmem:[#allocation2 + $0x60] sm:$0xe]  ;;  %v1754_v57 = vld [vmem:[#allocation2 + $0x64] sm:$0xf] }
  0xec   : > { %1863 = vst [vmem:[#allocation3 + $0x1a0] sm:$0xf] %v1821_v54  ;;  %v1825_v58 = vsel %vm8758_vm13, %v6977_v51, %v1824_v52  ;;  %v1826_v59 = vrot.slane %v1824_v52, 4  ;;  %v6978_v60 = vrot.slane %v1753_v56, 9  ;;  %v1831_v61 = vrot.slane %v1754_v57, 5 }
  0xed   : > { %1864 = vst [vmem:[#allocation3 + $0x1c4] sm:$0xf] %v1825_v58  ;;  %v1755_v62 = vld [vmem:[#allocation2 + $0x68] sm:$0x1]  ;;  %v1869_v63 = vld [vmem:[#allocation2 + $0x18] sm:$0xf] }
  0xee   : > { %v1828_v1 = vsel %vm8758_vm13, %v1826_v59, %v1827_v55  ;;  %v1832_v2 = vsel %vm8758_vm13, %v6978_v60, %v1831_v61  ;;  %v1833_v3 = vrot.slane %v1831_v61, 4  ;;  %v1834_v4 = vrot.slane %v1755_v62, 5  ;;  %1885 = vst [vmem:[#allocation3 + $0x18] sm:$0xf] %v1869_v63  ;;  %v1870_v5 = vld [vmem:[#allocation2 + $0x1c] sm:$0xf] }
  0xef   : > { %1865 = vst [vmem:[#allocation3 + $0x1e8] sm:$0xf] %v1828_v1  ;;  %v1871_v7 = vld [vmem:[#allocation2 + $0x24] sm:$0xf]  ;;  %v1872_v8 = vld [vmem:[#allocation2 + $0x28] sm:$0xf] }
  0xf0   : > { %1866 = vst [vmem:[#allocation3 + $0x20c] sm:$0xf] %v1832_v2  ;;  %v1835_v6 = vsel %vm8758_vm13, %v1833_v3, %v1834_v4  ;;  %v1873_v9 = vld [vmem:[#allocation2 + $0x30] sm:$0xf]  ;;  %v1874_v10 = vld [vmem:[#allocation2 + $0x34] sm:$0xf] }
  0xf1   : > { %1867 = vst [vmem:[#allocation3 + $0x230] sm:$0xf] %v1835_v6  ;;  %v1875_v11 = vld [vmem:[#allocation2 + $0x3c] sm:$0xf]  ;;  %v1876_v12 = vld [vmem:[#allocation2 + $0x40] sm:$0xf] }
  0xf2   : > { %1886 = vst [vmem:[#allocation3 + $0x3c] sm:$0xf] %v1870_v5  ;;  %v1877_v13 = vld [vmem:[#allocation2 + $0x48] sm:$0xf]  ;;  %v1878_v14 = vld [vmem:[#allocation2 + $0x4c] sm:$0xf] }
  0xf3   : > { %1887 = vst [vmem:[#allocation3 + $0x60] sm:$0xf] %v1871_v7  ;;  %v1879_v15 = vld [vmem:[#allocation2 + $0x54] sm:$0xf]  ;;  %v1901_v16 = vld [vmem:[#allocation2 + $0x18] sm:$0xf] }
  0xf4   : > { %1888 = vst [vmem:[#allocation3 + $0x84] sm:$0xf] %v1872_v8  ;;  %v1902_v17 = vld [vmem:[#allocation2 + $0x1c] sm:$0xf]  ;;  %v1880_v18 = vld [vmem:[#allocation2 + $0x58] sm:$0xf] }
  0xf5   : > { %1889 = vst [vmem:[#allocation3 + $0xa8] sm:$0xf] %v1873_v9  ;;  %v1926_v19 = vshrl.u32 %v1901_v16, 16  ;;  %v1929_v20 = vshll.u32 %v1901_v16, 16  ;;  %v1935_v22 = vshll.u32 %v1902_v17, 16  ;;  %v1939_v23 = vshrl.u32 %v1902_v17, 16 }
  0xf6   : > { %1890 = vst [vmem:[#allocation3 + $0xcc] sm:$0xf] %v1874_v10  ;;  %v1881_v24 = vld [vmem:[#allocation2 + $0x60] sm:$0xf]  ;;  %v1904_v28 = vld [vmem:[#allocation2 + $0x24] sm:$0xf] }
  0xf7   : > { %1891 = vst [vmem:[#allocation3 + $0xf0] sm:$0xf] %v1875_v11  ;;  %v1903_v27 = vld [vmem:[#allocation2 + $0x20] sm:$0x1]  ;;  %v1882_v29 = vld [vmem:[#allocation2 + $0x64] sm:$0xf] }
  0xf8   : > { %1892 = vst [vmem:[#allocation3 + $0x114] sm:$0xf] %v1876_v12  ;;  %v1928_v30 = vrot.slane %v1926_v19, 4  ;;  %v1931_v31 = vrot.slane %v1929_v20, 5  ;;  %v1937_v32 = vrot.slane %v1935_v22, 5  ;;  %v1941_v33 = vrot.slane %v1939_v23, 4 }
  0xf9   : > { %1893 = vst [vmem:[#allocation3 + $0x138] sm:$0xf] %v1877_v13  ;;  %v1883_v34 = vld [vmem:[#allocation2 + $0x6c] sm:$0xf]  ;;  %v1945_v36 = vshll.u32 %v1903_v27, 16  ;;  %v1950_v38 = vshrl.u32 %v1904_v28, 16 }
  0xfa   : > { %1894 = vst [vmem:[#allocation3 + $0x15c] sm:$0xf] %v1878_v14  ;;  %v1905_v37 = vld [vmem:[#allocation2 + $0x28] sm:$0xf]  ;;  %v1884_v39 = vld [vmem:[#allocation2 + $0x70] sm:$0xf]  ;;  %v1932_v40 = vor.u32 %v1931_v31, %v1928_v30  ;;  %v1942_v42 = vor.u32 %v1941_v33, %v1937_v32 }
  0xfb   : > { %1895 = vst [vmem:[#allocation3 + $0x180] sm:$0xf] %v1879_v15  ;;  %v1953_v43 = vshll.u32 %v1904_v28, 16  ;;  %v1959_v44 = vshll.u32 %v1905_v37, 16  ;;  %v1906_v45 = vld [vmem:[#allocation2 + $0x2c] sm:$0x1] }
  0xfc   : > { %1896 = vst [vmem:[#allocation3 + $0x1a4] sm:$0xf] %v1880_v18  ;;  %v1947_v46 = vrot.slane %v1945_v36, 5  ;;  %v1952_v47 = vrot.slane %v1950_v38, 4  ;;  %v1963_v48 = vshrl.u32 %v1905_v37, 16  ;;  %v1969_v49 = vshll.u32 %v1906_v45, 16 }
  0xfd   : > { %1897 = vst [vmem:[#allocation3 + $0x1c8] sm:$0xf] %v1881_v24  ;;  %v1933_v50 = vrot.slane %v1932_v40, 4  ;;  %v1943_v51 = vrot.slane %v1942_v42, 4  ;;  %v1955_v52 = vrot.slane %v1953_v43, 5  ;;  %v1961_v53 = vrot.slane %v1959_v44, 5 }
  0xfe   : > { %1898 = vst [vmem:[#allocation3 + $0x1ec] sm:$0xf] %v1882_v29  ;;  %v1965_v54 = vrot.slane %v1963_v48, 4  ;;  %v1971_v55 = vrot.slane %v1969_v49, 5  ;;  %v1907_v56 = vld [vmem:[#allocation2 + $0x30] sm:$0xf] }
  0xff   : > { %1899 = vst [vmem:[#allocation3 + $0x210] sm:$0xf] %v1883_v34  ;;  %v1938_v57 = vsel %vm8726_vm10, %v1933_v50, %v1937_v32  ;;  %v1948_v58 = vsel %vm8726_vm10, %v1943_v51, %v1947_v46  ;;  %v1956_v59 = vor.u32 %v1955_v52, %v1952_v47  ;;  %v1908_v60 = vld [vmem:[#allocation2 + $0x34] sm:$0xf]  ;;  %v1974_v61 = vshrl.u32 %v1907_v56, 16 }
 0x100   : > { %1900 = vst [vmem:[#allocation3 + $0x234] sm:$0xf] %v1884_v39  ;;  %v1966_v62 = vor.u32 %v1965_v54, %v1961_v53  ;;  %v1977_v63 = vshll.u32 %v1907_v56, 16  ;;  %v1983_v1 = vshll.u32 %v1908_v60, 16  ;;  %v1909_v2 = vld [vmem:[#allocation2 + $0x38] sm:$0x1] }
 0x101   : > { %2133 = vst [vmem:[#allocation3 + $0x1c] sm:$0xf] %v1938_v57  ;;  %v1957_v3 = vrot.slane %v1956_v59, 4  ;;  %v1976_v4 = vrot.slane %v1974_v61, 4  ;;  %v1987_v5 = vshrl.u32 %v1908_v60, 16  ;;  %v1993_v6 = vshll.u32 %v1909_v2, 16 }
 0x102   : > { %2134 = vst [vmem:[#allocation3 + $0x40] sm:$0xf] %v1948_v58  ;;  %v1967_v7 = vrot.slane %v1966_v62, 4  ;;  %v1979_v8 = vrot.slane %v1977_v63, 5  ;;  %v1985_v9 = vrot.slane %v1983_v1, 5 }
 0x103   : > { %v1962_v10 = vsel %vm8726_vm10, %v1957_v3, %v1961_v53  ;;  %v1989_v11 = vrot.slane %v1987_v5, 4  ;;  %v1995_v12 = vrot.slane %v1993_v6, 5  ;;  %v1910_v13 = vld [vmem:[#allocation2 + $0x3c] sm:$0xf]  ;;  %v1911_v14 = vld [vmem:[#allocation2 + $0x40] sm:$0xf] }
 0x104   : > { %2135 = vst [vmem:[#allocation3 + $0x64] sm:$0xf] %v1962_v10  ;;  %v1972_v15 = vsel %vm8726_vm10, %v1967_v7, %v1971_v55  ;;  %v1980_v16 = vor.u32 %v1979_v8, %v1976_v4  ;;  %v1998_v17 = vshrl.u32 %v1910_v13, 16  ;;  %v2001_v18 = vshll.u32 %v1910_v13, 16  ;;  %v1912_v19 = vld [vmem:[#allocation2 + $0x44] sm:$0x1] }
 0x105   : > { %2136 = vst [vmem:[#allocation3 + $0x88] sm:$0xf] %v1972_v15  ;;  %v1990_v20 = vor.u32 %v1989_v11, %v1985_v9  ;;  %v2007_v22 = vshll.u32 %v1911_v14, 16  ;;  %v2011_v23 = vshrl.u32 %v1911_v14, 16  ;;  %v2017_v24 = vshll.u32 %v1912_v19, 16 }
 0x106   : > { %v1981_v27 = vrot.slane %v1980_v16, 4  ;;  %v2000_v28 = vrot.slane %v1998_v17, 4  ;;  %v2003_v29 = vrot.slane %v2001_v18, 5  ;;  %v1913_v30 = vld [vmem:[#allocation2 + $0x48] sm:$0xf] }
 0x107   : > { %v1991_v31 = vrot.slane %v1990_v20, 4  ;;  %v2009_v32 = vrot.slane %v2007_v22, 5  ;;  %v2013_v33 = vrot.slane %v2011_v23, 4  ;;  %v2019_v34 = vrot.slane %v2017_v24, 5  ;;  %v1914_v36 = vld [vmem:[#allocation2 + $0x4c] sm:$0xf] }
 0x108   : > { %v1986_v37 = vsel %vm8726_vm10, %v1981_v27, %v1985_v9  ;;  %v2004_v38 = vor.u32 %v2003_v29, %v2000_v28  ;;  %v2022_v39 = vshrl.u32 %v1913_v30, 16  ;;  %v2025_v40 = vshll.u32 %v1913_v30, 16  ;;  %v1915_v42 = vld [vmem:[#allocation2 + $0x50] sm:$0x1]  ;;  %v1916_v43 = vld [vmem:[#allocation2 + $0x54] sm:$0xf] }
 0x109   : > { %2137 = vst [vmem:[#allocation3 + $0xac] sm:$0xf] %v1986_v37  ;;  %v1996_v44 = vsel %vm8726_vm10, %v1991_v31, %v1995_v12  ;;  %v2014_v45 = vor.u32 %v2013_v33, %v2009_v32  ;;  %v2031_v46 = vshll.u32 %v1914_v36, 16  ;;  %v2035_v47 = vshrl.u32 %v1914_v36, 16  ;;  %v1917_v48 = vld [vmem:[#allocation2 + $0x58] sm:$0xf] }
 0x10a   : > { %2138 = vst [vmem:[#allocation3 + $0xd0] sm:$0xf] %v1996_v44  ;;  %v2005_v49 = vrot.slane %v2004_v38, 4  ;;  %v2024_v50 = vrot.slane %v2022_v39, 4  ;;  %v2027_v51 = vrot.slane %v2025_v40, 5  ;;  %v2041_v52 = vshll.u32 %v1915_v42, 16 }
 0x10b   : > { %v2015_v53 = vrot.slane %v2014_v45, 4  ;;  %v2033_v54 = vrot.slane %v2031_v46, 5  ;;  %v2037_v55 = vrot.slane %v2035_v47, 4  ;;  %v2046_v56 = vshrl.u32 %v1916_v43, 16  ;;  %v1918_v57 = vld [vmem:[#allocation2 + $0x5c] sm:$0x1] }
 0x10c   : > { %v2010_v58 = vsel %vm8726_vm10, %v2005_v49, %v2009_v32  ;;  %v2028_v59 = vor.u32 %v2027_v51, %v2024_v50  ;;  %v2043_v60 = vrot.slane %v2041_v52, 5  ;;  %v2049_v61 = vshll.u32 %v1916_v43, 16  ;;  %v1919_v62 = vld [vmem:[#allocation2 + $0x60] sm:$0xf]  ;;  %v1920_v4 = vld [vmem:[#allocation2 + $0x64] sm:$0xf] }
 0x10d   : > { %2139 = vst [vmem:[#allocation3 + $0xf4] sm:$0xf] %v2010_v58  ;;  %v2020_v63 = vsel %vm8726_vm10, %v2015_v53, %v2019_v34  ;;  %v2038_v1 = vor.u32 %v2037_v55, %v2033_v54  ;;  %v2048_v2 = vrot.slane %v2046_v56, 4  ;;  %v2055_v3 = vshll.u32 %v1917_v48, 16  ;;  %v1921_v13 = vld [vmem:[#allocation2 + $0x68] sm:$0x1] }
 0x10e   : > { %2140 = vst [vmem:[#allocation3 + $0x118] sm:$0xf] %v2020_v63  ;;  %v2029_v5 = vrot.slane %v2028_v59, 4  ;;  %v2051_v6 = vrot.slane %v2049_v61, 5  ;;  %v2059_v7 = vshrl.u32 %v1917_v48, 16  ;;  %v2065_v8 = vshll.u32 %v1918_v57, 16 }
 0x10f   : > { %v2039_v9 = vrot.slane %v2038_v1, 4  ;;  %v2057_v10 = vrot.slane %v2055_v3, 5  ;;  %v2070_v11 = vshrl.u32 %v1919_v62, 16  ;;  %v2073_v12 = vshll.u32 %v1919_v62, 16  ;;  %v1922_v18 = vld [vmem:[#allocation2 + $0x6c] sm:$0xf] }
 0x110   : > { %v2034_v14 = vsel %vm8726_vm10, %v2029_v5, %v2033_v54  ;;  %v2052_v15 = vor.u32 %v2051_v6, %v2048_v2  ;;  %v2061_v16 = vrot.slane %v2059_v7, 4  ;;  %v2067_v17 = vrot.slane %v2065_v8, 5  ;;  %v1923_v19 = vld [vmem:[#allocation2 + $0x70] sm:$0xf]  ;;  %v1924_v27 = vld [vmem:[#allocation2 + $0x74] sm:$0x1] }
 0x111   : > { %2141 = vst [vmem:[#allocation3 + $0x13c] sm:$0xf] %v2034_v14  ;;  %v2044_v20 = vsel %vm8726_vm10, %v2039_v9, %v2043_v60  ;;  %v2072_v22 = vrot.slane %v2070_v11, 4  ;;  %v2075_v23 = vrot.slane %v2073_v12, 5  ;;  %v2079_v24 = vshll.u32 %v1920_v4, 16 }
 0x112   : > { %2142 = vst [vmem:[#allocation3 + $0x160] sm:$0xf] %v2044_v20  ;;  %v2053_v28 = vrot.slane %v2052_v15, 4  ;;  %v2062_v29 = vor.u32 %v2061_v16, %v2057_v10  ;;  %v2083_v30 = vshrl.u32 %v1920_v4, 16  ;;  %v2089_v31 = vshll.u32 %v1921_v13, 16 }
 0x113   : > { %v2076_v32 = vor.u32 %v2075_v23, %v2072_v22  ;;  %v2081_v33 = vrot.slane %v2079_v24, 5  ;;  %v2094_v34 = vshrl.u32 %v1922_v18, 16  ;;  %v2097_v36 = vshll.u32 %v1922_v18, 16  ;;  %v2149_v37 = vld [vmem:[#allocation2 + $0x18] sm:$0xe] }
 0x114   : > { %v2058_v38 = vsel %vm8726_vm10, %v2053_v28, %v2057_v10  ;;  %v2063_v39 = vrot.slane %v2062_v29, 4  ;;  %v2085_v40 = vrot.slane %v2083_v30, 4  ;;  %v2091_v42 = vrot.slane %v2089_v31, 5  ;;  %v2150_v43 = vld [vmem:[#allocation2 + $0x1c] sm:$0xf] }
 0x115   : > { %2143 = vst [vmem:[#allocation3 + $0x184] sm:$0xf] %v2058_v38  ;;  %v2077_v44 = vrot.slane %v2076_v32, 4  ;;  %v2096_v45 = vrot.slane %v2094_v34, 4  ;;  %v2099_v46 = vrot.slane %v2097_v36, 5  ;;  %v2103_v47 = vshll.u32 %v1923_v19, 16 }
 0x116   : > { %v2068_v48 = vsel %vm8726_vm10, %v2063_v39, %v2067_v17  ;;  %v2086_v49 = vor.u32 %v2085_v40, %v2081_v33  ;;  %v2107_v50 = vshrl.u32 %v1923_v19, 16  ;;  %v2113_v51 = vshll.u32 %v1924_v27, 16  ;;  %v2151_v52 = vld [vmem:[#allocation2 + $0x20] sm:$0x1]  ;;  %v2152_v53 = vld [vmem:[#allocation2 + $0x24] sm:$0xe] }
 0x117   : > { %2144 = vst [vmem:[#allocation3 + $0x1a8] sm:$0xf] %v2068_v48  ;;  %v2082_v54 = vsel %vm8726_vm10, %v2077_v44, %v2081_v33  ;;  %v2100_v55 = vor.u32 %v2099_v46, %v2096_v45  ;;  %v2105_v56 = vrot.slane %v2103_v47, 5  ;;  %v6979_v57 = vrot.slane %v2149_v37, 9  ;;  %v2153_v58 = vld [vmem:[#allocation2 + $0x28] sm:$0xf] }
 0x118   : > { %2145 = vst [vmem:[#allocation3 + $0x1cc] sm:$0xf] %v2082_v54  ;;  %v2087_v59 = vrot.slane %v2086_v49, 4  ;;  %v2109_v60 = vrot.slane %v2107_v50, 4  ;;  %v2115_v61 = vrot.slane %v2113_v51, 5  ;;  %v2199_v62 = vrot.slane %v2150_v43, 5 }
 0x119   : > { %v2101_v63 = vrot.slane %v2100_v55, 4  ;;  %v2202_v1 = vrot.slane %v2151_v52, 5  ;;  %v6980_v2 = vrot.slane %v2152_v53, 9  ;;  %v2206_v3 = vrot.slane %v2153_v58, 5  ;;  %v2154_v4 = vld [vmem:[#allocation2 + $0x2c] sm:$0x1] }
 0x11a   : > { %v2092_v5 = vsel %vm8726_vm10, %v2087_v59, %v2091_v42  ;;  %v2110_v6 = vor.u32 %v2109_v60, %v2105_v56  ;;  %v2200_v7 = vsel %vm8758_vm13, %v6979_v57, %v2199_v62  ;;  %v2201_v8 = vrot.slane %v2199_v62, 4  ;;  %v2155_v9 = vld [vmem:[#allocation2 + $0x30] sm:$0xe]  ;;  %v2156_v10 = vld [vmem:[#allocation2 + $0x34] sm:$0xf] }
 0x11b   : > { %2146 = vst [vmem:[#allocation3 + $0x1f0] sm:$0xf] %v2092_v5  ;;  %v2106_v11 = vsel %vm8726_vm10, %v2101_v63, %v2105_v56  ;;  %v2208_v12 = vrot.slane %v2206_v3, 4  ;;  %v2209_v13 = vrot.slane %v2154_v4, 5  ;;  %v2157_v14 = vld [vmem:[#allocation2 + $0x38] sm:$0x1]  ;;  %v2207_v19 = vsel %vm8758_vm13, %v6980_v2, %v2206_v3 }
 0x11c   : > { %2147 = vst [vmem:[#allocation3 + $0x214] sm:$0xf] %v2106_v11  ;;  %v2111_v15 = vrot.slane %v2110_v6, 4  ;;  %v2203_v16 = vsel %vm8758_vm13, %v2201_v8, %v2202_v1  ;;  %v6981_v17 = vrot.slane %v2155_v9, 9  ;;  %v2213_v18 = vrot.slane %v2156_v10, 5 }
 0x11d   : > { %2269 = vst [vmem:[#allocation3 + $0x20] sm:$0xf] %v2200_v7  ;;  %v2216_v20 = vrot.slane %v2157_v14, 5  ;;  %v2158_v22 = vld [vmem:[#allocation2 + $0x3c] sm:$0xe]  ;;  %v2210_v24 = vsel %vm8758_vm13, %v2208_v12, %v2209_v13 }
 0x11e   : > { %v2116_v23 = vsel %vm8726_vm10, %v2111_v15, %v2115_v61  ;;  %2270 = vst [vmem:[#allocation3 + $0x44] sm:$0xf] %v2203_v16  ;;  %v2215_v27 = vrot.slane %v2213_v18, 4  ;;  %v2159_v28 = vld [vmem:[#allocation2 + $0x40] sm:$0xf]  ;;  %v6982_v29 = vrot.slane %v2158_v22, 9  ;;  %v2214_v30 = vsel %vm8758_vm13, %v6981_v17, %v2213_v18 }
 0x11f   : > { %2148 = vst [vmem:[#allocation3 + $0x238] sm:$0xf] %v2116_v23  ;;  %v2220_v31 = vrot.slane %v2159_v28, 5  ;;  %v2160_v32 = vld [vmem:[#allocation2 + $0x44] sm:$0x1] }
 0x120   : > { %2271 = vst [vmem:[#allocation3 + $0x68] sm:$0xf] %v2207_v19  ;;  %v2217_v33 = vsel %vm8758_vm13, %v2215_v27, %v2216_v20  ;;  %v2223_v34 = vrot.slane %v2160_v32, 5  ;;  %v2161_v36 = vld [vmem:[#allocation2 + $0x48] sm:$0xe] }
 0x121   : > { %2272 = vst [vmem:[#allocation3 + $0x8c] sm:$0xf] %v2210_v24  ;;  %v2221_v37 = vsel %vm8758_vm13, %v6982_v29, %v2220_v31  ;;  %v2222_v38 = vrot.slane %v2220_v31, 4  ;;  %v2162_v39 = vld [vmem:[#allocation2 + $0x4c] sm:$0xf]  ;;  %v6983_v40 = vrot.slane %v2161_v36, 9 }
 0x122   : > { %2273 = vst [vmem:[#allocation3 + $0xb0] sm:$0xf] %v2214_v30  ;;  %v2227_v42 = vrot.slane %v2162_v39, 5  ;;  %v2163_v43 = vld [vmem:[#allocation2 + $0x50] sm:$0x1] }
 0x123   : > { %2274 = vst [vmem:[#allocation3 + $0xd4] sm:$0xf] %v2217_v33  ;;  %v2224_v44 = vsel %vm8758_vm13, %v2222_v38, %v2223_v34  ;;  %v2230_v45 = vrot.slane %v2163_v43, 5  ;;  %v2164_v46 = vld [vmem:[#allocation2 + $0x54] sm:$0xe] }
 0x124   : > { %2275 = vst [vmem:[#allocation3 + $0xf8] sm:$0xf] %v2221_v37  ;;  %v2228_v47 = vsel %vm8758_vm13, %v6983_v40, %v2227_v42  ;;  %v2229_v48 = vrot.slane %v2227_v42, 4  ;;  %v2165_v49 = vld [vmem:[#allocation2 + $0x58] sm:$0xf]  ;;  %v6984_v50 = vrot.slane %v2164_v46, 9 }
 0x125   : > { %2276 = vst [vmem:[#allocation3 + $0x11c] sm:$0xf] %v2224_v44  ;;  %v2234_v51 = vrot.slane %v2165_v49, 5  ;;  %v2166_v52 = vld [vmem:[#allocation2 + $0x5c] sm:$0x1] }
 0x126   : > { %2277 = vst [vmem:[#allocation3 + $0x140] sm:$0xf] %v2228_v47  ;;  %v2231_v53 = vsel %vm8758_vm13, %v2229_v48, %v2230_v45  ;;  %v2237_v54 = vrot.slane %v2166_v52, 5  ;;  %v2167_v55 = vld [vmem:[#allocation2 + $0x60] sm:$0xe] }
 0x127   : > { %2278 = vst [vmem:[#allocation3 + $0x164] sm:$0xf] %v2231_v53  ;;  %v2235_v56 = vsel %vm8758_vm13, %v6984_v50, %v2234_v51  ;;  %v2236_v57 = vrot.slane %v2234_v51, 4  ;;  %v2168_v58 = vld [vmem:[#allocation2 + $0x64] sm:$0xf]  ;;  %v6985_v59 = vrot.slane %v2167_v55, 9 }
 0x128   : > { %2279 = vst [vmem:[#allocation3 + $0x188] sm:$0xf] %v2235_v56  ;;  %v2241_v60 = vrot.slane %v2168_v58, 5  ;;  %v2169_v61 = vld [vmem:[#allocation2 + $0x68] sm:$0x1] }
 0x129   : > { %v2238_v62 = vsel %vm8758_vm13, %v2236_v57, %v2237_v54  ;;  %v2244_v63 = vrot.slane %v2169_v61, 5  ;;  %v2170_v1 = vld [vmem:[#allocation2 + $0x6c] sm:$0xe]  ;;  %v2171_v2 = vld [vmem:[#allocation2 + $0x70] sm:$0xf] }
 0x12a   : > { %2280 = vst [vmem:[#allocation3 + $0x1ac] sm:$0xf] %v2238_v62  ;;  %v2242_v3 = vsel %vm8758_vm13, %v6985_v59, %v2241_v60  ;;  %v2243_v4 = vrot.slane %v2241_v60, 4  ;;  %v6986_v5 = vrot.slane %v2170_v1, 9  ;;  %v2248_v6 = vrot.slane %v2171_v2, 5 }
 0x12b   : > { %2281 = vst [vmem:[#allocation3 + $0x1d0] sm:$0xf] %v2242_v3  ;;  %v2172_v7 = vld [vmem:[#allocation2 + $0x74] sm:$0x1]  ;;  %v2285_v8 = vld [vmem:[%s8573_s18] sm:$0xf] }
 0x12c   : > { %v2245_v9 = vsel %vm8758_vm13, %v2243_v4, %v2244_v63  ;;  %v2249_v10 = vsel %vm8758_vm13, %v6986_v5, %v2248_v6  ;;  %v2250_v11 = vrot.slane %v2248_v6, 4  ;;  %v2251_v12 = vrot.slane %v2172_v7, 5  ;;  %v2286_v13 = vld [vmem:[%s8573_s18 + $0x4] sm:$0xf]  ;;  %v2461_v19 = vld [vmem:[#allocation2 + $0xc] sm:$0xf] }
 0x12d   : > { %2282 = vst [vmem:[#allocation3 + $0x1f4] sm:$0xf] %v2245_v9  ;;  %v2302_v14 = vshrl.u32 %v2285_v8, 16  ;;  %v2305_v15 = vshll.u32 %v2285_v8, 16  ;;  %v2310_v16 = vshrl.u32 %v2286_v13, 16  ;;  %v2313_v17 = vshll.u32 %v2286_v13, 16 }
 0x12e   : > { %2283 = vst [vmem:[#allocation3 + $0x218] sm:$0xf] %v2249_v10  ;;  %v2252_v18 = vsel %vm8758_vm13, %v2250_v11, %v2251_v12  ;;  %v2287_v20 = vld [vmem:[%s8573_s18 + $0x8] sm:$0xf]  ;;  %v2465_v27 = vld [vmem:[#allocation2 + $0x14] sm:$0x1] }
 0x12f   : > { %2284 = vst [vmem:[#allocation3 + $0x23c] sm:$0xf] %v2252_v18  ;;  %v2304_v22 = vrot.slane %v2302_v14, 7  ;;  %v2312_v23 = vrot.slane %v2310_v16, 7  ;;  %v2319_v24 = vshrl.u32 %v2287_v20, 16  ;;  %v2322_v28 = vshll.u32 %v2287_v20, 16 }
 0x130   : > { %v2288_v29 = vld [vmem:[%s8573_s18 + $0xc] sm:$0xf]  ;;  %v2468_v34 = vld [vmem:[#allocation2 + $0x18] sm:$0xf]  ;;  %v2289_v36 = vld [vmem:[%s8573_s18 + $0x10] sm:$0xf] }
 0x131   : > { %v2307_v30 = vor.u32 %v2305_v15, %v2304_v22  ;;  %v2308_v31 = vrot.slane %v2304_v22, 4  ;;  %v2315_v32 = vor.u32 %v2313_v17, %v2312_v23  ;;  %v2317_v33 = vrot.slane %v2312_v23, 4  ;;  %v2290_v42 = vld [vmem:[%s8573_s18 + $0x14] sm:$0xf]  ;;  %v2472_v46 = vld [vmem:[#allocation2 + $0x20] sm:$0x1] }
 0x132   : > { %v2321_v37 = vrot.slane %v2319_v24, 7  ;;  %v2327_v38 = vshrl.u32 %v2288_v29, 16  ;;  %v2330_v39 = vshll.u32 %v2288_v29, 16  ;;  %v2336_v40 = vshrl.u32 %v2289_v36, 16  ;;  %v2475_v48 = vld [vmem:[#allocation2 + $0x24] sm:$0xf] }
 0x133   : > { %v2462_v43 = vsel %vm8619_vm5, %v2307_v30, %v2461_v19  ;;  %v2316_v44 = vsel %vm8626_vm6, %v2308_v31, %v2315_v32  ;;  %v2466_v45 = vsel %vm8635_vm7, %v2317_v33, %v2465_v27  ;;  %v2339_v47 = vshll.u32 %v2289_v36, 16  ;;  %v2291_v49 = vld [vmem:[%s8573_s18 + $0x18] sm:$0xf]  ;;  %v2479_v62 = vld [vmem:[#allocation2 + $0x2c] sm:$0x1] }
 0x134   : > { %2463 = vst [vmem:[#allocation2 + $0xc] sm:$0xf] %v2462_v43  ;;  %v2324_v50 = vor.u32 %v2322_v28, %v2321_v37  ;;  %v2325_v51 = vrot.slane %v2321_v37, 4  ;;  %v2329_v52 = vrot.slane %v2327_v38, 7  ;;  %v2338_v53 = vrot.slane %v2336_v40, 7 }
 0x135   : > { %2464 = vst [vmem:[#allocation2 + $0x10] sm:$0xf] %v2316_v44  ;;  %v2344_v54 = vshrl.u32 %v2290_v42, 16  ;;  %v2347_v55 = vshll.u32 %v2290_v42, 16  ;;  %v2353_v56 = vshrl.u32 %v2291_v49, 16  ;;  %v2356_v57 = vshll.u32 %v2291_v49, 16 }
 0x136   : > { %2467 = vst [vmem:[#allocation2 + $0x14] sm:$0x1] %v2466_v45  ;;  %v2469_v58 = vsel %vm8619_vm5, %v2324_v50, %v2468_v34  ;;  %v2332_v59 = vor.u32 %v2330_v39, %v2329_v52  ;;  %v2334_v60 = vrot.slane %v2329_v52, 4  ;;  %v2341_v61 = vor.u32 %v2339_v47, %v2338_v53  ;;  %v2482_v6 = vld [vmem:[#allocation2 + $0x30] sm:$0xf] }
 0x137   : > { %2470 = vst [vmem:[#allocation2 + $0x18] sm:$0xf] %v2469_v58  ;;  %v2342_v63 = vrot.slane %v2338_v53, 4  ;;  %v2346_v1 = vrot.slane %v2344_v54, 7  ;;  %v2355_v2 = vrot.slane %v2353_v56, 7 }
 0x138   : > { %v2333_v3 = vsel %vm8626_vm6, %v2325_v51, %v2332_v59  ;;  %v2473_v4 = vsel %vm8635_vm7, %v2334_v60, %v2472_v46  ;;  %v2476_v5 = vsel %vm8619_vm5, %v2341_v61, %v2475_v48  ;;  %v2292_v7 = vld [vmem:[%s8573_s18 + $0x1c] sm:$0xf]  ;;  %v2293_v8 = vld [vmem:[%s8573_s18 + $0x20] sm:$0xf]  ;;  %v2486_v19 = vld [vmem:[#allocation2 + $0x38] sm:$0x1] }
 0x139   : > { %2471 = vst [vmem:[#allocation2 + $0x1c] sm:$0xf] %v2333_v3  ;;  %v2349_v9 = vor.u32 %v2347_v55, %v2346_v1  ;;  %v2351_v10 = vrot.slane %v2346_v1, 4  ;;  %v2358_v11 = vor.u32 %v2356_v57, %v2355_v2  ;;  %v2361_v12 = vshrl.u32 %v2292_v7, 16  ;;  %v2489_v20 = vld [vmem:[#allocation2 + $0x3c] sm:$0xf] }
 0x13a   : > { %2474 = vst [vmem:[#allocation2 + $0x20] sm:$0x1] %v2473_v4  ;;  %v2364_v13 = vshll.u32 %v2292_v7, 16  ;;  %v2370_v14 = vshrl.u32 %v2293_v8, 16  ;;  %v2373_v15 = vshll.u32 %v2293_v8, 16  ;;  %v2359_v23 = vrot.slane %v2355_v2, 4 }
 0x13b   : > { %2477 = vst [vmem:[#allocation2 + $0x24] sm:$0xf] %v2476_v5  ;;  %v2350_v16 = vsel %vm8626_vm6, %v2342_v63, %v2349_v9  ;;  %v2480_v17 = vsel %vm8635_vm7, %v2351_v10, %v2479_v62  ;;  %v2483_v18 = vsel %vm8619_vm5, %v2358_v11, %v2482_v6  ;;  %v2294_v22 = vld [vmem:[%s8573_s18 + $0x24] sm:$0xf]  ;;  %v2363_v24 = vrot.slane %v2361_v12, 7 }
 0x13c   : > { %2478 = vst [vmem:[#allocation2 + $0x28] sm:$0xf] %v2350_v16  ;;  %v2372_v27 = vrot.slane %v2370_v14, 7  ;;  %v2378_v28 = vshrl.u32 %v2294_v22, 16  ;;  %v2381_v29 = vshll.u32 %v2294_v22, 16 }
 0x13d   : > { %2481 = vst [vmem:[#allocation2 + $0x2c] sm:$0x1] %v2480_v17  ;;  %v2295_v30 = vld [vmem:[%s8573_s18 + $0x28] sm:$0xf]  ;;  %v2366_v31 = vor.u32 %v2364_v13, %v2363_v24  ;;  %v2368_v32 = vrot.slane %v2363_v24, 4 }
 0x13e   : > { %2484 = vst [vmem:[#allocation2 + $0x30] sm:$0xf] %v2483_v18  ;;  %v2375_v33 = vor.u32 %v2373_v15, %v2372_v27  ;;  %v2376_v34 = vrot.slane %v2372_v27, 4  ;;  %v2296_v36 = vld [vmem:[%s8573_s18 + $0x2c] sm:$0xf]  ;;  %v2380_v37 = vrot.slane %v2378_v28, 7 }
 0x13f   : > { %v2493_v38 = vld [vmem:[#allocation2 + $0x44] sm:$0x1]  ;;  %v2387_v39 = vshrl.u32 %v2295_v30, 16  ;;  %v2390_v40 = vshll.u32 %v2295_v30, 16  ;;  %v2395_v42 = vshrl.u32 %v2296_v36, 16  ;;  %v2367_v43 = vsel %vm8626_vm6, %v2359_v23, %v2366_v31 }
 0x140   : > { %v2487_v44 = vsel %vm8635_vm7, %v2368_v32, %v2486_v19  ;;  %v2490_v45 = vsel %vm8619_vm5, %v2375_v33, %v2489_v20  ;;  %v2496_v46 = vld [vmem:[#allocation2 + $0x48] sm:$0xf]  ;;  %v2398_v47 = vshll.u32 %v2296_v36, 16  ;;  %v2297_v48 = vld [vmem:[%s8573_s18 + $0x30] sm:$0xf]  ;;  %v2383_v49 = vor.u32 %v2381_v29, %v2380_v37 }
 0x141   : > { %2485 = vst [vmem:[#allocation2 + $0x34] sm:$0xf] %v2367_v43  ;;  %v2385_v50 = vrot.slane %v2380_v37, 4  ;;  %v2389_v51 = vrot.slane %v2387_v39, 7  ;;  %v2397_v52 = vrot.slane %v2395_v42, 7  ;;  %v2404_v54 = vshrl.u32 %v2297_v48, 16 }
 0x142   : > { %v2500_v53 = vld [vmem:[#allocation2 + $0x50] sm:$0x1]  ;;  %2488 = vst [vmem:[#allocation2 + $0x38] sm:$0x1] %v2487_v44  ;;  %v2407_v55 = vshll.u32 %v2297_v48, 16  ;;  %v2384_v57 = vsel %vm8626_vm6, %v2376_v34, %v2383_v49 }
 0x143   : > { %v2298_v56 = vld [vmem:[%s8573_s18 + $0x34] sm:$0xf]  ;;  %2491 = vst [vmem:[#allocation2 + $0x3c] sm:$0xf] %v2490_v45  ;;  %v2494_v58 = vsel %vm8635_vm7, %v2385_v50, %v2493_v38  ;;  %v2392_v59 = vor.u32 %v2390_v40, %v2389_v51  ;;  %v2393_v60 = vrot.slane %v2389_v51, 4  ;;  %v2400_v62 = vor.u32 %v2398_v47, %v2397_v52 }
 0x144   : > { %v2503_v61 = vld [vmem:[#allocation2 + $0x54] sm:$0xf]  ;;  %2492 = vst [vmem:[#allocation2 + $0x40] sm:$0xf] %v2384_v57  ;;  %v2402_v63 = vrot.slane %v2397_v52, 4  ;;  %v2406_v1 = vrot.slane %v2404_v54, 7 }
 0x145   : > { %v2412_v2 = vshrl.u32 %v2298_v56, 16  ;;  %2495 = vst [vmem:[#allocation2 + $0x44] sm:$0x1] %v2494_v58  ;;  %v2497_v3 = vsel %vm8619_vm5, %v2392_v59, %v2496_v46  ;;  %v2415_v4 = vshll.u32 %v2298_v56, 16  ;;  %v2299_v5 = vld [vmem:[%s8573_s18 + $0x38] sm:$0xf]  ;;  %v2401_v6 = vsel %vm8626_vm6, %v2393_v60, %v2400_v62 }
 0x146   : > { %2498 = vst [vmem:[#allocation2 + $0x48] sm:$0xf] %v2497_v3  ;;  %v2501_v7 = vsel %vm8635_vm7, %v2402_v63, %v2500_v53  ;;  %v2409_v8 = vor.u32 %v2407_v55, %v2406_v1  ;;  %v2410_v9 = vrot.slane %v2406_v1, 4  ;;  %v2421_v11 = vshrl.u32 %v2299_v5, 16  ;;  %v2507_v14 = vld [vmem:[#allocation2 + $0x5c] sm:$0x1] }
 0x147   : > { %2499 = vst [vmem:[#allocation2 + $0x4c] sm:$0xf] %v2401_v6  ;;  %v2414_v10 = vrot.slane %v2412_v2, 7  ;;  %v2424_v12 = vshll.u32 %v2299_v5, 16  ;;  %v2300_v15 = vld [vmem:[%s8573_s18 + $0x3c] sm:$0xf] }
 0x148   : > { %2502 = vst [vmem:[#allocation2 + $0x50] sm:$0x1] %v2501_v7  ;;  %v2504_v13 = vsel %vm8619_vm5, %v2409_v8, %v2503_v61  ;;  %v2423_v18 = vrot.slane %v2421_v11, 7  ;;  %v2429_v19 = vshrl.u32 %v2300_v15, 16  ;;  %v2510_v20 = vld [vmem:[#allocation2 + $0x60] sm:$0xf] }
 0x149   : > { %2505 = vst [vmem:[#allocation2 + $0x54] sm:$0xf] %v2504_v13  ;;  %v2417_v16 = vor.u32 %v2415_v4, %v2414_v10  ;;  %v2419_v17 = vrot.slane %v2414_v10, 4  ;;  %v2432_v22 = vshll.u32 %v2300_v15, 16  ;;  %v2514_v31 = vld [vmem:[#allocation2 + $0x68] sm:$0x1] }
 0x14a   : > { %v2426_v27 = vor.u32 %v2424_v12, %v2423_v18  ;;  %v2427_v28 = vrot.slane %v2423_v18, 4  ;;  %v2431_v29 = vrot.slane %v2429_v19, 7 }
 0x14b   : > { %v2418_v23 = vsel %vm8626_vm6, %v2410_v9, %v2417_v16  ;;  %v2508_v24 = vsel %vm8635_vm7, %v2419_v17, %v2507_v14 }
 0x14c   : > { %2506 = vst [vmem:[#allocation2 + $0x58] sm:$0xf] %v2418_v23  ;;  %v2511_v30 = vsel %vm8619_vm5, %v2426_v27, %v2510_v20  ;;  %v2434_v32 = vor.u32 %v2432_v22, %v2431_v29  ;;  %v2436_v33 = vrot.slane %v2431_v29, 4  ;;  %2519 = sbr.rel (%p6961_p4) target bundleno = 348 (0x15c), region = 68 }
 0x14d   : > { %2509 = vst [vmem:[#allocation2 + $0x5c] sm:$0x1] %v2508_v24 }
 0x14e   : > { %2512 = vst [vmem:[#allocation2 + $0x60] sm:$0xf] %v2511_v30  ;;  %v2435_v34 = vsel %vm8626_vm6, %v2427_v28, %v2434_v32  ;;  %v2515_v36 = vsel %vm8635_vm7, %v2436_v33, %v2514_v31 }
 0x14f   : > { %2513 = vst [vmem:[#allocation2 + $0x64] sm:$0xf] %v2435_v34 }
 0x150   : > { %2516 = vst [vmem:[#allocation2 + $0x68] sm:$0x1] %v2515_v36 }
 0x151   : > { %v2520_v37 = vld [vmem:[%s8595_s26] sm:$0xf]  ;;  %v2521_v38 = vld [vmem:[%s8595_s26 + $0x4] sm:$0xf]  ;;  %v2546_v47 = vld [vmem:[#allocation2 + $0x8] sm:$0x1] }
 0x152   : > { %v2523_v39 = vshrl.u32 %v2520_v37, 16  ;;  %v2526_v40 = vshll.u32 %v2520_v37, 16  ;;  %v2531_v42 = vshrl.u32 %v2521_v38, 16  ;;  %v2534_v43 = vshll.u32 %v2521_v38, 16  ;;  %v2542_v46 = vld [vmem:[#allocation2] sm:$0xf] }
 0x154   : > { %v2525_v44 = vrot.slane %v2523_v39, 7  ;;  %v2533_v45 = vrot.slane %v2531_v42, 7 }
 0x156   : > { %v2528_v48 = vor.u32 %v2526_v40, %v2525_v44  ;;  %v2529_v49 = vrot.slane %v2525_v44, 4  ;;  %v2536_v50 = vor.u32 %v2534_v43, %v2533_v45  ;;  %v2538_v51 = vrot.slane %v2533_v45, 4 }
 0x158   : > { %v2543_v52 = vsel %vm8619_vm5, %v2528_v48, %v2542_v46  ;;  %v2537_v53 = vsel %vm8626_vm6, %v2529_v49, %v2536_v50  ;;  %v2547_v54 = vsel %vm8635_vm7, %v2538_v51, %v2546_v47 }
 0x159   : > { %2544 = vst [vmem:[#allocation2] sm:$0xf] %v2543_v52 }
 0x15a   : > { %2545 = vst [vmem:[#allocation2 + $0x4] sm:$0xf] %v2537_v53 }
 0x15b   : > { %2548 = vst [vmem:[#allocation2 + $0x8] sm:$0x1] %v2547_v54 }
 0x15c PF: > { %2551 = sbr.rel (%p6962_p5) target bundleno = 364 (0x16c), region = 72 }
 0x161   : > { %v2552_v55 = vld [vmem:[%s8601_s25] sm:$0xf]  ;;  %v2553_v56 = vld [vmem:[%s8601_s25 + $0x4] sm:$0xf]  ;;  %v2575_v63 = vld [vmem:[#allocation2 + $0x6c] sm:$0xf] }
 0x162   : > { %v2555_v57 = vshrl.u32 %v2552_v55, 16  ;;  %v2558_v58 = vshll.u32 %v2552_v55, 16  ;;  %v2563_v59 = vshrl.u32 %v2553_v56, 16  ;;  %v2566_v60 = vshll.u32 %v2553_v56, 16  ;;  %v2579_v1 = vld [vmem:[#allocation2 + $0x74] sm:$0x1] }
 0x164   : > { %v2557_v61 = vrot.slane %v2555_v57, 7  ;;  %v2565_v62 = vrot.slane %v2563_v59, 7 }
 0x166   : > { %v2560_v2 = vor.u32 %v2558_v58, %v2557_v61  ;;  %v2561_v3 = vrot.slane %v2557_v61, 4  ;;  %v2568_v4 = vor.u32 %v2566_v60, %v2565_v62  ;;  %v2570_v5 = vrot.slane %v2565_v62, 4 }
 0x168   : > { %v2576_v6 = vsel %vm8619_vm5, %v2560_v2, %v2575_v63  ;;  %v2569_v7 = vsel %vm8626_vm6, %v2561_v3, %v2568_v4  ;;  %v2580_v8 = vsel %vm8635_vm7, %v2570_v5, %v2579_v1 }
 0x169   : > { %2577 = vst [vmem:[#allocation2 + $0x6c] sm:$0xf] %v2576_v6 }
 0x16a   : > { %2578 = vst [vmem:[#allocation2 + $0x70] sm:$0xf] %v2569_v7 }
 0x16b   : > { %2581 = vst [vmem:[#allocation2 + $0x74] sm:$0x1] %v2580_v8 }
 0x16c PF: > { %v8067_v9 = vld [vmem:[%s10342_s7 + $0x38] sm:$0xff]  ;;  %8231 = vset.pattern.permute.xlu0 %v8397_v0  ;;  %8232 = vset.pattern.permute.xlu1 %v8397_v0  ;;  %v8066_v21 = vld [vmem:[%s10342_s7 + $0x30] sm:$0xff]  ;;  %v2582_v26 = vld [vmem:[#allocation2] sm:$0xf]  ;;  %s7896_s14 = sshll.u32 %s8383_s13, 5  ;;  %s6683_s20 = sshll.u32 %s8700_s1, 4  ;;  %s6684_s20 = int_to_ptr.vmem [resolvable:$true] %s6683_s20 }
 0x16d   : > { %8233 = vset.pattern.permute.xlu2 %v8397_v0  ;;  %8133 = vmatpush.bf16.msra.mxu1 %v8067_v9  ;;  %v2583_v35 = vld [vmem:[#allocation2 + $0x4] sm:$0xf]  ;;  %2598 = vst [vmem:[#allocation3 + $0x240] sm:$0xf] %v2582_v26  ;;  %v2590_v10 = vld [vmem:[#allocation2 + $0x30] sm:$0xf] }
 0x16e   : > { %8134 = vmatpush.bf16.msra.mxu2 %v8067_v9  ;;  %8135 = vmatpush.bf16.msra.mxu3 %v8067_v9  ;;  %v2591_v11 = vld [vmem:[#allocation2 + $0x34] sm:$0xf]  ;;  %2599 = vst [vmem:[#allocation3 + $0x264] sm:$0xf] %v2583_v35  ;;  %v8065_v0 = vld [vmem:[%s10342_s7 + $0x28] sm:$0xff]  ;;  %v8064_v12 = vld [vmem:[%s10342_s7 + $0x20] sm:$0xff] }
 0x16f   : > { %5306 = vmatpush.bf16.msra.mxu0 %v8067_v9  ;;  %2606 = vst [vmem:[#allocation3 + $0x360] sm:$0xf] %v2590_v10  ;;  %v2584_v13 = vld [vmem:[#allocation2 + $0xc] sm:$0xf]  ;;  %v2585_v14 = vld [vmem:[#allocation2 + $0x10] sm:$0xf] }
 0x170   : > { %2607 = vst [vmem:[#allocation3 + $0x384] sm:$0xf] %v2591_v11  ;;  %v2592_v15 = vld [vmem:[#allocation2 + $0x3c] sm:$0xf]  ;;  %v2593_v16 = vld [vmem:[#allocation2 + $0x40] sm:$0xf] }
 0x171   : > { %8136 = vmatpush.bf16.msra.mxu1 %v8066_v21  ;;  %2600 = vst [vmem:[#allocation3 + $0x288] sm:$0xf] %v2584_v13  ;;  %v8063_v17 = vld [vmem:[%s10342_s7 + $0x18] sm:$0xff]  ;;  %v8062_v18 = vld [vmem:[%s10342_s7 + $0x10] sm:$0xff]  ;;  %v8061_v19 = vld [vmem:[%s10342_s7 + $0x8] sm:$0xff]  ;;  %s10467_s0 = sand.u32 1, %s8371_s10  }
 0x172   : > { %8137 = vmatpush.bf16.msra.mxu2 %v8066_v21  ;;  %8138 = vmatpush.bf16.msra.mxu3 %v8066_v21  ;;  %2601 = vst [vmem:[#allocation3 + $0x2ac] sm:$0xf] %v2585_v14  ;;  %v2586_v20 = vld [vmem:[#allocation2 + $0x18] sm:$0xf]  ;;  %v2587_v22 = vld [vmem:[#allocation2 + $0x1c] sm:$0xf] }
 0x173   : > { %5307 = vmatpush.bf16.msra.mxu0 %v8066_v21  ;;  %2608 = vst [vmem:[#allocation3 + $0x3a8] sm:$0xf] %v2592_v15  ;;  %v2594_v23 = vld [vmem:[#allocation2 + $0x48] sm:$0xf]  ;;  %v8060_v24 = vld [vmem:[%s10342_s7] sm:$0xff]  ;;  %v8083_v37 = vld [vmem:[%s10342_s7 + $0xb8] sm:$0xff] }
 0x174   : > { %2609 = vst [vmem:[#allocation3 + $0x3cc] sm:$0xf] %v2593_v16  ;;  %v7159_v27 = vld [vmem:[#allocation3 + $0x120] sm:$0xf]  ;;  %v7956_v28 = vld [vmem:[#allocation3 + $0x140] sm:$0xf0] }
 0x175   : > { %8139 = vmatpush.bf16.msra.mxu1 %v8065_v0  ;;  %2602 = vst [vmem:[#allocation3 + $0x2d0] sm:$0xf] %v2586_v20  ;;  %v2595_v29 = vld [vmem:[#allocation2 + $0x4c] sm:$0xf]  ;;  %v7015_v30 = vld [vmem:[#allocation3] sm:$0xf]  ;;  %v7160_v39 = vor.u32 %v7956_v28, %v7159_v27 }
 0x176   : > { %8140 = vmatpush.bf16.msra.mxu2 %v8065_v0  ;;  %8141 = vmatpush.bf16.msra.mxu3 %v8065_v0  ;;  %v7920_v31 = vld [vmem:[#allocation3 + $0x20] sm:$0xf0]  ;;  %2603 = vst [vmem:[#allocation3 + $0x2f4] sm:$0xf] %v2587_v22  ;;  %v7303_v32 = vld [vmem:[#allocation3 + $0x240] sm:$0xf] }
 0x177   : > { %5308 = vmatpush.bf16.msra.mxu0 %v8065_v0  ;;  %v7992_v33 = vld [vmem:[#allocation3 + $0x260] sm:$0xf0]  ;;  %2610 = vst [vmem:[#allocation3 + $0x3f0] sm:$0xf] %v2594_v23  ;;  %v7447_v34 = vld [vmem:[#allocation3 + $0x360] sm:$0xf]  ;;  %v7016_v43 = vor.u32 %v7920_v31, %v7015_v30 }
 0x178   : > { %v8028_v36 = vld [vmem:[#allocation3 + $0x380] sm:$0xf0]  ;;  %2611 = vst [vmem:[#allocation3 + $0x414] sm:$0xf] %v2595_v29  ;;  %v7304_v40 = vor.u32 %v7992_v33, %v7303_v32  ;;  %v8082_v46 = vld [vmem:[%s10342_s7 + $0xb0] sm:$0xff]  ;;  %v8081_v50 = vld [vmem:[%s10342_s7 + $0xa8] sm:$0xff] }
 0x179   : > { %8142 = vmatpush.bf16.msra.mxu1 %v8064_v12  ;;  %v8091_v38 = vld [vmem:[%s10342_s7 + $0xf8] sm:$0xff]  ;;  %v7448_v42 = vor.u32 %v8028_v36, %v7447_v34  ;;  %v8090_v47 = vld [vmem:[%s10342_s7 + $0xf0] sm:$0xff]  ;;  %v8089_v51 = vld [vmem:[%s10342_s7 + $0xe8] sm:$0xff]  ;;  %s6668_s27 = scalar_lea.sflag [#allocation5], %s10467_s0  ;;  %s8321_s25 = scalar_lea.hbm %s10344_s9, 512 }
 0x17a   : > { %8143 = vmatpush.bf16.msra.mxu2 %v8064_v12  ;;  %8144 = vmatpush.bf16.msra.mxu3 %v8064_v12  ;;  %v8075_v44 = vld [vmem:[%s10342_s7 + $0x78] sm:$0xff]  ;;  %v8074_v48 = vld [vmem:[%s10342_s7 + $0x70] sm:$0xff]  ;;  %v8073_v52 = vld [vmem:[%s10342_s7 + $0x68] sm:$0xff] }
 0x17b   : > { %5309 = vmatpush.bf16.msra.mxu0 %v8064_v12  ;;  %v8099_v45 = vld [vmem:[%s10342_s7 + $0x138] sm:$0xff]  ;;  %v8098_v49 = vld [vmem:[%s10342_s7 + $0x130] sm:$0xff]  ;;  %v8097_v53 = vld [vmem:[%s10342_s7 + $0x128] sm:$0xff] }
 0x17c   : > { %v2588_v54 = vld [vmem:[#allocation2 + $0x24] sm:$0xf]  ;;  %v2589_v55 = vld [vmem:[#allocation2 + $0x28] sm:$0xf]  ;;  %v2596_v56 = vld [vmem:[#allocation2 + $0x54] sm:$0xf] }
 0x17d   : > { %8145 = vmatpush.bf16.msra.mxu1 %v8063_v17  ;;  %v7195_v57 = vld [vmem:[#allocation3 + $0x168] sm:$0xf]  ;;  %v7965_v58 = vld [vmem:[#allocation3 + $0x188] sm:$0xf0]  ;;  %2604 = vst [vmem:[#allocation3 + $0x318] sm:$0xf] %v2588_v54 }
 0x17e   : > { %8146 = vmatpush.bf16.msra.mxu2 %v8063_v17  ;;  %8147 = vmatpush.bf16.msra.mxu3 %v8063_v17  ;;  %v7339_v59 = vld [vmem:[#allocation3 + $0x288] sm:$0xf]  ;;  %v2597_v62 = vld [vmem:[#allocation2 + $0x58] sm:$0xf]  ;;  %v8001_v63 = vld [vmem:[#allocation3 + $0x2a8] sm:$0xf0]  ;;  %v7196_v9 = vor.u32 %v7965_v58, %v7195_v57 }
 0x17f   : > { %5310 = vmatpush.bf16.msra.mxu0 %v8063_v17  ;;  %v8080_v60 = vld [vmem:[%s10342_s7 + $0xa0] sm:$0xff]  ;;  %2605 = vst [vmem:[#allocation3 + $0x33c] sm:$0xf] %v2589_v55  ;;  %v8079_v7 = vld [vmem:[%s10342_s7 + $0x98] sm:$0xff]  ;;  %v7340_v21 = vor.u32 %v8001_v63, %v7339_v59  ;;  %v8078_v0 = vld [vmem:[%s10342_s7 + $0x90] sm:$0xff] }
 0x180   : > { %v8088_v61 = vld [vmem:[%s10342_s7 + $0xe0] sm:$0xff]  ;;  %2612 = vst [vmem:[#allocation3 + $0x438] sm:$0xf] %v2596_v56  ;;  %v8087_v8 = vld [vmem:[%s10342_s7 + $0xd8] sm:$0xff]  ;;  %v8086_v12 = vld [vmem:[%s10342_s7 + $0xd0] sm:$0xff] }
 0x181   : > { %8148 = vmatpush.bf16.msra.mxu1 %v8062_v18  ;;  %v7051_v1 = vld [vmem:[#allocation3 + $0x48] sm:$0xf]  ;;  %v7929_v3 = vld [vmem:[#allocation3 + $0x68] sm:$0xf0]  ;;  %2613 = vst [vmem:[#allocation3 + $0x45c] sm:$0xf] %v2597_v62 }
 0x182   : > { %8149 = vmatpush.bf16.msra.mxu2 %v8062_v18  ;;  %8150 = vmatpush.bf16.msra.mxu3 %v8062_v18  ;;  %v7483_v2 = vld [vmem:[#allocation3 + $0x3a8] sm:$0xf]  ;;  %v8037_v4 = vld [vmem:[#allocation3 + $0x3c8] sm:$0xf0]  ;;  %v7052_v35 = vor.u32 %v7929_v3, %v7051_v1  ;;  %v8071_v10 = vld [vmem:[%s10342_s7 + $0x58] sm:$0xff] }
 0x183   : > { %5311 = vmatpush.bf16.msra.mxu0 %v8062_v18  ;;  %v8072_v5 = vld [vmem:[%s10342_s7 + $0x60] sm:$0xff]  ;;  %v7484_v26 = vor.u32 %v8037_v4, %v7483_v2  ;;  %v8095_v11 = vld [vmem:[%s10342_s7 + $0x118] sm:$0xff]  ;;  %v8070_v13 = vld [vmem:[%s10342_s7 + $0x50] sm:$0xff] }
 0x184   : > { %v8096_v6 = vld [vmem:[%s10342_s7 + $0x120] sm:$0xff]  ;;  %v8094_v14 = vld [vmem:[%s10342_s7 + $0x110] sm:$0xff]  ;;  %v8077_v15 = vld [vmem:[%s10342_s7 + $0x88] sm:$0xff] }
 0x185   : > { %8151 = vmatpush.bf16.msra.mxu1 %v8061_v19  ;;  %v8085_v16 = vld [vmem:[%s10342_s7 + $0xc8] sm:$0xff]  ;;  %v8076_v20 = vld [vmem:[%s10342_s7 + $0x80] sm:$0xff]  ;;  %v7916_v56 = vld [vmem:[#allocation3 + $0x4] sm:$0xf] }
 0x186   : > { %8152 = vmatpush.bf16.msra.mxu2 %v8061_v19  ;;  %8153 = vmatpush.bf16.msra.mxu3 %v8061_v19  ;;  %v8069_v17 = vld [vmem:[%s10342_s7 + $0x48] sm:$0xff]  ;;  %v8084_v22 = vld [vmem:[%s10342_s7 + $0xc0] sm:$0xff] }
 0x187   : > { %5312 = vmatpush.bf16.msra.mxu0 %v8061_v19  ;;  %v8093_v18 = vld [vmem:[%s10342_s7 + $0x108] sm:$0xff]  ;;  %v8068_v32 = vld [vmem:[%s10342_s7 + $0x40] sm:$0xff] }
 0x188   : > { %v7231_v19 = vld [vmem:[#allocation3 + $0x1b0] sm:$0xf]  ;;  %v7974_v23 = vld [vmem:[#allocation3 + $0x1d0] sm:$0xf0]  ;;  %v8092_v33 = vld [vmem:[%s10342_s7 + $0x100] sm:$0xff] }
 0x189   : > { %8154 = vmatpush.bf16.msra.mxu1 %v8060_v24  ;;  %v8010_v27 = vld [vmem:[#allocation3 + $0x2f0] sm:$0xf0]  ;;  %v7519_v28 = vld [vmem:[#allocation3 + $0x3f0] sm:$0xf]  ;;  %v7232_v34 = vor.u32 %v7974_v23, %v7231_v19  ;;  %v7017_v57 = vld [vmem:[#allocation3 + $0x24] sm:$0xf0] }
 0x18a   : > { %8155 = vmatpush.bf16.msra.mxu2 %v8060_v24  ;;  %8156 = vmatpush.bf16.msra.mxu3 %v8060_v24  ;;  %v7087_v29 = vld [vmem:[#allocation3 + $0x90] sm:$0xf]  ;;  %v7938_v30 = vld [vmem:[#allocation3 + $0xb0] sm:$0xf0]  ;;  %v7023_v58 = vld [vmem:[#allocation3 + $0x8] sm:$0xf]  ;;  %v7020_v1 = vor.u32 %v7916_v56, %v7017_v57 }
 0x18b   : > { %5313 = vmatpush.bf16.msra.mxu0 %v8060_v24  ;;  %v7375_v24 = vld [vmem:[#allocation3 + $0x2d0] sm:$0xf]  ;;  %v8046_v31 = vld [vmem:[#allocation3 + $0x410] sm:$0xf0]  ;;  %v7921_v59 = vld [vmem:[#allocation3 + $0x28] sm:$0xf0] }
 0x18c   : > { %5334 = vmatmul.bf16.vlgmr.msra.gmra.mxu1 %v7160_v39  ;;  %v7376_v36 = vor.u32 %v8010_v27, %v7375_v24  ;;  %v8115_v39 = vld [vmem:[%s10342_s7 + $0x1b8] sm:$0xff]  ;;  %v7031_v62 = vld [vmem:[#allocation3 + $0x10] sm:$0xf]  ;;  %v7922_v63 = vld [vmem:[#allocation3 + $0x30] sm:$0xf0]  ;;  %v7024_v2 = vor.u32 %v7921_v59, %v7023_v58 }
 0x18d   : > { %5354 = vmatmul.bf16.vlgmr.msra.gmra.mxu2 %v7304_v40  ;;  %5374 = vmatmul.bf16.vlgmr.msra.gmra.mxu3 %v7448_v42  ;;  %v8123_v40 = vld [vmem:[%s10342_s7 + $0x1f8] sm:$0xff]  ;;  %v7032_v4 = vor.u32 %v7922_v63, %v7031_v62  ;;  %v7095_v19 = vld [vmem:[#allocation3 + $0x98] sm:$0xf]  ;;  %v7169_v56 = vld [vmem:[#allocation3 + $0x14c] sm:$0xf0] }
 0x18e   : > { %5484 = vmatpush.bf16.msrb.mxu2 %v8083_v37  ;;  %5573 = vmatpush.bf16.msrb.mxu3 %v8091_v38  ;;  %v7520_v37 = vor.u32 %v8046_v31, %v7519_v28  ;;  %v7088_v38 = vor.u32 %v7938_v30, %v7087_v29  ;;  %v8107_v42 = vld [vmem:[%s10342_s7 + $0x178] sm:$0xff]  ;;  %v7175_v57 = vld [vmem:[#allocation3 + $0x130] sm:$0xf]  ;;  %v7958_v58 = vld [vmem:[#allocation3 + $0x150] sm:$0xf0] }
 0x18f   : > { %5314 = vmatmul.bf16.vlgmr.msra.gmra.mxu0 %v7016_v43  ;;  %5395 = vmatpush.bf16.msrb.mxu1 %v8075_v44  ;;  %v8131_v43 = vld [vmem:[%s10342_s7 + $0x238] sm:$0xff]  ;;  %v7267_v44 = vld [vmem:[#allocation3 + $0x1f8] sm:$0xf]  ;;  %v7176_v63 = vor.u32 %v7958_v58, %v7175_v57 }
 0x190   : > { %5662 = vmatpush.bf16.msrb.mxu0 %v8099_v45  ;;  %v7983_v45 = vld [vmem:[#allocation3 + $0x218] sm:$0xf0]  ;;  %v7097_v23 = vld [vmem:[#allocation3 + $0xbc] sm:$0xf0]  ;;  %v7940_v27 = vld [vmem:[#allocation3 + $0xc0] sm:$0xf0] }
 0x191   : > { %v7103_v24 = vld [vmem:[#allocation3 + $0xa0] sm:$0xf] }
 0x192   : > { %5485 = vmatpush.bf16.msrb.mxu2 %v8082_v46  ;;  %5574 = vmatpush.bf16.msrb.mxu3 %v8090_v47  ;;  %v7411_v46 = vld [vmem:[#allocation3 + $0x318] sm:$0xf]  ;;  %v8019_v47 = vld [vmem:[#allocation3 + $0x338] sm:$0xf0]  ;;  %v7104_v31 = vor.u32 %v7940_v27, %v7103_v24 }
 0x193   : > { %5396 = vmatpush.bf16.msrb.mxu1 %v8074_v48  ;;  %v7555_v48 = vld [vmem:[#allocation3 + $0x438] sm:$0xf] }
 0x194   : > { %5663 = vmatpush.bf16.msrb.mxu0 %v8098_v49  ;;  %v8055_v49 = vld [vmem:[#allocation3 + $0x458] sm:$0xf0] }
 0x195   : > { %v7556_v54 = vor.u32 %v8055_v49, %v7555_v48 }
 0x196   : > { %5486 = vmatpush.bf16.msrb.mxu2 %v8081_v50  ;;  %5575 = vmatpush.bf16.msrb.mxu3 %v8089_v51  ;;  %v7123_v50 = vld [vmem:[#allocation3 + $0xd8] sm:$0xf]  ;;  %v7947_v51 = vld [vmem:[#allocation3 + $0xf8] sm:$0xf0] }
 0x197   : > { %5397 = vmatpush.bf16.msrb.mxu1 %v8073_v52  ;;  %v7268_v52 = vor.u32 %v7983_v45, %v7267_v44  ;;  %v7124_v55 = vor.u32 %v7947_v51, %v7123_v50  ;;  %v7139_v44 = vld [vmem:[#allocation3 + $0xe8] sm:$0xf]  ;;  %v7949_v45 = vld [vmem:[#allocation3 + $0x108] sm:$0xf0]  ;;  %v7952_v51 = vld [vmem:[#allocation3 + $0x124] sm:$0xf] }
 0x198   : > { %5664 = vmatpush.bf16.msrb.mxu0 %v8097_v53  ;;  %v7412_v53 = vor.u32 %v8019_v47, %v7411_v46  ;;  %v7140_v49 = vor.u32 %v7949_v45, %v7139_v44  ;;  %v9174_v50 = vld [vmem:[%s10343_s8] ss:$0 sm:$0xff]  ;;  %v3030_v44 = vld [vmem:[#allocation2 + $0xc] sm:$0xf] }
 0x19a   : > { %5487 = vmatpush.bf16.msrb.mxu2 %v8080_v60  ;;  %5576 = vmatpush.bf16.msrb.mxu3 %v8088_v61  ;;  %v7917_v60 = vld [vmem:[#allocation3 + $0xc] sm:$0xf]  ;;  %v7025_v61 = vld [vmem:[#allocation3 + $0x2c] sm:$0xf0] }
 0x19b   : > { %5398 = vmatpush.bf16.msrb.mxu1 %v8072_v5  ;;  %v7028_v3 = vor.u32 %v7917_v60, %v7025_v61  ;;  %v8114_v5 = vld [vmem:[%s10342_s7 + $0x1b0] sm:$0xff] }
 0x19c   : > { %5665 = vmatpush.bf16.msrb.mxu0 %v8096_v6  ;;  %5339 = vmatmul.bf16.gmra.mxu1 %v7196_v9  ;;  %v8122_v6 = vld [vmem:[%s10342_s7 + $0x1f0] sm:$0xff]  ;;  %v7925_v9 = vld [vmem:[#allocation3 + $0x4c] sm:$0xf] }
 0x19d   : > { %5359 = vmatmul.bf16.gmra.mxu2 %v7340_v21  ;;  %5379 = vmatmul.bf16.gmra.mxu3 %v7484_v26  ;;  %v7053_v21 = vld [vmem:[#allocation3 + $0x6c] sm:$0xf0] }
 0x19e   : > { %5488 = vmatpush.bf16.msrb.mxu2 %v8079_v7  ;;  %5577 = vmatpush.bf16.msrb.mxu3 %v8087_v8  ;;  %v8106_v7 = vld [vmem:[%s10342_s7 + $0x170] sm:$0xff]  ;;  %v7059_v26 = vld [vmem:[#allocation3 + $0x50] sm:$0xf] }
 0x19f   : > { %5319 = vmatmul.bf16.gmra.mxu0 %v7052_v35  ;;  %5399 = vmatpush.bf16.msrb.mxu1 %v8071_v10  ;;  %v8130_v8 = vld [vmem:[%s10342_s7 + $0x230] sm:$0xff]  ;;  %v7930_v35 = vld [vmem:[#allocation3 + $0x70] sm:$0xf0] }
 0x1a0   : > { %5666 = vmatpush.bf16.msrb.mxu0 %v8095_v11  ;;  %v7926_v10 = vld [vmem:[#allocation3 + $0x54] sm:$0xf]  ;;  %v7061_v11 = vld [vmem:[#allocation3 + $0x74] sm:$0xf0] }
 0x1a2   : > { %5489 = vmatpush.bf16.msrb.mxu2 %v8078_v0  ;;  %5578 = vmatpush.bf16.msrb.mxu3 %v8086_v12  ;;  %v7067_v0 = vld [vmem:[#allocation3 + $0x58] sm:$0xf]  ;;  %v7931_v12 = vld [vmem:[#allocation3 + $0x78] sm:$0xf0] }
 0x1a3   : > { %5400 = vmatpush.bf16.msrb.mxu1 %v8070_v13  ;;  %v7056_v13 = vor.u32 %v7925_v9, %v7053_v21  ;;  %v8104_v9 = vld [vmem:[%s10342_s7 + $0x160] sm:$0xff] }
 0x1a4   : > { %5667 = vmatpush.bf16.msrb.mxu0 %v8094_v14  ;;  %v7060_v14 = vor.u32 %v7930_v35, %v7059_v26  ;;  %v8128_v35 = vld [vmem:[%s10342_s7 + $0x220] sm:$0xff] }
 0x1a6   : > { %5490 = vmatpush.bf16.msrb.mxu2 %v8077_v15  ;;  %5579 = vmatpush.bf16.msrb.mxu3 %v8085_v16  ;;  %v7064_v15 = vor.u32 %v7926_v10, %v7061_v11  ;;  %v7068_v16 = vor.u32 %v7931_v12, %v7067_v0  ;;  %v7961_v10 = vld [vmem:[#allocation3 + $0x16c] sm:$0xf]  ;;  %v7197_v11 = vld [vmem:[#allocation3 + $0x18c] sm:$0xf0]  ;;  %v7966_v12 = vld [vmem:[#allocation3 + $0x190] sm:$0xf0] }
 0x1a7   : > { %5401 = vmatpush.bf16.msrb.mxu1 %v8069_v17  ;;  %v7934_v17 = vld [vmem:[#allocation3 + $0x94] sm:$0xf]  ;;  %v7203_v0 = vld [vmem:[#allocation3 + $0x170] sm:$0xf] }
 0x1a8   : > { %5668 = vmatpush.bf16.msrb.mxu0 %v8093_v18  ;;  %v7089_v18 = vld [vmem:[#allocation3 + $0xb4] sm:$0xf0] }
 0x1a9   : > { %v7092_v28 = vor.u32 %v7934_v17, %v7089_v18 }
 0x1aa   : > { %5491 = vmatpush.bf16.msrb.mxu2 %v8076_v20  ;;  %5580 = vmatpush.bf16.msrb.mxu3 %v8084_v22  ;;  %v7939_v20 = vld [vmem:[#allocation3 + $0xb8] sm:$0xf0] }
 0x1ab   : > { %5402 = vmatpush.bf16.msrb.mxu1 %v8068_v32  ;;  %v7935_v22 = vld [vmem:[#allocation3 + $0x9c] sm:$0xf]  ;;  %v7096_v29 = vor.u32 %v7939_v20, %v7095_v19  ;;  %v8113_v32 = vld [vmem:[%s10342_s7 + $0x1a8] sm:$0xff]  ;;  %v7200_v19 = vor.u32 %v7961_v10, %v7197_v11  ;;  %v7204_v20 = vor.u32 %v7966_v12, %v7203_v0 }
 0x1ac   : > { %5669 = vmatpush.bf16.msrb.mxu0 %v8092_v33  ;;  %5344 = vmatmul.bf16.gmra.mxu1 %v7232_v34  ;;  %v7100_v30 = vor.u32 %v7935_v22, %v7097_v23  ;;  %v8121_v33 = vld [vmem:[%s10342_s7 + $0x1e8] sm:$0xff]  ;;  %v7975_v10 = vld [vmem:[#allocation3 + $0x1d8] sm:$0xf0] }
 0x1ad   : > { %5364 = vmatmul.bf16.gmra.mxu2 %v7376_v36  ;;  %5384 = vmatmul.bf16.gmra.mxu3 %v7520_v37  ;;  %v8105_v34 = vld [vmem:[%s10342_s7 + $0x168] sm:$0xff]  ;;  %v7943_v37 = vld [vmem:[#allocation3 + $0xdc] sm:$0xf] }
 0x1ae   : > { %5840 = vmatpush.bf16.msra.mxu2 %v8115_v39  ;;  %5929 = vmatpush.bf16.msra.mxu3 %v8123_v40  ;;  %v8129_v36 = vld [vmem:[%s10342_s7 + $0x228] sm:$0xff]  ;;  %v7131_v39 = vld [vmem:[#allocation3 + $0xe0] sm:$0xf]  ;;  %v7948_v40 = vld [vmem:[#allocation3 + $0x100] sm:$0xf0] }
 0x1af   : > { %5324 = vmatmul.bf16.gmra.mxu0 %v7088_v38  ;;  %5751 = vmatpush.bf16.msra.mxu1 %v8107_v42  ;;  %v7125_v38 = vld [vmem:[#allocation3 + $0xfc] sm:$0xf0]  ;;  %v7944_v42 = vld [vmem:[#allocation3 + $0xe4] sm:$0xf]  ;;  %v7132_v47 = vor.u32 %v7948_v40, %v7131_v39  ;;  %v2998_v12 = vld [vmem:[#allocation2 + $0xc] sm:$0xf] }
 0x1b0   : > { %6018 = vmatpush.bf16.msra.mxu0 %v8131_v43  ;;  %v7133_v43 = vld [vmem:[#allocation3 + $0x104] sm:$0xf0]  ;;  %v7128_v46 = vor.u32 %v7943_v37, %v7125_v38  ;;  %v2863_v38 = vld [vmem:[#allocation2 + $0x4] sm:$0xf]  ;;  %3014 = vst [vmem:[#allocation3 + $0x24c] sm:$0xf] %v2998_v12 }
 0x1b1   : > { %v7136_v48 = vor.u32 %v7944_v42, %v7133_v43  ;;  %v2912_v43 = vrot.slane %v2863_v38, 5 }
 0x1b2   : > { %5841 = vmatpush.bf16.msra.mxu2 %v8114_v5  ;;  %5930 = vmatpush.bf16.msra.mxu3 %v8122_v6 }
 0x1b3   : > { %5752 = vmatpush.bf16.msra.mxu1 %v8106_v7  ;;  %v2914_v58 = vrot.slane %v2912_v43, 4 }
 0x1b4   : > { %6019 = vmatpush.bf16.msra.mxu0 %v8130_v8 }
 0x1b6   : > { %5842 = vmatpush.bf16.msra.mxu2 %v8113_v32  ;;  %5931 = vmatpush.bf16.msra.mxu3 %v8121_v33 }
 0x1b7   : > { %5753 = vmatpush.bf16.msra.mxu1 %v8105_v34  ;;  %v2616_v34 = vld [vmem:[#allocation2 + $0x8] sm:$0x1] }
 0x1b8   : > { %6020 = vmatpush.bf16.msra.mxu0 %v8129_v36  ;;  %v2658_v42 = vshll.u32 %v2616_v34, 16 }
 0x1bb   : > { %5754 = vmatpush.bf16.msra.mxu1 %v8104_v9  ;;  %v7233_v9 = vld [vmem:[#allocation3 + $0x1d4] sm:$0xf0] }
 0x1bc   : > { %5349 = vmatmul.bf16.gmra.mxu1 %v7268_v52  ;;  %v7161_v52 = vld [vmem:[#allocation3 + $0x144] sm:$0xf0]  ;;  %6021 = vmatpush.bf16.msra.mxu0 %v8128_v35  ;;  %v7239_v35 = vld [vmem:[#allocation3 + $0x1b8] sm:$0xf] }
 0x1bd   : > { %5369 = vmatmul.bf16.gmra.mxu2 %v7412_v53  ;;  %5389 = vmatmul.bf16.gmra.mxu3 %v7556_v54  ;;  %v7167_v53 = vld [vmem:[#allocation3 + $0x128] sm:$0xf]  ;;  %v7957_v54 = vld [vmem:[#allocation3 + $0x148] sm:$0xf0]  ;;  %v7164_v59 = vor.u32 %v7952_v51, %v7161_v52 }
 0x1be   : > { %v7168_v60 = vor.u32 %v7957_v54, %v7167_v53  ;;  %v2660_v53 = vrot.slane %v2658_v42, 5 }
 0x1bf   : > { %5329 = vmatmul.bf16.gmra.mxu0 %v7124_v55  ;;  %v7953_v55 = vld [vmem:[#allocation3 + $0x12c] sm:$0xf] }
 0x1c0   : > { %v7172_v62 = vor.u32 %v7953_v55, %v7169_v56 }
 0x1cc   : > { %5403 = vmatmul.bf16.vlgmr.msrb.gmra.mxu1 %v7020_v1 }
 0x1cd   : > { %5492 = vmatmul.bf16.vlgmr.msrb.gmra.mxu2 %v7024_v2  ;;  %5581 = vmatmul.bf16.vlgmr.msrb.gmra.mxu3 %v7028_v3  ;;  %v8112_v3 = vld [vmem:[%s10342_s7 + $0x1a0] sm:$0xff] }
 0x1ce   : > { %5843 = vmatpush.bf16.msra.mxu2 %v8112_v3 }
 0x1cf   : > { %5670 = vmatmul.bf16.vlgmr.msrb.gmra.mxu0 %v7032_v4  ;;  %v8120_v4 = vld [vmem:[%s10342_s7 + $0x1e0] sm:$0xff] }
 0x1d0   : > { %5932 = vmatpush.bf16.msra.mxu3 %v8120_v4  ;;  %v3032_v4 = vld [vmem:[#allocation2 + $0x14] sm:$0x1] }
 0x1dc   : > { %5408 = vmatmul.bf16.gmra.mxu1 %v7056_v13  ;;  %v7962_v13 = vld [vmem:[#allocation3 + $0x174] sm:$0xf] }
 0x1dd   : > { %5497 = vmatmul.bf16.gmra.mxu2 %v7060_v14  ;;  %5586 = vmatmul.bf16.gmra.mxu3 %v7064_v15  ;;  %v7205_v14 = vld [vmem:[#allocation3 + $0x194] sm:$0xf0] }
 0x1de   : > { %v7211_v15 = vld [vmem:[#allocation3 + $0x178] sm:$0xf]  ;;  %v7208_v24 = vor.u32 %v7962_v13, %v7205_v14  ;;  %v3058_v13 = vshll.u32 %v3030_v44, 16  ;;  %v7971_v14 = vld [vmem:[#allocation3 + $0x1bc] sm:$0xf] }
 0x1df   : > { %5675 = vmatmul.bf16.gmra.mxu0 %v7068_v16  ;;  %v7967_v16 = vld [vmem:[#allocation3 + $0x198] sm:$0xf0] }
 0x1e0   : > { %v7212_v27 = vor.u32 %v7967_v16, %v7211_v15  ;;  %v7241_v15 = vld [vmem:[#allocation3 + $0x1dc] sm:$0xf0] }
 0x1e1   : > { %v7247_v16 = vld [vmem:[#allocation3 + $0x1c0] sm:$0xf] }
 0x1ec   : > { %5413 = vmatmul.bf16.gmra.mxu1 %v7092_v28  ;;  %v2614_v28 = vld [vmem:[#allocation2] sm:$0xf] }
 0x1ed   : > { %5502 = vmatmul.bf16.gmra.mxu2 %v7096_v29  ;;  %5591 = vmatmul.bf16.gmra.mxu3 %v7100_v30  ;;  %v2639_v32 = vshrl.u32 %v2614_v28, 16  ;;  %v2642_v33 = vshll.u32 %v2614_v28, 16  ;;  %v3060_v28 = vrot.slane %v3058_v13, 5 }
 0x1ef   : > { %5680 = vmatmul.bf16.gmra.mxu0 %v7104_v31  ;;  %v2615_v31 = vld [vmem:[#allocation2 + $0x4] sm:$0xf]  ;;  %v2641_v39 = vrot.slane %v2639_v32, 4  ;;  %v2644_v40 = vrot.slane %v2642_v33, 5  ;;  %v7976_v32 = vld [vmem:[#allocation3 + $0x1e0] sm:$0xf0] }
 0x1f0   : > { %v2648_v36 = vshll.u32 %v2615_v31, 16  ;;  %v2652_v37 = vshrl.u32 %v2615_v31, 16  ;;  %v3074_v31 = vshll.u32 %v3032_v4, 16 }
 0x1f1   : > { %v2645_v52 = vor.u32 %v2644_v40, %v2641_v39  ;;  %v7240_v40 = vor.u32 %v7975_v10, %v7239_v35  ;;  %v3033_v35 = vld [vmem:[#allocation2 + $0x18] sm:$0xf]  ;;  %v2619_v10 = vld [vmem:[#allocation2 + $0x14] sm:$0x1] }
 0x1fc   : > { %5418 = vmatmul.bf16.gmra.mxu1 %v7128_v46  ;;  %v2650_v46 = vrot.slane %v2648_v36, 5 }
 0x1fd   : > { %5507 = vmatmul.bf16.gmra.mxu2 %v7132_v47  ;;  %5596 = vmatmul.bf16.gmra.mxu3 %v7136_v48  ;;  %v2654_v47 = vrot.slane %v2652_v37, 4  ;;  %v2862_v48 = vld [vmem:[#allocation2] sm:$0xe] }
 0x1fe   : > { %v6989_v54 = vrot.slane %v2862_v48, 9  ;;  %v7248_v48 = vor.u32 %v7976_v32, %v7247_v16 }
 0x1ff   : > { %5685 = vmatmul.bf16.gmra.mxu0 %v7140_v49  ;;  %v2864_v49 = vld [vmem:[#allocation2 + $0x8] sm:$0x1]  ;;  %v2655_v57 = vor.u32 %v2654_v47, %v2650_v46  ;;  %v7244_v47 = vor.u32 %v7971_v14, %v7241_v15  ;;  %v2682_v14 = vshll.u32 %v2619_v10, 16  ;;  %v2865_v15 = vld [vmem:[#allocation2 + $0xc] sm:$0xe] }
 0x200   : > { %v2913_v3 = vsel %vm8758_vm13, %v6989_v54, %v2912_v43  ;;  %v3076_v43 = vrot.slane %v3074_v31, 5  ;;  %v6990_v32 = vrot.slane %v2865_v15, 9 }
 0x201   : > { %v2656_v11 = vrot.slane %v2655_v57, 4  ;;  %2982 = vst [vmem:[#allocation3 + $0x248] sm:$0xf] %v2913_v3  ;;  %v2684_v31 = vrot.slane %v2682_v14, 5 }
 0x209   : > { %v5335_v61 = vpop.f32.mrf.mxu1 }
 0x20a   : > { %v9177_v1 = vadd.f32 %v9174_v50, %v5335_v61 }
 0x20c   : > { %v9179_v2 = vpop.f32.mrf.mxu0  ;;  %5423 = vmatmul.bf16.gmra.mxu1 %v7164_v59  ;;  %v2915_v59 = vrot.slane %v2864_v49, 5 }
 0x20d   : > { %5512 = vmatmul.bf16.gmra.mxu2 %v7168_v60  ;;  %5601 = vmatmul.bf16.gmra.mxu3 %v7172_v62  ;;  %v3031_v60 = vld [vmem:[#allocation2 + $0x10] sm:$0xf] }
 0x20e   : > { %v2916_v0 = vsel %vm8758_vm13, %v2914_v58, %v2915_v59 }
 0x20f   : > { %5690 = vmatmul.bf16.gmra.mxu0 %v7176_v63  ;;  %v2646_v63 = vrot.slane %v2645_v52, 4  ;;  %2983 = vst [vmem:[#allocation3 + $0x26c] sm:$0xf] %v2916_v0  ;;  %v2618_v52 = vld [vmem:[#allocation2 + $0x10] sm:$0xf] }
 0x210   : > { %v9187_v5 = vpop.f32.mrf.mxu2  ;;  %v5375_v6 = vpop.f32.mrf.mxu3 }
 0x211   : > { %v9190_v7 = vadd.f32 %v9174_v50, %v5375_v6  ;;  %v5337_v8 = vpop.f32.mrf.mxu1  ;;  %v3055_v6 = vshrl.u32 %v3030_v44, 16 }
 0x212   : > { %v9196_v21 = vadd.f32 %v9174_v50, %v5337_v8  ;;  %v7970_v8 = vld [vmem:[#allocation3 + $0x1b4] sm:$0xf] }
 0x213   : > { %v7236_v39 = vor.u32 %v7970_v8, %v7233_v9  ;;  %v8111_v8 = vld [vmem:[%s10342_s7 + $0x198] sm:$0xff] }
 0x214   : > { %v9198_v26 = vpop.f32.mrf.mxu0  ;;  %v8119_v9 = vld [vmem:[%s10342_s7 + $0x1d8] sm:$0xff]  ;;  %5844 = vmatpush.bf16.msra.mxu2 %v8111_v8  ;;  %v3035_v8 = vld [vmem:[#allocation2 + $0x20] sm:$0x1] }
 0x215   : > { %5933 = vmatpush.bf16.msra.mxu3 %v8119_v9  ;;  %v3082_v9 = vshll.u32 %v3033_v35, 16 }
 0x217   : > { %v3084_v15 = vrot.slane %v3082_v9, 5 }
 0x218   : > { %v9203_v17 = vpop.f32.mrf.mxu2  ;;  %v5377_v18 = vpop.f32.mrf.mxu3 }
 0x219   : > { %v9206_v22 = vadd.f32 %v9174_v50, %v5377_v18  ;;  %v5340_v23 = vpop.f32.mrf.mxu1  ;;  %v2651_v18 = vsel %vm8726_vm10, %v2646_v63, %v2650_v46  ;;  %v2676_v63 = vshrl.u32 %v2618_v52, 16 }
 0x21a   : > { %v9209_v29 = vadd.f32 %v9174_v50, %v5340_v23  ;;  %v3068_v23 = vshrl.u32 %v3031_v60, 16  ;;  %2846 = vst [vmem:[#allocation3 + $0x244] sm:$0xf] %v2651_v18 }
 0x21b   : > { %v2678_v12 = vrot.slane %v2676_v63, 4 }
 0x21c   : > { %v9211_v30 = vpop.f32.mrf.mxu0  ;;  %5428 = vmatmul.bf16.gmra.mxu1 %v7200_v19  ;;  %v3057_v19 = vrot.slane %v3055_v6, 4  ;;  %v3070_v34 = vrot.slane %v3068_v23, 4  ;;  %v2867_v23 = vld [vmem:[#allocation2 + $0x14] sm:$0x1] }
 0x21d   : > { %5517 = vmatmul.bf16.gmra.mxu2 %v7204_v20  ;;  %5606 = vmatmul.bf16.gmra.mxu3 %v7208_v24  ;;  %v3064_v20 = vshll.u32 %v3031_v60, 16  ;;  %v2661_v24 = vsel %vm8726_vm10, %v2656_v11, %v2660_v53  ;;  %v2672_v60 = vshll.u32 %v2618_v52, 16  ;;  %v7980_v52 = vld [vmem:[#allocation3 + $0x204] sm:$0xf] }
 0x21e   : > { %2847 = vst [vmem:[#allocation3 + $0x268] sm:$0xf] %v2661_v24  ;;  %v3061_v37 = vor.u32 %v3060_v28, %v3057_v19  ;;  %v3079_v24 = vshrl.u32 %v3033_v35, 16 }
 0x21f   : > { %5695 = vmatmul.bf16.gmra.mxu0 %v7212_v27  ;;  %v2999_v27 = vld [vmem:[#allocation2 + $0x10] sm:$0xf]  ;;  %v3066_v33 = vrot.slane %v3064_v20, 5  ;;  %v2674_v0 = vrot.slane %v2672_v60, 5  ;;  %v7283_v60 = vld [vmem:[#allocation3 + $0x208] sm:$0xf] }
 0x220   : > { %v9213_v45 = vpop.f32.mrf.mxu2  ;;  %v5380_v51 = vpop.f32.mrf.mxu3  ;;  %3015 = vst [vmem:[#allocation3 + $0x270] sm:$0xf] %v2999_v27  ;;  %v3062_v49 = vrot.slane %v3061_v37, 4  ;;  %v2866_v20 = vld [vmem:[#allocation2 + $0x10] sm:$0xf] }
 0x221   : > { %v9216_v55 = vadd.f32 %v9174_v50, %v5380_v51  ;;  %v5342_v56 = vpop.f32.mrf.mxu1  ;;  %v3071_v42 = vor.u32 %v3070_v34, %v3066_v33  ;;  %v2617_v51 = vld [vmem:[#allocation2 + $0xc] sm:$0xf]  ;;  %v2679_v19 = vor.u32 %v2678_v12, %v2674_v0  ;;  %v3098_v12 = vshll.u32 %v3035_v8, 16 }
 0x222   : > { %v9219_v61 = vadd.f32 %v9174_v50, %v5342_v56  ;;  %v2663_v57 = vshrl.u32 %v2617_v51, 16  ;;  %v2666_v58 = vshll.u32 %v2617_v51, 16  ;;  %v3067_v59 = vsel %vm8726_vm10, %v3062_v49, %v3066_v33  ;;  %v7275_v49 = vld [vmem:[#allocation3 + $0x200] sm:$0xf]  ;;  %v7984_v51 = vld [vmem:[#allocation3 + $0x220] sm:$0xf0] }
 0x223   : > { %v3072_v56 = vrot.slane %v3071_v42, 4  ;;  %3262 = vst [vmem:[#allocation3 + $0x250] sm:$0xf] %v3067_v59  ;;  %v2919_v33 = vrot.slane %v2866_v20, 5  ;;  %v2680_v42 = vrot.slane %v2679_v19, 4  ;;  %v7276_v20 = vor.u32 %v7984_v51, %v7275_v49 }
 0x224   : > { %v9221_v62 = vpop.f32.mrf.mxu0  ;;  %v2665_v4 = vrot.slane %v2663_v57, 4  ;;  %v2668_v6 = vrot.slane %v2666_v58, 5  ;;  %v3000_v59 = vld [vmem:[#allocation2 + $0x18] sm:$0xf] }
 0x225   : > { %v3077_v3 = vsel %vm8726_vm10, %v3072_v56, %v3076_v43  ;;  %v2922_v43 = vrot.slane %v2867_v23, 5  ;;  %v7277_v56 = vld [vmem:[#allocation3 + $0x224] sm:$0xf0]  ;;  %v2920_v57 = vsel %vm8758_vm13, %v6990_v32, %v2919_v33  ;;  %v2921_v58 = vrot.slane %v2919_v33, 4  ;;  %3016 = vst [vmem:[#allocation3 + $0x294] sm:$0xf] %v3000_v59 }
 0x226   : > { %3263 = vst [vmem:[#allocation3 + $0x274] sm:$0xf] %v3077_v3  ;;  %v2669_v11 = vor.u32 %v2668_v6, %v2665_v4  ;;  %v2685_v63 = vsel %vm8726_vm10, %v2680_v42, %v2684_v31  ;;  %v3001_v3 = vld [vmem:[#allocation2 + $0x1c] sm:$0xf]  ;;  %v3081_v4 = vrot.slane %v3079_v24, 4  ;;  %v7280_v23 = vor.u32 %v7980_v52, %v7277_v56 }
 0x227   : > { %2984 = vst [vmem:[#allocation3 + $0x290] sm:$0xf] %v2920_v57  ;;  %v2923_v6 = vsel %vm8758_vm13, %v2921_v58, %v2922_v43  ;;  %v3100_v33 = vrot.slane %v3098_v12, 5  ;;  %v2622_v59 = vld [vmem:[#allocation2 + $0x20] sm:$0x1] }
 0x228   : > { %v9231_v36 = vpop.f32.mrf.mxu2  ;;  %v5382_v38 = vpop.f32.mrf.mxu3  ;;  %v2670_v18 = vrot.slane %v2669_v11, 4  ;;  %2849 = vst [vmem:[#allocation3 + $0x2b0] sm:$0xf] %v2685_v63  ;;  %v7985_v11 = vld [vmem:[#allocation3 + $0x228] sm:$0xf0]  ;;  %v3085_v32 = vor.u32 %v3084_v15, %v3081_v4 }
 0x229   : > { %v9234_v44 = vadd.f32 %v9174_v50, %v5382_v38  ;;  %v5345_v46 = vpop.f32.mrf.mxu1  ;;  %v8103_v38 = vld [vmem:[%s10342_s7 + $0x158] sm:$0xff]  ;;  %2985 = vst [vmem:[#allocation3 + $0x2b4] sm:$0xf] %v2923_v6  ;;  %v7284_v31 = vor.u32 %v7985_v11, %v7283_v60  ;;  %v2706_v6 = vshll.u32 %v2622_v59, 16  ;;  %v3037_v59 = vld [vmem:[#allocation2 + $0x28] sm:$0xf] }
 0x22a   : > { %v9237_v53 = vadd.f32 %v9174_v50, %v5345_v46  ;;  %v3034_v46 = vld [vmem:[#allocation2 + $0x1c] sm:$0xf]  ;;  %5755 = vmatpush.bf16.msra.mxu1 %v8103_v38  ;;  %3017 = vst [vmem:[#allocation3 + $0x2b8] sm:$0xf] %v3001_v3  ;;  %v2620_v38 = vld [vmem:[#allocation2 + $0x18] sm:$0xf] }
 0x22b   : > { %10376 = vst [vmem:[#allocation14_spill] sm:$0xff] %v9234_v44  ;;  %v3088_v10 = vshll.u32 %v3034_v46, 16  ;;  %v2708_v12 = vrot.slane %v2706_v6, 5  ;;  %v2869_v15 = vld [vmem:[#allocation2 + $0x1c] sm:$0xf] }
 0x22c   : > { %v9239_v54 = vpop.f32.mrf.mxu0  ;;  %5433 = vmatmul.bf16.gmra.mxu1 %v7236_v39  ;;  %v8127_v39 = vld [vmem:[%s10342_s7 + $0x218] sm:$0xff] }
 0x22d   : > { %5522 = vmatmul.bf16.gmra.mxu2 %v7240_v40  ;;  %5611 = vmatmul.bf16.gmra.mxu3 %v7244_v47  ;;  %v2675_v40 = vsel %vm8726_vm10, %v2670_v18, %v2674_v0  ;;  %v7979_v47 = vld [vmem:[#allocation3 + $0x1fc] sm:$0xf]  ;;  %v3092_v0 = vshrl.u32 %v3034_v46, 16  ;;  %v2687_v46 = vshrl.u32 %v2620_v38, 16 }
 0x22e   : > { %2848 = vst [vmem:[#allocation3 + $0x28c] sm:$0xf] %v2675_v40  ;;  %6022 = vmatpush.bf16.msra.mxu0 %v8127_v39  ;;  %v2621_v39 = vld [vmem:[#allocation2 + $0x1c] sm:$0xf] }
 0x22f   : > { %5700 = vmatmul.bf16.gmra.mxu0 %v7248_v48  ;;  %v7269_v48 = vld [vmem:[#allocation3 + $0x21c] sm:$0xf0]  ;;  %v3094_v24 = vrot.slane %v3092_v0, 4  ;;  %v2696_v49 = vshll.u32 %v2621_v39, 16  ;;  %v2700_v51 = vshrl.u32 %v2621_v39, 16  ;;  %v2689_v56 = vrot.slane %v2687_v46, 4 }
 0x230   : > { %v9251_v13 = vpop.f32.mrf.mxu2  ;;  %v5385_v16 = vpop.f32.mrf.mxu3  ;;  %v7272_v19 = vor.u32 %v7979_v47, %v7269_v48  ;;  %v2690_v47 = vshll.u32 %v2620_v38, 16  ;;  %v3086_v48 = vrot.slane %v3085_v32, 4  ;;  %v3002_v39 = vld [vmem:[#allocation2 + $0x24] sm:$0xf]  ;;  %v7988_v46 = vld [vmem:[#allocation3 + $0x244] sm:$0xf] }
 0x231   : > { %v9254_v27 = vadd.f32 %v9174_v50, %v5385_v16  ;;  %v5347_v28 = vpop.f32.mrf.mxu1  ;;  %v3090_v16 = vrot.slane %v3088_v10, 5  ;;  %v2698_v60 = vrot.slane %v2696_v49, 5  ;;  %v2702_v63 = vrot.slane %v2700_v51, 4  ;;  %v2868_v10 = vld [vmem:[#allocation2 + $0x18] sm:$0xe] }
 0x232   : > { %v9257_v34 = vadd.f32 %v9174_v50, %v5347_v28  ;;  %v2692_v57 = vrot.slane %v2690_v47, 5  ;;  %v7305_v47 = vld [vmem:[#allocation3 + $0x264] sm:$0xf0]  ;;  %v7993_v49 = vld [vmem:[#allocation3 + $0x268] sm:$0xf0] }
 0x233   : > { %10377 = vst [vmem:[#allocation15_spill] sm:$0xff] %v9254_v27  ;;  %v3095_v43 = vor.u32 %v3094_v24, %v3090_v16  ;;  %v3091_v58 = vsel %vm8726_vm10, %v3086_v48, %v3090_v16  ;;  %v2703_v9 = vor.u32 %v2702_v63, %v2698_v60  ;;  %v2926_v24 = vrot.slane %v2869_v15, 5  ;;  %v7311_v48 = vld [vmem:[#allocation3 + $0x248] sm:$0xf]  ;;  %v7989_v51 = vld [vmem:[#allocation3 + $0x24c] sm:$0xf] }
 0x234   : > { %v9259_v37 = vpop.f32.mrf.mxu0  ;;  %3264 = vst [vmem:[#allocation3 + $0x298] sm:$0xf] %v3091_v58  ;;  %v2693_v4 = vor.u32 %v2692_v57, %v2689_v56  ;;  %v7319_v63 = vld [vmem:[#allocation3 + $0x250] sm:$0xf] }
 0x235   : > { %v3096_v52 = vrot.slane %v3095_v43, 4  ;;  %v2928_v58 = vrot.slane %v2926_v24, 4  ;;  %3018 = vst [vmem:[#allocation3 + $0x2dc] sm:$0xf] %v3002_v39 }
 0x236   : > { %v2694_v0 = vrot.slane %v2693_v4, 4 }
 0x237   : > { %v3101_v3 = vsel %vm8726_vm10, %v3096_v52, %v3100_v33  ;;  %v7313_v52 = vld [vmem:[#allocation3 + $0x26c] sm:$0xf0] }
 0x238   : > { %v9275_v14 = vpop.f32.mrf.mxu2  ;;  %v5387_v18 = vpop.f32.mrf.mxu3  ;;  %3265 = vst [vmem:[#allocation3 + $0x2bc] sm:$0xf] %v3101_v3  ;;  %v2699_v33 = vsel %vm8726_vm10, %v2694_v0, %v2698_v60  ;;  %v3038_v60 = vld [vmem:[#allocation2 + $0x2c] sm:$0x1] }
 0x239   : > { %v9278_v28 = vadd.f32 %v9174_v50, %v5387_v18  ;;  %v5350_v35 = vpop.f32.mrf.mxu1  ;;  %v2870_v18 = vld [vmem:[#allocation2 + $0x20] sm:$0x1]  ;;  %2850 = vst [vmem:[#allocation3 + $0x2d4] sm:$0xf] %v2699_v33  ;;  %v7994_v0 = vld [vmem:[#allocation3 + $0x270] sm:$0xf0]  ;;  %v7312_v33 = vor.u32 %v7993_v49, %v7311_v48 }
 0x23a   : > { %v9281_v40 = vadd.f32 %v9174_v50, %v5350_v35  ;;  %v3036_v35 = vld [vmem:[#allocation2 + $0x24] sm:$0xf]  ;;  %v2929_v38 = vrot.slane %v2870_v18, 5  ;;  %v3122_v15 = vshll.u32 %v3038_v60, 16  ;;  %v5316_v18 = vadd.f32 %v9174_v50, %v9179_v2  ;;  %v2624_v2 = vld [vmem:[#allocation2 + $0x28] sm:$0xf] }
 0x23b   : > { %10378 = vst [vmem:[#allocation16_spill] sm:$0xff] %v9278_v28  ;;  %v3103_v43 = vshrl.u32 %v3036_v35, 16  ;;  %v3106_v4 = vshll.u32 %v3036_v35, 16  ;;  %v7308_v35 = vor.u32 %v7988_v46, %v7305_v47  ;;  %v2720_v47 = vshll.u32 %v2624_v2, 16  ;;  %v2627_v28 = vld [vmem:[#allocation2 + $0x34] sm:$0xf] }
 0x23c   : > { %v9283_v42 = vpop.f32.mrf.mxu0  ;;  %5438 = vmatmul.bf16.gmra.mxu1 %v7272_v19  ;;  %v2930_v6 = vsel %vm8758_vm13, %v2928_v58, %v2929_v38  ;;  %v7316_v38 = vor.u32 %v7989_v51, %v7313_v52  ;;  %v7320_v58 = vor.u32 %v7994_v0, %v7319_v63  ;;  %v3124_v60 = vrot.slane %v3122_v15, 5  ;;  %v3039_v63 = vld [vmem:[#allocation2 + $0x30] sm:$0xf] }
 0x23d   : > { %5527 = vmatmul.bf16.gmra.mxu2 %v7276_v20  ;;  %5616 = vmatmul.bf16.gmra.mxu3 %v7280_v23  ;;  %v2704_v20 = vrot.slane %v2703_v9, 4  ;;  %v6991_v23 = vrot.slane %v2868_v10, 9  ;;  %v3105_v3 = vrot.slane %v3103_v43, 4  ;;  %v3003_v9 = vld [vmem:[#allocation2 + $0x28] sm:$0xf]  ;;  %v3112_v10 = vshll.u32 %v3037_v59, 16 }
 0x23e   : > { %2987 = vst [vmem:[#allocation3 + $0x2fc] sm:$0xf] %v2930_v6  ;;  %v2724_v48 = vshrl.u32 %v2624_v2, 16  ;;  %v8118_v0 = vld [vmem:[%s10342_s7 + $0x1d0] sm:$0xff] }
 0x23f   : > { %5705 = vmatmul.bf16.gmra.mxu0 %v7284_v31  ;;  %v2709_v56 = vsel %vm8726_vm10, %v2704_v20, %v2708_v12  ;;  %v2927_v57 = vsel %vm8758_vm13, %v6991_v23, %v2926_v24  ;;  %v3108_v12 = vrot.slane %v3106_v4, 5  ;;  %v3114_v20 = vrot.slane %v3112_v10, 5  ;;  %3019 = vst [vmem:[#allocation3 + $0x300] sm:$0xf] %v3003_v9  ;;  %v2623_v4 = vld [vmem:[#allocation2 + $0x24] sm:$0xf]  ;;  %5934 = vmatpush.bf16.msra.mxu3 %v8118_v0 }
 0x240   : > { %v9289_v8 = vpop.f32.mrf.mxu2  ;;  %v5390_v11 = vpop.f32.mrf.mxu3  ;;  %2851 = vst [vmem:[#allocation3 + $0x2f8] sm:$0xf] %v2709_v56  ;;  %v2711_v10 = vshrl.u32 %v2623_v4, 16  ;;  %v7347_v0 = vld [vmem:[#allocation3 + $0x290] sm:$0xf] }
 0x241   : > { %v9292_v16 = vadd.f32 %v9174_v50, %v5390_v11  ;;  %v5352_v19 = vpop.f32.mrf.mxu1  ;;  %2986 = vst [vmem:[#allocation3 + $0x2d8] sm:$0xf] %v2927_v57  ;;  %v3116_v11 = vshrl.u32 %v3037_v59, 16  ;;  %v3109_v43 = vor.u32 %v3108_v12, %v3105_v3  ;;  %v8110_v3 = vld [vmem:[%s10342_s7 + $0x190] sm:$0xff]  ;;  %v2625_v12 = vld [vmem:[#allocation2 + $0x2c] sm:$0x1] }
 0x242   : > { %v9295_v31 = vadd.f32 %v9174_v50, %v5352_v19  ;;  %v2713_v51 = vrot.slane %v2711_v10, 4  ;;  %5845 = vmatpush.bf16.msra.mxu2 %v8110_v3  ;;  %v2873_v10 = vld [vmem:[#allocation2 + $0x2c] sm:$0x1] }
 0x243   : > { %10379 = vst [vmem:[#allocation17_spill] sm:$0xff] %v9292_v16  ;;  %v3118_v23 = vrot.slane %v3116_v11, 4  ;;  %v3110_v39 = vrot.slane %v3109_v43, 4  ;;  %v2714_v11 = vshll.u32 %v2623_v4, 16  ;;  %v2936_v3 = vrot.slane %v2873_v10, 5 }
 0x244   : > { %v9297_v32 = vpop.f32.mrf.mxu0 }
 0x245   : > { %v3119_v59 = vor.u32 %v3118_v23, %v3114_v20  ;;  %v3115_v49 = vsel %vm8726_vm10, %v3110_v39, %v3114_v20  ;;  %v2716_v52 = vrot.slane %v2714_v11, 5  ;;  %v2722_v20 = vrot.slane %v2720_v47, 5 }
 0x246   : > { %3266 = vst [vmem:[#allocation3 + $0x2e0] sm:$0xf] %v3115_v49  ;;  %v2726_v23 = vrot.slane %v2724_v48, 4 }
 0x247   : > { %v3120_v46 = vrot.slane %v3119_v59, 4  ;;  %v2717_v15 = vor.u32 %v2716_v52, %v2713_v51  ;;  %v2872_v59 = vld [vmem:[#allocation2 + $0x28] sm:$0xf]  ;;  %v7997_v51 = vld [vmem:[#allocation3 + $0x28c] sm:$0xf] }
 0x248   : > { %v9309_v19 = vpop.f32.mrf.mxu2  ;;  %v5392_v24 = vpop.f32.mrf.mxu3  ;;  %v2727_v2 = vor.u32 %v2726_v23, %v2722_v20  ;;  %v7341_v52 = vld [vmem:[#allocation3 + $0x2ac] sm:$0xf0] }
 0x249   : > { %v9312_v56 = vadd.f32 %v9174_v50, %v5392_v24  ;;  %v5404_v57 = vpop.f32.mrf.mxu1  ;;  %v3125_v9 = vsel %vm8726_vm10, %v3120_v46, %v3124_v60  ;;  %v2730_v24 = vshll.u32 %v2625_v12, 16  ;;  %v3130_v60 = vshll.u32 %v3039_v63, 16  ;;  %v8002_v12 = vld [vmem:[#allocation3 + $0x2b0] sm:$0xf0] }
 0x24a   : > { %v5405_v6 = vadd.f32 %v5404_v57, %v5316_v18  ;;  %3267 = vst [vmem:[#allocation3 + $0x304] sm:$0xf] %v3125_v9  ;;  %v2718_v57 = vrot.slane %v2717_v15, 4  ;;  %v2933_v46 = vrot.slane %v2872_v59, 5  ;;  %v3004_v9 = vld [vmem:[#allocation2 + $0x30] sm:$0xf] }
 0x24b   : > { %10380 = vst [vmem:[#allocation18_spill] sm:$0xff] %v9312_v56  ;;  %v2732_v39 = vrot.slane %v2730_v24, 5  ;;  %v2728_v15 = vrot.slane %v2727_v2, 4  ;;  %v7998_v24 = vld [vmem:[#allocation3 + $0x294] sm:$0xf] }
 0x24c   : > { %v9314_v16 = vpop.f32.mrf.mxu0  ;;  %5443 = vmatmul.bf16.gmra.mxu1 %v7308_v35  ;;  %v3127_v35 = vshrl.u32 %v3039_v63, 16  ;;  %v2723_v63 = vsel %vm8726_vm10, %v2718_v57, %v2722_v20  ;;  %v2935_v23 = vrot.slane %v2933_v46, 4  ;;  %3020 = vst [vmem:[#allocation3 + $0x324] sm:$0xf] %v3004_v9  ;;  %v3041_v2 = vld [vmem:[#allocation2 + $0x38] sm:$0x1] }
 0x24d   : > { %5532 = vmatmul.bf16.gmra.mxu2 %v7312_v33  ;;  %5621 = vmatmul.bf16.gmra.mxu3 %v7316_v38  ;;  %v5318_v33 = vadd.f32 %v9174_v50, %v9198_v26  ;;  %v8102_v26 = vld [vmem:[%s10342_s7 + $0x150] sm:$0xff]  ;;  %2852 = vst [vmem:[#allocation3 + $0x31c] sm:$0xf] %v2723_v63  ;;  %v2733_v57 = vsel %vm8726_vm10, %v2728_v15, %v2732_v39 }
 0x24e   : > { %5756 = vmatpush.bf16.msra.mxu1 %v8102_v26  ;;  %v2937_v59 = vsel %vm8758_vm13, %v2935_v23, %v2936_v3  ;;  %2853 = vst [vmem:[#allocation3 + $0x340] sm:$0xf] %v2733_v57  ;;  %v3129_v10 = vrot.slane %v3127_v35, 4  ;;  %v5321_v26 = vadd.f32 %v9174_v50, %v9211_v30  ;;  %v7344_v63 = vor.u32 %v7997_v51, %v7341_v52  ;;  %v2626_v56 = vld [vmem:[#allocation2 + $0x30] sm:$0xf] }
 0x24f   : > { %5710 = vmatmul.bf16.gmra.mxu0 %v7320_v58  ;;  %v2871_v58 = vld [vmem:[#allocation2 + $0x24] sm:$0xe]  ;;  %2989 = vst [vmem:[#allocation3 + $0x344] sm:$0xf] %v2937_v59  ;;  %v7348_v15 = vor.u32 %v8002_v12, %v7347_v0  ;;  %v2735_v52 = vshrl.u32 %v2626_v56, 16  ;;  %v2744_v59 = vshll.u32 %v2627_v28, 16 }
 0x250   : > { %v5493_v18 = vpop.f32.mrf.mxu2  ;;  %v5582_v43 = vpop.f32.mrf.mxu3  ;;  %v6992_v11 = vrot.slane %v2871_v58, 9  ;;  %v3040_v58 = vld [vmem:[#allocation2 + $0x34] sm:$0xf]  ;;  %v2748_v0 = vshrl.u32 %v2627_v28, 16 }
 0x251   : > { %v5494_v38 = vadd.f32 %v5493_v18, %v5405_v6  ;;  %v5406_v4 = vpop.f32.mrf.mxu1  ;;  %v8126_v6 = vld [vmem:[%s10342_s7 + $0x210] sm:$0xff] }
 0x252   : > { %v5407_v47 = vadd.f32 %v5406_v4, %v5318_v33  ;;  %v2934_v18 = vsel %vm8758_vm13, %v6992_v11, %v2933_v46  ;;  %v7349_v33 = vld [vmem:[#allocation3 + $0x2b4] sm:$0xf0]  ;;  %6023 = vmatpush.bf16.msra.mxu0 %v8126_v6  ;;  %v3005_v4 = vld [vmem:[#allocation2 + $0x34] sm:$0xf]  ;;  %v3132_v11 = vrot.slane %v3130_v60, 5  ;;  %v3136_v46 = vshll.u32 %v3040_v58, 16 }
 0x253   : > { %v5583_v49 = vadd.f32 %v5582_v43, %v5494_v38  ;;  %v7355_v38 = vld [vmem:[#allocation3 + $0x298] sm:$0xf]  ;;  %v8003_v43 = vld [vmem:[#allocation3 + $0x2b8] sm:$0xf0]  ;;  %2988 = vst [vmem:[#allocation3 + $0x320] sm:$0xf] %v2934_v18 }
 0x254   : > { %v9328_v48 = vpop.f32.mrf.mxu0  ;;  %3021 = vst [vmem:[#allocation3 + $0x348] sm:$0xf] %v3005_v4  ;;  %v3133_v3 = vor.u32 %v3132_v11, %v3129_v10  ;;  %v3138_v23 = vrot.slane %v3136_v46, 5  ;;  %v7356_v57 = vor.u32 %v8003_v43, %v7355_v38  ;;  %v2628_v4 = vld [vmem:[#allocation2 + $0x38] sm:$0x1]  ;;  %v2750_v10 = vrot.slane %v2748_v0, 4 }
 0x255   : > { %v9341_v20 = vadd.f32 %v9314_v16, %v5583_v49  ;;  %v3140_v16 = vshrl.u32 %v3040_v58, 16  ;;  %v3146_v49 = vshll.u32 %v3041_v2, 16  ;;  %v2746_v2 = vrot.slane %v2744_v59, 5  ;;  %v8011_v59 = vld [vmem:[#allocation3 + $0x2f8] sm:$0xf0] }
 0x256   : > { %v3134_v51 = vrot.slane %v3133_v3, 4  ;;  %v2754_v46 = vshll.u32 %v2628_v4, 16  ;;  %v8007_v4 = vld [vmem:[#allocation3 + $0x2dc] sm:$0xf] }
 0x257   : > { %10381 = vst [vmem:[#allocation19_spill] sm:$0xff] %v9341_v20  ;;  %v7352_v20 = vor.u32 %v7998_v24, %v7349_v33  ;;  %v3142_v35 = vrot.slane %v3140_v16, 4  ;;  %v3148_v60 = vrot.slane %v3146_v49, 5  ;;  %v2737_v24 = vrot.slane %v2735_v52, 4  ;;  %v2875_v16 = vld [vmem:[#allocation2 + $0x34] sm:$0xf] }
 0x258   : > { %v5495_v6 = vpop.f32.mrf.mxu2  ;;  %v5584_v39 = vpop.f32.mrf.mxu3  ;;  %v3139_v12 = vsel %vm8726_vm10, %v3134_v51, %v3138_v23  ;;  %v2876_v49 = vld [vmem:[#allocation2 + $0x38] sm:$0x1] }
 0x259   : > { %v5496_v18 = vadd.f32 %v5495_v6, %v5407_v47  ;;  %v5409_v9 = vpop.f32.mrf.mxu1  ;;  %v3143_v58 = vor.u32 %v3142_v35, %v3138_v23  ;;  %v2738_v47 = vshll.u32 %v2626_v56, 16  ;;  %3268 = vst [vmem:[#allocation3 + $0x328] sm:$0xf] %v3139_v12  ;;  %v3042_v6 = vld [vmem:[#allocation2 + $0x3c] sm:$0xf]  ;;  %v2940_v23 = vrot.slane %v2875_v16, 5 }
 0x25a   : > { %v5410_v30 = vadd.f32 %v5409_v9, %v5321_v26  ;;  %v2874_v26 = vld [vmem:[#allocation2 + $0x30] sm:$0xe]  ;;  %v3043_v9 = vld [vmem:[#allocation2 + $0x40] sm:$0xf]  ;;  %v2943_v52 = vrot.slane %v2876_v49, 5 }
 0x25b   : > { %v5585_v27 = vadd.f32 %v5584_v39, %v5496_v18  ;;  %v3144_v38 = vrot.slane %v3143_v58, 4  ;;  %v2740_v43 = vrot.slane %v2738_v47, 5  ;;  %v6993_v3 = vrot.slane %v2874_v26, 9  ;;  %v3006_v58 = vld [vmem:[#allocation2 + $0x3c] sm:$0xf] }
 0x25c   : > { %v9349_v44 = vpop.f32.mrf.mxu0  ;;  %5448 = vmatmul.bf16.gmra.mxu1 %v7344_v63  ;;  %v2751_v63 = vor.u32 %v2750_v10, %v2746_v2  ;;  %v8006_v47 = vld [vmem:[#allocation3 + $0x2d4] sm:$0xf]  ;;  %3022 = vst [vmem:[#allocation3 + $0x36c] sm:$0xf] %v3006_v58  ;;  %v7385_v10 = vld [vmem:[#allocation3 + $0x2fc] sm:$0xf0] }
 0x25d   : > { %5537 = vmatmul.bf16.gmra.mxu2 %v7348_v15  ;;  %v9354_v33 = vadd.f32 %v9328_v48, %v5585_v27  ;;  %5626 = vmatmul.bf16.gmra.mxu3 %v7352_v20  ;;  %v3149_v28 = vsel %vm8726_vm10, %v3144_v38, %v3148_v60  ;;  %v2741_v11 = vor.u32 %v2740_v43, %v2737_v24  ;;  %v2756_v15 = vrot.slane %v2754_v46, 5  ;;  %v3044_v38 = vld [vmem:[#allocation2 + $0x44] sm:$0x1]  ;;  %v8012_v16 = vld [vmem:[#allocation3 + $0x300] sm:$0xf0] }
 0x25e   : > { %v5323_v27 = vadd.f32 %v9174_v50, %v9221_v62  ;;  %3269 = vst [vmem:[#allocation3 + $0x34c] sm:$0xf] %v3149_v28  ;;  %v2752_v51 = vrot.slane %v2751_v63, 4  ;;  %v7377_v62 = vld [vmem:[#allocation3 + $0x2f4] sm:$0xf0]  ;;  %v2941_v12 = vsel %vm8758_vm13, %v6993_v3, %v2940_v23  ;;  %v2942_v24 = vrot.slane %v2940_v23, 4 }
 0x25f   : > { %5715 = vmatmul.bf16.gmra.mxu0 %v7356_v57  ;;  %v2742_v39 = vrot.slane %v2741_v11, 4  ;;  %v3151_v43 = vshrl.u32 %v3042_v6, 16  ;;  %v3007_v11 = vld [vmem:[#allocation2 + $0x40] sm:$0xf]  ;;  %v3154_v46 = vshll.u32 %v3042_v6, 16  ;;  %v3160_v26 = vshll.u32 %v3043_v9, 16 }
 0x260   : > { %v5498_v56 = vpop.f32.mrf.mxu2  ;;  %v5587_v20 = vpop.f32.mrf.mxu3  ;;  %v2757_v28 = vsel %vm8726_vm10, %v2752_v51, %v2756_v15  ;;  %v3170_v63 = vshll.u32 %v3044_v38, 16  ;;  %2990 = vst [vmem:[#allocation3 + $0x368] sm:$0xf] %v2941_v12  ;;  %v7380_v23 = vor.u32 %v8006_v47, %v7377_v62  ;;  %v7388_v58 = vor.u32 %v8007_v4, %v7385_v10  ;;  %v2629_v12 = vld [vmem:[#allocation2 + $0x3c] sm:$0xf]  ;;  %v8109_v4 = vld [vmem:[%s10342_s7 + $0x188] sm:$0xff] }
 0x261   : > { %v5499_v48 = vadd.f32 %v5498_v56, %v5410_v30  ;;  %v5411_v18 = vpop.f32.mrf.mxu1  ;;  %v7383_v30 = vld [vmem:[#allocation3 + $0x2d8] sm:$0xf]  ;;  %v2747_v0 = vsel %vm8726_vm10, %v2742_v39, %v2746_v2  ;;  %v7391_v56 = vld [vmem:[#allocation3 + $0x2e0] sm:$0xf]  ;;  %2855 = vst [vmem:[#allocation3 + $0x388] sm:$0xf] %v2757_v28  ;;  %v2944_v2 = vsel %vm8758_vm13, %v2942_v24, %v2943_v52  ;;  %v5326_v39 = vadd.f32 %v9174_v50, %v9239_v54 }
 0x262   : > { %v5412_v35 = vadd.f32 %v5411_v18, %v5323_v27  ;;  %2854 = vst [vmem:[#allocation3 + $0x364] sm:$0xf] %v2747_v0  ;;  %v3156_v49 = vrot.slane %v3154_v46, 5  ;;  %v3162_v18 = vrot.slane %v3160_v26, 5  ;;  %v3172_v24 = vrot.slane %v3170_v63, 5  ;;  %5846 = vmatpush.bf16.msra.mxu2 %v8109_v4 }
 0x263   : > { %v5588_v57 = vadd.f32 %v5587_v20, %v5499_v48  ;;  %v3153_v48 = vrot.slane %v3151_v43, 4  ;;  %v3164_v20 = vshrl.u32 %v3043_v9, 16  ;;  %2991 = vst [vmem:[#allocation3 + $0x38c] sm:$0xf] %v2944_v2  ;;  %v7392_v9 = vor.u32 %v8012_v16, %v7391_v56  ;;  %v2630_v38 = vld [vmem:[#allocation2 + $0x40] sm:$0xf] }
 0x264   : > { %v5678_v60 = vpop.f32.mrf.mxu0  ;;  %3023 = vst [vmem:[#allocation3 + $0x390] sm:$0xf] %v3007_v11  ;;  %v2759_v54 = vshrl.u32 %v2629_v12, 16  ;;  %v2768_v2 = vshll.u32 %v2630_v38, 16  ;;  %v2772_v47 = vshrl.u32 %v2630_v38, 16  ;;  %v8117_v56 = vld [vmem:[%s10342_s7 + $0x1c8] sm:$0xff] }
 0x265   : > { %v9367_v27 = vadd.f32 %v9349_v44, %v5588_v57  ;;  %v3166_v6 = vrot.slane %v3164_v20, 4  ;;  %v7384_v57 = vor.u32 %v8011_v59, %v7383_v30  ;;  %v3157_v51 = vor.u32 %v3156_v49, %v3153_v48  ;;  %v9387_v11 = vld [vmem:[#allocation2 + $0x48] sm:$0xf]  ;;  %v2631_v48 = vld [vmem:[#allocation2 + $0x44] sm:$0x1]  ;;  %5935 = vmatpush.bf16.msra.mxu3 %v8117_v56 }
 0x266   : > { %v2761_v30 = vrot.slane %v2759_v54, 4  ;;  %v2770_v63 = vrot.slane %v2768_v2, 5  ;;  %v2774_v16 = vrot.slane %v2772_v47, 4  ;;  %v9392_v49 = vld [vmem:[%s10343_s8] ss:$0 sm:$0xff]  ;;  %v8101_v54 = vld [vmem:[%s10342_s7 + $0x148] sm:$0xff] }
 0x267   : > { %v3167_v0 = vor.u32 %v3166_v6, %v3162_v18  ;;  %v3158_v50 = vrot.slane %v3157_v51, 4  ;;  %v2778_v6 = vshll.u32 %v2631_v48, 16  ;;  %v3008_v47 = vld [vmem:[#allocation2 + $0x48] sm:$0xf]  ;;  %v3046_v56 = vld [vmem:[#allocation2 + $0x4c] sm:$0xf]  ;;  %5757 = vmatpush.bf16.msra.mxu1 %v8101_v54 }
 0x268   : > { %v5500_v15 = vpop.f32.mrf.mxu2  ;;  %v5589_v44 = vpop.f32.mrf.mxu3  ;;  %v8016_v48 = vld [vmem:[#allocation3 + $0x324] sm:$0xf]  ;;  %3024 = vst [vmem:[#allocation3 + $0x3b4] sm:$0xf] %v3008_v47 }
 0x269   : > { %v5501_v3 = vadd.f32 %v5500_v15, %v5412_v35  ;;  %v5414_v52 = vpop.f32.mrf.mxu1  ;;  %v3168_v26 = vrot.slane %v3167_v0, 4  ;;  %v2762_v35 = vshll.u32 %v2629_v12, 16  ;;  %v3163_v62 = vsel %vm8726_vm10, %v3158_v50, %v3162_v18  ;;  %v7413_v50 = vld [vmem:[#allocation3 + $0x33c] sm:$0xf0] }
 0x26a   : > { %v5415_v28 = vadd.f32 %v5414_v52, %v5326_v39  ;;  %3270 = vst [vmem:[#allocation3 + $0x370] sm:$0xf] %v3163_v62  ;;  %v5328_v18 = vadd.f32 %v9392_v49, %v9259_v37  ;;  %v2775_v52 = vor.u32 %v2774_v16, %v2770_v63  ;;  %v7419_v37 = vld [vmem:[#allocation3 + $0x320] sm:$0xf]  ;;  %v3047_v16 = vld [vmem:[#allocation2 + $0x50] sm:$0x1] }
 0x26b   : > { %v5590_v43 = vadd.f32 %v5589_v44, %v5501_v3  ;;  %v3173_v10 = vsel %vm8726_vm10, %v3168_v26, %v3172_v24  ;;  %v2764_v20 = vrot.slane %v2762_v35, 5  ;;  %v2877_v3 = vld [vmem:[#allocation2 + $0x3c] sm:$0xe]  ;;  %v2878_v44 = vld [vmem:[#allocation2 + $0x40] sm:$0xf]  ;;  %v8125_v26 = vld [vmem:[%s10342_s7 + $0x208] sm:$0xff] }
 0x26c   : > { %v9373_v46 = vpop.f32.mrf.mxu0  ;;  %5453 = vmatmul.bf16.gmra.mxu1 %v7380_v23  ;;  %3271 = vst [vmem:[#allocation3 + $0x394] sm:$0xf] %v3173_v10  ;;  %v3175_v23 = vshrl.u32 %v9387_v11, 16  ;;  %v2947_v0 = vrot.slane %v2878_v44, 5  ;;  %v2780_v35 = vrot.slane %v2778_v6, 5  ;;  %6024 = vmatpush.bf16.msra.mxu0 %v8125_v26 }
 0x26d   : > { %5542 = vmatmul.bf16.gmra.mxu2 %v7384_v57  ;;  %v9377_v59 = vadd.f32 %v5678_v60, %v5590_v43  ;;  %5631 = vmatmul.bf16.gmra.mxu3 %v7388_v58  ;;  %v2765_v51 = vor.u32 %v2764_v20, %v2761_v30  ;;  %v2879_v58 = vld [vmem:[#allocation2 + $0x44] sm:$0x1]  ;;  %v8015_v43 = vld [vmem:[#allocation3 + $0x31c] sm:$0xf]  ;;  %v2776_v30 = vrot.slane %v2775_v52, 4  ;;  %v3184_v52 = vshll.u32 %v3046_v56, 16 }
 0x26e   : > { %v2950_v2 = vrot.slane %v2879_v58, 5  ;;  %v2949_v10 = vrot.slane %v2947_v0, 4  ;;  %v7427_v20 = vld [vmem:[#allocation3 + $0x328] sm:$0xf]  ;;  %v3009_v44 = vld [vmem:[#allocation2 + $0x4c] sm:$0xf] }
 0x26f   : > { %5720 = vmatmul.bf16.gmra.mxu0 %v7392_v9  ;;  %v6994_v9 = vrot.slane %v2877_v3, 9  ;;  %v2766_v62 = vrot.slane %v2765_v51, 4  ;;  %v2781_v6 = vsel %vm8726_vm10, %v2776_v30, %v2780_v35  ;;  %v3178_v51 = vshll.u32 %v9387_v11, 16  ;;  %3025 = vst [vmem:[#allocation3 + $0x3d8] sm:$0xf] %v3009_v44 }
 0x270   : > { %v5503_v60 = vpop.f32.mrf.mxu2  ;;  %v5592_v15 = vpop.f32.mrf.mxu3  ;;  %v2951_v3 = vsel %vm8758_vm13, %v2949_v10, %v2950_v2  ;;  %v3188_v58 = vshrl.u32 %v3046_v56, 16  ;;  %2857 = vst [vmem:[#allocation3 + $0x3d0] sm:$0xf] %v2781_v6  ;;  %v3186_v2 = vrot.slane %v3184_v52, 5 }
 0x271   : > { %v5504_v39 = vadd.f32 %v5503_v60, %v5415_v28  ;;  %v5416_v57 = vpop.f32.mrf.mxu1  ;;  %v8020_v28 = vld [vmem:[#allocation3 + $0x340] sm:$0xf0]  ;;  %v2948_v4 = vsel %vm8758_vm13, %v6994_v9, %v2947_v0  ;;  %v7421_v60 = vld [vmem:[#allocation3 + $0x344] sm:$0xf0]  ;;  %v7416_v0 = vor.u32 %v8015_v43, %v7413_v50  ;;  %2993 = vst [vmem:[#allocation3 + $0x3d4] sm:$0xf] %v2951_v3 }
 0x272   : > { %v5417_v12 = vadd.f32 %v5416_v57, %v5328_v18  ;;  %2992 = vst [vmem:[#allocation3 + $0x3b0] sm:$0xf] %v2948_v4  ;;  %v3177_v57 = vrot.slane %v3175_v23, 4  ;;  %v3180_v35 = vrot.slane %v3178_v51, 5  ;;  %v3190_v47 = vrot.slane %v3188_v58, 4 }
 0x273   : > { %v5593_v24 = vadd.f32 %v5592_v15, %v5504_v39  ;;  %v8021_v39 = vld [vmem:[#allocation3 + $0x348] sm:$0xf0]  ;;  %v2771_v15 = vsel %vm8726_vm10, %v2766_v62, %v2770_v63  ;;  %v7420_v63 = vor.u32 %v8020_v28, %v7419_v37  ;;  %v7424_v23 = vor.u32 %v8016_v48, %v7421_v60  ;;  %v2632_v4 = vld [vmem:[#allocation2 + $0x48] sm:$0xf]  ;;  %v2633_v37 = vld [vmem:[#allocation2 + $0x4c] sm:$0xf] }
 0x274   : > { %v9397_v38 = vpop.f32.mrf.mxu0  ;;  %2856 = vst [vmem:[#allocation3 + $0x3ac] sm:$0xf] %v2771_v15  ;;  %v7428_v30 = vor.u32 %v8021_v39, %v7427_v20  ;;  %v3181_v43 = vor.u32 %v3180_v35, %v3177_v57  ;;  %v3191_v50 = vor.u32 %v3190_v47, %v3186_v2  ;;  %v2783_v28 = vshrl.u32 %v2632_v4, 16  ;;  %v2634_v60 = vld [vmem:[#allocation2 + $0x50] sm:$0x1] }
 0x275   : > { %v9408_v18 = vadd.f32 %v9373_v46, %v5593_v24  ;;  %v5331_v46 = vadd.f32 %v9392_v49, %v9283_v42  ;;  %v3194_v24 = vshll.u32 %v3047_v16, 16  ;;  %v2792_v16 = vshll.u32 %v2633_v37, 16  ;;  %v2881_v58 = vld [vmem:[#allocation2 + $0x4c] sm:$0xf]  ;;  %v2880_v35 = vld [vmem:[#allocation2 + $0x48] sm:$0xe] }
 0x276   : > { %v2796_v15 = vshrl.u32 %v2633_v37, 16  ;;  %v3182_v6 = vrot.slane %v3181_v43, 4  ;;  %v3192_v3 = vrot.slane %v3191_v50, 4  ;;  %v2785_v20 = vrot.slane %v2783_v28, 4  ;;  %v3010_v28 = vld [vmem:[#allocation2 + $0x54] sm:$0xf] }
 0x277   : > { %v3196_v11 = vrot.slane %v3194_v24, 5  ;;  %v2794_v51 = vrot.slane %v2792_v16, 5  ;;  %v7449_v16 = vld [vmem:[#allocation3 + $0x384] sm:$0xf0]  ;;  %3026 = vst [vmem:[#allocation3 + $0x3fc] sm:$0xf] %v3010_v28 }
 0x278   : > { %v5505_v9 = vpop.f32.mrf.mxu2  ;;  %v5594_v26 = vpop.f32.mrf.mxu3  ;;  %v3187_v44 = vsel %vm8726_vm10, %v3182_v6, %v3186_v2  ;;  %v2798_v52 = vrot.slane %v2796_v15, 4  ;;  %v3048_v2 = vld [vmem:[#allocation2 + $0x54] sm:$0xf] }
 0x279   : > { %v5506_v54 = vadd.f32 %v5505_v9, %v5417_v12  ;;  %v5419_v62 = vpop.f32.mrf.mxu1  ;;  %v2786_v12 = vshll.u32 %v2632_v4, 16  ;;  %v3197_v57 = vsel %vm8726_vm10, %v3192_v3, %v3196_v11  ;;  %3272 = vst [vmem:[#allocation3 + $0x3b8] sm:$0xf] %v3187_v44  ;;  %v6995_v11 = vrot.slane %v2880_v35, 9  ;;  %v8025_v44 = vld [vmem:[#allocation3 + $0x36c] sm:$0xf] }
 0x27a   : > { %v5420_v56 = vadd.f32 %v5419_v62, %v5331_v46  ;;  %3273 = vst [vmem:[#allocation3 + $0x3dc] sm:$0xf] %v3197_v57  ;;  %v7457_v57 = vld [vmem:[#allocation3 + $0x38c] sm:$0xf0] }
 0x27b   : > { %v5595_v10 = vadd.f32 %v5594_v26, %v5506_v54  ;;  %v2788_v39 = vrot.slane %v2786_v12, 5  ;;  %v2799_v26 = vor.u32 %v2798_v52, %v2794_v51  ;;  %v8024_v12 = vld [vmem:[#allocation3 + $0x364] sm:$0xf]  ;;  %v7463_v52 = vld [vmem:[#allocation3 + $0x370] sm:$0xf]  ;;  %v7460_v28 = vor.u32 %v8025_v44, %v7457_v57  ;;  %v8116_v57 = vld [vmem:[%s10342_s7 + $0x1c0] sm:$0xff] }
 0x27c   : > { %v9419_v42 = vpop.f32.mrf.mxu0  ;;  %5458 = vmatmul.bf16.gmra.mxu1 %v7416_v0  ;;  %v2802_v0 = vshll.u32 %v2634_v60, 16  ;;  %v3011_v60 = vld [vmem:[#allocation2 + $0x58] sm:$0xf]  ;;  %5936 = vmatpush.bf16.msra.mxu3 %v8116_v57  ;;  %v8034_v57 = vld [vmem:[#allocation3 + $0x3b4] sm:$0xf] }
 0x27d   : > { %5547 = vmatmul.bf16.gmra.mxu2 %v7420_v63  ;;  %v9422_v48 = vadd.f32 %v9397_v38, %v5595_v10  ;;  %5636 = vmatmul.bf16.gmra.mxu3 %v7424_v23  ;;  %v2789_v9 = vor.u32 %v2788_v39, %v2785_v20  ;;  %v2954_v38 = vrot.slane %v2881_v58, 5  ;;  %v5333_v63 = vadd.f32 %v9392_v49, %v9297_v32  ;;  %v7455_v32 = vld [vmem:[#allocation3 + $0x368] sm:$0xf]  ;;  %v3049_v20 = vld [vmem:[#allocation2 + $0x58] sm:$0xf] }
 0x27e   : > { %v2804_v23 = vrot.slane %v2802_v0, 5  ;;  %v2800_v50 = vrot.slane %v2799_v26, 4  ;;  %v3199_v39 = vshrl.u32 %v3048_v2, 16  ;;  %v3208_v0 = vshll.u32 %v3049_v20, 16  ;;  %v8030_v26 = vld [vmem:[#allocation3 + $0x390] sm:$0xf0] }
 0x27f   : > { %5725 = vmatmul.bf16.gmra.mxu0 %v7428_v30  ;;  %v2790_v62 = vrot.slane %v2789_v9, 4  ;;  %v2882_v30 = vld [vmem:[#allocation2 + $0x50] sm:$0x1]  ;;  %v2956_v37 = vrot.slane %v2954_v38, 4  ;;  %v2955_v6 = vsel %vm8758_vm13, %v6995_v11, %v2954_v38  ;;  %v3202_v9 = vshll.u32 %v3048_v2, 16 }
 0x280   : > { %v5508_v46 = vpop.f32.mrf.mxu2  ;;  %v5597_v54 = vpop.f32.mrf.mxu3  ;;  %v2957_v3 = vrot.slane %v2882_v30, 5  ;;  %v2805_v58 = vsel %vm8726_vm10, %v2800_v50, %v2804_v23  ;;  %2994 = vst [vmem:[#allocation3 + $0x3f8] sm:$0xf] %v2955_v6  ;;  %v7452_v11 = vor.u32 %v8024_v12, %v7449_v16 }
 0x281   : > { %v5509_v24 = vadd.f32 %v5508_v46, %v5420_v56  ;;  %v5421_v47 = vpop.f32.mrf.mxu1  ;;  %v8029_v56 = vld [vmem:[#allocation3 + $0x388] sm:$0xf0]  ;;  %v2795_v15 = vsel %vm8726_vm10, %v2790_v62, %v2794_v51  ;;  %v3050_v46 = vld [vmem:[#allocation2 + $0x5c] sm:$0x1]  ;;  %2859 = vst [vmem:[#allocation3 + $0x418] sm:$0xf] %v2805_v58 }
 0x282   : > { %v5422_v10 = vadd.f32 %v5421_v47, %v5333_v63  ;;  %2858 = vst [vmem:[#allocation3 + $0x3f4] sm:$0xf] %v2795_v15  ;;  %v2958_v38 = vsel %vm8758_vm13, %v2956_v37, %v2957_v3  ;;  %v3201_v63 = vrot.slane %v3199_v39, 4  ;;  %v3204_v35 = vrot.slane %v3202_v9, 5  ;;  %v2636_v39 = vld [vmem:[#allocation2 + $0x58] sm:$0xf] }
 0x283   : > { %v5598_v4 = vadd.f32 %v5597_v54, %v5509_v24  ;;  %v3212_v24 = vshrl.u32 %v3049_v20, 16  ;;  %v3218_v54 = vshll.u32 %v3050_v46, 16  ;;  %v3210_v47 = vrot.slane %v3208_v0, 5  ;;  %2995 = vst [vmem:[#allocation3 + $0x41c] sm:$0xf] %v2958_v38 }
 0x284   : > { %v5688_v43 = vpop.f32.mrf.mxu0  ;;  %v7456_v50 = vor.u32 %v8029_v56, %v7455_v32  ;;  %3027 = vst [vmem:[#allocation3 + $0x420] sm:$0xf] %v3011_v60  ;;  %v7464_v15 = vor.u32 %v8030_v26, %v7463_v52  ;;  %v2635_v20 = vld [vmem:[#allocation2 + $0x54] sm:$0xf]  ;;  %v2816_v12 = vshll.u32 %v2636_v39, 16  ;;  %v2820_v16 = vshrl.u32 %v2636_v39, 16 }
 0x285   : > { %v9437_v51 = vadd.f32 %v9419_v42, %v5598_v4  ;;  %v3214_v23 = vrot.slane %v3212_v24, 4  ;;  %v3205_v42 = vor.u32 %v3204_v35, %v3201_v63  ;;  %v3220_v3 = vrot.slane %v3218_v54, 5  ;;  %v9456_v52 = vld [vmem:[#allocation2 + $0x60] sm:$0xf]  ;;  %v2637_v63 = vld [vmem:[#allocation2 + $0x5c] sm:$0x1] }
 0x286   : > { %v2807_v0 = vshrl.u32 %v2635_v20, 16  ;;  %v2810_v38 = vshll.u32 %v2635_v20, 16  ;;  %v2818_v54 = vrot.slane %v2816_v12, 5  ;;  %v2822_v26 = vrot.slane %v2820_v16, 4  ;;  %v8033_v39 = vld [vmem:[#allocation3 + $0x3ac] sm:$0xf] }
 0x287   : > { %v3215_v37 = vor.u32 %v3214_v23, %v3210_v47  ;;  %v3206_v9 = vrot.slane %v3205_v42, 4  ;;  %v2883_v23 = vld [vmem:[#allocation2 + $0x54] sm:$0xe]  ;;  %v3012_v16 = vld [vmem:[#allocation2 + $0x60] sm:$0xf] }
 0x288   : > { %v5510_v62 = vpop.f32.mrf.mxu2  ;;  %v5599_v2 = vpop.f32.mrf.mxu3  ;;  %v2809_v56 = vrot.slane %v2807_v0, 4  ;;  %v2812_v24 = vrot.slane %v2810_v38, 5  ;;  %v2823_v42 = vor.u32 %v2822_v26, %v2818_v54  ;;  %v8100_v0 = vld [vmem:[%s10342_s7 + $0x140] sm:$0xff]  ;;  %3028 = vst [vmem:[#allocation3 + $0x444] sm:$0xf] %v3012_v16 }
 0x289   : > { %v5511_v30 = vadd.f32 %v5510_v62, %v5422_v10  ;;  %v5424_v4 = vpop.f32.mrf.mxu1  ;;  %v3216_v10 = vrot.slane %v3215_v37, 4  ;;  %v3211_v32 = vsel %vm8726_vm10, %v3206_v9, %v3210_v47  ;;  %v2826_v62 = vshll.u32 %v2637_v63, 16  ;;  %v7491_v9 = vld [vmem:[#allocation3 + $0x3b0] sm:$0xf]  ;;  %v7493_v63 = vld [vmem:[#allocation3 + $0x3d4] sm:$0xf0]  ;;  %5758 = vmatpush.bf16.msra.mxu1 %v8100_v0 }
 0x28a   : > { %v5425_v6 = vadd.f32 %v5424_v4, %v9177_v1  ;;  %v8108_v1 = vld [vmem:[%s10342_s7 + $0x180] sm:$0xff]  ;;  %3274 = vst [vmem:[#allocation3 + $0x400] sm:$0xf] %v3211_v32  ;;  %v2885_v4 = vld [vmem:[#allocation2 + $0x5c] sm:$0x1] }
 0x28b   : > { %v5600_v58 = vadd.f32 %v5599_v2, %v5511_v30  ;;  %v3221_v44 = vsel %vm8726_vm10, %v3216_v10, %v3220_v3  ;;  %5847 = vmatpush.bf16.msra.mxu2 %v8108_v1  ;;  %v2884_v30 = vld [vmem:[#allocation2 + $0x58] sm:$0xf]  ;;  %v3223_v2 = vshrl.u32 %v9456_v52, 16  ;;  %v8124_v10 = vld [vmem:[%s10342_s7 + $0x200] sm:$0xff]  ;;  %v2828_v38 = vrot.slane %v2826_v62, 5 }
 0x28c   : > { %v9442_v46 = vpop.f32.mrf.mxu0  ;;  %5463 = vmatmul.bf16.gmra.mxu1 %v7452_v11  ;;  %3275 = vst [vmem:[#allocation3 + $0x424] sm:$0xf] %v3221_v44  ;;  %v2964_v12 = vrot.slane %v2885_v4, 5  ;;  %v3052_v44 = vld [vmem:[#allocation2 + $0x64] sm:$0xf]  ;;  %6025 = vmatpush.bf16.msra.mxu0 %v8124_v10 }
 0x28d   : > { %5552 = vmatmul.bf16.gmra.mxu2 %v7456_v50  ;;  %v9446_v60 = vadd.f32 %v5688_v43, %v5600_v58  ;;  %5641 = vmatmul.bf16.gmra.mxu3 %v7460_v28  ;;  %v2813_v50 = vor.u32 %v2812_v24, %v2809_v56  ;;  %v6996_v28 = vrot.slane %v2883_v23, 9  ;;  %v7485_v58 = vld [vmem:[#allocation3 + $0x3cc] sm:$0xf0]  ;;  %v2824_v56 = vrot.slane %v2823_v42, 4 }
 0x28e   : > { %v3053_v24 = vld [vmem:[#allocation2 + $0x68] sm:$0x1]  ;;  %v3232_v42 = vshll.u32 %v3052_v44, 16  ;;  %v3236_v4 = vshrl.u32 %v3052_v44, 16 }
 0x28f   : > { %5730 = vmatmul.bf16.gmra.mxu0 %v7464_v15  ;;  %v2961_v15 = vrot.slane %v2884_v30, 5  ;;  %v2814_v32 = vrot.slane %v2813_v50, 4  ;;  %v2829_v62 = vsel %vm8726_vm10, %v2824_v56, %v2828_v38  ;;  %v3013_v30 = vld [vmem:[#allocation2 + $0x64] sm:$0xf]  ;;  %v3226_v50 = vshll.u32 %v9456_v52, 16 }
 0x290   : > { %v5513_v43 = vpop.f32.mrf.mxu2  ;;  %v5602_v47 = vpop.f32.mrf.mxu3  ;;  %2861 = vst [vmem:[#allocation3 + $0x460] sm:$0xf] %v2829_v62  ;;  %v3234_v38 = vrot.slane %v3232_v42, 5  ;;  %v7496_v56 = vor.u32 %v8034_v57, %v7493_v63  ;;  %v8042_v62 = vld [vmem:[#allocation3 + $0x3f4] sm:$0xf] }
 0x291   : > { %v5514_v35 = vadd.f32 %v5513_v43, %v5425_v6  ;;  %v5426_v11 = vpop.f32.mrf.mxu1  ;;  %v8038_v6 = vld [vmem:[#allocation3 + $0x3d0] sm:$0xf0]  ;;  %v2963_v1 = vrot.slane %v2961_v15, 4  ;;  %v7499_v43 = vld [vmem:[#allocation3 + $0x3b8] sm:$0xf]  ;;  %v3228_v10 = vrot.slane %v3226_v50, 5 }
 0x292   : > { %v5427_v3 = vadd.f32 %v5426_v11, %v9196_v21  ;;  %v2962_v21 = vsel %vm8758_vm13, %v6996_v28, %v2961_v15  ;;  %v3225_v11 = vrot.slane %v3223_v2, 4  ;;  %v7488_v28 = vor.u32 %v8033_v39, %v7485_v58  ;;  %3029 = vst [vmem:[#allocation3 + $0x468] sm:$0xf] %v3013_v30  ;;  %v7527_v50 = vld [vmem:[#allocation3 + $0x3f8] sm:$0xf] }
 0x293   : > { %v5603_v37 = vadd.f32 %v5602_v47, %v5514_v35  ;;  %2996 = vst [vmem:[#allocation3 + $0x440] sm:$0xf] %v2962_v21  ;;  %v8039_v35 = vld [vmem:[#allocation3 + $0x3d8] sm:$0xf0]  ;;  %v2819_v47 = vsel %vm8726_vm10, %v2814_v32, %v2818_v54  ;;  %v2965_v23 = vsel %vm8758_vm13, %v2963_v1, %v2964_v12  ;;  %v7492_v15 = vor.u32 %v8038_v6, %v7491_v9 }
 0x294   : > { %v5693_v20 = vpop.f32.mrf.mxu0  ;;  %2860 = vst [vmem:[#allocation3 + $0x43c] sm:$0xf] %v2819_v47  ;;  %v3238_v32 = vrot.slane %v3236_v4, 4  ;;  %v7500_v16 = vor.u32 %v8039_v35, %v7499_v43  ;;  %v3229_v44 = vor.u32 %v3228_v10, %v3225_v11  ;;  %v7521_v11 = vld [vmem:[#allocation3 + $0x414] sm:$0xf0] }
 0x295   : > { %v9469_v26 = vadd.f32 %v9442_v46, %v5603_v37  ;;  %v3242_v37 = vshll.u32 %v3053_v24, 16  ;;  %2997 = vst [vmem:[#allocation3 + $0x464] sm:$0xf] %v2965_v23  ;;  %v8043_v23 = vld [vmem:[#allocation3 + $0x3fc] sm:$0xf]  ;;  %v7524_v10 = vor.u32 %v8042_v62, %v7521_v11 }
 0x296   : > { %v3239_v39 = vor.u32 %v3238_v32, %v3234_v38  ;;  %v3230_v58 = vrot.slane %v3229_v44, 4  ;;  %v8047_v42 = vld [vmem:[#allocation3 + $0x418] sm:$0xf0]  ;;  %v7529_v4 = vld [vmem:[#allocation3 + $0x41c] sm:$0xf0]  ;;  %v6108_v44 = vld [vmem:[%s8609_s11 + $0x8] sm:$0xff] }
 0x297   : > { %v3244_v2 = vrot.slane %v3242_v37, 5  ;;  %v6107_v37 = vld [vmem:[%s8609_s11] sm:$0xff]  ;;  %v7557_v62 = vld [vmem:[#allocation3 + $0x45c] sm:$0xf0] }
 0x298   : > { %v5515_v46 = vpop.f32.mrf.mxu2  ;;  %v5604_v0 = vpop.f32.mrf.mxu3  ;;  %v3235_v6 = vsel %vm8726_vm10, %v3230_v58, %v3234_v38  ;;  %v7528_v38 = vor.u32 %v8047_v42, %v7527_v50  ;;  %v7877_v32 = vmul.f32 -1.442695, %v6107_v37 }
 0x299   : > { %v5516_v54 = vadd.f32 %v5515_v46, %v5427_v3  ;;  %v5429_v12 = vpop.f32.mrf.mxu1  ;;  %v3240_v3 = vrot.slane %v3239_v39, 4  ;;  %3276 = vst [vmem:[#allocation3 + $0x448] sm:$0xf] %v3235_v6  ;;  %v7535_v46 = vld [vmem:[#allocation3 + $0x400] sm:$0xf] }
 0x29a   : > { %v5430_v52 = vadd.f32 %v5429_v12, %v9209_v29  ;;  %v7532_v12 = vor.u32 %v8043_v23, %v7529_v4  ;;  %8235 = vpow2.f32 %v7877_v32  ;;  %v7878_v6 = vmul.f32 -1.442695, %v6108_v44  ;;  %v7565_v11 = vld [vmem:[#allocation3 + $0x464] sm:$0xf0] }
 0x29b   : > { %v5605_v21 = vadd.f32 %v5604_v0, %v5516_v54  ;;  %v3245_v57 = vsel %vm8726_vm10, %v3240_v3, %v3244_v2 }
 0x29c   : > { %v5696_v1 = vpop.f32.mrf.mxu0  ;;  %5468 = vmatmul.bf16.gmra.mxu1 %v7488_v28  ;;  %3277 = vst [vmem:[#allocation3 + $0x46c] sm:$0xf] %v3245_v57  ;;  %v8048_v28 = vld [vmem:[#allocation3 + $0x420] sm:$0xf0]  ;;  %8237 = vpow2.f32 %v7878_v6 }
 0x29d   : > { %5557 = vmatmul.bf16.gmra.mxu2 %v7492_v15  ;;  %v9479_v9 = vadd.f32 %v5693_v20, %v5605_v21  ;;  %5646 = vmatmul.bf16.gmra.mxu3 %v7496_v56  ;;  %v7536_v56 = vor.u32 %v8048_v28, %v7535_v46  ;;  %v8056_v23 = vld [vmem:[#allocation3 + $0x460] sm:$0xf0]  ;;  %v6109_v46 = vld [vmem:[%s8609_s11 + $0x10] sm:$0xff] }
 0x29e   : > { %v6110_v6 = vld [vmem:[%s8609_s11 + $0x18] sm:$0xff] }
 0x29f   : > { %5735 = vmatmul.bf16.gmra.mxu0 %v7500_v16 }
 0x2a0   : > { %v5518_v63 = vpop.f32.mrf.mxu2  ;;  %v5607_v43 = vpop.f32.mrf.mxu3  ;;  %v7571_v50 = vld [vmem:[#allocation3 + $0x448] sm:$0xf] }
 0x2a1   : > { %v5519_v29 = vadd.f32 %v5518_v63, %v5430_v52  ;;  %v5431_v24 = vpop.f32.mrf.mxu1  ;;  %v8236_v39 = vpop.eup %8235 }
 0x2a2   : > { %v5432_v47 = vadd.f32 %v5431_v24, %v9219_v61  ;;  %v9493_v63 = vadd.f32 1.0, %v8236_v39  ;;  %v7563_v24 = vld [vmem:[#allocation3 + $0x440] sm:$0xf]  ;;  %v8238_v28 = vpop.eup %8237 }
 0x2a3   : > { %v5608_v35 = vadd.f32 %v5607_v43, %v5519_v29  ;;  %v8057_v42 = vld [vmem:[#allocation3 + $0x468] sm:$0xf0] }
 0x2a4   : > { %v5698_v20 = vpop.f32.mrf.mxu0  ;;  %8239 = vrcp.f32 %v9493_v63  ;;  %vm6192_vm14 = vweird.f32 %v9493_v63 }
 0x2a5   : > { %v9486_v30 = vadd.f32 %v5696_v1, %v5608_v35  ;;  %v8052_v35 = vld [vmem:[#allocation3 + $0x444] sm:$0xf] }
 0x2a6   : > { %v7568_v32 = vor.u32 %v8052_v35, %v7565_v11  ;;  %v7880_v11 = vmul.f32 -1.442695, %v6110_v6 }
 0x2a7   : > { %10382 = vst [vmem:[#allocation20_spill] sm:$0xff] %v9486_v30 }
 0x2a8   : > { %v5520_v15 = vpop.f32.mrf.mxu2  ;;  %v5609_v0 = vpop.f32.mrf.mxu3 }
 0x2a9   : > { %v5521_v54 = vadd.f32 %v5520_v15, %v5432_v47  ;;  %v5434_v61 = vpop.f32.mrf.mxu1 }
 0x2aa   : > { %v5435_v2 = vadd.f32 %v5434_v61, %v9237_v53  ;;  %v7572_v61 = vor.u32 %v8057_v42, %v7571_v50 }
 0x2ab   : > { %v5610_v16 = vadd.f32 %v5609_v0, %v5521_v54  ;;  %v7564_v54 = vor.u32 %v8056_v23, %v7563_v24  ;;  %v7879_v0 = vmul.f32 -1.442695, %v6109_v46 }
 0x2ac   : > { %v5701_v21 = vpop.f32.mrf.mxu0  ;;  %5473 = vmatmul.bf16.gmra.mxu1 %v7524_v10  ;;  %v8240_v10 = vpop.eup %8239 }
 0x2ad   : > { %5562 = vmatmul.bf16.gmra.mxu2 %v7528_v38  ;;  %v9490_v52 = vadd.f32 %v5698_v20, %v5610_v16  ;;  %5651 = vmatmul.bf16.gmra.mxu3 %v7532_v12  ;;  %v8051_v20 = vld [vmem:[#allocation3 + $0x43c] sm:$0xf]  ;;  %v9500_v12 = vadd.f32 1.0, %v8238_v28  ;;  %8241 = vpow2.f32 %v7879_v0  ;;  %vm6193_vm15 = vweird.f32 %v8240_v10 }
 0x2ae   : > { %vm9510_vm0 = vmor %vm6192_vm14, %vm6193_vm15 }
 0x2af   : > { %10383 = vst [vmem:[#allocation21_spill] sm:$0xff] %v9490_v52  ;;  %5740 = vmatmul.bf16.gmra.mxu0 %v7536_v56  ;;  %8243 = vrcp.f32 %v9500_v12  ;;  %vm6207_vm2 = vweird.f32 %v9500_v12 }
 0x2b0   : > { %v5523_v1 = vpop.f32.mrf.mxu2  ;;  %v5612_v3 = vpop.f32.mrf.mxu3 }
 0x2b1   : > { %v5524_v58 = vadd.f32 %v5523_v1, %v5435_v2  ;;  %v5436_v57 = vpop.f32.mrf.mxu1 }
 0x2b2   : > { %v5437_v53 = vadd.f32 %v5436_v57, %v9257_v34  ;;  %v7560_v34 = vor.u32 %v8051_v20, %v7557_v62 }
 0x2b3   : > { %v5613_v29 = vadd.f32 %v5612_v3, %v5524_v58  ;;  %v6198_v3 = vand.u32 2147483648, %v9493_v63  ;;  %v8242_v57 = vpop.eup %8241 }
 0x2b4   : > { %v5703_v43 = vpop.f32.mrf.mxu0  ;;  %v9515_v23 = vadd.f32 1.0, %v8242_v57 }
 0x2b5   : > { %v9497_v47 = vadd.f32 %v5701_v21, %v5613_v29  ;;  %v6188_v21 = vmul.f32 %v8240_v10, %v9493_v63  ;;  %v8244_v24 = vpop.eup %8243  ;;  %v6199_v62 = vor.u32 1.1754944e-38, %v6198_v3 }
 0x2b6   : > { %v6203_v28 = vmul.f32 %v8244_v24, %v9500_v12  ;;  %8245 = vrcp.f32 %v9515_v23  ;;  %vm6208_vm3 = vweird.f32 %v8244_v24  ;;  %vm6222_vm6 = vweird.f32 %v9515_v23 }
 0x2b7   : > { %10384 = vst [vmem:[#allocation22_spill] sm:$0xff] %v9497_v47  ;;  %v6189_v1 = vsub.f32 1.0, %v6188_v21  ;;  %8247 = vpow2.f32 %v7880_v11  ;;  %vm6209_vm4 = vmor %vm6207_vm2, %vm6208_vm3 }
 0x2b8   : > { %v5525_v4 = vpop.f32.mrf.mxu2  ;;  %v5614_v37 = vpop.f32.mrf.mxu3  ;;  %v6204_v0 = vsub.f32 1.0, %v6203_v28 }
 0x2b9   : > { %v5526_v15 = vadd.f32 %v5525_v4, %v5437_v53  ;;  %v5439_v38 = vpop.f32.mrf.mxu1  ;;  %v6190_v39 = vmul.f32 %v8240_v10, %v6189_v1 }
 0x2ba   : > { %v5440_v16 = vadd.f32 %v5439_v38, %v9281_v40 }
 0x2bb   : > { %v5615_v56 = vadd.f32 %v5614_v37, %v5526_v15  ;;  %v6191_v53 = vadd.f32 %v8240_v10, %v6190_v39  ;;  %v7918_v15 = vld [vmem:[#allocation3 + $0x14] sm:$0xf]  ;;  %v7033_v37 = vld [vmem:[#allocation3 + $0x34] sm:$0xf0] }
 0x2bc   : > { %v5706_v2 = vpop.f32.mrf.mxu0  ;;  %5478 = vmatmul.bf16.gmra.mxu1 %v7560_v34  ;;  %v7039_v34 = vld [vmem:[#allocation3 + $0x18] sm:$0xf]  ;;  %v7036_v1 = vor.u32 %v7918_v15, %v7033_v37 }
 0x2bd   : > { %5567 = vmatmul.bf16.gmra.mxu2 %v7564_v54  ;;  %v9505_v44 = vadd.f32 %v5703_v43, %v5615_v56  ;;  %5656 = vmatmul.bf16.gmra.mxu3 %v7568_v32  ;;  %v6196_v43 = vand.u32 2147483647, %v9493_v63  ;;  %v6195_v46 = vsel %vm9510_vm0, %v8240_v10, %v6191_v53  ;;  %v7923_v63 = vld [vmem:[#allocation3 + $0x38] sm:$0xf0]  ;;  %v7041_v32 = vld [vmem:[#allocation3 + $0x3c] sm:$0xf0]  ;;  %v6205_v56 = vmul.f32 %v8244_v24, %v6204_v0 }
 0x2be   : > { %v7047_v10 = vld [vmem:[#allocation3 + $0x20] sm:$0xf]  ;;  %v7040_v39 = vor.u32 %v7923_v63, %v7039_v34  ;;  %v6228_v63 = vand.u32 2147483648, %v9515_v23 }
 0x2bf   : > { %10385 = vst [vmem:[#allocation23_spill] sm:$0xff] %v9505_v44  ;;  %5745 = vmatmul.bf16.gmra.mxu0 %v7572_v61  ;;  %vm6197_vm1 = vcmp.eq.f32.partialorder %v6196_v43, 8.507059e+37  ;;  %v7924_v61 = vld [vmem:[#allocation3 + $0x40] sm:$0xf0]  ;;  %v6206_v57 = vadd.f32 %v8244_v24, %v6205_v56 }
 0x2c0   : > { %v5528_v58 = vpop.f32.mrf.mxu2  ;;  %v5617_v29 = vpop.f32.mrf.mxu3  ;;  %v9522_v54 = vsel %vm6197_vm1, %v6199_v62, %v6195_v46  ;;  %v7048_v53 = vor.u32 %v7924_v61, %v7047_v10  ;;  %v6229_v61 = vor.u32 1.1754944e-38, %v6228_v63  ;;  %v3415_v44 = vld [vmem:[#allocation2 + $0x1c] sm:$0xf] }
 0x2c1   : > { %v5529_v40 = vadd.f32 %v5528_v58, %v5440_v16  ;;  %v5441_v35 = vpop.f32.mrf.mxu1  ;;  %6429 = vperm.xlu0 %8231, %v9522_v54   ;;  %v5356_v16 = vadd.f32 %v9392_v49, %v9187_v5  ;;  %v6213_v58 = vand.u32 2147483648, %v9500_v12  ;;  %3431 = vst [vmem:[#allocation3 + $0x27c] sm:$0xf] %v3415_v44 }
 0x2c2   : > { %v5442_v42 = vadd.f32 %v5441_v35, %v9295_v31  ;;  %v7919_v31 = vld [vmem:[#allocation3 + $0x1c] sm:$0xf]  ;;  %v6211_v35 = vand.u32 2147483647, %v9500_v12 }
 0x2c3   : > { %v5618_v50 = vadd.f32 %v5617_v29, %v5529_v40  ;;  %v7044_v29 = vor.u32 %v7919_v31, %v7041_v32  ;;  %v6214_v20 = vor.u32 1.1754944e-38, %v6213_v58  ;;  %v7069_v58 = vld [vmem:[#allocation3 + $0x7c] sm:$0xf0] }
 0x2c4   : > { %v5708_v4 = vpop.f32.mrf.mxu0  ;;  %vm6212_vm5 = vcmp.eq.f32.partialorder %v6211_v35, 8.507059e+37  ;;  %v7077_v35 = vld [vmem:[#allocation3 + $0x84] sm:$0xf0] }
 0x2c5   : > { %v9524_v38 = vadd.f32 %v5706_v2, %v5618_v50  ;;  %v8246_v2 = vpop.eup %8245  ;;  %v6210_v50 = vsel %vm6209_vm4, %v8244_v24, %v6206_v57  ;;  %v5358_v24 = vadd.f32 %v9392_v49, %v9203_v17  ;;  %v7927_v17 = vld [vmem:[#allocation3 + $0x5c] sm:$0xf] }
 0x2c6   : > { %v8248_v5 = vpop.eup %8247  ;;  %v9535_v28 = vsel %vm6212_vm5, %v6214_v20, %v6210_v50  ;;  %vm6223_vm7 = vweird.f32 %v8246_v2  ;;  %v7083_v20 = vld [vmem:[#allocation3 + $0x68] sm:$0xf] }
 0x2c7   : > { %10388 = vst [vmem:[#allocation24_spill] sm:$0xff] %v9524_v38  ;;  %v9533_v46 = vadd.f32 1.0, %v8248_v5  ;;  %vm6224_vm8 = vmor %vm6222_vm6, %vm6223_vm7 }
 0x2c8   : > { %v5530_v21 = vpop.f32.mrf.mxu2  ;;  %v5619_v6 = vpop.f32.mrf.mxu3 }
 0x2c9   : > { %v5531_v3 = vadd.f32 %v5530_v21, %v5442_v42  ;;  %v5444_v40 = vpop.f32.mrf.mxu1  ;;  %v6218_v42 = vmul.f32 %v8246_v2, %v9515_v23  ;;  %6434 = vperm.xlu0 %8231, %v9535_v28   ;;  %8249 = vrcp.f32 %v9533_v46  ;;  %vm6237_vm11 = vweird.f32 %v9533_v46 }
 0x2ca   : > { %v5445_v62 = vadd.f32 %v5444_v40, %v5356_v16 }
 0x2cb   : > { %v5620_v43 = vadd.f32 %v5619_v6, %v5531_v3  ;;  %v6219_v12 = vsub.f32 1.0, %v6218_v42  ;;  %v7075_v3 = vld [vmem:[#allocation3 + $0x60] sm:$0xf]  ;;  %v7932_v6 = vld [vmem:[#allocation3 + $0x80] sm:$0xf0]  ;;  %v6243_v42 = vand.u32 2147483648, %v9533_v46 }
 0x2cc   : > { %v5711_v11 = vpop.f32.mrf.mxu0  ;;  %5759 = vmatmul.bf16.vlgmr.msra.gmra.mxu1 %v7036_v1 }
 0x2cd   : > { %5848 = vmatmul.bf16.vlgmr.msra.gmra.mxu2 %v7040_v39  ;;  %v9537_v15 = vadd.f32 %v5708_v4, %v5620_v43  ;;  %5937 = vmatmul.bf16.vlgmr.msra.gmra.mxu3 %v7044_v29  ;;  %v6220_v34 = vmul.f32 %v8246_v2, %v6219_v12  ;;  %v6226_v4 = vand.u32 2147483647, %v9515_v23  ;;  %v7928_v23 = vld [vmem:[#allocation3 + $0x64] sm:$0xf]  ;;  %v7072_v43 = vor.u32 %v7927_v17, %v7069_v58  ;;  %v6113_v12 = vld [vmem:[%s8609_s11 + $0x30] sm:$0xff]  ;;  %v6111_v58 = vld [vmem:[%s8609_s11 + $0x20] sm:$0xff] }
 0x2ce   : > { %v7080_v63 = vor.u32 %v7928_v23, %v7077_v35 }
 0x2cf   : > { %10389 = vst [vmem:[#allocation25_spill] sm:$0xff] %v9537_v15  ;;  %6026 = vmatmul.bf16.vlgmr.msra.gmra.mxu0 %v7048_v53  ;;  %v6221_v10 = vadd.f32 %v8246_v2, %v6220_v34  ;;  %vm6227_vm9 = vcmp.eq.f32.partialorder %v6226_v4, 8.507059e+37  ;;  %v8250_v39 = vpop.eup %8249  ;;  %v5361_v53 = vadd.f32 %v9392_v49, %v9213_v45 }
 0x2d0   : > { %v5533_v37 = vpop.f32.mrf.mxu2  ;;  %v5622_v31 = vpop.f32.mrf.mxu3  ;;  %v6233_v29 = vmul.f32 %v8250_v39, %v9533_v46  ;;  %vm6238_vm12 = vweird.f32 %v8250_v39 }
 0x2d1   : > { %v5534_v0 = vadd.f32 %v5533_v37, %v5445_v62  ;;  %v5446_v32 = vpop.f32.mrf.mxu1  ;;  %v6225_v1 = vsel %vm6224_vm8, %v8246_v2, %v6221_v10  ;;  %v7933_v2 = vld [vmem:[#allocation3 + $0x88] sm:$0xf0]  ;;  %v7076_v62 = vor.u32 %v7932_v6, %v7075_v3  ;;  %v6241_v37 = vand.u32 2147483647, %v9533_v46  ;;  %vm6239_vm14 = vmor %vm6237_vm11, %vm6238_vm12  ;;  %v6114_v3 = vld [vmem:[%s8609_s11 + $0x38] sm:$0xff] }
 0x2d2   : > { %v5447_v16 = vadd.f32 %v5446_v32, %v5358_v24  ;;  %v9546_v57 = vsel %vm6227_vm9, %v6229_v61, %v6225_v1  ;;  %v6234_v50 = vsub.f32 1.0, %v6233_v29  ;;  %v7084_v45 = vor.u32 %v7933_v2, %v7083_v20 }
 0x2d3   : > { %v5623_v56 = vadd.f32 %v5622_v31, %v5534_v0  ;;  %6439 = vperm.xlu1 %8232, %v9546_v57   ;;  %v7883_v31 = vmul.f32 -1.442695, %v6113_v12  ;;  %v6244_v61 = vor.u32 1.1754944e-38, %v6243_v42  ;;  %vm6242_vm15 = vcmp.eq.f32.partialorder %v6241_v37, 8.507059e+37  ;;  %v7937_v12 = vld [vmem:[#allocation3 + $0xac] sm:$0xf] }
 0x2d4   : > { %v5713_v21 = vpop.f32.mrf.mxu0  ;;  %v6235_v0 = vmul.f32 %v8250_v39, %v6234_v50  ;;  %v5363_v6 = vadd.f32 %v9392_v49, %v9231_v36  ;;  %v7884_v35 = vmul.f32 -1.442695, %v6114_v3  ;;  %v7105_v50 = vld [vmem:[#allocation3 + $0xc4] sm:$0xf0]  ;;  %v7941_v49 = vld [vmem:[#allocation3 + $0xc8] sm:$0xf0] }
 0x2d5   : > { %v9548_v40 = vadd.f32 %v5711_v11, %v5623_v56  ;;  %8251 = vpow2.f32 %v7883_v31  ;;  %v7111_v36 = vld [vmem:[#allocation3 + $0xa8] sm:$0xf]  ;;  %v7942_v37 = vld [vmem:[#allocation3 + $0xd0] sm:$0xf0] }
 0x2d6   : > { %v6236_v56 = vadd.f32 %v8250_v39, %v6235_v0  ;;  %v6112_v0 = vld [vmem:[%s8609_s11 + $0x28] sm:$0xff] }
 0x2d7   : > { %10390 = vst [vmem:[#allocation26_spill] sm:$0xff] %v9548_v40  ;;  %v3695_v40 = vld [vmem:[#allocation2 + $0x1c] sm:$0xf] }
 0x2d8   : > { %v5535_v5 = vpop.f32.mrf.mxu2  ;;  %v5624_v24 = vpop.f32.mrf.mxu3  ;;  %v6240_v46 = vsel %vm6239_vm14, %v8250_v39, %v6236_v56  ;;  %v7882_v56 = vmul.f32 -1.442695, %v6112_v0  ;;  %v3744_v47 = vrot.slane %v3695_v40, 5 }
 0x2d9   : > { %v5536_v11 = vadd.f32 %v5535_v5, %v5447_v16  ;;  %v5449_v34 = vpop.f32.mrf.mxu1  ;;  %v9560_v17 = vsel %vm6242_vm15, %v6244_v61, %v6240_v46  ;;  %v7112_v61 = vor.u32 %v7941_v49, %v7111_v36  ;;  %v6116_v49 = vld [vmem:[%s8609_s11 + $0x48] sm:$0xff] }
 0x2da   : > { %v5450_v32 = vadd.f32 %v5449_v34, %v5361_v53  ;;  %v7881_v53 = vmul.f32 -1.442695, %v6111_v58  ;;  %v9575_v34 = vld [vmem:[%s10343_s8] ss:$0 sm:$0xff] }
 0x2db   : > { %v5625_v4 = vadd.f32 %v5624_v24, %v5536_v11  ;;  %6444 = vperm.xlu1 %8232, %v9560_v17   ;;  %v8252_v20 = vpop.eup %8251  ;;  %v7113_v11 = vld [vmem:[#allocation3 + $0xcc] sm:$0xf0] }
 0x2dc   : > { %v5716_v10 = vpop.f32.mrf.mxu0  ;;  %5764 = vmatmul.bf16.gmra.mxu1 %v7072_v43  ;;  %v9567_v39 = vadd.f32 1.0, %v8252_v20  ;;  %8253 = vpow2.f32 %v7881_v53  ;;  %v7119_v24 = vld [vmem:[#allocation3 + $0xb0] sm:$0xf]  ;;  %v7116_v58 = vor.u32 %v7937_v12, %v7113_v11 }
 0x2dd   : > { %5853 = vmatmul.bf16.gmra.mxu2 %v7076_v62  ;;  %v9558_v16 = vadd.f32 %v5713_v21, %v5625_v4  ;;  %5942 = vmatmul.bf16.gmra.mxu3 %v7080_v63  ;;  %8255 = vpow2.f32 %v7884_v35  ;;  %v7936_v62 = vld [vmem:[#allocation3 + $0xa4] sm:$0xf]  ;;  %v5366_v63 = vadd.f32 %v9575_v34, %v9251_v13  ;;  %v7120_v3 = vor.u32 %v7942_v37, %v7119_v24 }
 0x2de   : > { %8257 = vrcp.f32 %v9567_v39  ;;  %v6288_v36 = vand.u32 2147483648, %v9567_v39  ;;  %vm6282_vm0 = vweird.f32 %v9567_v39 }
 0x2df   : > { %10391 = vst [vmem:[#allocation27_spill] sm:$0xff] %v9558_v16  ;;  %6031 = vmatmul.bf16.gmra.mxu0 %v7084_v45  ;;  %8259 = vpow2.f32 %v7882_v56  ;;  %v3414_v16 = vld [vmem:[#allocation2 + $0x18] sm:$0xf] }
 0x2e0   : > { %v5538_v1 = vpop.f32.mrf.mxu2  ;;  %v5627_v29 = vpop.f32.mrf.mxu3  ;;  %3430 = vst [vmem:[#allocation3 + $0x258] sm:$0xf] %v3414_v16  ;;  %v3449_v16 = vld [vmem:[#allocation2 + $0x24] sm:$0xf] }
 0x2e1   : > { %v5539_v23 = vadd.f32 %v5538_v1, %v5450_v32  ;;  %v5451_v21 = vpop.f32.mrf.mxu1 }
 0x2e2   : > { %v5452_v5 = vadd.f32 %v5451_v21, %v5363_v6  ;;  %v8254_v31 = vpop.eup %8253 }
 0x2e3   : > { %v5628_v2 = vadd.f32 %v5627_v29, %v5539_v23  ;;  %v8256_v46 = vpop.eup %8255  ;;  %v9580_v6 = vadd.f32 1.0, %v8254_v31  ;;  %v6289_v31 = vor.u32 1.1754944e-38, %v6288_v36 }
 0x2e4   : > { %v5718_v43 = vpop.f32.mrf.mxu0  ;;  %v8258_v23 = vpop.eup %8257  ;;  %v9584_v20 = vadd.f32 1.0, %v8256_v46  ;;  %v7141_v46 = vld [vmem:[#allocation3 + $0x10c] sm:$0xf0] }
 0x2e5   : > { %v9570_v42 = vadd.f32 %v5716_v10, %v5628_v2  ;;  %v7108_v10 = vor.u32 %v7936_v62, %v7105_v50  ;;  %v6278_v13 = vmul.f32 %v8258_v23, %v9567_v39  ;;  %8261 = vrcp.f32 %v9580_v6  ;;  %v8260_v12 = vpop.eup %8259 }
 0x2e6   : > { %8263 = vrcp.f32 %v9584_v20  ;;  %vm6283_vm1 = vweird.f32 %v8258_v23  ;;  %vm6252_vm4 = vweird.f32 %v9580_v6  ;;  %vm6297_vm7 = vweird.f32 %v9584_v20 }
 0x2e7   : > { %10392 = vst [vmem:[#allocation28_spill] sm:$0xff] %v9570_v42  ;;  %v6279_v2 = vsub.f32 1.0, %v6278_v13  ;;  %vm9597_vm2 = vmor %vm6282_vm0, %vm6283_vm1 }
 0x2e8   : > { %v5540_v45 = vpop.f32.mrf.mxu2  ;;  %v5629_v32 = vpop.f32.mrf.mxu3 }
 0x2e9   : > { %v5541_v4 = vadd.f32 %v5540_v45, %v5452_v5  ;;  %v5454_v1 = vpop.f32.mrf.mxu1  ;;  %v5368_v5 = vadd.f32 %v9575_v34, %v9275_v14  ;;  %v6280_v50 = vmul.f32 %v8258_v23, %v6279_v2  ;;  %v7945_v45 = vld [vmem:[#allocation3 + $0xec] sm:$0xf]  ;;  %v7155_v2 = vld [vmem:[#allocation3 + $0xf8] sm:$0xf]  ;;  %v6258_v14 = vand.u32 2147483648, %v9580_v6 }
 0x2ea   : > { %v5455_v53 = vadd.f32 %v5454_v1, %v5366_v63  ;;  %v7147_v1 = vld [vmem:[#allocation3 + $0xf0] sm:$0xf] }
 0x2eb   : > { %v5630_v29 = vadd.f32 %v5629_v32, %v5541_v4  ;;  %v9595_v37 = vpop.eup %8261  ;;  %v6281_v0 = vadd.f32 %v8258_v23, %v6280_v50  ;;  %v9601_v4 = vadd.f32 1.0, %v8260_v12  ;;  %v7886_v32 = vmul.f32 -1.442695, %v6116_v49 }
 0x2ec   : > { %v5721_v35 = vpop.f32.mrf.mxu0  ;;  %5769 = vmatmul.bf16.gmra.mxu1 %v7108_v10  ;;  %v8264_v13 = vpop.eup %8263  ;;  %v5371_v49 = vadd.f32 %v9575_v34, %v9289_v8  ;;  %vm6253_vm5 = vweird.f32 %v9595_v37 }
 0x2ed   : > { %5858 = vmatmul.bf16.gmra.mxu2 %v7112_v61  ;;  %v9586_v21 = vadd.f32 %v5718_v43, %v5630_v29  ;;  %5947 = vmatmul.bf16.gmra.mxu3 %v7116_v58  ;;  %v6286_v43 = vand.u32 2147483647, %v9567_v39  ;;  %v6248_v39 = vmul.f32 %v9595_v37, %v9580_v6  ;;  %v7950_v58 = vld [vmem:[#allocation3 + $0x110] sm:$0xf0]  ;;  %v7149_v29 = vld [vmem:[#allocation3 + $0x114] sm:$0xf0]  ;;  %8265 = vrcp.f32 %v9601_v4  ;;  %vm9624_vm6 = vmor %vm6252_vm4, %vm6253_vm5 }
 0x2ee   : > { %v6293_v12 = vmul.f32 %v8264_v13, %v9584_v20  ;;  %8267 = vpow2.f32 %v7886_v32  ;;  %vm6298_vm8 = vweird.f32 %v8264_v13  ;;  %vm6267_vm14 = vweird.f32 %v9601_v4 }
 0x2ef   : > { %10393 = vst [vmem:[#allocation29_spill] sm:$0xff] %v9586_v21  ;;  %6036 = vmatmul.bf16.gmra.mxu0 %v7120_v3  ;;  %vm6287_vm3 = vcmp.eq.f32.partialorder %v6286_v43, 8.507059e+37  ;;  %v7946_v3 = vld [vmem:[#allocation3 + $0xf4] sm:$0xf]  ;;  %vm6299_vm11 = vmor %vm6297_vm7, %vm6298_vm8 }
 0x2f0   : > { %v5543_v62 = vpop.f32.mrf.mxu2  ;;  %v5632_v24 = vpop.f32.mrf.mxu3 }
 0x2f1   : > { %v5544_v11 = vadd.f32 %v5543_v62, %v5455_v53  ;;  %v5456_v63 = vpop.f32.mrf.mxu1  ;;  %v6285_v53 = vsel %vm9597_vm2, %v8258_v23, %v6281_v0  ;;  %v7951_v62 = vld [vmem:[#allocation3 + $0x118] sm:$0xf0]  ;;  %v7148_v23 = vor.u32 %v7950_v58, %v7147_v1  ;;  %v6259_v1 = vor.u32 1.1754944e-38, %v6258_v14 }
 0x2f2   : > { %v5457_v61 = vadd.f32 %v5456_v63, %v5368_v5  ;;  %v9609_v50 = vsel %vm6287_vm3, %v6289_v31, %v6285_v53  ;;  %v6249_v5 = vsub.f32 1.0, %v6248_v39  ;;  %v7156_v0 = vor.u32 %v7951_v62, %v7155_v2 }
 0x2f3   : > { %v5633_v10 = vadd.f32 %v5632_v24, %v5544_v11  ;;  %6459 = vperm.xlu0 %8231, %v9609_v50   ;;  %v7144_v11 = vor.u32 %v7945_v45, %v7141_v46  ;;  %v7152_v24 = vor.u32 %v7946_v3, %v7149_v29  ;;  %v6294_v31 = vsub.f32 1.0, %v6293_v12 }
 0x2f4   : > { %v9603_v56 = vpop.f32.mrf.mxu0  ;;  %v6250_v43 = vmul.f32 %v9595_v37, %v6249_v5  ;;  %v6256_v46 = vand.u32 2147483647, %v9580_v6  ;;  %v6301_v6 = vand.u32 2147483647, %v9584_v20 }
 0x2f5   : > { %v9612_v36 = vadd.f32 %v5721_v35, %v5633_v10  ;;  %v6303_v35 = vand.u32 2147483648, %v9584_v20  ;;  %v6295_v58 = vmul.f32 %v8264_v13, %v6294_v31  ;;  %v5373_v20 = vadd.f32 %v9575_v34, %v9309_v19 }
 0x2f6   : > { %v6251_v8 = vadd.f32 %v9595_v37, %v6250_v43  ;;  %vm6257_vm9 = vcmp.eq.f32.partialorder %v6256_v46, 8.507059e+37  ;;  %vm6302_vm12 = vcmp.eq.f32.partialorder %v6301_v6, 8.507059e+37  ;;  %v6271_v19 = vand.u32 2147483647, %v9601_v4  ;;  %v7185_v6 = vld [vmem:[#allocation3 + $0x15c] sm:$0xf0] }
 0x2f7   : > { %10396 = vst [vmem:[#allocation30_spill] sm:$0xff] %v9612_v36  ;;  %v6296_v5 = vadd.f32 %v8264_v13, %v6295_v58  ;;  %v6304_v12 = vor.u32 1.1754944e-38, %v6303_v35  ;;  %v7177_v58 = vld [vmem:[#allocation3 + $0x154] sm:$0xf0] }
 0x2f8   : > { %v5545_v63 = vpop.f32.mrf.mxu2  ;;  %v5634_v39 = vpop.f32.mrf.mxu3  ;;  %v6255_v2 = vsel %vm9624_vm6, %v9595_v37, %v6251_v8  ;;  %vm6272_vm1 = vcmp.eq.f32.partialorder %v6271_v19, 8.507059e+37 }
 0x2f9   : > { %v5546_v10 = vadd.f32 %v5545_v63, %v5457_v61  ;;  %v5459_v45 = vpop.f32.mrf.mxu1  ;;  %v9630_v61 = vpop.eup %8265  ;;  %v9636_v43 = vsel %vm6257_vm9, %v6259_v1, %v6255_v2  ;;  %v6117_v63 = vld [vmem:[%s8609_s11 + $0x50] sm:$0xff]  ;;  %v7954_v1 = vld [vmem:[#allocation3 + $0x134] sm:$0xf] }
 0x2fa   : > { %v5460_v29 = vadd.f32 %v5459_v45, %v5371_v49  ;;  %v8268_v62 = vpop.eup %8267  ;;  %v6300_v49 = vsel %vm6299_vm11, %v8264_v13, %v6296_v5  ;;  %6449 = vperm.xlu2 %8233, %v9636_v43   ;;  %v6263_v14 = vmul.f32 %v9630_v61, %v9601_v4  ;;  %v6115_v13 = vld [vmem:[%s8609_s11 + $0x40] sm:$0xff]  ;;  %vm6268_vm15 = vweird.f32 %v9630_v61  ;;  %v7955_v5 = vld [vmem:[#allocation3 + $0x13c] sm:$0xf] }
 0x2fb   : > { %v5635_v3 = vadd.f32 %v5634_v39, %v5546_v10  ;;  %v9640_v37 = vsel %vm6302_vm12, %v6304_v12, %v6300_v49  ;;  %v9644_v31 = vadd.f32 1.0, %v8268_v62  ;;  %v7885_v34 = vmul.f32 -1.442695, %v6115_v13  ;;  %vm9661_vm0 = vmor %vm6267_vm14, %vm6268_vm15  ;;  %v7191_v49 = vld [vmem:[#allocation3 + $0x140] sm:$0xf] }
 0x2fc   : > { %v5726_v53 = vpop.f32.mrf.mxu0  ;;  %5774 = vmatmul.bf16.gmra.mxu1 %v7144_v11  ;;  %6464 = vperm.xlu1 %8232, %v9640_v37   ;;  %v6264_v39 = vsub.f32 1.0, %v6263_v14  ;;  %v7960_v14 = vld [vmem:[#allocation3 + $0x160] sm:$0xf0] }
 0x2fd   : > { %5863 = vmatmul.bf16.gmra.mxu2 %v7148_v23  ;;  %5952 = vmatmul.bf16.gmra.mxu3 %v7152_v24  ;;  %v6273_v23 = vand.u32 2147483648, %v9601_v4  ;;  %v7887_v24 = vmul.f32 -1.442695, %v6117_v63  ;;  %8269 = vrcp.f32 %v9644_v31  ;;  %v7192_v19 = vor.u32 %v7960_v14, %v7191_v49 }
 0x2fe   : > { %vm6327_vm2 = vweird.f32 %v9644_v31 }
 0x2ff   : > { %6041 = vmatmul.bf16.gmra.mxu0 %v7156_v0  ;;  %v9652_v0 = vadd.f32 %v9603_v56, %v5635_v3  ;;  %v6265_v56 = vmul.f32 %v9630_v61, %v6264_v39  ;;  %8271 = vpow2.f32 %v7887_v24  ;;  %v7183_v3 = vld [vmem:[#allocation3 + $0x138] sm:$0xf]  ;;  %v6274_v62 = vor.u32 1.1754944e-38, %v6273_v23 }
 0x300   : > { %v5548_v11 = vpop.f32.mrf.mxu2  ;;  %v5637_v10 = vpop.f32.mrf.mxu3  ;;  %8273 = vpow2.f32 %v7885_v34  ;;  %v7180_v24 = vor.u32 %v7954_v1, %v7177_v58  ;;  %v6333_v34 = vand.u32 2147483648, %v9644_v31  ;;  %v6331_v1 = vand.u32 2147483647, %v9644_v31 }
 0x301   : > { %10399 = vst [vmem:[#allocation31_spill] sm:$0xff] %v9652_v0  ;;  %v5549_v35 = vadd.f32 %v5548_v11, %v5460_v29  ;;  %v5461_v8 = vpop.f32.mrf.mxu1  ;;  %v7959_v29 = vld [vmem:[#allocation3 + $0x158] sm:$0xf0]  ;;  %v6266_v12 = vadd.f32 %v9630_v61, %v6265_v56 }
 0x302   : > { %v5462_v32 = vadd.f32 %v5461_v8, %v5373_v20  ;;  %v7184_v13 = vor.u32 %v7959_v29, %v7183_v3  ;;  %vm6332_vm5 = vcmp.eq.f32.partialorder %v6331_v1, 8.507059e+37 }
 0x303   : > { %v5638_v45 = vadd.f32 %v5637_v10, %v5549_v35  ;;  %v6270_v20 = vsel %vm9661_vm0, %v9630_v61, %v6266_v12  ;;  %v8270_v4 = vpop.eup %8269  ;;  %v7188_v35 = vor.u32 %v7955_v5, %v7185_v6  ;;  %v6334_v12 = vor.u32 1.1754944e-38, %v6333_v34 }
 0x304   : > { %v5728_v46 = vpop.f32.mrf.mxu0  ;;  %v9671_v23 = vsel %vm6272_vm1, %v6274_v62, %v6270_v20  ;;  %vm6328_vm3 = vweird.f32 %v8270_v4  ;;  %v6119_v62 = vld [vmem:[%s8609_s11 + $0x60] sm:$0xff] }
 0x305   : > { %v9666_v63 = vadd.f32 %v5726_v53, %v5638_v45  ;;  %v8272_v10 = vpop.eup %8271  ;;  %6454 = vperm.xlu2 %8233, %v9671_v23   ;;  %v6323_v53 = vmul.f32 %v8270_v4, %v9644_v31  ;;  %vm9691_vm4 = vmor %vm6327_vm2, %vm6328_vm3  ;;  %v7889_v49 = vmul.f32 -1.442695, %v6119_v62  ;;  %v7227_v62 = vld [vmem:[#allocation3 + $0x188] sm:$0xf] }
 0x306   : > { %v8274_v45 = vpop.eup %8273  ;;  %v9678_v58 = vadd.f32 1.0, %v8272_v10 }
 0x307   : > { %10402 = vst [vmem:[#allocation32_spill] sm:$0xff] %v9666_v63  ;;  %v6324_v29 = vsub.f32 1.0, %v6323_v53  ;;  %v9681_v2 = vadd.f32 1.0, %v8274_v45 }
 0x308   : > { %v5550_v11 = vpop.f32.mrf.mxu2  ;;  %v5639_v8 = vpop.f32.mrf.mxu3  ;;  %8275 = vrcp.f32 %v9678_v58  ;;  %vm6342_vm6 = vweird.f32 %v9678_v58 }
 0x309   : > { %v5551_v39 = vadd.f32 %v5550_v11, %v5462_v32  ;;  %v5464_v61 = vpop.f32.mrf.mxu1  ;;  %v6325_v5 = vmul.f32 %v8270_v4, %v6324_v29  ;;  %8277 = vrcp.f32 %v9681_v2  ;;  %v6120_v11 = vld [vmem:[%s8609_s11 + $0x68] sm:$0xff]  ;;  %v7221_v29 = vld [vmem:[#allocation3 + $0x1a4] sm:$0xf0]  ;;  %vm6312_vm11 = vweird.f32 %v9681_v2 }
 0x30a   : > { %v5465_v32 = vadd.f32 %v5464_v61, %v9190_v7  ;;  %8279 = vpow2.f32 %v7889_v49  ;;  %v7890_v34 = vmul.f32 -1.442695, %v6120_v11  ;;  %v6346_v7 = vand.u32 2147483647, %v9678_v58 }
 0x30b   : > { %v5640_v56 = vadd.f32 %v5639_v8, %v5551_v39  ;;  %v6326_v14 = vadd.f32 %v8270_v4, %v6325_v5  ;;  %v7219_v8 = vld [vmem:[#allocation3 + $0x180] sm:$0xf]  ;;  %v7969_v5 = vld [vmem:[#allocation3 + $0x1a8] sm:$0xf0] }
 0x30c   : > { %v5731_v3 = vpop.f32.mrf.mxu0  ;;  %5779 = vmatmul.bf16.gmra.mxu1 %v7180_v24  ;;  %8281 = vpow2.f32 %v7890_v34  ;;  %vm9723_vm9 = vcmp.eq.f32.partialorder %v6346_v7, 8.507059e+37 }
 0x30d   : > { %5868 = vmatmul.bf16.gmra.mxu2 %v7184_v13  ;;  %v9686_v6 = vadd.f32 %v5728_v46, %v5640_v56  ;;  %5957 = vmatmul.bf16.gmra.mxu3 %v7188_v35  ;;  %v9696_v46 = vld [vmem:[#allocation3 + $0x17c] sm:$0xf]  ;;  %v9698_v35 = vld [vmem:[#allocation3 + $0x19c] sm:$0xf0]  ;;  %v6330_v31 = vsel %vm9691_vm4, %v8270_v4, %v6326_v14 }
 0x30e   : > { %v8276_v10 = vpop.eup %8275  ;;  %v9702_v53 = vsel %vm6332_vm5, %v6334_v12, %v6330_v31  ;;  %v6348_v12 = vand.u32 2147483648, %v9678_v58  ;;  %v7216_v11 = vor.u32 %v9696_v46, %v9698_v35  ;;  %v6318_v46 = vand.u32 2147483648, %v9681_v2 }
 0x30f   : > { %10403 = vst [vmem:[#allocation33_spill] sm:$0xff] %v9686_v6  ;;  %6046 = vmatmul.bf16.gmra.mxu0 %v7192_v19  ;;  %v7968_v19 = vld [vmem:[#allocation3 + $0x1a0] sm:$0xf0]  ;;  %v8278_v45 = vpop.eup %8277  ;;  %6474 = vperm.xlu0 %8231, %v9702_v53   ;;  %v6338_v4 = vmul.f32 %v8276_v10, %v9678_v58  ;;  %vm6343_vm7 = vweird.f32 %v8276_v10 }
 0x310   : > { %v5553_v20 = vpop.f32.mrf.mxu2  ;;  %v5642_v13 = vpop.f32.mrf.mxu3  ;;  %v6308_v49 = vmul.f32 %v8278_v45, %v9681_v2  ;;  %vm9719_vm8 = vmor %vm6342_vm6, %vm6343_vm7  ;;  %vm6313_vm12 = vweird.f32 %v8278_v45  ;;  %v6319_v7 = vor.u32 1.1754944e-38, %v6318_v46  ;;  %v9754_v46 = vld [vmem:[#allocation3 + $0x1cc] sm:$0xf] }
 0x311   : > { %v5554_v24 = vadd.f32 %v5553_v20, %v5465_v32  ;;  %v5466_v39 = vpop.f32.mrf.mxu1  ;;  %v7964_v32 = vld [vmem:[#allocation3 + $0x184] sm:$0xf]  ;;  %v6339_v14 = vsub.f32 1.0, %v6338_v4  ;;  %v8280_v20 = vpop.eup %8279  ;;  %vm9729_vm14 = vmor %vm6312_vm11, %vm6313_vm12  ;;  %v3280_v4 = vld [vmem:[#allocation2 + $0x14] sm:$0x1] }
 0x312   : > { %v5467_v1 = vadd.f32 %v5466_v39, %v9206_v22  ;;  %v7224_v31 = vor.u32 %v7964_v32, %v7221_v29  ;;  %v7228_v39 = vor.u32 %v7969_v5, %v7227_v62  ;;  %v9717_v63 = vadd.f32 1.0, %v8280_v20  ;;  %v8282_v32 = vpop.eup %8281  ;;  %v3446_v20 = vld [vmem:[#allocation2 + $0x18] sm:$0xf] }
 0x313   : > { %v5643_v61 = vadd.f32 %v5642_v13, %v5554_v24  ;;  %v7220_v24 = vor.u32 %v7968_v19, %v7219_v8  ;;  %v6309_v13 = vsub.f32 1.0, %v6308_v49  ;;  %v6340_v6 = vmul.f32 %v8276_v10, %v6339_v14  ;;  %v9740_v49 = vld [vmem:[#allocation3 + $0x1e4] sm:$0xf0] }
 0x314   : > { %v9705_v56 = vpop.f32.mrf.mxu0  ;;  %v6316_v5 = vand.u32 2147483647, %v9681_v2  ;;  %8283 = vrcp.f32 %v9717_v63  ;;  %v9760_v34 = vadd.f32 1.0, %v8282_v32  ;;  %v3471_v58 = vshrl.u32 %v3446_v20, 16 }
 0x315   : > { %v9713_v22 = vadd.f32 %v5731_v3, %v5643_v61  ;;  %v6349_v3 = vor.u32 1.1754944e-38, %v6348_v12  ;;  %v6310_v61 = vmul.f32 %v8278_v45, %v6309_v13  ;;  %v6341_v19 = vadd.f32 %v8276_v10, %v6340_v6  ;;  %v9738_v6 = vld [vmem:[#allocation3 + $0x1c4] sm:$0xf]  ;;  %v9744_v13 = vld [vmem:[#allocation3 + $0x1c8] sm:$0xf] }
 0x316   : > { %vm6317_vm15 = vcmp.eq.f32.partialorder %v6316_v5, 8.507059e+37  ;;  %8285 = vrcp.f32 %v9760_v34  ;;  %v3473_v5 = vrot.slane %v3471_v58, 4  ;;  %vm6372_vm0 = vweird.f32 %v9717_v63 }
 0x317   : > { %10406 = vst [vmem:[#allocation34_spill] sm:$0xff] %v9713_v22  ;;  %v6311_v62 = vadd.f32 %v8278_v45, %v6310_v61  ;;  %v6345_v14 = vsel %vm9719_vm8, %v8276_v10, %v6341_v19  ;;  %v9746_v61 = vld [vmem:[#allocation3 + $0x1e8] sm:$0xf0]  ;;  %v3474_v19 = vshll.u32 %v3446_v20, 16  ;;  %v6376_v32 = vand.u32 2147483647, %v9717_v63 }
 0x318   : > { %v5555_v0 = vpop.f32.mrf.mxu2  ;;  %v5644_v8 = vpop.f32.mrf.mxu3  ;;  %v9750_v2 = vsel %vm9723_vm9, %v6349_v3, %v6345_v14  ;;  %v9779_v14 = vld [vmem:[#allocation3 + $0x1f0] sm:$0xf0]  ;;  %v3331_v42 = vrot.slane %v3280_v4, 5  ;;  %vm6387_vm4 = vweird.f32 %v9760_v34  ;;  %v6391_v40 = vand.u32 2147483647, %v9760_v34 }
 0x319   : > { %v5556_v35 = vadd.f32 %v5555_v0, %v5467_v1  ;;  %v5469_v29 = vpop.f32.mrf.mxu1  ;;  %6479 = vperm.xlu1 %8232, %v9750_v2   ;;  %vm9808_vm3 = vcmp.eq.f32.partialorder %v6376_v32, 8.507059e+37  ;;  %v6393_v32 = vand.u32 2147483648, %v9760_v34 }
 0x31a   : > { %v5470_v0 = vadd.f32 %v5469_v29, %v9216_v55  ;;  %v6315_v55 = vsel %vm9729_vm14, %v8278_v45, %v6311_v62  ;;  %v6378_v29 = vand.u32 2147483648, %v9717_v63  ;;  %v3278_v62 = vld [vmem:[#allocation2 + $0xc] sm:$0xe]  ;;  %vm9839_vm7 = vcmp.eq.f32.partialorder %v6391_v40, 8.507059e+37  ;;  %v9874_v40 = vld [vmem:[#allocation3 + $0x20c] sm:$0xf] }
 0x31b   : > { %v5645_v12 = vadd.f32 %v5644_v8, %v5556_v35  ;;  %v9756_v35 = vld [vmem:[#allocation3 + $0x1ec] sm:$0xf0]  ;;  %v9758_v10 = vsel %vm6317_vm15, %v6319_v7, %v6315_v55  ;;  %v3279_v8 = vld [vmem:[#allocation2 + $0x10] sm:$0xf]  ;;  %v3447_v55 = vld [vmem:[#allocation2 + $0x1c] sm:$0xf] }
 0x31c   : > { %v9736_v1 = vpop.f32.mrf.mxu0  ;;  %5784 = vmatmul.bf16.gmra.mxu1 %v7216_v11  ;;  %v9767_v11 = vld [vmem:[#allocation3 + $0x1d0] sm:$0xf]  ;;  %6469 = vperm.xlu2 %8233, %v9758_v10   ;;  %v6379_v45 = vor.u32 1.1754944e-38, %v6378_v29  ;;  %v3476_v29 = vrot.slane %v3474_v19, 5  ;;  %v3484_v4 = vshrl.u32 %v3447_v55, 16 }
 0x31d   : > { %5873 = vmatmul.bf16.gmra.mxu2 %v7220_v24  ;;  %5962 = vmatmul.bf16.gmra.mxu3 %v7224_v31  ;;  %v9763_v3 = vadd.f32 %v9705_v56, %v5645_v12  ;;  %v3328_v24 = vrot.slane %v3279_v8, 5  ;;  %v9772_v31 = vpop.eup %8283  ;;  %v3448_v8 = vld [vmem:[#allocation2 + $0x20] sm:$0x1]  ;;  %v7264_v15 = vor.u32 %v9779_v14, %v9767_v11 }
 0x31e   : > { %v6368_v20 = vmul.f32 %v9772_v31, %v9717_v63  ;;  %vm6373_vm1 = vweird.f32 %v9772_v31 }
 0x31f   : > { %6051 = vmatmul.bf16.gmra.mxu0 %v7228_v39  ;;  %10413 = vst [vmem:[#allocation35_spill] sm:$0xff] %v9763_v3  ;;  %v6997_v3 = vrot.slane %v3278_v62, 9  ;;  %v3330_v22 = vrot.slane %v3328_v24, 4  ;;  %v3480_v62 = vshll.u32 %v3447_v55, 16  ;;  %vm9804_vm2 = vmor %vm6372_vm0, %vm6373_vm1 }
 0x320   : > { %v5558_v39 = vpop.f32.mrf.mxu2  ;;  %v5647_v12 = vpop.f32.mrf.mxu3  ;;  %v6369_v21 = vsub.f32 1.0, %v6368_v20  ;;  %v3490_v20 = vshll.u32 %v3448_v8, 16 }
 0x321   : > { %v5559_v7 = vadd.f32 %v5558_v39, %v5470_v0  ;;  %v5471_v56 = vpop.f32.mrf.mxu1  ;;  %v10414_v0 = vld [vmem:[#allocation14_spill] sm:$0xff]  ;;  %v3329_v38 = vsel %vm8758_vm13, %v6997_v3, %v3328_v24  ;;  %v3486_v24 = vrot.slane %v3484_v4, 4 }
 0x322   : > { %v5472_v39 = vadd.f32 %v5471_v56, %v10414_v0  ;;  %v6370_v56 = vmul.f32 %v9772_v31, %v6369_v21  ;;  %3398 = vst [vmem:[#allocation3 + $0x254] sm:$0xf] %v3329_v38  ;;  %v3694_v0 = vld [vmem:[#allocation2 + $0x18] sm:$0xe]  ;;  %v3477_v38 = vor.u32 %v3476_v29, %v3473_v5  ;;  %v3492_v63 = vrot.slane %v3490_v20, 5 }
 0x323   : > { %v9786_v58 = vadd.f32 %v5647_v12, %v5559_v7  ;;  %v9795_v7 = vpop.eup %8285  ;;  %v3332_v12 = vsel %vm8758_vm13, %v3330_v22, %v3331_v42  ;;  %v3482_v42 = vrot.slane %v3480_v62, 5  ;;  %v3696_v22 = vld [vmem:[#allocation2 + $0x20] sm:$0x1]  ;;  %v7005_v19 = vrot.slane %v3694_v0, 9  ;;  %v6118_v3 = vld [vmem:[%s8609_s11 + $0x58] sm:$0xff] }
 0x324   : > { %v9789_v36 = vpop.f32.mrf.mxu0  ;;  %v6383_v21 = vmul.f32 %v9795_v7, %v9760_v34  ;;  %3399 = vst [vmem:[#allocation3 + $0x278] sm:$0xf] %v3332_v12  ;;  %v6371_v11 = vadd.f32 %v9772_v31, %v6370_v56  ;;  %v3478_v8 = vrot.slane %v3477_v38, 4  ;;  %vm6388_vm5 = vweird.f32 %v9795_v7  ;;  %v10419_v12 = vld [vmem:[#allocation15_spill] sm:$0xff]  ;;  %v6122_v38 = vld [vmem:[%s8609_s11 + $0x78] sm:$0xff] }
 0x325   : > { %vm9831_vm6 = vmor %vm6387_vm4, %vm6388_vm5  ;;  %v6394_v0 = vor.u32 1.1754944e-38, %v6393_v32 }
 0x326   : > { %v6384_v55 = vsub.f32 1.0, %v6383_v21  ;;  %v6375_v5 = vsel %vm9804_vm2, %v9772_v31, %v6371_v11  ;;  %v3745_v21 = vsel %vm8758_vm13, %v7005_v19, %v3744_v47  ;;  %v10425_v11 = vor.u32 %v9746_v61, %v9744_v13  ;;  %v3450_v19 = vld [vmem:[#allocation2 + $0x28] sm:$0xf] }
 0x327   : > { %v9823_v29 = vsel %vm9808_vm3, %v6379_v45, %v6375_v5  ;;  %v3483_v45 = vsel %vm8726_vm10, %v3478_v8, %v3482_v42  ;;  %3814 = vst [vmem:[#allocation3 + $0x260] sm:$0xf] %v3745_v21  ;;  %v7888_v13 = vmul.f32 -1.442695, %v6118_v3  ;;  %v3283_v5 = vld [vmem:[#allocation2 + $0x20] sm:$0x1] }
 0x328   : > { %v5560_v14 = vpop.f32.mrf.mxu2  ;;  %v5649_v30 = vpop.f32.mrf.mxu3  ;;  %v6385_v62 = vmul.f32 %v9795_v7, %v6384_v55  ;;  %6489 = vperm.xlu0 %8231, %v9823_v29   ;;  %3678 = vst [vmem:[#allocation3 + $0x25c] sm:$0xf] %v3483_v45  ;;  %v9854_v55 = vadd.f32 %v9736_v1, %v9786_v58  ;;  %v7892_v1 = vmul.f32 -1.442695, %v6122_v38  ;;  %v3282_v58 = vld [vmem:[#allocation2 + $0x1c] sm:$0xf] }
 0x329   : > { %v5561_v52 = vadd.f32 %v5560_v14, %v5472_v39  ;;  %v5474_v44 = vpop.f32.mrf.mxu1  ;;  %v3747_v39 = vrot.slane %v3696_v22, 5  ;;  %v10424_v22 = vor.u32 %v9738_v6, %v9740_v49  ;;  %v3746_v14 = vrot.slane %v3744_v47, 4  ;;  %v10427_v3 = vld [vmem:[#allocation16_spill] sm:$0xff]  ;;  %v3416_v21 = vld [vmem:[#allocation2 + $0x24] sm:$0xf] }
 0x32a   : > { %v5475_v4 = vadd.f32 %v5474_v44, %v10419_v12  ;;  %v6386_v34 = vadd.f32 %v9795_v7, %v6385_v62  ;;  %v3495_v47 = vshrl.u32 %v3449_v16, 16  ;;  %8287 = vpow2.f32 %v7888_v13  ;;  %v7299_v13 = vld [vmem:[#allocation3 + $0x218] sm:$0xf]  ;;  %3432 = vst [vmem:[#allocation3 + $0x2a0] sm:$0xf] %v3416_v21 }
 0x32b   : > { %v5650_v56 = vadd.f32 %v5649_v30, %v5561_v52  ;;  %v3487_v52 = vor.u32 %v3486_v24, %v3482_v42  ;;  %v10426_v24 = vor.u32 %v9754_v46, %v9756_v35  ;;  %v3281_v35 = vld [vmem:[#allocation2 + $0x18] sm:$0xe]  ;;  %8289 = vpow2.f32 %v7892_v1  ;;  %v7986_v30 = vld [vmem:[#allocation3 + $0x230] sm:$0xf0] }
 0x32c   : > { %v9828_v20 = vpop.f32.mrf.mxu0  ;;  %5789 = vmatmul.bf16.gmra.mxu1 %v10424_v22  ;;  %v6390_v6 = vsel %vm9831_vm6, %v9795_v7, %v6386_v34  ;;  %v3335_v7 = vrot.slane %v3282_v58, 5  ;;  %v6998_v44 = vrot.slane %v3281_v35, 9  ;;  %v3338_v31 = vrot.slane %v3283_v5, 5  ;;  %v3697_v35 = vld [vmem:[#allocation2 + $0x24] sm:$0xe] }
 0x32d   : > { %5878 = vmatmul.bf16.gmra.mxu2 %v10425_v11  ;;  %v9857_v42 = vadd.f32 %v9789_v36, %v5650_v56  ;;  %5967 = vmatmul.bf16.gmra.mxu3 %v10426_v24  ;;  %v3488_v49 = vrot.slane %v3487_v52, 4  ;;  %v9867_v61 = vsel %vm9839_vm7, %v6394_v0, %v6390_v6  ;;  %v3748_v36 = vsel %vm8758_vm13, %v3746_v14, %v3747_v39  ;;  %v9876_v39 = vld [vmem:[#allocation3 + $0x22c] sm:$0xf0]  ;;  %v9886_v11 = vld [vmem:[#allocation3 + $0x214] sm:$0xf] }
 0x32e   : > { %6494 = vperm.xlu1 %8232, %v9867_v61   ;;  %3815 = vst [vmem:[#allocation3 + $0x284] sm:$0xf] %v3748_v36  ;;  %v9878_v56 = vld [vmem:[#allocation3 + $0x210] sm:$0xf]  ;;  %v3337_v12 = vrot.slane %v3335_v7, 4  ;;  %v3498_v0 = vshll.u32 %v3449_v16, 16  ;;  %v3336_v52 = vsel %vm8758_vm13, %v6998_v44, %v3335_v7 }
 0x32f   : > { %6056 = vmatmul.bf16.gmra.mxu0 %v7264_v15  ;;  %v3493_v15 = vsel %vm8726_vm10, %v3488_v49, %v3492_v63  ;;  %v3497_v63 = vrot.slane %v3495_v47, 4  ;;  %v3504_v38 = vshll.u32 %v3450_v19, 16  ;;  %v6523_v22 = vsub.f32 1.0, %v9522_v54  ;;  %v9888_v14 = vld [vmem:[#allocation3 + $0x234] sm:$0xf0] }
 0x330   : > { %v5563_v46 = vpop.f32.mrf.mxu2  ;;  %v5652_v8 = vpop.f32.mrf.mxu3  ;;  %3679 = vst [vmem:[#allocation3 + $0x280] sm:$0xf] %v3493_v15  ;;  %v3339_v16 = vsel %vm8758_vm13, %v3337_v12, %v3338_v31  ;;  %v3417_v24 = vld [vmem:[#allocation2 + $0x28] sm:$0xf]  ;;  %v3500_v6 = vrot.slane %v3498_v0, 5  ;;  %v6526_v49 = vsub.f32 1.0, %v9560_v17 }
 0x331   : > { %v5564_v32 = vadd.f32 %v5563_v46, %v5475_v4  ;;  %v5476_v62 = vpop.f32.mrf.mxu1  ;;  %3400 = vst [vmem:[#allocation3 + $0x29c] sm:$0xf] %v3336_v52  ;;  %v7987_v47 = vld [vmem:[#allocation3 + $0x238] sm:$0xf0]  ;;  %v3451_v36 = vld [vmem:[#allocation2 + $0x2c] sm:$0x1]  ;;  %v8288_v54 = vpop.eup %8287 }
 0x332   : > { %v5477_v34 = vadd.f32 %v5476_v62, %v10427_v3  ;;  %3401 = vst [vmem:[#allocation3 + $0x2c0] sm:$0xf] %v3339_v16  ;;  %v3508_v1 = vshrl.u32 %v3450_v19, 16  ;;  %v9896_v46 = vld [vmem:[#allocation3 + $0x254] sm:$0xf]  ;;  %v3501_v15 = vor.u32 %v3500_v6, %v3497_v63  ;;  %v8290_v7 = vpop.eup %8289  ;;  %v9901_v5 = vadd.f32 1.0, %v8288_v54 }
 0x333   : > { %v5653_v45 = vadd.f32 %v5652_v8, %v5564_v32  ;;  %v7288_v32 = vor.u32 %v9874_v40, %v9876_v39  ;;  %v7292_v8 = vor.u32 %v7986_v30, %v9878_v56  ;;  %3433 = vst [vmem:[#allocation3 + $0x2c4] sm:$0xf] %v3417_v24  ;;  %v3506_v44 = vrot.slane %v3504_v38, 5  ;;  %v3698_v19 = vld [vmem:[#allocation2 + $0x28] sm:$0xf]  ;;  %v10429_v24 = vld [vmem:[#allocation17_spill] sm:$0xff] }
 0x334   : > { %v9881_v4 = vpop.f32.mrf.mxu0  ;;  %v9905_v12 = vadd.f32 1.0, %v8290_v7  ;;  %v3502_v31 = vrot.slane %v3501_v15, 4  ;;  %v3510_v0 = vrot.slane %v3508_v1, 4  ;;  %v3514_v63 = vshll.u32 %v3451_v36, 16  ;;  %v9909_v39 = vld [vmem:[#allocation3 + $0x258] sm:$0xf] }
 0x335   : > { %v9894_v58 = vadd.f32 %v9828_v20, %v5653_v45  ;;  %v9903_v20 = vld [vmem:[#allocation3 + $0x274] sm:$0xf0]  ;;  %v7296_v40 = vor.u32 %v9886_v11, %v9888_v14  ;;  %v9911_v56 = vld [vmem:[#allocation3 + $0x278] sm:$0xf0]  ;;  %8291 = vrcp.f32 %v9901_v5  ;;  %v7006_v30 = vrot.slane %v3697_v35, 9 }
 0x336   : > { %6541 = vperm.xlu1 %8232, %v6523_v22   ;;  %v7300_v21 = vor.u32 %v7987_v47, %v7299_v13  ;;  %v6361_v38 = vand.u32 2147483647, %v9901_v5  ;;  %8293 = vrcp.f32 %v9905_v12  ;;  %v3751_v22 = vrot.slane %v3698_v19, 5  ;;  %v3699_v36 = vld [vmem:[#allocation2 + $0x2c] sm:$0x1]  ;;  %v6121_v35 = vld [vmem:[%s8609_s11 + $0x70] sm:$0xff] }
 0x337   : > { %10428 = vst [vmem:[#allocation14_spill] sm:$0xff] %v9894_v58  ;;  %v9922_v1 = vld [vmem:[#allocation2 + $0x30] sm:$0xf]  ;;  %v3507_v47 = vsel %vm8726_vm10, %v3502_v31, %v3506_v44  ;;  %v3511_v54 = vor.u32 %v3510_v0, %v3506_v44  ;;  %v3516_v15 = vrot.slane %v3514_v63, 5  ;;  %v6363_v7 = vand.u32 2147483648, %v9901_v5  ;;  %s8132_s11 = sshll.u32 %s8379_s12, 4 }
 0x338   : > { %v5565_v62 = vpop.f32.mrf.mxu2  ;;  %v5654_v3 = vpop.f32.mrf.mxu3  ;;  %3680 = vst [vmem:[#allocation3 + $0x2a4] sm:$0xf] %v3507_v47  ;;  %vm9934_vm8 = vcmp.eq.f32.partialorder %v6361_v38, 8.507059e+37  ;;  %v3753_v31 = vrot.slane %v3751_v22, 4  ;;  %vm6357_vm9 = vweird.f32 %v9901_v5  ;;  %vm6417_vm11 = vweird.f32 %v9905_v12  ;;  %v3418_v6 = vld [vmem:[#allocation2 + $0x30] sm:$0xf]  ;;  %s6680_s28 = sadd.s32 %s8132_s11, %s7896_s14 }
 0x339   : > { %v5566_v45 = vadd.f32 %v5565_v62, %v5477_v34  ;;  %v5479_v52 = vpop.f32.mrf.mxu1  ;;  %v6423_v62 = vand.u32 2147483648, %v9905_v12  ;;  %v3512_v44 = vrot.slane %v3511_v54, 4  ;;  %v7891_v63 = vmul.f32 -1.442695, %v6121_v35  ;;  %v3453_v35 = vld [vmem:[#allocation2 + $0x34] sm:$0xf] }
 0x33a   : > { %v5480_v11 = vadd.f32 %v5479_v52, %v10429_v24  ;;  %v3419_v34 = vld [vmem:[#allocation2 + $0x34] sm:$0xf]  ;;  %3434 = vst [vmem:[#allocation3 + $0x2e8] sm:$0xf] %v3418_v6  ;;  %v3528_v6 = vshll.u32 %v3453_v35, 16  ;;  %s7897_s17 = sshll.u32 %s6680_s28, 3 }
 0x33b   : > { %v5655_v16 = vadd.f32 %v5654_v3, %v5566_v45  ;;  %v3752_v45 = vsel %vm8758_vm13, %v7006_v30, %v3751_v22  ;;  %v9939_v0 = vpop.eup %8291  ;;  %v3285_v30 = vld [vmem:[#allocation2 + $0x28] sm:$0xf]  ;;  %v3517_v22 = vsel %vm8726_vm10, %v3512_v44, %v3516_v15  ;;  %8295 = vpow2.f32 %v7891_v63  ;;  %3435 = vst [vmem:[#allocation3 + $0x30c] sm:$0xf] %v3419_v34  ;;  %s6682_s18 = scalar_lea.hbm %s10344_s9, %s7897_s17 }
 0x33c   : > { %v9918_v14 = vpop.f32.mrf.mxu0  ;;  %5794 = vmatmul.bf16.gmra.mxu1 %v7288_v32  ;;  %v3754_v32 = vrot.slane %v3699_v36, 5  ;;  %3816 = vst [vmem:[#allocation3 + $0x2a8] sm:$0xf] %v3752_v45  ;;  %v9946_v52 = vpop.eup %8293  ;;  %v6353_v38 = vmul.f32 %v9939_v0, %v9901_v5  ;;  %vm6358_vm12 = vweird.f32 %v9939_v0  ;;  %v3284_v36 = vld [vmem:[#allocation2 + $0x24] sm:$0xe]  ;;  %v6424_v5 = vor.u32 1.1754944e-38, %v6423_v62 }
 0x33d   : > { %5883 = vmatmul.bf16.gmra.mxu2 %v7292_v8  ;;  %5972 = vmatmul.bf16.gmra.mxu3 %v7296_v40  ;;  %v3519_v8 = vshrl.u32 %v9922_v1, 16  ;;  %v9944_v40 = vadd.f32 %v9881_v4, %v5655_v16  ;;  %v3286_v4 = vld [vmem:[#allocation2 + $0x2c] sm:$0x1]  ;;  %v6413_v54 = vmul.f32 %v9946_v52, %v9905_v12  ;;  %vm6418_vm14 = vweird.f32 %v9946_v52  ;;  %3681 = vst [vmem:[#allocation3 + $0x2c8] sm:$0xf] %v3517_v22  ;;  %vm9975_vm15 = vmor %vm6357_vm9, %vm6358_vm12  ;;  %s6685_s29 = sshll.u32 %s6682_s18, 4  ;;  %s6686_s29 = int_to_ptr.hbm [resolvable:$true] %s6685_s29 }
 0x33e   : > { %v3755_v24 = vsel %vm8758_vm13, %v3753_v31, %v3754_v32  ;;  %6556 = vperm.xlu1 %8232, %v6526_v49   ;;  %v6354_v15 = vsub.f32 1.0, %v6353_v38  ;;  %v6999_v44 = vrot.slane %v3284_v36, 9  ;;  %v3342_v31 = vrot.slane %v3285_v30, 5  ;;  %v10433_v49 = vld [vmem:[#allocation18_spill] sm:$0xff]  ;;  %v7991_v36 = vld [vmem:[#allocation3 + $0x25c] sm:$0xf]  ;;  %vm9985_vm0 = vmor %vm6417_vm11, %vm6418_vm14 }
 0x33f   : > { %6061 = vmatmul.bf16.gmra.mxu0 %v7300_v21  ;;  %10432 = vst [vmem:[#allocation15_spill] sm:$0xff] %v9944_v40  ;;  %v3345_v32 = vrot.slane %v3286_v4, 5  ;;  %v3521_v19 = vrot.slane %v3519_v8, 4  ;;  %v3522_v30 = vshll.u32 %v9922_v1, 16  ;;  %v7329_v4 = vld [vmem:[#allocation3 + $0x27c] sm:$0xf0] }
 0x340   : > { %v5568_v21 = vpop.f32.mrf.mxu2  ;;  %v5657_v47 = vpop.f32.mrf.mxu3  ;;  %3817 = vst [vmem:[#allocation3 + $0x2cc] sm:$0xf] %v3755_v24  ;;  %v6355_v22 = vmul.f32 %v9939_v0, %v6354_v15  ;;  %v3343_v63 = vsel %vm8758_vm13, %v6999_v44, %v3342_v31  ;;  %v3344_v38 = vrot.slane %v3342_v31, 4  ;;  %v9969_v24 = vld [vmem:[#allocation2 + $0x34] sm:$0xf]  ;;  %v3532_v1 = vshrl.u32 %v3453_v35, 16 }
 0x341   : > { %v5569_v16 = vadd.f32 %v5568_v21, %v5480_v11  ;;  %v5481_v45 = vpop.f32.mrf.mxu1  ;;  %v6414_v21 = vsub.f32 1.0, %v6413_v54  ;;  %v6364_v54 = vor.u32 1.1754944e-38, %v6363_v7  ;;  %3402 = vst [vmem:[#allocation3 + $0x2e4] sm:$0xf] %v3343_v63  ;;  %v3454_v31 = vld [vmem:[#allocation2 + $0x38] sm:$0x1]  ;;  %v8296_v35 = vpop.eup %8295 }
 0x342   : > { %v5482_v13 = vadd.f32 %v5481_v45, %v10433_v49  ;;  %v6356_v15 = vadd.f32 %v9939_v0, %v6355_v22  ;;  %v3346_v7 = vsel %vm8758_vm13, %v3344_v38, %v3345_v32  ;;  %v3524_v49 = vrot.slane %v3522_v30, 5  ;;  %v10037_v63 = vld [vmem:[#allocation3 + $0x2bc] sm:$0xf0]  ;;  %s8315_s24 = sshra.s32 %s6686_s29, 4  ;;  %s8316_s24 = int_to_ptr.hbm [resolvable:$true] %s8315_s24 }
 0x343   : > { %v9960_v17 = vadd.f32 %v5657_v47, %v5569_v16  ;;  %v7335_v16 = vld [vmem:[#allocation3 + $0x260] sm:$0xf]  ;;  %v7996_v47 = vld [vmem:[#allocation3 + $0x280] sm:$0xf0]  ;;  %v6415_v45 = vmul.f32 %v9946_v52, %v6414_v21  ;;  %v10438_v22 = vand.u32 2147483647, %v9905_v12  ;;  %p8322_p10 = scmp.lt.s32.totalorder %s8316_s24, %s10344_s9 }
 0x344   : > { %v9963_v11 = vpop.f32.mrf.mxu0  ;;  %3403 = vst [vmem:[#allocation3 + $0x308] sm:$0xf] %v3346_v7  ;;  %v3530_v40 = vrot.slane %v3528_v6, 5  ;;  %v3758_v58 = vrot.slane %v9969_v24, 5  ;;  %v6360_v34 = vsel %vm9975_vm15, %v9939_v0, %v6356_v15  ;;  %v10004_v32 = vadd.f32 1.0, %v8296_v35  ;;  %s8317_s26 = scalar_lea.hbm %s8316_s24, 128 }
 0x345   : > { %v6416_v21 = vadd.f32 %v9946_v52, %v6415_v45  ;;  %vm9996_vm1 = vcmp.eq.f32.partialorder %v10438_v22, 8.507059e+37  ;;  %v3525_v38 = vor.u32 %v3524_v49, %v3521_v19  ;;  %v3534_v30 = vrot.slane %v3532_v1, 4  ;;  %v3702_v19 = vld [vmem:[#allocation2 + $0x38] sm:$0x1]  ;;  %v10442_v1 = vld [vmem:[#allocation19_spill] sm:$0xff]  ;;  %p8318_p6 = scmp.ne.s32.totalorder %s8316_s24, %s8317_s26  ;;  %p8323_p11 = scmp.lt.s32.totalorder %s8321_s25, %s8317_s26 }
 0x346   : > { %v10441_v45 = vsub.f32 1.0, %v9609_v50  ;;  %v10010_v7 = vsel %vm9934_vm8, %v6364_v54, %v6360_v34  ;;  %v3538_v6 = vshll.u32 %v3454_v31, 16  ;;  %v7332_v0 = vor.u32 %v7991_v36, %v7329_v4  ;;  %v3455_v4 = vld [vmem:[#allocation2 + $0x3c] sm:$0xf] }
 0x347   : > { %v6420_v24 = vsel %vm9985_vm0, %v9946_v52, %v6416_v21  ;;  %v7336_v15 = vor.u32 %v7996_v47, %v7335_v16  ;;  %6484 = vperm.xlu2 %8233, %v10010_v7   ;;  %8297 = vrcp.f32 %v10004_v32  ;;  %v6525_v3 = vsub.f32 1.0, %v9546_v57  ;;  %p8319_p7 = pnand %p8318_p6, %p8501_p3  ;;  %p8324_p12 = por %p8323_p11, %p8322_p10 }
 0x348   : > { %v5570_v62 = vpop.f32.mrf.mxu2  ;;  %6571 = vperm.xlu1 %8232, %v10441_v45   ;;  %v5659_v22 = vpop.f32.mrf.mxu3  ;;  %v10018_v50 = vsel %vm9996_vm1, %v6424_v5, %v6420_v24  ;;  %v3760_v36 = vrot.slane %v3758_v58, 4  ;;  %v6528_v16 = vsub.f32 1.0, %v9671_v23  ;;  %v6532_v47 = vsub.f32 1.0, %v9702_v53  ;;  %v10028_v5 = vld [vmem:[#allocation3 + $0x29c] sm:$0xf] }
 0x349   : > { %v5571_v12 = vadd.f32 %v5570_v62, %v5482_v13  ;;  %v5760_v8 = vpop.f32.mrf.mxu1  ;;  %v3700_v13 = vld [vmem:[#allocation2 + $0x30] sm:$0xe]  ;;  %6504 = vperm.xlu0 %8231, %v10018_v50   ;;  %v3526_v31 = vrot.slane %v3525_v38, 4  ;;  %v3535_v49 = vor.u32 %v3534_v30, %v3530_v40  ;;  %v6535_v35 = vsub.f32 1.0, %v9823_v29  ;;  %p8320_p9 = pneg %p8319_p7 }
 0x34a   : > { %v5761_v44 = vadd.f32 %v5760_v8, %v10442_v1  ;;  %v10443_v57 = vor.u32 %v9896_v46, %v9903_v20  ;;  %v10444_v21 = vor.u32 %v9911_v56, %v9909_v39  ;;  %v3540_v62 = vrot.slane %v3538_v6, 5 }
 0x34b   : > { %v5660_v54 = vadd.f32 %v5659_v22, %v5571_v12  ;;  %v7007_v34 = vrot.slane %v3700_v13, 9  ;;  %v3761_v45 = vrot.slane %v3702_v19, 5  ;;  %v6406_v53 = vand.u32 2147483647, %v10004_v32  ;;  %v3288_v12 = vld [vmem:[#allocation2 + $0x34] sm:$0xf]  ;;  %p8325_p13 = pnand %p8324_p12, %p8320_p9 }
 0x34c   : > { %v10023_v52 = vpop.f32.mrf.mxu0  ;;  %5799 = vmatmul.bf16.gmra.mxu1 %v10443_v57  ;;  %v6408_v38 = vand.u32 2147483648, %v10004_v32  ;;  %v3531_v30 = vsel %vm8726_vm10, %v3526_v31, %v3530_v40  ;;  %v3543_v46 = vshrl.u32 %v3455_v4, 16  ;;  %v3536_v20 = vrot.slane %v3535_v49, 4  ;;  %v3287_v40 = vld [vmem:[#allocation2 + $0x30] sm:$0xe] }
 0x34d   : > { %5888 = vmatmul.bf16.gmra.mxu2 %v10444_v21  ;;  %5977 = vmatmul.bf16.gmra.mxu3 %v7332_v0  ;;  %3682 = vst [vmem:[#allocation3 + $0x2ec] sm:$0xf] %v3531_v30  ;;  %v3759_v39 = vsel %vm8758_vm13, %v7007_v34, %v3758_v58  ;;  %v3762_v56 = vsel %vm8758_vm13, %v3760_v36, %v3761_v45  ;;  %v3546_v22 = vshll.u32 %v3455_v4, 16  ;;  %v10047_v24 = vpop.eup %8297  ;;  %vm6402_vm2 = vweird.f32 %v10004_v32  ;;  %v3289_v0 = vld [vmem:[#allocation2 + $0x38] sm:$0x1] }
 0x34e   : > { %v7360_v8 = vor.u32 %v10028_v5, %v10037_v63  ;;  %3818 = vst [vmem:[#allocation3 + $0x2f0] sm:$0xf] %v3759_v39  ;;  %v10054_v58 = vadd.f32 %v9918_v14, %v9960_v17  ;;  %v6398_v1 = vmul.f32 %v10047_v24, %v10004_v32  ;;  %vm6403_vm3 = vweird.f32 %v10047_v24  ;;  %v3456_v4 = vld [vmem:[#allocation2 + $0x40] sm:$0xf]  ;;  %v10064_v49 = vld [vmem:[#allocation3 + $0x2a0] sm:$0xf] }
 0x34f   : > { %6066 = vmatmul.bf16.gmra.mxu0 %v7336_v15  ;;  %v10057_v15 = vadd.f32 %v9963_v11, %v5660_v54  ;;  %v3541_v36 = vsel %vm8726_vm10, %v3536_v20, %v3540_v62  ;;  %3819 = vst [vmem:[#allocation3 + $0x314] sm:$0xf] %v3762_v56  ;;  %v10066_v14 = vld [vmem:[#allocation3 + $0x2c0] sm:$0xf0]  ;;  %v7000_v17 = vrot.slane %v3287_v40, 9  ;;  %v3349_v11 = vrot.slane %v3288_v12, 5  ;;  %vm10085_vm4 = vmor %vm6402_vm2, %vm6403_vm3 }
 0x350   : > { %v5849_v6 = vpop.f32.mrf.mxu2  ;;  %6586 = vperm.xlu1 %8232, %v6532_v47   ;;  %v5938_v19 = vpop.f32.mrf.mxu3  ;;  %v3457_v47 = vld [vmem:[#allocation2 + $0x44] sm:$0x1]  ;;  %3683 = vst [vmem:[#allocation3 + $0x310] sm:$0xf] %v3541_v36  ;;  %v3352_v54 = vrot.slane %v3289_v0, 5  ;;  %v6399_v45 = vsub.f32 1.0, %v6398_v1 }
 0x351   : > { %v5850_v13 = vadd.f32 %v5849_v6, %v5761_v44  ;;  %v5762_v31 = vpop.f32.mrf.mxu1  ;;  %v3545_v44 = vrot.slane %v3543_v46, 4  ;;  %6551 = vperm.xlu0 %8231, %v6525_v3   ;;  %v3420_v62 = vld [vmem:[#allocation2 + $0x3c] sm:$0xf]  ;;  %v3421_v30 = vld [vmem:[#allocation2 + $0x40] sm:$0xf]  ;;  %v3548_v20 = vrot.slane %v3546_v22, 5  ;;  %v3350_v12 = vsel %vm8758_vm13, %v7000_v17, %v3349_v11 }
 0x352   : > { %v5763_v21 = vadd.f32 %v5762_v31, %v9354_v33  ;;  %v3704_v39 = vld [vmem:[#allocation2 + $0x40] sm:$0xf]  ;;  %v10071_v56 = vld [vmem:[#allocation3 + $0x2a4] sm:$0xf]  ;;  %v3351_v40 = vrot.slane %v3349_v11, 4  ;;  %v3552_v46 = vshll.u32 %v3456_v4, 16  ;;  %v6400_v3 = vmul.f32 %v10047_v24, %v6399_v45 }
 0x353   : > { %v5939_v57 = vadd.f32 %v5938_v19, %v5850_v13  ;;  %v10073_v6 = vld [vmem:[#allocation3 + $0x2c4] sm:$0xf0]  ;;  %3436 = vst [vmem:[#allocation3 + $0x330] sm:$0xf] %v3420_v62  ;;  %v3556_v0 = vshrl.u32 %v3456_v4, 16  ;;  %v3549_v22 = vor.u32 %v3548_v20, %v3545_v44  ;;  %v3562_v19 = vshll.u32 %v3457_v47, 16 }
 0x354   : > { %v10069_v34 = vpop.f32.mrf.mxu0  ;;  %v7371_v13 = vld [vmem:[#allocation3 + $0x2a8] sm:$0xf]  ;;  %3404 = vst [vmem:[#allocation3 + $0x32c] sm:$0xf] %v3350_v12  ;;  %v3703_v1 = vld [vmem:[#allocation2 + $0x3c] sm:$0xe]  ;;  %v7364_v11 = vor.u32 %v10066_v14, %v10064_v49  ;;  %v6401_v44 = vadd.f32 %v10047_v24, %v6400_v3  ;;  %v7368_v12 = vor.u32 %v10071_v56, %v10073_v6 }
 0x355   : > { %v10078_v33 = vadd.f32 %v10023_v52, %v5939_v57  ;;  %v6409_v31 = vor.u32 1.1754944e-38, %v6408_v38  ;;  %v3353_v52 = vsel %vm8758_vm13, %v3351_v40, %v3352_v54  ;;  %3437 = vst [vmem:[#allocation3 + $0x354] sm:$0xf] %v3421_v30  ;;  %v3554_v4 = vrot.slane %v3552_v46, 5  ;;  %v8005_v47 = vld [vmem:[#allocation3 + $0x2c8] sm:$0xf0] }
 0x356   : > { %v3558_v17 = vrot.slane %v3556_v0, 4  ;;  %vm10096_vm5 = vcmp.eq.f32.partialorder %v6406_v53, 8.507059e+37  ;;  %3405 = vst [vmem:[#allocation3 + $0x350] sm:$0xf] %v3353_v52  ;;  %v3550_v38 = vrot.slane %v3549_v22, 4  ;;  %v3564_v54 = vrot.slane %v3562_v19, 5 }
 0x357   : > { %v7008_v30 = vrot.slane %v3703_v1, 9  ;;  %v3765_v20 = vrot.slane %v3704_v39, 5  ;;  %v6405_v32 = vsel %vm10085_vm4, %v10047_v24, %v6401_v44  ;;  %v3705_v40 = vld [vmem:[#allocation2 + $0x44] sm:$0x1]  ;;  %v7372_v0 = vor.u32 %v8005_v47, %v7371_v13  ;;  %v3459_v1 = vld [vmem:[#allocation2 + $0x4c] sm:$0xf] }
 0x358   : > { %v5851_v45 = vpop.f32.mrf.mxu2  ;;  %v3559_v62 = vor.u32 %v3558_v17, %v3554_v4  ;;  %6601 = vperm.xlu1 %8232, %v6535_v35   ;;  %v5940_v14 = vpop.f32.mrf.mxu3  ;;  %v3555_v53 = vsel %vm8726_vm10, %v3550_v38, %v3554_v4  ;;  %v10111_v39 = vsel %vm10096_vm5, %v6409_v31, %v6405_v32  ;;  %v6538_v3 = vsub.f32 1.0, %v10018_v50  ;;  %v3291_v52 = vld [vmem:[#allocation2 + $0x40] sm:$0xf]  ;;  %v3460_v63 = vld [vmem:[#allocation2 + $0x50] sm:$0x1] }
 0x359   : > { %v5852_v49 = vadd.f32 %v5851_v45, %v5763_v21  ;;  %v5765_v46 = vpop.f32.mrf.mxu1  ;;  %3684 = vst [vmem:[#allocation3 + $0x334] sm:$0xf] %v3555_v53  ;;  %v3766_v35 = vsel %vm8758_vm13, %v7008_v30, %v3765_v20  ;;  %v3458_v21 = vld [vmem:[#allocation2 + $0x48] sm:$0xf]  ;;  %6499 = vperm.xlu2 %8233, %v10111_v39   ;;  %6566 = vperm.xlu0 %8231, %v6528_v16   ;;  %v3767_v13 = vrot.slane %v3765_v20, 4  ;;  %v3768_v19 = vrot.slane %v3705_v40, 5 }
 0x35a   : > { %v3560_v29 = vrot.slane %v3559_v62, 4  ;;  %v5766_v6 = vadd.f32 %v5765_v46, %v9367_v27  ;;  %3820 = vst [vmem:[#allocation3 + $0x338] sm:$0xf] %v3766_v35  ;;  %v3567_v36 = vshrl.u32 %v3458_v21, 16  ;;  %v3570_v23 = vshll.u32 %v3458_v21, 16 }
 0x35b   : > { %v5941_v56 = vadd.f32 %v5940_v14, %v5852_v49  ;;  %v6524_v16 = vsub.f32 1.0, %v9535_v28  ;;  %v6531_v50 = vsub.f32 1.0, %v9758_v10  ;;  %v3769_v31 = vsel %vm8758_vm13, %v3767_v13, %v3768_v19  ;;  %v3292_v47 = vld [vmem:[#allocation2 + $0x44] sm:$0x1]  ;;  %v3706_v14 = vld [vmem:[#allocation2 + $0x48] sm:$0xe] }
 0x35c   : > { %v6032_v24 = vpop.f32.mrf.mxu0  ;;  %v3565_v22 = vsel %vm8726_vm10, %v3560_v29, %v3564_v54  ;;  %5804 = vmatmul.bf16.gmra.mxu1 %v7360_v8  ;;  %v3576_v4 = vshll.u32 %v3459_v1, 16  ;;  %3821 = vst [vmem:[#allocation3 + $0x35c] sm:$0xf] %v3769_v31  ;;  %v3356_v5 = vrot.slane %v3291_v52, 5  ;;  %v3569_v8 = vrot.slane %v3567_v36, 4 }
 0x35d   : > { %5893 = vmatmul.bf16.gmra.mxu2 %v7364_v11  ;;  %v10126_v27 = vadd.f32 %v10069_v34, %v5941_v56  ;;  %3685 = vst [vmem:[#allocation3 + $0x358] sm:$0xf] %v3565_v22  ;;  %5982 = vmatmul.bf16.gmra.mxu3 %v7368_v12  ;;  %v6527_v34 = vsub.f32 1.0, %v9636_v43  ;;  %v3290_v11 = vld [vmem:[#allocation2 + $0x3c] sm:$0xe]  ;;  %v3572_v28 = vrot.slane %v3570_v23, 5 }
 0x35e   : > { %v7001_v57 = vrot.slane %v3290_v11, 9  ;;  %v3358_v38 = vrot.slane %v3356_v5, 4  ;;  %v3359_v45 = vrot.slane %v3292_v47, 5  ;;  %v3578_v30 = vrot.slane %v3576_v4, 5  ;;  %v3707_v29 = vld [vmem:[#allocation2 + $0x4c] sm:$0xf] }
 0x35f   : > { %6071 = vmatmul.bf16.gmra.mxu0 %v7372_v0  ;;  %v3573_v54 = vor.u32 %v3572_v28, %v3569_v8  ;;  %v3580_v20 = vshrl.u32 %v3459_v1, 16  ;;  %v3586_v49 = vshll.u32 %v3460_v63, 16  ;;  %v6534_v12 = vsub.f32 1.0, %v10010_v7  ;;  %v3422_v0 = vld [vmem:[#allocation2 + $0x48] sm:$0xf] }
 0x360   : > { %v5854_v17 = vpop.f32.mrf.mxu2  ;;  %6616 = vperm.xlu1 %8232, %v6538_v3   ;;  %v5943_v10 = vpop.f32.mrf.mxu3  ;;  %v3357_v46 = vsel %vm8758_vm13, %v7001_v57, %v3356_v5  ;;  %v8008_v35 = vld [vmem:[#allocation3 + $0x2e4] sm:$0xf]  ;;  %v7393_v21 = vld [vmem:[#allocation3 + $0x304] sm:$0xf0]  ;;  %v3360_v13 = vsel %vm8758_vm13, %v3358_v38, %v3359_v45  ;;  %v3423_v7 = vld [vmem:[#allocation2 + $0x4c] sm:$0xf] }
 0x361   : > { %v5855_v44 = vadd.f32 %v5854_v17, %v5766_v6  ;;  %v5767_v62 = vpop.f32.mrf.mxu1  ;;  %6581 = vperm.xlu0 %8231, %v6531_v50   ;;  %6546 = vperm.xlu2 %8233, %v6524_v16   ;;  %v7399_v56 = vld [vmem:[#allocation3 + $0x2e8] sm:$0xf]  ;;  %v8013_v6 = vld [vmem:[#allocation3 + $0x308] sm:$0xf0]  ;;  %3406 = vst [vmem:[#allocation3 + $0x374] sm:$0xf] %v3357_v46 }
 0x362   : > { %v5768_v53 = vadd.f32 %v5767_v62, %v9377_v59  ;;  %v3574_v3 = vrot.slane %v3573_v54, 4  ;;  %v3582_v22 = vrot.slane %v3580_v20, 4  ;;  %v8009_v19 = vld [vmem:[#allocation3 + $0x2ec] sm:$0xf]  ;;  %3407 = vst [vmem:[#allocation3 + $0x398] sm:$0xf] %v3360_v13 }
 0x363   : > { %v5944_v32 = vadd.f32 %v5943_v10, %v5855_v44  ;;  %v3588_v1 = vrot.slane %v3586_v49, 5  ;;  %v3708_v36 = vld [vmem:[#allocation2 + $0x50] sm:$0x1]  ;;  %v7009_v23 = vrot.slane %v3706_v14, 9  ;;  %v7407_v16 = vld [vmem:[#allocation3 + $0x2f0] sm:$0xf]  ;;  %v7396_v44 = vor.u32 %v8008_v35, %v7393_v21 }
 0x364   : > { %v6034_v40 = vpop.f32.mrf.mxu0  ;;  %3438 = vst [vmem:[#allocation3 + $0x378] sm:$0xf] %v3422_v0  ;;  %v3579_v50 = vsel %vm8726_vm10, %v3574_v3, %v3578_v30  ;;  %v3583_v31 = vor.u32 %v3582_v22, %v3578_v30  ;;  %v3772_v52 = vrot.slane %v3707_v29, 5  ;;  %v3775_v4 = vrot.slane %v3708_v36, 5  ;;  %v7401_v5 = vld [vmem:[#allocation3 + $0x30c] sm:$0xf0] }
 0x365   : > { %v10139_v59 = vadd.f32 %v6032_v24, %v5944_v32  ;;  %v8014_v63 = vld [vmem:[#allocation3 + $0x310] sm:$0xf0]  ;;  %3439 = vst [vmem:[#allocation3 + $0x39c] sm:$0xf] %v3423_v7  ;;  %v7400_v10 = vor.u32 %v8013_v6, %v7399_v56  ;;  %v7404_v38 = vor.u32 %v8009_v19, %v7401_v5  ;;  %v3461_v30 = vld [vmem:[#allocation2 + $0x54] sm:$0xf]  ;;  %v10156_v19 = vpop.permute.xlu0 %6429 }
 0x366   : > { %v3584_v17 = vrot.slane %v3583_v31, 4  ;;  %3686 = vst [vmem:[#allocation3 + $0x37c] sm:$0xf] %v3579_v50  ;;  %v3773_v24 = vsel %vm8758_vm13, %v7009_v23, %v3772_v52  ;;  %v3774_v11 = vrot.slane %v3772_v52, 4  ;;  %v7408_v45 = vor.u32 %v8014_v63, %v7407_v16  ;;  %v3462_v32 = vld [vmem:[#allocation2 + $0x58] sm:$0xf]  ;;  %v6450_v31 = vpop.permute.xlu2 %6449 }
 0x367   : > { %3822 = vst [vmem:[#allocation3 + $0x380] sm:$0xf] %v3773_v24  ;;  %v3594_v46 = vshll.u32 %v3461_v30, 16  ;;  %v3294_v21 = vld [vmem:[#allocation2 + $0x4c] sm:$0xf]  ;;  %v3604_v56 = vshrl.u32 %v3462_v32, 16 }
 0x368   : > { %v5856_v8 = vpop.f32.mrf.mxu2  ;;  %v5945_v28 = vpop.f32.mrf.mxu3  ;;  %v3589_v62 = vsel %vm8726_vm10, %v3584_v17, %v3588_v1  ;;  %v3776_v54 = vsel %vm8758_vm13, %v3774_v11, %v3775_v4  ;;  %v6537_v43 = vsub.f32 1.0, %v10111_v39  ;;  %v3463_v6 = vld [vmem:[#allocation2 + $0x5c] sm:$0x1]  ;;  %v3293_v3 = vld [vmem:[#allocation2 + $0x48] sm:$0xe] }
 0x369   : > { %v5857_v47 = vadd.f32 %v5856_v8, %v5768_v53  ;;  %v5770_v57 = vpop.f32.mrf.mxu1  ;;  %6596 = vperm.xlu0 %8231, %v6534_v12   ;;  %3687 = vst [vmem:[#allocation3 + $0x3a0] sm:$0xf] %v3589_v62  ;;  %6561 = vperm.xlu2 %8233, %v6527_v34   ;;  %v3591_v53 = vshrl.u32 %v3461_v30, 16  ;;  %v3596_v35 = vrot.slane %v3594_v46, 5  ;;  %v6530_v12 = vsub.f32 1.0, %v9640_v37 }
 0x36a   : > { %v5771_v49 = vadd.f32 %v5770_v57, %v9408_v18  ;;  %3823 = vst [vmem:[#allocation3 + $0x3a4] sm:$0xf] %v3776_v54  ;;  %v3600_v18 = vshll.u32 %v3462_v32, 16  ;;  %v3363_v34 = vrot.slane %v3294_v21, 5  ;;  %v3295_v22 = vld [vmem:[#allocation2 + $0x50] sm:$0x1] }
 0x36b   : > { %v5946_v20 = vadd.f32 %v5945_v28, %v5857_v47  ;;  %v3593_v29 = vrot.slane %v3591_v53, 4  ;;  %v7002_v36 = vrot.slane %v3293_v3, 9  ;;  %v3366_v16 = vrot.slane %v3295_v22, 5  ;;  %v3424_v17 = vld [vmem:[#allocation2 + $0x54] sm:$0xf] }
 0x36c   : > { %v6037_v14 = vpop.f32.mrf.mxu0  ;;  %5809 = vmatmul.bf16.gmra.mxu1 %v7396_v44  ;;  %v3365_v23 = vrot.slane %v3363_v34, 4  ;;  %v3602_v4 = vrot.slane %v3600_v18, 5  ;;  %v3606_v37 = vrot.slane %v3604_v56, 4  ;;  %v3610_v5 = vshll.u32 %v3463_v6, 16  ;;  %v3425_v24 = vld [vmem:[#allocation2 + $0x58] sm:$0xf] }
 0x36d   : > { %5898 = vmatmul.bf16.gmra.mxu2 %v7400_v10  ;;  %v10152_v0 = vadd.f32 %v6034_v40, %v5946_v20  ;;  %5987 = vmatmul.bf16.gmra.mxu3 %v7404_v38  ;;  %v3597_v13 = vor.u32 %v3596_v35, %v3593_v29  ;;  %v3710_v11 = vld [vmem:[#allocation2 + $0x58] sm:$0xf]  ;;  %v8017_v47 = vld [vmem:[#allocation3 + $0x32c] sm:$0xf]  ;;  %v7429_v28 = vld [vmem:[#allocation3 + $0x34c] sm:$0xf0]  ;;  %v3364_v57 = vsel %vm8758_vm13, %v7002_v36, %v3363_v34 }
 0x36e   : > { %v7435_v44 = vld [vmem:[#allocation3 + $0x330] sm:$0xf]  ;;  %v8022_v10 = vld [vmem:[#allocation3 + $0x350] sm:$0xf0]  ;;  %v3367_v38 = vsel %vm8758_vm13, %v3365_v23, %v3366_v16  ;;  %3440 = vst [vmem:[#allocation3 + $0x3c0] sm:$0xf] %v3424_v17 }
 0x36f   : > { %6076 = vmatmul.bf16.gmra.mxu0 %v7408_v45  ;;  %v3598_v52 = vrot.slane %v3597_v13, 4  ;;  %v3709_v45 = vld [vmem:[#allocation2 + $0x54] sm:$0xe]  ;;  %v3711_v62 = vld [vmem:[#allocation2 + $0x5c] sm:$0x1]  ;;  %v3612_v32 = vrot.slane %v3610_v5, 5  ;;  %v7436_v3 = vor.u32 %v8022_v10, %v7435_v44 }
 0x370   : > { %v5859_v7 = vpop.f32.mrf.mxu2  ;;  %v5948_v1 = vpop.f32.mrf.mxu3  ;;  %v8018_v30 = vld [vmem:[#allocation3 + $0x334] sm:$0xf]  ;;  %v7443_v20 = vld [vmem:[#allocation3 + $0x338] sm:$0xf]  ;;  %3408 = vst [vmem:[#allocation3 + $0x3bc] sm:$0xf] %v3364_v57 }
 0x371   : > { %v5860_v40 = vadd.f32 %v5859_v7, %v5771_v49  ;;  %v5772_v50 = vpop.f32.mrf.mxu1  ;;  %6611 = vperm.xlu0 %8231, %v6537_v43   ;;  %6576 = vperm.xlu2 %8233, %v6530_v12   ;;  %v3607_v49 = vor.u32 %v3606_v37, %v3602_v4  ;;  %v7010_v53 = vrot.slane %v3709_v45, 9  ;;  %v7437_v46 = vld [vmem:[#allocation3 + $0x354] sm:$0xf0]  ;;  %3409 = vst [vmem:[#allocation3 + $0x3e0] sm:$0xf] %v3367_v38  ;;  %v3779_v29 = vrot.slane %v3710_v11, 5 }
 0x372   : > { %v5773_v63 = vadd.f32 %v5772_v50, %v9422_v48  ;;  %v3603_v48 = vsel %vm8726_vm10, %v3598_v52, %v3602_v4  ;;  %v3782_v35 = vrot.slane %v3711_v62, 5  ;;  %v6533_v21 = vsub.f32 1.0, %v9750_v2  ;;  %v8023_v56 = vld [vmem:[#allocation3 + $0x358] sm:$0xf0]  ;;  %3441 = vst [vmem:[#allocation3 + $0x3e4] sm:$0xf] %v3425_v24  ;;  %v10172_v2 = vpop.permute.xlu1 %6439 }
 0x373   : > { %v5949_v39 = vadd.f32 %v5948_v1, %v5860_v40  ;;  %v3608_v12 = vrot.slane %v3607_v49, 4  ;;  %3688 = vst [vmem:[#allocation3 + $0x3c4] sm:$0xf] %v3603_v48  ;;  %v3781_v34 = vrot.slane %v3779_v29, 4  ;;  %v7432_v7 = vor.u32 %v8017_v47, %v7429_v28  ;;  %v3464_v16 = vld [vmem:[#allocation2 + $0x60] sm:$0xf] }
 0x374   : > { %v6039_v8 = vpop.f32.mrf.mxu0  ;;  %v7440_v1 = vor.u32 %v8018_v30, %v7437_v46  ;;  %v7444_v36 = vor.u32 %v8023_v56, %v7443_v20  ;;  %v3465_v4 = vld [vmem:[#allocation2 + $0x64] sm:$0xf]  ;;  %v3615_v37 = vshrl.u32 %v3464_v16, 16  ;;  %v3618_v5 = vshll.u32 %v3464_v16, 16  ;;  %v3297_v47 = vld [vmem:[#allocation2 + $0x58] sm:$0xf] }
 0x375   : > { %v6038_v54 = vadd.f32 %v6037_v14, %v5949_v39  ;;  %v3780_v14 = vsel %vm8758_vm13, %v7010_v53, %v3779_v29  ;;  %v3613_v22 = vsel %vm8726_vm10, %v3608_v12, %v3612_v32  ;;  %v3783_v23 = vsel %vm8758_vm13, %v3781_v34, %v3782_v35  ;;  %v10177_v39 = vpop.permute.xlu0 %6434  ;;  %v3296_v45 = vld [vmem:[#allocation2 + $0x54] sm:$0xe]  ;;  %v3298_v62 = vld [vmem:[#allocation2 + $0x5c] sm:$0x1]  ;;  %v3466_v32 = vld [vmem:[#allocation2 + $0x68] sm:$0x1] }
 0x376   : > { %3824 = vst [vmem:[#allocation3 + $0x3c8] sm:$0xf] %v3780_v14  ;;  %v3617_v24 = vrot.slane %v3615_v37, 4  ;;  %v3620_v11 = vrot.slane %v3618_v5, 5  ;;  %v3624_v28 = vshll.u32 %v3465_v4, 16  ;;  %v3628_v44 = vshrl.u32 %v3465_v4, 16 }
 0x377   : > { %v10166_v18 = vmul.f32 %v6450_v31, %v6038_v54  ;;  %3689 = vst [vmem:[#allocation3 + $0x3e8] sm:$0xf] %v3613_v22  ;;  %v3370_v57 = vrot.slane %v3297_v47, 5  ;;  %v7003_v20 = vrot.slane %v3296_v45, 9  ;;  %v3373_v49 = vrot.slane %v3298_v62, 5 }
 0x378   : > { %v5861_v43 = vpop.f32.mrf.mxu2  ;;  %v5950_v13 = vpop.f32.mrf.mxu3  ;;  %3825 = vst [vmem:[#allocation3 + $0x3ec] sm:$0xf] %v3783_v23  ;;  %v3621_v38 = vor.u32 %v3620_v11, %v3617_v24  ;;  %v3626_v29 = vrot.slane %v3624_v28, 5  ;;  %v3630_v35 = vrot.slane %v3628_v44, 4  ;;  %v3427_v14 = vld [vmem:[#allocation2 + $0x64] sm:$0xf] }
 0x379   : > { %v5862_v6 = vadd.f32 %v5861_v43, %v5773_v63  ;;  %v5775_v40 = vpop.f32.mrf.mxu1  ;;  %6591 = vperm.xlu2 %8233, %v6533_v21   ;;  %v6455_v63 = vpop.permute.xlu2 %6454  ;;  %v3371_v12 = vsel %vm8758_vm13, %v7003_v20, %v3370_v57  ;;  %v3426_v43 = vld [vmem:[#allocation2 + $0x60] sm:$0xf]  ;;  %v7471_v22 = vld [vmem:[#allocation3 + $0x378] sm:$0xf]  ;;  %v3713_v23 = vld [vmem:[#allocation2 + $0x64] sm:$0xf] }
 0x37a   : > { %v5776_v31 = vadd.f32 %v5775_v40, %v9437_v51  ;;  %v6536_v51 = vsub.f32 1.0, %v9867_v61  ;;  %v3622_v46 = vrot.slane %v3621_v38, 4  ;;  %v3712_v34 = vld [vmem:[#allocation2 + $0x60] sm:$0xe]  ;;  %v8031_v40 = vld [vmem:[#allocation3 + $0x398] sm:$0xf0] }
 0x37b   : > { %v5951_v50 = vadd.f32 %v5950_v13, %v5862_v6  ;;  %v10185_v6 = vpop.permute.xlu1 %6444  ;;  %3410 = vst [vmem:[#allocation3 + $0x404] sm:$0xf] %v3371_v12  ;;  %v7479_v4 = vld [vmem:[#allocation3 + $0x380] sm:$0xf]  ;;  %v3714_v5 = vld [vmem:[#allocation2 + $0x68] sm:$0x1] }
 0x37c   : > { %v6042_v52 = vpop.f32.mrf.mxu0  ;;  %5814 = vmatmul.bf16.gmra.mxu1 %v7432_v7  ;;  %v8026_v7 = vld [vmem:[#allocation3 + $0x374] sm:$0xf]  ;;  %v3627_v37 = vsel %vm8726_vm10, %v3622_v46, %v3626_v29  ;;  %3442 = vst [vmem:[#allocation3 + $0x408] sm:$0xf] %v3426_v43  ;;  %v3789_v47 = vrot.slane %v3714_v5, 5 }
 0x37d   : > { %5903 = vmatmul.bf16.gmra.mxu2 %v7436_v3  ;;  %v6040_v17 = vadd.f32 %v6039_v8, %v5951_v50  ;;  %5992 = vmatmul.bf16.gmra.mxu3 %v7440_v1  ;;  %v3372_v8 = vrot.slane %v3370_v57, 4  ;;  %v6460_v13 = vpop.permute.xlu0 %6459  ;;  %v7465_v3 = vld [vmem:[#allocation3 + $0x394] sm:$0xf0]  ;;  %v8027_v50 = vld [vmem:[#allocation3 + $0x37c] sm:$0xf] }
 0x37e   : > { %v8032_v44 = vld [vmem:[#allocation3 + $0x3a0] sm:$0xf0]  ;;  %3443 = vst [vmem:[#allocation3 + $0x42c] sm:$0xf] %v3427_v14  ;;  %v7468_v62 = vor.u32 %v8026_v7, %v7465_v3 }
 0x37f   : > { %6081 = vmatmul.bf16.gmra.mxu0 %v7444_v36  ;;  %v10180_v10 = vmul.f32 %v6455_v63, %v6040_v17  ;;  %v3374_v1 = vsel %vm8758_vm13, %v3372_v8, %v3373_v49  ;;  %v3634_v36 = vshll.u32 %v3466_v32, 16  ;;  %v7011_v63 = vrot.slane %v3712_v34, 9  ;;  %3690 = vst [vmem:[#allocation3 + $0x40c] sm:$0xf] %v3627_v37  ;;  %v3467_v32 = vld [vmem:[#allocation2 + $0x6c] sm:$0xf] }
 0x380   : > { %v5864_v48 = vpop.f32.mrf.mxu2  ;;  %v5953_v30 = vpop.f32.mrf.mxu3  ;;  %3411 = vst [vmem:[#allocation3 + $0x428] sm:$0xf] %v3374_v1  ;;  %v3786_v17 = vrot.slane %v3713_v23, 5  ;;  %v7480_v49 = vor.u32 %v8032_v44, %v7479_v4  ;;  %v3469_v4 = vld [vmem:[#allocation2 + $0x74] sm:$0x1] }
 0x381   : > { %v5865_v54 = vadd.f32 %v5864_v48, %v5776_v31  ;;  %v5777_v53 = vpop.f32.mrf.mxu1  ;;  %6606 = vperm.xlu2 %8233, %v6536_v51   ;;  %v7473_v31 = vld [vmem:[#allocation3 + $0x39c] sm:$0xf0]  ;;  %v3636_v11 = vrot.slane %v3634_v36, 5  ;;  %v3301_v36 = vld [vmem:[#allocation2 + $0x68] sm:$0x1] }
 0x382   : > { %v5778_v61 = vadd.f32 %v5777_v53, %v9446_v60  ;;  %v3631_v60 = vor.u32 %v3630_v35, %v3626_v29  ;;  %v3788_v51 = vrot.slane %v3786_v17, 4  ;;  %v7476_v8 = vor.u32 %v8027_v50, %v7473_v31  ;;  %v3468_v35 = vld [vmem:[#allocation2 + $0x70] sm:$0xf] }
 0x383   : > { %v5954_v21 = vadd.f32 %v5953_v30, %v5865_v54  ;;  %v7472_v54 = vor.u32 %v8031_v40, %v7471_v22  ;;  %v6465_v12 = vpop.permute.xlu1 %6464  ;;  %v3648_v7 = vshll.u32 %v3468_v35, 16  ;;  %v3652_v3 = vshrl.u32 %v3468_v35, 16  ;;  %v7515_v35 = vld [vmem:[#allocation3 + $0x3c8] sm:$0xf] }
 0x384   : > { %v6044_v56 = vpop.f32.mrf.mxu0  ;;  %v3632_v24 = vrot.slane %v3631_v60, 4  ;;  %v3790_v30 = vsel %vm8758_vm13, %v3788_v51, %v3789_v47  ;;  %v3299_v60 = vld [vmem:[#allocation2 + $0x60] sm:$0xe]  ;;  %v3380_v37 = vrot.slane %v3301_v36, 5  ;;  %v3428_v51 = vld [vmem:[#allocation2 + $0x6c] sm:$0xf] }
 0x385   : > { %v6043_v16 = vadd.f32 %v6042_v52, %v5954_v21  ;;  %v3787_v52 = vsel %vm8758_vm13, %v7011_v63, %v3786_v17  ;;  %3827 = vst [vmem:[#allocation3 + $0x434] sm:$0xf] %v3790_v30  ;;  %v3639_v21 = vshrl.u32 %v3467_v32, 16  ;;  %v7004_v50 = vrot.slane %v3299_v60, 9  ;;  %v8040_v30 = vld [vmem:[#allocation3 + $0x3e0] sm:$0xf0]  ;;  %v6475_v25 = vpop.permute.xlu0 %6474 }
 0x386   : > { %v3637_v38 = vsel %vm8726_vm10, %v3632_v24, %v3636_v11  ;;  %3826 = vst [vmem:[#allocation3 + $0x410] sm:$0xf] %v3787_v52  ;;  %v3650_v63 = vrot.slane %v3648_v7, 5  ;;  %v3654_v17 = vrot.slane %v3652_v3, 4  ;;  %v3716_v24 = vld [vmem:[#allocation2 + $0x70] sm:$0xf] }
 0x387   : > { %v10191_v28 = vmul.f32 %v6460_v13, %v6043_v16  ;;  %3691 = vst [vmem:[#allocation3 + $0x430] sm:$0xf] %v3637_v38  ;;  %v3641_v14 = vrot.slane %v3639_v21, 4  ;;  %v3300_v13 = vld [vmem:[#allocation2 + $0x64] sm:$0xf] }
 0x388   : > { %v5866_v57 = vpop.f32.mrf.mxu2  ;;  %v5955_v45 = vpop.f32.mrf.mxu3  ;;  %v3377_v40 = vrot.slane %v3300_v13, 5  ;;  %v3715_v38 = vld [vmem:[#allocation2 + $0x6c] sm:$0xe]  ;;  %3444 = vst [vmem:[#allocation3 + $0x450] sm:$0xf] %v3428_v51 }
 0x389   : > { %v5867_v48 = vadd.f32 %v5866_v57, %v5778_v61  ;;  %v5780_v20 = vpop.f32.mrf.mxu1  ;;  %v3642_v61 = vshll.u32 %v3467_v32, 16  ;;  %v3429_v57 = vld [vmem:[#allocation2 + $0x70] sm:$0xf]  ;;  %v3717_v32 = vld [vmem:[#allocation2 + $0x74] sm:$0x1]  ;;  %v7012_v21 = vrot.slane %v3715_v38, 9 }
 0x38a   : > { %v5781_v46 = vadd.f32 %v5780_v20, %v9469_v26  ;;  %v3379_v31 = vrot.slane %v3377_v40, 4  ;;  %v3378_v52 = vsel %vm8758_vm13, %v7004_v50, %v3377_v40  ;;  %v8041_v7 = vld [vmem:[#allocation3 + $0x3e8] sm:$0xf0]  ;;  %3445 = vst [vmem:[#allocation3 + $0x474] sm:$0xf] %v3429_v57  ;;  %v10450_v57 = vld [vmem:[#allocation21_spill] sm:$0xff] }
 0x38b   : > { %v5956_v53 = vadd.f32 %v5955_v45, %v5867_v48  ;;  %v3644_v34 = vrot.slane %v3642_v61, 5  ;;  %v6470_v48 = vpop.permute.xlu2 %6469  ;;  %v8035_v45 = vld [vmem:[#allocation3 + $0x3bc] sm:$0xf]  ;;  %3412 = vst [vmem:[#allocation3 + $0x44c] sm:$0xf] %v3378_v52  ;;  %v3793_v61 = vrot.slane %v3716_v24, 5 }
 0x38c   : > { %v6047_v29 = vpop.f32.mrf.mxu0  ;;  %5819 = vmatmul.bf16.gmra.mxu1 %v7468_v62  ;;  %v7501_v62 = vld [vmem:[#allocation3 + $0x3dc] sm:$0xf0]  ;;  %v3381_v20 = vsel %vm8758_vm13, %v3379_v31, %v3380_v37  ;;  %v10449_v37 = vld [vmem:[#allocation20_spill] sm:$0xff] }
 0x38d   : > { %5908 = vmatmul.bf16.gmra.mxu2 %v7472_v54  ;;  %v6045_v43 = vadd.f32 %v6044_v56, %v5956_v53  ;;  %5997 = vmatmul.bf16.gmra.mxu3 %v7476_v8  ;;  %v3645_v26 = vor.u32 %v3644_v34, %v3641_v14  ;;  %v7507_v54 = vld [vmem:[#allocation3 + $0x3c0] sm:$0xf]  ;;  %3413 = vst [vmem:[#allocation3 + $0x470] sm:$0xf] %v3381_v20  ;;  %v3795_v40 = vrot.slane %v3793_v61, 4 }
 0x38e   : > { %v3794_v3 = vsel %vm8758_vm13, %v7012_v21, %v3793_v61  ;;  %v7504_v36 = vor.u32 %v8035_v45, %v7501_v62  ;;  %v6480_v45 = vpop.permute.xlu1 %6479  ;;  %v7543_v20 = vld [vmem:[#allocation3 + $0x408] sm:$0xf] }
 0x38f   : > { %6086 = vmatmul.bf16.gmra.mxu0 %v7480_v49  ;;  %v10200_v22 = vmul.f32 %v6465_v12, %v6045_v43  ;;  %v3646_v5 = vrot.slane %v3645_v26, 4  ;;  %v3658_v49 = vshll.u32 %v3469_v4, 16  ;;  %v3796_v12 = vrot.slane %v3717_v32, 5  ;;  %v7509_v43 = vld [vmem:[#allocation3 + $0x3e4] sm:$0xf0] }
 0x390   : > { %v5869_v1 = vpop.f32.mrf.mxu2  ;;  %v5958_v16 = vpop.f32.mrf.mxu3  ;;  %v7516_v4 = vor.u32 %v8041_v7, %v7515_v35  ;;  %3828 = vst [vmem:[#allocation3 + $0x458] sm:$0xf] %v3794_v3  ;;  %v7551_v32 = vld [vmem:[#allocation3 + $0x410] sm:$0xf]  ;;  %v10451_v3 = vld [vmem:[#allocation22_spill] sm:$0xff] }
 0x391   : > { %v5870_v23 = vadd.f32 %v5869_v1, %v5781_v46  ;;  %v5782_v56 = vpop.f32.mrf.mxu1  ;;  %v3651_v8 = vsel %vm8726_vm10, %v3646_v5, %v3650_v63  ;;  %v8036_v46 = vld [vmem:[#allocation3 + $0x3c4] sm:$0xf]  ;;  %v3660_v34 = vrot.slane %v3658_v49, 5  ;;  %v7545_v49 = vld [vmem:[#allocation3 + $0x42c] sm:$0xf0] }
 0x392   : > { %v5783_v47 = vadd.f32 %v5782_v56, %v9479_v9  ;;  %v3655_v9 = vor.u32 %v3654_v17, %v3650_v63  ;;  %3692 = vst [vmem:[#allocation3 + $0x454] sm:$0xf] %v3651_v8  ;;  %v7512_v31 = vor.u32 %v8036_v46, %v7509_v43  ;;  %v8049_v8 = vld [vmem:[#allocation3 + $0x428] sm:$0xf0] }
 0x393   : > { %v5959_v11 = vadd.f32 %v5958_v16, %v5870_v23  ;;  %v7508_v23 = vor.u32 %v8040_v30, %v7507_v54  ;;  %v3797_v16 = vsel %vm8758_vm13, %v3795_v40, %v3796_v12  ;;  %v8044_v54 = vld [vmem:[#allocation3 + $0x404] sm:$0xf]  ;;  %v7537_v30 = vld [vmem:[#allocation3 + $0x424] sm:$0xf0]  ;;  %v7544_v12 = vor.u32 %v8049_v8, %v7543_v20 }
 0x394   : > { %v6049_v44 = vpop.f32.mrf.mxu0  ;;  %v3656_v14 = vrot.slane %v3655_v9, 4  ;;  %3829 = vst [vmem:[#allocation3 + $0x47c] sm:$0xf] %v3797_v16  ;;  %v8045_v9 = vld [vmem:[#allocation3 + $0x40c] sm:$0xf]  ;;  %v7540_v61 = vor.u32 %v8044_v54, %v7537_v30 }
 0x395   : > { %v6048_v53 = vadd.f32 %v6047_v29, %v5959_v11 }
 0x396   : > { %v3661_v29 = vsel %vm8726_vm10, %v3656_v14, %v3660_v34  ;;  %v7548_v14 = vor.u32 %v8045_v9, %v7545_v49 }
 0x397   : > { %v10209_v13 = vmul.f32 %v6470_v48, %v6048_v53  ;;  %3693 = vst [vmem:[#allocation3 + $0x478] sm:$0xf] %v3661_v29  ;;  %v8050_v53 = vld [vmem:[#allocation3 + $0x430] sm:$0xf0] }
 0x398   : > { %v5871_v26 = vpop.f32.mrf.mxu2  ;;  %v5960_v60 = vpop.f32.mrf.mxu3  ;;  %v7552_v34 = vor.u32 %v8050_v53, %v7551_v32  ;;  %v10453_v32 = vld [vmem:[#allocation24_spill] sm:$0xff] }
 0x399   : > { %v5872_v1 = vadd.f32 %v5871_v26, %v5783_v47  ;;  %v5785_v50 = vpop.f32.mrf.mxu1 }
 0x39a   : > { %v5786_v5 = vadd.f32 %v5785_v50, %v10449_v37 }
 0x39b   : > { %v5961_v56 = vadd.f32 %v5960_v60, %v5872_v1 }
 0x39c   : > { %v6052_v63 = vpop.f32.mrf.mxu0  ;;  %5824 = vmatmul.bf16.gmra.mxu1 %v7504_v36 }
 0x39d   : > { %5913 = vmatmul.bf16.gmra.mxu2 %v7508_v23  ;;  %v6050_v17 = vadd.f32 %v6049_v44, %v5961_v56  ;;  %6002 = vmatmul.bf16.gmra.mxu3 %v7512_v31 }
 0x39f   : > { %6091 = vmatmul.bf16.gmra.mxu0 %v7516_v4  ;;  %v10218_v24 = vmul.f32 %v6475_v25, %v6050_v17  ;;  %v10452_v4 = vld [vmem:[#allocation23_spill] sm:$0xff]  ;;  %v7573_v17 = vld [vmem:[#allocation3 + $0x46c] sm:$0xf0] }
 0x3a0   : > { %v5874_v11 = vpop.f32.mrf.mxu2  ;;  %v5963_v47 = vpop.f32.mrf.mxu3  ;;  %v8053_v25 = vld [vmem:[#allocation3 + $0x44c] sm:$0xf] }
 0x3a1   : > { %v5875_v41 = vadd.f32 %v5874_v11, %v5786_v5  ;;  %v5787_v52 = vpop.f32.mrf.mxu1  ;;  %v6485_v29 = vpop.permute.xlu2 %6484  ;;  %v7579_v11 = vld [vmem:[#allocation3 + $0x450] sm:$0xf]  ;;  %v7576_v54 = vor.u32 %v8053_v25, %v7573_v17 }
 0x3a2   : > { %v5788_v38 = vadd.f32 %v5787_v52, %v10450_v57  ;;  %v6490_v5 = vpop.permute.xlu0 %6489  ;;  %v7587_v57 = vld [vmem:[#allocation3 + $0x458] sm:$0xf] }
 0x3a3   : > { %v5964_v51 = vadd.f32 %v5963_v47, %v5875_v41  ;;  %v8058_v41 = vld [vmem:[#allocation3 + $0x470] sm:$0xf0] }
 0x3a4   : > { %v6054_v48 = vpop.f32.mrf.mxu0  ;;  %v8054_v47 = vld [vmem:[#allocation3 + $0x454] sm:$0xf]  ;;  %v7580_v30 = vor.u32 %v8058_v41, %v7579_v11 }
 0x3a5   : > { %v6053_v62 = vadd.f32 %v6052_v63, %v5964_v51  ;;  %v7581_v51 = vld [vmem:[#allocation3 + $0x474] sm:$0xf0] }
 0x3a6   : > { %v7584_v8 = vor.u32 %v8054_v47, %v7581_v51 }
 0x3a7   : > { %v10221_v44 = vmul.f32 %v6480_v45, %v6053_v62 }
 0x3a8   : > { %v5876_v46 = vpop.f32.mrf.mxu2  ;;  %v5965_v21 = vpop.f32.mrf.mxu3 }
 0x3a9   : > { %v5877_v35 = vadd.f32 %v5876_v46, %v5788_v38  ;;  %v5790_v43 = vpop.f32.mrf.mxu1  ;;  %v8059_v38 = vld [vmem:[#allocation3 + $0x478] sm:$0xf0] }
 0x3aa   : > { %v5791_v40 = vadd.f32 %v5790_v43, %v10451_v3  ;;  %v7588_v9 = vor.u32 %v8059_v38, %v7587_v57  ;;  %v10454_v3 = vld [vmem:[#allocation25_spill] sm:$0xff] }
 0x3ab   : > { %v5966_v7 = vadd.f32 %v5965_v21, %v5877_v35  ;;  %v6495_v35 = vpop.permute.xlu1 %6494 }
 0x3ac   : > { %v6057_v26 = vpop.f32.mrf.mxu0  ;;  %5829 = vmatmul.bf16.gmra.mxu1 %v7540_v61 }
 0x3ad   : > { %5918 = vmatmul.bf16.gmra.mxu2 %v7544_v12  ;;  %v6055_v1 = vadd.f32 %v6054_v48, %v5966_v7  ;;  %6007 = vmatmul.bf16.gmra.mxu3 %v7548_v14 }
 0x3af   : > { %6096 = vmatmul.bf16.gmra.mxu0 %v7552_v34  ;;  %v10224_v60 = vmul.f32 %v6485_v29, %v6055_v1 }
 0x3b0   : > { %v5879_v36 = vpop.f32.mrf.mxu2  ;;  %v5968_v16 = vpop.f32.mrf.mxu3 }
 0x3b1   : > { %v5880_v23 = vadd.f32 %v5879_v36, %v5791_v40  ;;  %v5792_v50 = vpop.f32.mrf.mxu1 }
 0x3b2   : > { %v5793_v56 = vadd.f32 %v5792_v50, %v10452_v4 }
 0x3b3   : > { %v5969_v31 = vadd.f32 %v5968_v16, %v5880_v23  ;;  %v6500_v29 = vpop.permute.xlu2 %6499 }
 0x3b4   : > { %v6059_v37 = vpop.f32.mrf.mxu0 }
 0x3b5   : > { %v6058_v63 = vadd.f32 %v6057_v26, %v5969_v31 }
 0x3b7   : > { %v10227_v52 = vmul.f32 %v6490_v5, %v6058_v63  ;;  %v10455_v63 = vld [vmem:[#allocation26_spill] sm:$0xff] }
 0x3b8   : > { %v5881_v48 = vpop.f32.mrf.mxu2  ;;  %v5970_v62 = vpop.f32.mrf.mxu3 }
 0x3b9   : > { %v5882_v45 = vadd.f32 %v5881_v48, %v5793_v56  ;;  %v5795_v20 = vpop.f32.mrf.mxu1  ;;  %v6542_v48 = vpop.permute.xlu1 %6541 }
 0x3ba   : > { %v5796_v53 = vadd.f32 %v5795_v20, %v10453_v32 }
 0x3bb   : > { %v5971_v49 = vadd.f32 %v5970_v62, %v5882_v45  ;;  %v6507_v62 = vmul.f32 %v10156_v19, %v10078_v33 }
 0x3bc   : > { %v6062_v46 = vpop.f32.mrf.mxu0  ;;  %5834 = vmatmul.bf16.gmra.mxu1 %v7576_v54  ;;  %v10456_v54 = vld [vmem:[#allocation27_spill] sm:$0xff] }
 0x3bd   : > { %5923 = vmatmul.bf16.gmra.mxu2 %v7580_v30  ;;  %v6060_v21 = vadd.f32 %v6059_v37, %v5971_v49  ;;  %6012 = vmatmul.bf16.gmra.mxu3 %v7584_v8  ;;  %v6505_v37 = vpop.permute.xlu0 %6504 }
 0x3bf   : > { %6101 = vmatmul.bf16.gmra.mxu0 %v7588_v9  ;;  %v10230_v61 = vmul.f32 %v6495_v35, %v6060_v21  ;;  %v6547_v21 = vpop.permute.xlu2 %6546 }
 0x3c0   : > { %v5884_v12 = vpop.f32.mrf.mxu2  ;;  %v5973_v14 = vpop.f32.mrf.mxu3 }
 0x3c1   : > { %v5885_v43 = vadd.f32 %v5884_v12, %v5796_v53  ;;  %v5797_v34 = vpop.f32.mrf.mxu1 }
 0x3c2   : > { %v5798_v40 = vadd.f32 %v5797_v34, %v10454_v3 }
 0x3c3   : > { %v5974_v7 = vadd.f32 %v5973_v14, %v5885_v43  ;;  %v6508_v43 = vmul.f32 %v10177_v39, %v10126_v27  ;;  %v10457_v14 = vld [vmem:[#allocation28_spill] sm:$0xff] }
 0x3c4   : > { %v6064_v26 = vpop.f32.mrf.mxu0 }
 0x3c5   : > { %v6063_v1 = vadd.f32 %v6062_v46, %v5974_v7 }
 0x3c7   : > { %v10233_v36 = vmul.f32 %v6500_v29, %v6063_v1 }
 0x3c8   : > { %v5886_v23 = vpop.f32.mrf.mxu2  ;;  %v5975_v50 = vpop.f32.mrf.mxu3 }
 0x3c9   : > { %v5887_v16 = vadd.f32 %v5886_v23, %v5798_v40  ;;  %v5800_v31 = vpop.f32.mrf.mxu1 }
 0x3ca   : > { %v5801_v25 = vadd.f32 %v5800_v31, %v10455_v63 }
 0x3cb   : > { %v5976_v4 = vadd.f32 %v5975_v50, %v5887_v16  ;;  %v6552_v16 = vpop.permute.xlu0 %6551  ;;  %v6509_v50 = vmul.f32 %v10172_v2, %v10139_v59 }
 0x3cc   : > { %v6067_v56 = vpop.f32.mrf.mxu0 }
 0x3cd   : > { %v6065_v5 = vadd.f32 %v6064_v26, %v5976_v4  ;;  %v10458_v4 = vld [vmem:[#allocation29_spill] sm:$0xff] }
 0x3cf   : > { %v10236_v17 = vmul.f32 %v6505_v37, %v6065_v5 }
 0x3d0   : > { %v5889_v11 = vpop.f32.mrf.mxu2  ;;  %v5978_v47 = vpop.f32.mrf.mxu3 }
 0x3d1   : > { %v5890_v41 = vadd.f32 %v5889_v11, %v5801_v25  ;;  %v5802_v51 = vpop.f32.mrf.mxu1 }
 0x3d2   : > { %v5803_v30 = vadd.f32 %v5802_v51, %v10456_v54  ;;  %v6510_v51 = vmul.f32 %v10185_v6, %v10152_v0 }
 0x3d3   : > { %v5979_v57 = vadd.f32 %v5978_v47, %v5890_v41  ;;  %v6557_v47 = vpop.permute.xlu1 %6556 }
 0x3d4   : > { %v6069_v38 = vpop.f32.mrf.mxu0 }
 0x3d5   : > { %v6068_v45 = vadd.f32 %v6067_v56, %v5979_v57 }
 0x3d7   : > { %v6619_v20 = vmul.f32 %v6542_v48, %v6068_v45 }
 0x3d8   : > { %v5891_v8 = vpop.f32.mrf.mxu2  ;;  %v5980_v32 = vpop.f32.mrf.mxu3 }
 0x3d9   : > { %v6635_v9 = vadd.f32 %v6619_v20, %v6507_v62  ;;  %v5892_v49 = vadd.f32 %v5891_v8, %v5803_v30  ;;  %v5805_v53 = vpop.f32.mrf.mxu1 }
 0x3da   : > { %v5806_v34 = vadd.f32 %v5805_v53, %v10457_v14 }
 0x3db   : > { %6651 = vst [vmem:[%s8700_s1] sm:$0xff] %v6635_v9  ;;  %v5981_v46 = vadd.f32 %v5980_v32, %v5892_v49  ;;  %v6562_v9 = vpop.permute.xlu2 %6561  ;;  %v10460_v32 = vld [vmem:[#allocation31_spill] sm:$0xff] }
 0x3dc   : > { %v6072_v35 = vpop.f32.mrf.mxu0 }
 0x3dd   : > { %v6070_v12 = vadd.f32 %v6069_v38, %v5981_v46  ;;  %v10459_v38 = vld [vmem:[#allocation30_spill] sm:$0xff] }
 0x3df   : > { %v6620_v33 = vmul.f32 %v6547_v21, %v6070_v12 }
 0x3e0   : > { %v5894_v19 = vpop.f32.mrf.mxu2  ;;  %v5983_v40 = vpop.f32.mrf.mxu3 }
 0x3e1   : > { %v6636_v7 = vadd.f32 %v6620_v33, %v6508_v43  ;;  %v5895_v3 = vadd.f32 %v5894_v19, %v5806_v34  ;;  %v5807_v26 = vpop.f32.mrf.mxu1  ;;  %v6567_v34 = vpop.permute.xlu0 %6566  ;;  %v10461_v19 = vld [vmem:[#allocation32_spill] sm:$0xff] }
 0x3e2   : > { %v5808_v27 = vadd.f32 %v5807_v26, %v10458_v4  ;;  %v10462_v4 = vld [vmem:[#allocation33_spill] sm:$0xff] }
 0x3e3   : > { %6652 = vst [vmem:[%s8700_s1 + $0x8] sm:$0xff] %v6636_v7  ;;  %v5984_v29 = vadd.f32 %v5983_v40, %v5895_v3 }
 0x3e4   : > { %v6074_v1 = vpop.f32.mrf.mxu0 }
 0x3e5   : > { %v6073_v23 = vadd.f32 %v6072_v35, %v5984_v29 }
 0x3e7   : > { %v6621_v31 = vmul.f32 %v6552_v16, %v6073_v23 }
 0x3e8   : > { %v5896_v39 = vpop.f32.mrf.mxu2  ;;  %v5985_v5 = vpop.f32.mrf.mxu3 }
 0x3e9   : > { %v6637_v56 = vadd.f32 %v6621_v31, %v6509_v50  ;;  %v5897_v37 = vadd.f32 %v5896_v39, %v5808_v27  ;;  %v5810_v63 = vpop.f32.mrf.mxu1  ;;  %v6572_v50 = vpop.permute.xlu1 %6571 }
 0x3ea   : > { %v5811_v59 = vadd.f32 %v5810_v63, %v10459_v38 }
 0x3eb   : > { %6653 = vst [vmem:[%s8700_s1 + $0x10] sm:$0xff] %v6637_v56  ;;  %v5986_v25 = vadd.f32 %v5985_v5, %v5897_v37 }
 0x3ec   : > { %v6077_v11 = vpop.f32.mrf.mxu0 }
 0x3ed   : > { %v6075_v41 = vadd.f32 %v6074_v1, %v5986_v25 }
 0x3ef   : > { %v6622_v57 = vmul.f32 %v6557_v47, %v6075_v41  ;;  %v6577_v41 = vpop.permute.xlu2 %6576 }
 0x3f0   : > { %v5899_v2 = vpop.f32.mrf.mxu2  ;;  %v5988_v62 = vpop.f32.mrf.mxu3 }
 0x3f1   : > { %v6638_v48 = vadd.f32 %v6622_v57, %v6510_v51  ;;  %v5900_v45 = vadd.f32 %v5899_v2, %v5811_v59  ;;  %v5812_v54 = vpop.f32.mrf.mxu1  ;;  %v10463_v51 = vld [vmem:[#allocation34_spill] sm:$0xff] }
 0x3f2   : > { %v5813_v53 = vadd.f32 %v5812_v54, %v10460_v32 }
 0x3f3   : > { %6654 = vst [vmem:[%s8700_s1 + $0x18] sm:$0xff] %v6638_v48  ;;  %v5989_v30 = vadd.f32 %v5988_v62, %v5900_v45 }
 0x3f4   : > { %v6079_v20 = vpop.f32.mrf.mxu0 }
 0x3f5   : > { %v6078_v8 = vadd.f32 %v6077_v11, %v5989_v30  ;;  %v6582_v30 = vpop.permute.xlu0 %6581 }
 0x3f7   : > { %v6623_v49 = vmul.f32 %v6562_v9, %v6078_v8  ;;  %v10464_v8 = vld [vmem:[#allocation35_spill] sm:$0xff] }
 0x3f8   : > { %v5901_v46 = vpop.f32.mrf.mxu2  ;;  %v5990_v35 = vpop.f32.mrf.mxu3 }
 0x3f9   : > { %v6639_v0 = vadd.f32 %v6623_v49, %v10166_v18  ;;  %v5902_v6 = vadd.f32 %v5901_v46, %v5813_v53  ;;  %v5815_v21 = vpop.f32.mrf.mxu1 }
 0x3fa   : > { %v5816_v7 = vadd.f32 %v5815_v21, %v10461_v19  ;;  %v6587_v21 = vpop.permute.xlu1 %6586 }
 0x3fb   : > { %6655 = vst [vmem:[%s8700_s1 + $0x20] sm:$0xff] %v6639_v0  ;;  %v5991_v12 = vadd.f32 %v5990_v35, %v5902_v6 }
 0x3fc   : > { %v6082_v43 = vpop.f32.mrf.mxu0 }
 0x3fd   : > { %v6080_v14 = vadd.f32 %v6079_v20, %v5991_v12 }
 0x3ff   : > { %v6624_v33 = vmul.f32 %v6567_v34, %v6080_v14 }
 0x400   : > { %v5904_v3 = vpop.f32.mrf.mxu2  ;;  %v5993_v29 = vpop.f32.mrf.mxu3 }
 0x401   : > { %v6640_v40 = vadd.f32 %v6624_v33, %v10180_v10  ;;  %v5905_v26 = vadd.f32 %v5904_v3, %v5816_v7  ;;  %v5817_v1 = vpop.f32.mrf.mxu1 }
 0x402   : > { %v5818_v27 = vadd.f32 %v5817_v1, %v10462_v4  ;;  %v6597_v4 = vpop.permute.xlu0 %6596 }
 0x403   : > { %6656 = vst [vmem:[%s8700_s1 + $0x28] sm:$0xff] %v6640_v40  ;;  %v5994_v18 = vadd.f32 %v5993_v29, %v5905_v26  ;;  %v6592_v26 = vpop.permute.xlu2 %6591 }
 0x404   : > { %v6084_v23 = vpop.f32.mrf.mxu0 }
 0x405   : > { %v6083_v16 = vadd.f32 %v6082_v43, %v5994_v18 }
 0x407   : > { %v6625_v31 = vmul.f32 %v6572_v50, %v6083_v16 }
 0x408   : > { %v5906_v39 = vpop.f32.mrf.mxu2  ;;  %v5995_v5 = vpop.f32.mrf.mxu3 }
 0x409   : > { %v6641_v56 = vadd.f32 %v6625_v31, %v10191_v28  ;;  %v5907_v37 = vadd.f32 %v5906_v39, %v5818_v27  ;;  %v5820_v63 = vpop.f32.mrf.mxu1 }
 0x40a   : > { %v5821_v57 = vadd.f32 %v5820_v63, %v10463_v51  ;;  %v10466_v51 = vld [vmem:[#allocation15_spill] sm:$0xff] }
 0x40b   : > { %6657 = vst [vmem:[%s8700_s1 + $0x30] sm:$0xff] %v6641_v56  ;;  %v5996_v10 = vadd.f32 %v5995_v5, %v5907_v37  ;;  %v10465_v56 = vld [vmem:[#allocation14_spill] sm:$0xff] }
 0x40c   : > { %v6087_v25 = vpop.f32.mrf.mxu0 }
 0x40d   : > { %v6085_v11 = vadd.f32 %v6084_v23, %v5996_v10 }
 0x40f   : > { %v6626_v47 = vmul.f32 %v6577_v41, %v6085_v11  ;;  %v6602_v41 = vpop.permute.xlu1 %6601 }
 0x410   : > { %v5909_v38 = vpop.f32.mrf.mxu2  ;;  %v5998_v48 = vpop.f32.mrf.mxu3 }
 0x411   : > { %v6642_v59 = vadd.f32 %v6626_v47, %v10200_v22  ;;  %v5910_v2 = vadd.f32 %v5909_v38, %v5821_v57  ;;  %v5822_v45 = vpop.f32.mrf.mxu1 }
 0x412   : > { %v5823_v9 = vadd.f32 %v5822_v45, %v10464_v8 }
 0x413   : > { %6658 = vst [vmem:[%s8700_s1 + $0x38] sm:$0xff] %v6642_v59  ;;  %v5999_v28 = vadd.f32 %v5998_v48, %v5910_v2 }
 0x414   : > { %v6089_v62 = vpop.f32.mrf.mxu0 }
 0x415   : > { %v6088_v54 = vadd.f32 %v6087_v25, %v5999_v28 }
 0x417   : > { %v6627_v20 = vmul.f32 %v6582_v30, %v6088_v54  ;;  %v6607_v54 = vpop.permute.xlu2 %6606 }
 0x418   : > { %v5911_v49 = vpop.f32.mrf.mxu2  ;;  %v6000_v46 = vpop.f32.mrf.mxu3 }
 0x419   : > { %v6643_v32 = vadd.f32 %v6627_v20, %v10209_v13  ;;  %v5912_v53 = vadd.f32 %v5911_v49, %v5823_v9  ;;  %v5825_v0 = vpop.f32.mrf.mxu1 }
 0x41a   : > { %v5826_v43 = vadd.f32 %v5825_v0, %v9854_v55 }
 0x41b   : > { %6659 = vst [vmem:[%s8700_s1 + $0x40] sm:$0xff] %v6643_v32  ;;  %v6001_v22 = vadd.f32 %v6000_v46, %v5912_v53 }
 0x41c   : > { %v6092_v6 = vpop.f32.mrf.mxu0 }
 0x41d   : > { %v6090_v35 = vadd.f32 %v6089_v62, %v6001_v22  ;;  %v6612_v22 = vpop.permute.xlu0 %6611 }
 0x41f   : > { %v6628_v12 = vmul.f32 %v6587_v21, %v6090_v35 }
 0x420   : > { %v5914_v14 = vpop.f32.mrf.mxu2  ;;  %v6003_v19 = vpop.f32.mrf.mxu3 }
 0x421   : > { %v6644_v34 = vadd.f32 %v6628_v12, %v10218_v24  ;;  %v5915_v33 = vadd.f32 %v5914_v14, %v5826_v43  ;;  %v5827_v7 = vpop.f32.mrf.mxu1 }
 0x422   : > { %v5828_v1 = vadd.f32 %v5827_v7, %v9857_v42 }
 0x423   : > { %6660 = vst [vmem:[%s8700_s1 + $0x48] sm:$0xff] %v6644_v34  ;;  %v6004_v13 = vadd.f32 %v6003_v19, %v5915_v33  ;;  %v6617_v33 = vpop.permute.xlu1 %6616 }
 0x424   : > { %v6094_v3 = vpop.f32.mrf.mxu0 }
 0x425   : > { %v6093_v40 = vadd.f32 %v6092_v6, %v6004_v13 }
 0x427   : > { %v6629_v29 = vmul.f32 %v6592_v26, %v6093_v40 }
 0x428   : > { %v5916_v18 = vpop.f32.mrf.mxu2  ;;  %v6005_v16 = vpop.f32.mrf.mxu3 }
 0x429   : > { %v6645_v23 = vadd.f32 %v6629_v29, %v10221_v44  ;;  %v5917_v55 = vadd.f32 %v5916_v18, %v5828_v1  ;;  %v5830_v50 = vpop.f32.mrf.mxu1 }
 0x42a   : > { %v5831_v37 = vadd.f32 %v5830_v50, %v10465_v56 }
 0x42b   : > { %6661 = vst [vmem:[%s8700_s1 + $0x50] sm:$0xff] %v6645_v23  ;;  %v6006_v24 = vadd.f32 %v6005_v16, %v5917_v55 }
 0x42c   : > { %v6097_v27 = vpop.f32.mrf.mxu0 }
 0x42d   : > { %v6095_v31 = vadd.f32 %v6094_v3, %v6006_v24 }
 0x42f   : > { %v6630_v39 = vmul.f32 %v6597_v4, %v6095_v31 }
 0x430   : > { %v5919_v5 = vpop.f32.mrf.mxu2  ;;  %v6008_v10 = vpop.f32.mrf.mxu3 }
 0x431   : > { %v6646_v63 = vadd.f32 %v6630_v39, %v10224_v60  ;;  %v5920_v42 = vadd.f32 %v5919_v5, %v5831_v37  ;;  %v5832_v25 = vpop.f32.mrf.mxu1 }
 0x432   : > { %v5833_v57 = vadd.f32 %v5832_v25, %v10466_v51 }
 0x433   : > { %6662 = vst [vmem:[%s8700_s1 + $0x58] sm:$0xff] %v6646_v63  ;;  %v6009_v44 = vadd.f32 %v6008_v10, %v5920_v42 }
 0x434   : > { %v6099_v38 = vpop.f32.mrf.mxu0 }
 0x435   : > { %v6098_v11 = vadd.f32 %v6097_v27, %v6009_v44 }
 0x437   : > { %v6631_v47 = vmul.f32 %v6602_v41, %v6098_v11 }
 0x438   : > { %v5921_v59 = vpop.f32.mrf.mxu2  ;;  %v6010_v60 = vpop.f32.mrf.mxu3 }
 0x439   : > { %v6647_v2 = vadd.f32 %v6631_v47, %v10227_v52  ;;  %v5922_v48 = vadd.f32 %v5921_v59, %v5833_v57  ;;  %v5835_v45 = vpop.f32.mrf.mxu1 }
 0x43a   : > { %v5836_v20 = vadd.f32 %v5835_v45, %v10054_v58 }
 0x43b   : > { %6663 = vst [vmem:[%s8700_s1 + $0x60] sm:$0xff] %v6647_v2  ;;  %v6011_v28 = vadd.f32 %v6010_v60, %v5922_v48 }
 0x43c   : > { %v6102_v53 = vpop.f32.mrf.mxu0 }
 0x43d   : > { %v6100_v62 = vadd.f32 %v6099_v38, %v6011_v28 }
 0x43f   : > { %v6632_v30 = vmul.f32 %v6607_v54, %v6100_v62 }
 0x440   : > { %v5924_v8 = vpop.f32.mrf.mxu2  ;;  %v6013_v32 = vpop.f32.mrf.mxu3 }
 0x441   : > { %v6648_v9 = vadd.f32 %v6632_v30, %v10230_v61  ;;  %v5925_v49 = vadd.f32 %v5924_v8, %v5836_v20  ;;  %v5837_v46 = vpop.f32.mrf.mxu1 }
 0x442   : > { %v5838_v35 = vadd.f32 %v5837_v46, %v10057_v15 }
 0x443   : > { %6664 = vst [vmem:[%s8700_s1 + $0x68] sm:$0xff] %v6648_v9  ;;  %v6014_v52 = vadd.f32 %v6013_v32, %v5925_v49 }
 0x444   : > { %v6104_v14 = vpop.f32.mrf.mxu0 }
 0x445   : > { %v6103_v0 = vadd.f32 %v6102_v53, %v6014_v52 }
 0x447   : > { %v6633_v6 = vmul.f32 %v6612_v22, %v6103_v0 }
 0x448   : > { %v5926_v58 = vpop.f32.mrf.mxu2  ;;  %v6015_v12 = vpop.f32.mrf.mxu3 }
 0x449   : > { %v6649_v61 = vadd.f32 %v6633_v6, %v10233_v36  ;;  %v5927_v21 = vadd.f32 %v5926_v58, %v5838_v35 }
 0x44b   : > { %6665 = vst [vmem:[%s8700_s1 + $0x70] sm:$0xff] %v6649_v61  ;;  %v6016_v43 = vadd.f32 %v6015_v12, %v5927_v21 }
 0x44d   : > { %v6105_v34 = vadd.f32 %v6104_v14, %v6016_v43 }
 0x44f   : > { %v6634_v15 = vmul.f32 %v6617_v33, %v6105_v34 }
 0x451   : > { %v6650_v19 = vadd.f32 %v6634_v15, %v10236_v17 }
 0x453   : > { %6666 = vst [vmem:[%s8700_s1 + $0x78] sm:$0xff] %v6650_v19 }
 0x454   : > { %8328 = shalt.err (!%p8325_p13)
}
 0x455   : > { %s8398_s1 = smov 128   ;;  %s8399_s11 = smov 8  }
 0x456   : > { %8157 = dma.vmem_to_hbm [thread:$0]  (%p8501_p3), %s6684_s20, 2048, %s6686_s29, %s6668_s27, %s8398_s1, %s8398_s1, %s8399_s11  }
 0x457 PF: > { %p8163_p0 = scmp.ge.s32.totalorder %s8395_s16, 2  ;;  %s6700_s28 = sand.u32 1, %s8367_s30  }
 0x458   : > { %s6701_s17 = scalar_lea.sflag [#allocation5], %s6700_s28 }
 0x459   : > { %p8160_p1 = pnand %p8163_p0, %p8510_p8 }
 0x45b   : > { %p8161_p2 = pneg %p8160_p1 }
 0x45d   : > { %8362 = dma.done.wait (%p8161_p2), %s6701_s17, 2048  }
 0x45e   : > { %8364 = vsyncadd (%p8161_p2), %s6701_s17, 4294965248  ;;  %s22_s16 = sadd.s32 1, %s8395_s16   ;;  %s10469_s12 = sld [smem:[#allocation7_spill]] }
 0x45f   : > { %p19_p4 = scmp.ge.s32.totalorder %s22_s16, 6   ;;  %s10470_s11 = sld [smem:[#allocation13_spill]] }
 0x460   : > { %s10471_s22 = sld [smem:[#allocation8_spill]]  ;;  %s10475_s30 = smov %s8371_s10 }
 0x461   : > { %s10472_s13 = sld [smem:[#allocation9_spill]] }
 0x462   : > { %s10473_s14 = sld [smem:[#allocation10_spill]]  ;;  %21 = sbr.rel (!%p19_p4) target bundleno = 8 (0x8), region = 129 }
 0x463   : > { %s10474_s15 = sld [smem:[#allocation11_spill]] }
 0x464   : > { %s10476_s10 = smov %s10469_s12 }
 0x466   : > { %s10477_s12 = smov %s10471_s22 }
 0x467   :  { %6707 = vsyncpa [#allocation5], 1 }
 0x468   :  { %6709 = vsyncpa [#allocation5 + $0x1], 1 }

</bundles_post_ra>
